<compile_context>
chip_gen: v6e
topology: v6e:2x2x1
jax: 0.10.0
libtpu: 0.0.40
codegen_flags: <defaults>
</compile_context>

<pallas_src>
import jax
import jax.numpy as jnp
import numpy as np
from jax import lax
from jax.experimental import pallas as pl
from jax.experimental.pallas import tpu as pltpu


def _round_up(a, m):
    return ((a + m - 1) // m) * m


def fused_bilstm2_kernel(x_ref, wih1_ref, whh1_ref, b1_ref,
                         wih2_ref, whh2_ref, b2_ref, len_ref,
                         hlast_ref, xpf_ref, xpb_ref, y1_ref):
    """Fused 2-layer bidirectional LSTM for one batch block.

    x_ref:     (T, Bb, Din) f32   padded input, time-major
    wih*_ref:  (Din_l, 8H)  bf16  [fwd | bwd] input->gate weights (transposed)
    whh*_ref:  (2, H, 4H)   bf16  recurrent weights (transposed), [fwd, bwd]
    b*_ref:    (1, 8H)      f32   b_ih + b_hh, [fwd | bwd]
    len_ref:   (Bb, H)      i32   per-row sequence length (broadcast along H)
    hlast_ref: (Bb, 2H)     f32   layer-2 final hidden [h_fwd_last | h_bwd_last]
    xpf_ref:   (T, Bb, 4H)  bf16  scratch: fwd input projections (reused per layer)
    xpb_ref:   (T, Bb, 4H)  bf16  scratch: bwd input projections (reused per layer)
    y1_ref:    (T, Bb, 2H)  f32   scratch: layer-1 per-step hidden (layer-2 input)
    """
    T, Bb, _ = x_ref.shape
    H = whh1_ref.shape[1]
    H4 = 4 * H
    unroll = T if T <= 8 else 8

    lens = len_ref[...]                                # (Bb, H) i32, loop-invariant

    def project(inp_3d, wih_ref, b_ref):
        # One big (T*Bb, Din) @ (Din, 8H) MXU matmul with f32 accumulation.
        # The (T, Bb) -> (T*Bb) merge is done on the f32 value with Bb a multiple of
        # the 8-row sublane tile, so no relayout copy is materialized.
        din = inp_3d.shape[-1]
        a = inp_3d.reshape(T * Bb, din).astype(jnp.bfloat16)
        p = jnp.dot(a, wih_ref[...], preferred_element_type=jnp.float32) + b_ref[...]
        p = p.reshape(T, Bb, 2 * H4)
        xpf_ref[...] = p[..., 0:H4].astype(xpf_ref.dtype)        # lane-aligned split
        xpb_ref[...] = p[..., H4:2 * H4].astype(xpb_ref.dtype)

    def cell(gin, h_prev, c_prev, whh_view, update):
        g = gin.astype(jnp.float32) + jnp.dot(
            h_prev.astype(jnp.bfloat16), whh_view[...],
            preferred_element_type=jnp.float32)
        i = jax.nn.sigmoid(g[:, 0 * H:1 * H])
        f = jax.nn.sigmoid(g[:, 1 * H:2 * H])
        gg = jnp.tanh(g[:, 2 * H:3 * H])
        o = jax.nn.sigmoid(g[:, 3 * H:4 * H])
        c_new = f * c_prev + i * gg
        h_new = o * jnp.tanh(c_new)
        # masked update == packed-sequence semantics (padded steps never update)
        return (jnp.where(update, h_new, h_prev),
                jnp.where(update, c_new, c_prev))

    def run_layer(whh_ref, write_y):
        whh_f = whh_ref.at[0]          # zero-cost Ref views
        whh_b = whh_ref.at[1]

        def step(s, carry):
            hf, cf, hb, cb = carry
            tf = s                     # forward time index
            tb = T - 1 - s             # backward time index
            hf, cf = cell(xpf_ref[tf], hf, cf, whh_f, tf < lens)
            hb, cb = cell(xpb_ref[tb], hb, cb, whh_b, tb < lens)
            if write_y:
                y1_ref[pl.ds(tf, 1), :, 0:H] = hf[None].astype(y1_ref.dtype)
                y1_ref[pl.ds(tb, 1), :, H:2 * H] = hb[None].astype(y1_ref.dtype)
            return hf, cf, hb, cb

        z = jnp.zeros((Bb, H), jnp.float32)
        return lax.fori_loop(0, T, step, (z, z, z, z), unroll=unroll)

    # ---- layer 1: per-step hidden states stay in VMEM (y1), never hit HBM ----
    project(x_ref[...], wih1_ref, b1_ref)
    run_layer(whh1_ref, write_y=True)

    # ---- layer 2: input = layer-1 output in VMEM; only the final hidden is kept ----
    project(y1_ref[...], wih2_ref, b2_ref)
    hf, _, hb, _ = run_layer(whh2_ref, write_y=False)

    hlast_ref[:, 0:H] = hf
    hlast_ref[:, H:2 * H] = hb


def _fused_bilstm2(x_tm, lens2d, wih1, whh1, b1, wih2, whh2, b2, *, block_b):
    T, B_pad, Dp = x_tm.shape
    H = whh1.shape[1]
    grid = (B_pad // block_b,)

    # scoped-VMEM sizing: double-buffered IO blocks + scratches, 64 MiB cap (v7x)
    f32, bf16 = 4, 2
    io_bytes = (T * block_b * Dp * f32                                         # x
                + Dp * 8 * H * bf16 + 2 * H * 4 * H * bf16 + 8 * H * f32       # layer 1
                + 2 * H * 8 * H * bf16 + 2 * H * 4 * H * bf16 + 8 * H * f32    # layer 2
                + block_b * H * 4                                              # lens
                + block_b * 2 * H * f32)                                       # hlast
    scratch_bytes = (2 * T * block_b * 4 * H * bf16                            # xpf+xpb
                     + T * block_b * 2 * H * f32)                              # y1
    vmem_limit = int(min(64 * 2**20,
                         max(32 * 2**20, 2 * (2 * io_bytes + scratch_bytes))))

    return pl.pallas_call(
        fused_bilstm2_kernel,
        out_shape=jax.ShapeDtypeStruct((B_pad, 2 * H), jnp.float32),
        grid_spec=pltpu.PrefetchScalarGridSpec(
            num_scalar_prefetch=0,
            grid=grid,
            in_specs=[
                pl.BlockSpec((T, block_b, Dp), lambda b: (0, b, 0)),
                pl.BlockSpec((Dp, 8 * H), lambda b: (0, 0)),
                pl.BlockSpec((2, H, 4 * H), lambda b: (0, 0, 0)),
                pl.BlockSpec((1, 8 * H), lambda b: (0, 0)),
                pl.BlockSpec((2 * H, 8 * H), lambda b: (0, 0)),
                pl.BlockSpec((2, H, 4 * H), lambda b: (0, 0, 0)),
                pl.BlockSpec((1, 8 * H), lambda b: (0, 0)),
                pl.BlockSpec((block_b, H), lambda b: (b, 0)),
            ],
            out_specs=pl.BlockSpec((block_b, 2 * H), lambda b: (b, 0)),
            scratch_shapes=[
                pltpu.VMEM((T, block_b, 4 * H), jnp.bfloat16),
                pltpu.VMEM((T, block_b, 4 * H), jnp.bfloat16),
                pltpu.VMEM((T, block_b, 2 * H), jnp.float32),
            ],
        ),
        compiler_params=pltpu.CompilerParams(
            dimension_semantics=("parallel",),
            vmem_limit_bytes=vmem_limit,
        ),
    )(x_tm, wih1, whh1, b1, wih2, whh2, b2, lens2d)


def prepare_lstm_params(params, *, hidden_size, in_dim, num_layers=2):
    """Pack / transpose / bf16-cast the LSTM weights ONCE per model (hoisted out of
    the forward path)."""
    assert num_layers == 2, "fused kernel implements the module's 2-layer LSTM"
    H = hidden_size
    d_pad = {0: _round_up(in_dim, 8), 1: 2 * H}

    def pack(l):
        wi_f = params[f"weight_ih_l{l}"].T
        wi_b = params[f"weight_ih_l{l}_reverse"].T
        d = d_pad[l]
        if wi_f.shape[0] < d:                       # zero-pad padded input features
            pad = ((0, d - wi_f.shape[0]), (0, 0))
            wi_f, wi_b = jnp.pad(wi_f, pad), jnp.pad(wi_b, pad)
        wih = jnp.concatenate([wi_f, wi_b], axis=1).astype(jnp.bfloat16)    # (d, 8H)
        whh = jnp.stack([params[f"weight_hh_l{l}"].T,
                         params[f"weight_hh_l{l}_reverse"].T],
                        axis=0).astype(jnp.bfloat16)                        # (2, H, 4H)
        b = jnp.concatenate([
            params[f"bias_ih_l{l}"] + params[f"bias_hh_l{l}"],
            params[f"bias_ih_l{l}_reverse"] + params[f"bias_hh_l{l}_reverse"],
        ])[None, :].astype(jnp.float32)                                     # (1, 8H)
        return wih, whh, b

    w1, h1, bb1 = pack(0)
    w2, h2, bb2 = pack(1)
    return dict(wih1=w1, whh1=h1, b1=bb1, wih2=w2, whh2=h2, b2=bb2)


@jax.jit
def sketch_lstm_forward(x, seq_len, packed):
    """Sketch_LSTM.forward: returns (B, 2H) = last layer's [h_fwd_last | h_bwd_last]."""
    B, T, in_dim = x.shape
    H = packed["whh1"].shape[1]
    Dp = packed["wih1"].shape[0]

    # Batch block: 32 amortizes MXU weight staging / EUP / loop overhead without vreg
    # spill; capped by the 8-padded batch so small batches are not over-padded.
    # (On v7x keep >=2 grid blocks when B allows, so both TensorCores are used.)
    Bb = min(32, _round_up(B, 8))
    B_pad = _round_up(B, Bb)

    # time-major; pad batch rows (length 0 -> never updated) and input features (zeros)
    x_tm = jnp.transpose(x.astype(jnp.float32), (1, 0, 2))
    x_tm = jnp.pad(x_tm, ((0, 0), (0, B_pad - B), (0, Dp - in_dim)))
    lens = jnp.pad(seq_len.astype(jnp.int32), (0, B_pad - B))
    lens2d = jnp.broadcast_to(lens[:, None], (B_pad, H))

    hlast = _fused_bilstm2(x_tm, lens2d,
                           packed["wih1"], packed["whh1"], packed["b1"],
                           packed["wih2"], packed["whh2"], packed["b2"],
                           block_b=Bb)
    # TODO(synk): nn.LSTM inter-layer dropout (p=0.5) is training-mode only; this is
    # the inference forward, so it is intentionally omitted.
    return hlast[:B]


def reference(x, seq_len, params, *, hidden_size, num_layers=2):
    """Pure-JAX f32 reference with packed-sequence (length-masked) semantics."""
    B, T, _ = x.shape
    H = hidden_size
    x = x.astype(jnp.float32)

    def run_dir(inp, wi, wh, b, reverse):
        h = jnp.zeros((B, H), jnp.float32)
        c = jnp.zeros((B, H), jnp.float32)
        outs = [None] * T
        order = range(T - 1, -1, -1) if reverse else range(T)
        for t in order:
            g = inp[:, t, :] @ wi.T + h @ wh.T + b
            i = jax.nn.sigmoid(g[:, :H])
            f = jax.nn.sigmoid(g[:, H:2 * H])
            gg = jnp.tanh(g[:, 2 * H:3 * H])
            o = jax.nn.sigmoid(g[:, 3 * H:])
            c_new = f * c + i * gg
            h_new = o * jnp.tanh(c_new)
            upd = (t < seq_len)[:, None]
            h = jnp.where(upd, h_new, h)
            c = jnp.where(upd, c_new, c)
            outs[t] = h
        return jnp.stack(outs, axis=1), h

    inp = x
    last = None
    for l in range(num_layers):
        pre = f"_l{l}"
        yf, hf = run_dir(inp, params["weight_ih" + pre], params["weight_hh" + pre],
                         params["bias_ih" + pre] + params["bias_hh" + pre], False)
        yb, hb = run_dir(inp, params["weight_ih" + pre + "_reverse"],
                         params["weight_hh" + pre + "_reverse"],
                         params["bias_ih" + pre + "_reverse"]
                         + params["bias_hh" + pre + "_reverse"], True)
        inp = jnp.concatenate([yf, yb], axis=-1)
        last = jnp.concatenate([hf, hb], axis=-1)
    return last


if __name__ == "__main__":
    key = jax.random.PRNGKey(0)
    B, T, inp_dim, H, n_layers = 4, 8, 5, 128, 2

    keys = jax.random.split(key, 1 + 8 * n_layers)
    kit = iter(keys)

    x = jax.random.normal(next(kit), (B, T, inp_dim), jnp.float32)
    seq_len = jnp.array([8, 5, 3, 1], dtype=jnp.int32)   # ragged lengths -> masking

    params = {}
    in_dims = {0: inp_dim, 1: 2 * H}
    for l in range(n_layers):
        for sfx in ("", "_reverse"):
            params[f"weight_ih_l{l}{sfx}"] = 0.1 * jax.random.normal(
                next(kit), (4 * H, in_dims[l]), jnp.float32)
            params[f"weight_hh_l{l}{sfx}"] = 0.1 * jax.random.normal(
                next(kit), (4 * H, H), jnp.float32)
            params[f"bias_ih_l{l}{sfx}"] = 0.1 * jax.random.normal(
                next(kit), (4 * H,), jnp.float32)
            params[f"bias_hh_l{l}{sfx}"] = 0.1 * jax.random.normal(
                next(kit), (4 * H,), jnp.float32)

    packed = prepare_lstm_params(params, hidden_size=H, in_dim=inp_dim)

    out = jax.block_until_ready(sketch_lstm_forward(x, seq_len, packed))
    ref = jax.block_until_ready(
        reference(x, seq_len, params, hidden_size=H, num_layers=n_layers))

    assert out.shape == (B, 2 * H), out.shape
    np.testing.assert_allclose(np.asarray(out), np.asarray(ref), atol=2e-2, rtol=2e-2)
    print("KERNEL_OK")
</pallas_src>

<mosaic_0001>
module attributes {stable_mosaic.version = 11 : i64} {
  func.func @fused_bilstm2_kernel(%arg0: i32, %arg1: memref<8x8x8xf32, #tpu.memory_space<vmem>>, %arg2: memref<8x1024xbf16, #tpu.memory_space<vmem>>, %arg3: memref<2x128x512xbf16, #tpu.memory_space<vmem>>, %arg4: memref<1x1024xf32, #tpu.memory_space<vmem>>, %arg5: memref<256x1024xbf16, #tpu.memory_space<vmem>>, %arg6: memref<2x128x512xbf16, #tpu.memory_space<vmem>>, %arg7: memref<1x1024xf32, #tpu.memory_space<vmem>>, %arg8: memref<8x128xi32, #tpu.memory_space<vmem>>, %arg9: memref<8x256xf32, #tpu.memory_space<vmem>>, %arg10: memref<8x8x512xbf16, #tpu.memory_space<vmem>>, %arg11: memref<8x8x512xbf16, #tpu.memory_space<vmem>>, %arg12: memref<8x8x256xf32, #tpu.memory_space<vmem>>) attributes {dimension_semantics = [#tpu.dimension_semantics<parallel>], iteration_bounds = array<i64: 1>, scalar_prefetch = 0 : i64, scratch_operands = 3 : i64, tpu.core_type = #tpu.core_type<tc>, window_params = [{transform_indices = @transform_0, window_bounds = array<i64: 8, 8, 8>}, {pipeline_mode = #tpu.pipeline_mode<synchronous>, transform_indices = @transform_1, window_bounds = array<i64: 8, 1024>}, {pipeline_mode = #tpu.pipeline_mode<synchronous>, transform_indices = @transform_2, window_bounds = array<i64: 2, 128, 512>}, {pipeline_mode = #tpu.pipeline_mode<synchronous>, transform_indices = @transform_3, window_bounds = array<i64: 1, 1024>}, {pipeline_mode = #tpu.pipeline_mode<synchronous>, transform_indices = @transform_4, window_bounds = array<i64: 256, 1024>}, {pipeline_mode = #tpu.pipeline_mode<synchronous>, transform_indices = @transform_5, window_bounds = array<i64: 2, 128, 512>}, {pipeline_mode = #tpu.pipeline_mode<synchronous>, transform_indices = @transform_6, window_bounds = array<i64: 1, 1024>}, {transform_indices = @transform_7, window_bounds = array<i64: 8, 128>}, {transform_indices = @transform_8, window_bounds = array<i64: 8, 256>}]} {
    %c0 = arith.constant 0 : index
    %c0_0 = arith.constant 0 : index
    %0 = vector.load %arg8[%c0, %c0_0] : memref<8x128xi32, #tpu.memory_space<vmem>>, vector<8x128xi32>
    %c0_1 = arith.constant 0 : index
    %c0_2 = arith.constant 0 : index
    %c0_3 = arith.constant 0 : index
    %1 = vector.load %arg1[%c0_1, %c0_2, %c0_3] : memref<8x8x8xf32, #tpu.memory_space<vmem>>, vector<8x8x8xf32>
    %2 = vector.shape_cast %1 : vector<8x8x8xf32> to vector<64x8xf32>
    %3 = arith.truncf %2 : vector<64x8xf32> to vector<64x8xbf16>
    %c0_4 = arith.constant 0 : index
    %c0_5 = arith.constant 0 : index
    %4 = vector.load %arg2[%c0_4, %c0_5] : memref<8x1024xbf16, #tpu.memory_space<vmem>>, vector<8x1024xbf16>
    %cst = arith.constant dense<0.000000e+00> : vector<64x1024xf32>
    %5 = tpu.matmul %3, %4, %cst {dimension_numbers = #tpu.dot_dimension_numbers<[1], [0], [0], [1], [0, 0, 1, 1], [], []>} : vector<64x8xbf16>, vector<8x1024xbf16>, vector<64x1024xf32> -> vector<64x1024xf32>
    %c0_6 = arith.constant 0 : index
    %c0_7 = arith.constant 0 : index
    %6 = vector.load %arg4[%c0_6, %c0_7] : memref<1x1024xf32, #tpu.memory_space<vmem>>, vector<1x1024xf32>
    %7 = vector.broadcast %6 : vector<1x1024xf32> to vector<64x1024xf32>
    %8 = arith.addf %5, %7 : vector<64x1024xf32>
    %9 = vector.shape_cast %8 : vector<64x1024xf32> to vector<8x8x1024xf32>
    %10 = vector.extract_strided_slice %9 {offsets = [0, 0, 0], sizes = [8, 8, 512], strides = [1, 1, 1]} : vector<8x8x1024xf32> to vector<8x8x512xf32>
    %11 = arith.truncf %10 : vector<8x8x512xf32> to vector<8x8x512xbf16>
    %c0_8 = arith.constant 0 : index
    %c0_9 = arith.constant 0 : index
    %c0_10 = arith.constant 0 : index
    %12 = vector.load %arg10[%c0_8, %c0_9, %c0_10] : memref<8x8x512xbf16, #tpu.memory_space<vmem>>, vector<8x8x512xbf16>
    tpu.vector_store %arg10[%c0_8, %c0_9, %c0_10], %11 {strides = array<i32>} : memref<8x8x512xbf16, #tpu.memory_space<vmem>>, vector<8x8x512xbf16>,
    %13 = vector.extract_strided_slice %9 {offsets = [0, 0, 512], sizes = [8, 8, 512], strides = [1, 1, 1]} : vector<8x8x1024xf32> to vector<8x8x512xf32>
    %14 = arith.truncf %13 : vector<8x8x512xf32> to vector<8x8x512xbf16>
    %c0_11 = arith.constant 0 : index
    %c0_12 = arith.constant 0 : index
    %c0_13 = arith.constant 0 : index
    %15 = vector.load %arg11[%c0_11, %c0_12, %c0_13] : memref<8x8x512xbf16, #tpu.memory_space<vmem>>, vector<8x8x512xbf16>
    tpu.vector_store %arg11[%c0_11, %c0_12, %c0_13], %14 {strides = array<i32>} : memref<8x8x512xbf16, #tpu.memory_space<vmem>>, vector<8x8x512xbf16>,
    %cst_14 = arith.constant 0.000000e+00 : f32
    %16 = vector.broadcast %cst_14 : f32 to vector<8x128xf32>
    %c0_i32 = arith.constant 0 : i32
    %c1_i32 = arith.constant 1 : i32
    %c0_i32_15 = arith.constant 0 : i32
    %c7_i32 = arith.constant 7 : i32
    %17 = arith.subi %c7_i32, %c0_i32_15 : i32
    %18 = arith.index_cast %c0_i32_15 : i32 to index
    %c0_16 = arith.constant 0 : index
    %c0_17 = arith.constant 0 : index
    %19 = vector.load %arg10[%18, %c0_16, %c0_17] : memref<8x8x512xbf16, #tpu.memory_space<vmem>>, vector<1x8x512xbf16>
    %20 = vector.shape_cast %19 : vector<1x8x512xbf16> to vector<8x512xbf16>
    %21 = vector.broadcast %c0_i32_15 : i32 to vector<8x128xi32>
    %22 = arith.cmpi slt, %21, %0 : vector<8x128xi32>
    %23 = arith.extf %20 : vector<8x512xbf16> to vector<8x512xf32>
    %24 = arith.truncf %16 : vector<8x128xf32> to vector<8x128xbf16>
    %25 = arith.index_cast %c0_i32 : i32 to index
    %c0_18 = arith.constant 0 : index
    %c0_19 = arith.constant 0 : index
    %26 = vector.load %arg3[%25, %c0_18, %c0_19] : memref<2x128x512xbf16, #tpu.memory_space<vmem>>, vector<1x128x512xbf16>
    %27 = vector.shape_cast %26 : vector<1x128x512xbf16> to vector<128x512xbf16>
    %cst_20 = arith.constant dense<0.000000e+00> : vector<8x512xf32>
    %28 = tpu.matmul %24, %27, %cst_20 {dimension_numbers = #tpu.dot_dimension_numbers<[1], [0], [0], [1], [0, 0, 1, 1], [], []>} : vector<8x128xbf16>, vector<128x512xbf16>, vector<8x512xf32> -> vector<8x512xf32>
    %29 = arith.addf %23, %28 : vector<8x512xf32>
    %30 = vector.extract_strided_slice %29 {offsets = [0, 0], sizes = [8, 128], strides = [1, 1]} : vector<8x512xf32> to vector<8x128xf32>
    %31 = arith.negf %30 : vector<8x128xf32>
    %32 = math.exp %31 : vector<8x128xf32>
    %cst_21 = arith.constant 1.000000e+00 : f32
    %33 = vector.broadcast %cst_21 : f32 to vector<8x128xf32>
    %34 = arith.addf %33, %32 : vector<8x128xf32>
    %35 = arith.divf %33, %34 : vector<8x128xf32>
    %36 = vector.extract_strided_slice %29 {offsets = [0, 128], sizes = [8, 128], strides = [1, 1]} : vector<8x512xf32> to vector<8x128xf32>
    %37 = arith.negf %36 : vector<8x128xf32>
    %38 = math.exp %37 : vector<8x128xf32>
    %cst_22 = arith.constant 1.000000e+00 : f32
    %39 = vector.broadcast %cst_22 : f32 to vector<8x128xf32>
    %40 = arith.addf %39, %38 : vector<8x128xf32>
    %41 = arith.divf %39, %40 : vector<8x128xf32>
    %42 = vector.extract_strided_slice %29 {offsets = [0, 256], sizes = [8, 128], strides = [1, 1]} : vector<8x512xf32> to vector<8x128xf32>
    %43 = math.tanh %42 : vector<8x128xf32>
    %44 = vector.extract_strided_slice %29 {offsets = [0, 384], sizes = [8, 128], strides = [1, 1]} : vector<8x512xf32> to vector<8x128xf32>
    %45 = arith.negf %44 : vector<8x128xf32>
    %46 = math.exp %45 : vector<8x128xf32>
    %cst_23 = arith.constant 1.000000e+00 : f32
    %47 = vector.broadcast %cst_23 : f32 to vector<8x128xf32>
    %48 = arith.addf %47, %46 : vector<8x128xf32>
    %49 = arith.divf %47, %48 : vector<8x128xf32>
    %50 = arith.mulf %41, %16 : vector<8x128xf32>
    %51 = arith.mulf %35, %43 : vector<8x128xf32>
    %52 = arith.addf %50, %51 : vector<8x128xf32>
    %53 = math.tanh %52 : vector<8x128xf32>
    %54 = arith.mulf %49, %53 : vector<8x128xf32>
    %55 = arith.select %22, %54, %16 : vector<8x128xi1>, vector<8x128xf32>
    %56 = arith.select %22, %52, %16 : vector<8x128xi1>, vector<8x128xf32>
    %57 = arith.index_cast %17 : i32 to index
    %c0_24 = arith.constant 0 : index
    %c0_25 = arith.constant 0 : index
    %58 = vector.load %arg11[%57, %c0_24, %c0_25] : memref<8x8x512xbf16, #tpu.memory_space<vmem>>, vector<1x8x512xbf16>
    %59 = vector.shape_cast %58 : vector<1x8x512xbf16> to vector<8x512xbf16>
    %60 = vector.broadcast %17 : i32 to vector<8x128xi32>
    %61 = arith.cmpi slt, %60, %0 : vector<8x128xi32>
    %62 = arith.extf %59 : vector<8x512xbf16> to vector<8x512xf32>
    %63 = arith.truncf %16 : vector<8x128xf32> to vector<8x128xbf16>
    %64 = arith.index_cast %c1_i32 : i32 to index
    %c0_26 = arith.constant 0 : index
    %c0_27 = arith.constant 0 : index
    %65 = vector.load %arg3[%64, %c0_26, %c0_27] : memref<2x128x512xbf16, #tpu.memory_space<vmem>>, vector<1x128x512xbf16>
    %66 = vector.shape_cast %65 : vector<1x128x512xbf16> to vector<128x512xbf16>
    %cst_28 = arith.constant dense<0.000000e+00> : vector<8x512xf32>
    %67 = tpu.matmul %63, %66, %cst_28 {dimension_numbers = #tpu.dot_dimension_numbers<[1], [0], [0], [1], [0, 0, 1, 1], [], []>} : vector<8x128xbf16>, vector<128x512xbf16>, vector<8x512xf32> -> vector<8x512xf32>
    %68 = arith.addf %62, %67 : vector<8x512xf32>
    %69 = vector.extract_strided_slice %68 {offsets = [0, 0], sizes = [8, 128], strides = [1, 1]} : vector<8x512xf32> to vector<8x128xf32>
    %70 = arith.negf %69 : vector<8x128xf32>
    %71 = math.exp %70 : vector<8x128xf32>
    %cst_29 = arith.constant 1.000000e+00 : f32
    %72 = vector.broadcast %cst_29 : f32 to vector<8x128xf32>
    %73 = arith.addf %72, %71 : vector<8x128xf32>
    %74 = arith.divf %72, %73 : vector<8x128xf32>
    %75 = vector.extract_strided_slice %68 {offsets = [0, 128], sizes = [8, 128], strides = [1, 1]} : vector<8x512xf32> to vector<8x128xf32>
    %76 = arith.negf %75 : vector<8x128xf32>
    %77 = math.exp %76 : vector<8x128xf32>
    %cst_30 = arith.constant 1.000000e+00 : f32
    %78 = vector.broadcast %cst_30 : f32 to vector<8x128xf32>
    %79 = arith.addf %78, %77 : vector<8x128xf32>
    %80 = arith.divf %78, %79 : vector<8x128xf32>
    %81 = vector.extract_strided_slice %68 {offsets = [0, 256], sizes = [8, 128], strides = [1, 1]} : vector<8x512xf32> to vector<8x128xf32>
    %82 = math.tanh %81 : vector<8x128xf32>
    %83 = vector.extract_strided_slice %68 {offsets = [0, 384], sizes = [8, 128], strides = [1, 1]} : vector<8x512xf32> to vector<8x128xf32>
    %84 = arith.negf %83 : vector<8x128xf32>
    %85 = math.exp %84 : vector<8x128xf32>
    %cst_31 = arith.constant 1.000000e+00 : f32
    %86 = vector.broadcast %cst_31 : f32 to vector<8x128xf32>
    %87 = arith.addf %86, %85 : vector<8x128xf32>
    %88 = arith.divf %86, %87 : vector<8x128xf32>
    %89 = arith.mulf %80, %16 : vector<8x128xf32>
    %90 = arith.mulf %74, %82 : vector<8x128xf32>
    %91 = arith.addf %89, %90 : vector<8x128xf32>
    %92 = math.tanh %91 : vector<8x128xf32>
    %93 = arith.mulf %88, %92 : vector<8x128xf32>
    %94 = arith.select %61, %93, %16 : vector<8x128xi1>, vector<8x128xf32>
    %95 = arith.select %61, %91, %16 : vector<8x128xi1>, vector<8x128xf32>
    %96 = vector.shape_cast %55 : vector<8x128xf32> to vector<1x8x128xf32>
    %97 = arith.index_cast %c0_i32_15 : i32 to index
    %c0_32 = arith.constant 0 : index
    %c0_33 = arith.constant 0 : index
    %98 = vector.load %arg12[%97, %c0_32, %c0_33] : memref<8x8x256xf32, #tpu.memory_space<vmem>>, vector<1x8x128xf32>
    tpu.vector_store %arg12[%97, %c0_32, %c0_33], %96 {strides = array<i32>} : memref<8x8x256xf32, #tpu.memory_space<vmem>>, vector<1x8x128xf32>,
    %99 = vector.shape_cast %94 : vector<8x128xf32> to vector<1x8x128xf32>
    %100 = arith.index_cast %17 : i32 to index
    %c0_34 = arith.constant 0 : index
    %c128 = arith.constant 128 : index
    %101 = vector.load %arg12[%100, %c0_34, %c128] : memref<8x8x256xf32, #tpu.memory_space<vmem>>, vector<1x8x128xf32>
    tpu.vector_store %arg12[%100, %c0_34, %c128], %99 {strides = array<i32>} : memref<8x8x256xf32, #tpu.memory_space<vmem>>, vector<1x8x128xf32>,
    %c1_i32_35 = arith.constant 1 : i32
    %c7_i32_36 = arith.constant 7 : i32
    %102 = arith.subi %c7_i32_36, %c1_i32_35 : i32
    %103 = arith.index_cast %c1_i32_35 : i32 to index
    %c0_37 = arith.constant 0 : index
    %c0_38 = arith.constant 0 : index
    %104 = vector.load %arg10[%103, %c0_37, %c0_38] : memref<8x8x512xbf16, #tpu.memory_space<vmem>>, vector<1x8x512xbf16>
    %105 = vector.shape_cast %104 : vector<1x8x512xbf16> to vector<8x512xbf16>
    %106 = vector.broadcast %c1_i32_35 : i32 to vector<8x128xi32>
    %107 = arith.cmpi slt, %106, %0 : vector<8x128xi32>
    %108 = arith.extf %105 : vector<8x512xbf16> to vector<8x512xf32>
    %109 = arith.truncf %55 : vector<8x128xf32> to vector<8x128xbf16>
    %110 = arith.index_cast %c0_i32 : i32 to index
    %c0_39 = arith.constant 0 : index
    %c0_40 = arith.constant 0 : index
    %111 = vector.load %arg3[%110, %c0_39, %c0_40] : memref<2x128x512xbf16, #tpu.memory_space<vmem>>, vector<1x128x512xbf16>
    %112 = vector.shape_cast %111 : vector<1x128x512xbf16> to vector<128x512xbf16>
    %cst_41 = arith.constant dense<0.000000e+00> : vector<8x512xf32>
    %113 = tpu.matmul %109, %112, %cst_41 {dimension_numbers = #tpu.dot_dimension_numbers<[1], [0], [0], [1], [0, 0, 1, 1], [], []>} : vector<8x128xbf16>, vector<128x512xbf16>, vector<8x512xf32> -> vector<8x512xf32>
    %114 = arith.addf %108, %113 : vector<8x512xf32>
    %115 = vector.extract_strided_slice %114 {offsets = [0, 0], sizes = [8, 128], strides = [1, 1]} : vector<8x512xf32> to vector<8x128xf32>
    %116 = arith.negf %115 : vector<8x128xf32>
    %117 = math.exp %116 : vector<8x128xf32>
    %cst_42 = arith.constant 1.000000e+00 : f32
    %118 = vector.broadcast %cst_42 : f32 to vector<8x128xf32>
    %119 = arith.addf %118, %117 : vector<8x128xf32>
    %120 = arith.divf %118, %119 : vector<8x128xf32>
    %121 = vector.extract_strided_slice %114 {offsets = [0, 128], sizes = [8, 128], strides = [1, 1]} : vector<8x512xf32> to vector<8x128xf32>
    %122 = arith.negf %121 : vector<8x128xf32>
    %123 = math.exp %122 : vector<8x128xf32>
    %cst_43 = arith.constant 1.000000e+00 : f32
    %124 = vector.broadcast %cst_43 : f32 to vector<8x128xf32>
    %125 = arith.addf %124, %123 : vector<8x128xf32>
    %126 = arith.divf %124, %125 : vector<8x128xf32>
    %127 = vector.extract_strided_slice %114 {offsets = [0, 256], sizes = [8, 128], strides = [1, 1]} : vector<8x512xf32> to vector<8x128xf32>
    %128 = math.tanh %127 : vector<8x128xf32>
    %129 = vector.extract_strided_slice %114 {offsets = [0, 384], sizes = [8, 128], strides = [1, 1]} : vector<8x512xf32> to vector<8x128xf32>
    %130 = arith.negf %129 : vector<8x128xf32>
    %131 = math.exp %130 : vector<8x128xf32>
    %cst_44 = arith.constant 1.000000e+00 : f32
    %132 = vector.broadcast %cst_44 : f32 to vector<8x128xf32>
    %133 = arith.addf %132, %131 : vector<8x128xf32>
    %134 = arith.divf %132, %133 : vector<8x128xf32>
    %135 = arith.mulf %126, %56 : vector<8x128xf32>
    %136 = arith.mulf %120, %128 : vector<8x128xf32>
    %137 = arith.addf %135, %136 : vector<8x128xf32>
    %138 = math.tanh %137 : vector<8x128xf32>
    %139 = arith.mulf %134, %138 : vector<8x128xf32>
    %140 = arith.select %107, %139, %55 : vector<8x128xi1>, vector<8x128xf32>
    %141 = arith.select %107, %137, %56 : vector<8x128xi1>, vector<8x128xf32>
    %142 = arith.index_cast %102 : i32 to index
    %c0_45 = arith.constant 0 : index
    %c0_46 = arith.constant 0 : index
    %143 = vector.load %arg11[%142, %c0_45, %c0_46] : memref<8x8x512xbf16, #tpu.memory_space<vmem>>, vector<1x8x512xbf16>
    %144 = vector.shape_cast %143 : vector<1x8x512xbf16> to vector<8x512xbf16>
    %145 = vector.broadcast %102 : i32 to vector<8x128xi32>
    %146 = arith.cmpi slt, %145, %0 : vector<8x128xi32>
    %147 = arith.extf %144 : vector<8x512xbf16> to vector<8x512xf32>
    %148 = arith.truncf %94 : vector<8x128xf32> to vector<8x128xbf16>
    %149 = arith.index_cast %c1_i32 : i32 to index
    %c0_47 = arith.constant 0 : index
    %c0_48 = arith.constant 0 : index
    %150 = vector.load %arg3[%149, %c0_47, %c0_48] : memref<2x128x512xbf16, #tpu.memory_space<vmem>>, vector<1x128x512xbf16>
    %151 = vector.shape_cast %150 : vector<1x128x512xbf16> to vector<128x512xbf16>
    %cst_49 = arith.constant dense<0.000000e+00> : vector<8x512xf32>
    %152 = tpu.matmul %148, %151, %cst_49 {dimension_numbers = #tpu.dot_dimension_numbers<[1], [0], [0], [1], [0, 0, 1, 1], [], []>} : vector<8x128xbf16>, vector<128x512xbf16>, vector<8x512xf32> -> vector<8x512xf32>
    %153 = arith.addf %147, %152 : vector<8x512xf32>
    %154 = vector.extract_strided_slice %153 {offsets = [0, 0], sizes = [8, 128], strides = [1, 1]} : vector<8x512xf32> to vector<8x128xf32>
    %155 = arith.negf %154 : vector<8x128xf32>
    %156 = math.exp %155 : vector<8x128xf32>
    %cst_50 = arith.constant 1.000000e+00 : f32
    %157 = vector.broadcast %cst_50 : f32 to vector<8x128xf32>
    %158 = arith.addf %157, %156 : vector<8x128xf32>
    %159 = arith.divf %157, %158 : vector<8x128xf32>
    %160 = vector.extract_strided_slice %153 {offsets = [0, 128], sizes = [8, 128], strides = [1, 1]} : vector<8x512xf32> to vector<8x128xf32>
    %161 = arith.negf %160 : vector<8x128xf32>
    %162 = math.exp %161 : vector<8x128xf32>
    %cst_51 = arith.constant 1.000000e+00 : f32
    %163 = vector.broadcast %cst_51 : f32 to vector<8x128xf32>
    %164 = arith.addf %163, %162 : vector<8x128xf32>
    %165 = arith.divf %163, %164 : vector<8x128xf32>
    %166 = vector.extract_strided_slice %153 {offsets = [0, 256], sizes = [8, 128], strides = [1, 1]} : vector<8x512xf32> to vector<8x128xf32>
    %167 = math.tanh %166 : vector<8x128xf32>
    %168 = vector.extract_strided_slice %153 {offsets = [0, 384], sizes = [8, 128], strides = [1, 1]} : vector<8x512xf32> to vector<8x128xf32>
    %169 = arith.negf %168 : vector<8x128xf32>
    %170 = math.exp %169 : vector<8x128xf32>
    %cst_52 = arith.constant 1.000000e+00 : f32
    %171 = vector.broadcast %cst_52 : f32 to vector<8x128xf32>
    %172 = arith.addf %171, %170 : vector<8x128xf32>
    %173 = arith.divf %171, %172 : vector<8x128xf32>
    %174 = arith.mulf %165, %95 : vector<8x128xf32>
    %175 = arith.mulf %159, %167 : vector<8x128xf32>
    %176 = arith.addf %174, %175 : vector<8x128xf32>
    %177 = math.tanh %176 : vector<8x128xf32>
    %178 = arith.mulf %173, %177 : vector<8x128xf32>
    %179 = arith.select %146, %178, %94 : vector<8x128xi1>, vector<8x128xf32>
    %180 = arith.select %146, %176, %95 : vector<8x128xi1>, vector<8x128xf32>
    %181 = vector.shape_cast %140 : vector<8x128xf32> to vector<1x8x128xf32>
    %182 = arith.index_cast %c1_i32_35 : i32 to index
    %c0_53 = arith.constant 0 : index
    %c0_54 = arith.constant 0 : index
    %183 = vector.load %arg12[%182, %c0_53, %c0_54] : memref<8x8x256xf32, #tpu.memory_space<vmem>>, vector<1x8x128xf32>
    tpu.vector_store %arg12[%182, %c0_53, %c0_54], %181 {strides = array<i32>} : memref<8x8x256xf32, #tpu.memory_space<vmem>>, vector<1x8x128xf32>,
    %184 = vector.shape_cast %179 : vector<8x128xf32> to vector<1x8x128xf32>
    %185 = arith.index_cast %102 : i32 to index
    %c0_55 = arith.constant 0 : index
    %c128_56 = arith.constant 128 : index
    %186 = vector.load %arg12[%185, %c0_55, %c128_56] : memref<8x8x256xf32, #tpu.memory_space<vmem>>, vector<1x8x128xf32>
    tpu.vector_store %arg12[%185, %c0_55, %c128_56], %184 {strides = array<i32>} : memref<8x8x256xf32, #tpu.memory_space<vmem>>, vector<1x8x128xf32>,
    %c2_i32 = arith.constant 2 : i32
    %c7_i32_57 = arith.constant 7 : i32
    %187 = arith.subi %c7_i32_57, %c2_i32 : i32
    %188 = arith.index_cast %c2_i32 : i32 to index
    %c0_58 = arith.constant 0 : index
    %c0_59 = arith.constant 0 : index
    %189 = vector.load %arg10[%188, %c0_58, %c0_59] : memref<8x8x512xbf16, #tpu.memory_space<vmem>>, vector<1x8x512xbf16>
    %190 = vector.shape_cast %189 : vector<1x8x512xbf16> to vector<8x512xbf16>
    %191 = vector.broadcast %c2_i32 : i32 to vector<8x128xi32>
    %192 = arith.cmpi slt, %191, %0 : vector<8x128xi32>
    %193 = arith.extf %190 : vector<8x512xbf16> to vector<8x512xf32>
    %194 = arith.truncf %140 : vector<8x128xf32> to vector<8x128xbf16>
    %195 = arith.index_cast %c0_i32 : i32 to index
    %c0_60 = arith.constant 0 : index
    %c0_61 = arith.constant 0 : index
    %196 = vector.load %arg3[%195, %c0_60, %c0_61] : memref<2x128x512xbf16, #tpu.memory_space<vmem>>, vector<1x128x512xbf16>
    %197 = vector.shape_cast %196 : vector<1x128x512xbf16> to vector<128x512xbf16>
    %cst_62 = arith.constant dense<0.000000e+00> : vector<8x512xf32>
    %198 = tpu.matmul %194, %197, %cst_62 {dimension_numbers = #tpu.dot_dimension_numbers<[1], [0], [0], [1], [0, 0, 1, 1], [], []>} : vector<8x128xbf16>, vector<128x512xbf16>, vector<8x512xf32> -> vector<8x512xf32>
    %199 = arith.addf %193, %198 : vector<8x512xf32>
    %200 = vector.extract_strided_slice %199 {offsets = [0, 0], sizes = [8, 128], strides = [1, 1]} : vector<8x512xf32> to vector<8x128xf32>
    %201 = arith.negf %200 : vector<8x128xf32>
    %202 = math.exp %201 : vector<8x128xf32>
    %cst_63 = arith.constant 1.000000e+00 : f32
    %203 = vector.broadcast %cst_63 : f32 to vector<8x128xf32>
    %204 = arith.addf %203, %202 : vector<8x128xf32>
    %205 = arith.divf %203, %204 : vector<8x128xf32>
    %206 = vector.extract_strided_slice %199 {offsets = [0, 128], sizes = [8, 128], strides = [1, 1]} : vector<8x512xf32> to vector<8x128xf32>
    %207 = arith.negf %206 : vector<8x128xf32>
    %208 = math.exp %207 : vector<8x128xf32>
    %cst_64 = arith.constant 1.000000e+00 : f32
    %209 = vector.broadcast %cst_64 : f32 to vector<8x128xf32>
    %210 = arith.addf %209, %208 : vector<8x128xf32>
    %211 = arith.divf %209, %210 : vector<8x128xf32>
    %212 = vector.extract_strided_slice %199 {offsets = [0, 256], sizes = [8, 128], strides = [1, 1]} : vector<8x512xf32> to vector<8x128xf32>
    %213 = math.tanh %212 : vector<8x128xf32>
    %214 = vector.extract_strided_slice %199 {offsets = [0, 384], sizes = [8, 128], strides = [1, 1]} : vector<8x512xf32> to vector<8x128xf32>
    %215 = arith.negf %214 : vector<8x128xf32>
    %216 = math.exp %215 : vector<8x128xf32>
    %cst_65 = arith.constant 1.000000e+00 : f32
    %217 = vector.broadcast %cst_65 : f32 to vector<8x128xf32>
    %218 = arith.addf %217, %216 : vector<8x128xf32>
    %219 = arith.divf %217, %218 : vector<8x128xf32>
    %220 = arith.mulf %211, %141 : vector<8x128xf32>
    %221 = arith.mulf %205, %213 : vector<8x128xf32>
    %222 = arith.addf %220, %221 : vector<8x128xf32>
    %223 = math.tanh %222 : vector<8x128xf32>
    %224 = arith.mulf %219, %223 : vector<8x128xf32>
    %225 = arith.select %192, %224, %140 : vector<8x128xi1>, vector<8x128xf32>
    %226 = arith.select %192, %222, %141 : vector<8x128xi1>, vector<8x128xf32>
    %227 = arith.index_cast %187 : i32 to index
    %c0_66 = arith.constant 0 : index
    %c0_67 = arith.constant 0 : index
    %228 = vector.load %arg11[%227, %c0_66, %c0_67] : memref<8x8x512xbf16, #tpu.memory_space<vmem>>, vector<1x8x512xbf16>
    %229 = vector.shape_cast %228 : vector<1x8x512xbf16> to vector<8x512xbf16>
    %230 = vector.broadcast %187 : i32 to vector<8x128xi32>
    %231 = arith.cmpi slt, %230, %0 : vector<8x128xi32>
    %232 = arith.extf %229 : vector<8x512xbf16> to vector<8x512xf32>
    %233 = arith.truncf %179 : vector<8x128xf32> to vector<8x128xbf16>
    %234 = arith.index_cast %c1_i32 : i32 to index
    %c0_68 = arith.constant 0 : index
    %c0_69 = arith.constant 0 : index
    %235 = vector.load %arg3[%234, %c0_68, %c0_69] : memref<2x128x512xbf16, #tpu.memory_space<vmem>>, vector<1x128x512xbf16>
    %236 = vector.shape_cast %235 : vector<1x128x512xbf16> to vector<128x512xbf16>
    %cst_70 = arith.constant dense<0.000000e+00> : vector<8x512xf32>
    %237 = tpu.matmul %233, %236, %cst_70 {dimension_numbers = #tpu.dot_dimension_numbers<[1], [0], [0], [1], [0, 0, 1, 1], [], []>} : vector<8x128xbf16>, vector<128x512xbf16>, vector<8x512xf32> -> vector<8x512xf32>
    %238 = arith.addf %232, %237 : vector<8x512xf32>
    %239 = vector.extract_strided_slice %238 {offsets = [0, 0], sizes = [8, 128], strides = [1, 1]} : vector<8x512xf32> to vector<8x128xf32>
    %240 = arith.negf %239 : vector<8x128xf32>
    %241 = math.exp %240 : vector<8x128xf32>
    %cst_71 = arith.constant 1.000000e+00 : f32
    %242 = vector.broadcast %cst_71 : f32 to vector<8x128xf32>
    %243 = arith.addf %242, %241 : vector<8x128xf32>
    %244 = arith.divf %242, %243 : vector<8x128xf32>
    %245 = vector.extract_strided_slice %238 {offsets = [0, 128], sizes = [8, 128], strides = [1, 1]} : vector<8x512xf32> to vector<8x128xf32>
    %246 = arith.negf %245 : vector<8x128xf32>
    %247 = math.exp %246 : vector<8x128xf32>
    %cst_72 = arith.constant 1.000000e+00 : f32
    %248 = vector.broadcast %cst_72 : f32 to vector<8x128xf32>
    %249 = arith.addf %248, %247 : vector<8x128xf32>
    %250 = arith.divf %248, %249 : vector<8x128xf32>
    %251 = vector.extract_strided_slice %238 {offsets = [0, 256], sizes = [8, 128], strides = [1, 1]} : vector<8x512xf32> to vector<8x128xf32>
    %252 = math.tanh %251 : vector<8x128xf32>
    %253 = vector.extract_strided_slice %238 {offsets = [0, 384], sizes = [8, 128], strides = [1, 1]} : vector<8x512xf32> to vector<8x128xf32>
    %254 = arith.negf %253 : vector<8x128xf32>
    %255 = math.exp %254 : vector<8x128xf32>
    %cst_73 = arith.constant 1.000000e+00 : f32
    %256 = vector.broadcast %cst_73 : f32 to vector<8x128xf32>
    %257 = arith.addf %256, %255 : vector<8x128xf32>
    %258 = arith.divf %256, %257 : vector<8x128xf32>
    %259 = arith.mulf %250, %180 : vector<8x128xf32>
    %260 = arith.mulf %244, %252 : vector<8x128xf32>
    %261 = arith.addf %259, %260 : vector<8x128xf32>
    %262 = math.tanh %261 : vector<8x128xf32>
    %263 = arith.mulf %258, %262 : vector<8x128xf32>
    %264 = arith.select %231, %263, %179 : vector<8x128xi1>, vector<8x128xf32>
    %265 = arith.select %231, %261, %180 : vector<8x128xi1>, vector<8x128xf32>
    %266 = vector.shape_cast %225 : vector<8x128xf32> to vector<1x8x128xf32>
    %267 = arith.index_cast %c2_i32 : i32 to index
    %c0_74 = arith.constant 0 : index
    %c0_75 = arith.constant 0 : index
    %268 = vector.load %arg12[%267, %c0_74, %c0_75] : memref<8x8x256xf32, #tpu.memory_space<vmem>>, vector<1x8x128xf32>
    tpu.vector_store %arg12[%267, %c0_74, %c0_75], %266 {strides = array<i32>} : memref<8x8x256xf32, #tpu.memory_space<vmem>>, vector<1x8x128xf32>,
    %269 = vector.shape_cast %264 : vector<8x128xf32> to vector<1x8x128xf32>
    %270 = arith.index_cast %187 : i32 to index
    %c0_76 = arith.constant 0 : index
    %c128_77 = arith.constant 128 : index
    %271 = vector.load %arg12[%270, %c0_76, %c128_77] : memref<8x8x256xf32, #tpu.memory_space<vmem>>, vector<1x8x128xf32>
    tpu.vector_store %arg12[%270, %c0_76, %c128_77], %269 {strides = array<i32>} : memref<8x8x256xf32, #tpu.memory_space<vmem>>, vector<1x8x128xf32>,
    %c3_i32 = arith.constant 3 : i32
    %c7_i32_78 = arith.constant 7 : i32
    %272 = arith.subi %c7_i32_78, %c3_i32 : i32
    %273 = arith.index_cast %c3_i32 : i32 to index
    %c0_79 = arith.constant 0 : index
    %c0_80 = arith.constant 0 : index
    %274 = vector.load %arg10[%273, %c0_79, %c0_80] : memref<8x8x512xbf16, #tpu.memory_space<vmem>>, vector<1x8x512xbf16>
    %275 = vector.shape_cast %274 : vector<1x8x512xbf16> to vector<8x512xbf16>
    %276 = vector.broadcast %c3_i32 : i32 to vector<8x128xi32>
    %277 = arith.cmpi slt, %276, %0 : vector<8x128xi32>
    %278 = arith.extf %275 : vector<8x512xbf16> to vector<8x512xf32>
    %279 = arith.truncf %225 : vector<8x128xf32> to vector<8x128xbf16>
    %280 = arith.index_cast %c0_i32 : i32 to index
    %c0_81 = arith.constant 0 : index
    %c0_82 = arith.constant 0 : index
    %281 = vector.load %arg3[%280, %c0_81, %c0_82] : memref<2x128x512xbf16, #tpu.memory_space<vmem>>, vector<1x128x512xbf16>
    %282 = vector.shape_cast %281 : vector<1x128x512xbf16> to vector<128x512xbf16>
    %cst_83 = arith.constant dense<0.000000e+00> : vector<8x512xf32>
    %283 = tpu.matmul %279, %282, %cst_83 {dimension_numbers = #tpu.dot_dimension_numbers<[1], [0], [0], [1], [0, 0, 1, 1], [], []>} : vector<8x128xbf16>, vector<128x512xbf16>, vector<8x512xf32> -> vector<8x512xf32>
    %284 = arith.addf %278, %283 : vector<8x512xf32>
    %285 = vector.extract_strided_slice %284 {offsets = [0, 0], sizes = [8, 128], strides = [1, 1]} : vector<8x512xf32> to vector<8x128xf32>
    %286 = arith.negf %285 : vector<8x128xf32>
    %287 = math.exp %286 : vector<8x128xf32>
    %cst_84 = arith.constant 1.000000e+00 : f32
    %288 = vector.broadcast %cst_84 : f32 to vector<8x128xf32>
    %289 = arith.addf %288, %287 : vector<8x128xf32>
    %290 = arith.divf %288, %289 : vector<8x128xf32>
    %291 = vector.extract_strided_slice %284 {offsets = [0, 128], sizes = [8, 128], strides = [1, 1]} : vector<8x512xf32> to vector<8x128xf32>
    %292 = arith.negf %291 : vector<8x128xf32>
    %293 = math.exp %292 : vector<8x128xf32>
    %cst_85 = arith.constant 1.000000e+00 : f32
    %294 = vector.broadcast %cst_85 : f32 to vector<8x128xf32>
    %295 = arith.addf %294, %293 : vector<8x128xf32>
    %296 = arith.divf %294, %295 : vector<8x128xf32>
    %297 = vector.extract_strided_slice %284 {offsets = [0, 256], sizes = [8, 128], strides = [1, 1]} : vector<8x512xf32> to vector<8x128xf32>
    %298 = math.tanh %297 : vector<8x128xf32>
    %299 = vector.extract_strided_slice %284 {offsets = [0, 384], sizes = [8, 128], strides = [1, 1]} : vector<8x512xf32> to vector<8x128xf32>
    %300 = arith.negf %299 : vector<8x128xf32>
    %301 = math.exp %300 : vector<8x128xf32>
    %cst_86 = arith.constant 1.000000e+00 : f32
    %302 = vector.broadcast %cst_86 : f32 to vector<8x128xf32>
    %303 = arith.addf %302, %301 : vector<8x128xf32>
    %304 = arith.divf %302, %303 : vector<8x128xf32>
    %305 = arith.mulf %296, %226 : vector<8x128xf32>
    %306 = arith.mulf %290, %298 : vector<8x128xf32>
    %307 = arith.addf %305, %306 : vector<8x128xf32>
    %308 = math.tanh %307 : vector<8x128xf32>
    %309 = arith.mulf %304, %308 : vector<8x128xf32>
    %310 = arith.select %277, %309, %225 : vector<8x128xi1>, vector<8x128xf32>
    %311 = arith.select %277, %307, %226 : vector<8x128xi1>, vector<8x128xf32>
    %312 = arith.index_cast %272 : i32 to index
    %c0_87 = arith.constant 0 : index
    %c0_88 = arith.constant 0 : index
    %313 = vector.load %arg11[%312, %c0_87, %c0_88] : memref<8x8x512xbf16, #tpu.memory_space<vmem>>, vector<1x8x512xbf16>
    %314 = vector.shape_cast %313 : vector<1x8x512xbf16> to vector<8x512xbf16>
    %315 = vector.broadcast %272 : i32 to vector<8x128xi32>
    %316 = arith.cmpi slt, %315, %0 : vector<8x128xi32>
    %317 = arith.extf %314 : vector<8x512xbf16> to vector<8x512xf32>
    %318 = arith.truncf %264 : vector<8x128xf32> to vector<8x128xbf16>
    %319 = arith.index_cast %c1_i32 : i32 to index
    %c0_89 = arith.constant 0 : index
    %c0_90 = arith.constant 0 : index
    %320 = vector.load %arg3[%319, %c0_89, %c0_90] : memref<2x128x512xbf16, #tpu.memory_space<vmem>>, vector<1x128x512xbf16>
    %321 = vector.shape_cast %320 : vector<1x128x512xbf16> to vector<128x512xbf16>
    %cst_91 = arith.constant dense<0.000000e+00> : vector<8x512xf32>
    %322 = tpu.matmul %318, %321, %cst_91 {dimension_numbers = #tpu.dot_dimension_numbers<[1], [0], [0], [1], [0, 0, 1, 1], [], []>} : vector<8x128xbf16>, vector<128x512xbf16>, vector<8x512xf32> -> vector<8x512xf32>
    %323 = arith.addf %317, %322 : vector<8x512xf32>
    %324 = vector.extract_strided_slice %323 {offsets = [0, 0], sizes = [8, 128], strides = [1, 1]} : vector<8x512xf32> to vector<8x128xf32>
    %325 = arith.negf %324 : vector<8x128xf32>
    %326 = math.exp %325 : vector<8x128xf32>
    %cst_92 = arith.constant 1.000000e+00 : f32
    %327 = vector.broadcast %cst_92 : f32 to vector<8x128xf32>
    %328 = arith.addf %327, %326 : vector<8x128xf32>
    %329 = arith.divf %327, %328 : vector<8x128xf32>
    %330 = vector.extract_strided_slice %323 {offsets = [0, 128], sizes = [8, 128], strides = [1, 1]} : vector<8x512xf32> to vector<8x128xf32>
    %331 = arith.negf %330 : vector<8x128xf32>
    %332 = math.exp %331 : vector<8x128xf32>
    %cst_93 = arith.constant 1.000000e+00 : f32
    %333 = vector.broadcast %cst_93 : f32 to vector<8x128xf32>
    %334 = arith.addf %333, %332 : vector<8x128xf32>
    %335 = arith.divf %333, %334 : vector<8x128xf32>
    %336 = vector.extract_strided_slice %323 {offsets = [0, 256], sizes = [8, 128], strides = [1, 1]} : vector<8x512xf32> to vector<8x128xf32>
    %337 = math.tanh %336 : vector<8x128xf32>
    %338 = vector.extract_strided_slice %323 {offsets = [0, 384], sizes = [8, 128], strides = [1, 1]} : vector<8x512xf32> to vector<8x128xf32>
    %339 = arith.negf %338 : vector<8x128xf32>
    %340 = math.exp %339 : vector<8x128xf32>
    %cst_94 = arith.constant 1.000000e+00 : f32
    %341 = vector.broadcast %cst_94 : f32 to vector<8x128xf32>
    %342 = arith.addf %341, %340 : vector<8x128xf32>
    %343 = arith.divf %341, %342 : vector<8x128xf32>
    %344 = arith.mulf %335, %265 : vector<8x128xf32>
    %345 = arith.mulf %329, %337 : vector<8x128xf32>
    %346 = arith.addf %344, %345 : vector<8x128xf32>
    %347 = math.tanh %346 : vector<8x128xf32>
    %348 = arith.mulf %343, %347 : vector<8x128xf32>
    %349 = arith.select %316, %348, %264 : vector<8x128xi1>, vector<8x128xf32>
    %350 = arith.select %316, %346, %265 : vector<8x128xi1>, vector<8x128xf32>
    %351 = vector.shape_cast %310 : vector<8x128xf32> to vector<1x8x128xf32>
    %352 = arith.index_cast %c3_i32 : i32 to index
    %c0_95 = arith.constant 0 : index
    %c0_96 = arith.constant 0 : index
    %353 = vector.load %arg12[%352, %c0_95, %c0_96] : memref<8x8x256xf32, #tpu.memory_space<vmem>>, vector<1x8x128xf32>
    tpu.vector_store %arg12[%352, %c0_95, %c0_96], %351 {strides = array<i32>} : memref<8x8x256xf32, #tpu.memory_space<vmem>>, vector<1x8x128xf32>,
    %354 = vector.shape_cast %349 : vector<8x128xf32> to vector<1x8x128xf32>
    %355 = arith.index_cast %272 : i32 to index
    %c0_97 = arith.constant 0 : index
    %c128_98 = arith.constant 128 : index
    %356 = vector.load %arg12[%355, %c0_97, %c128_98] : memref<8x8x256xf32, #tpu.memory_space<vmem>>, vector<1x8x128xf32>
    tpu.vector_store %arg12[%355, %c0_97, %c128_98], %354 {strides = array<i32>} : memref<8x8x256xf32, #tpu.memory_space<vmem>>, vector<1x8x128xf32>,
    %c4_i32 = arith.constant 4 : i32
    %c7_i32_99 = arith.constant 7 : i32
    %357 = arith.subi %c7_i32_99, %c4_i32 : i32
    %358 = arith.index_cast %c4_i32 : i32 to index
    %c0_100 = arith.constant 0 : index
    %c0_101 = arith.constant 0 : index
    %359 = vector.load %arg10[%358, %c0_100, %c0_101] : memref<8x8x512xbf16, #tpu.memory_space<vmem>>, vector<1x8x512xbf16>
    %360 = vector.shape_cast %359 : vector<1x8x512xbf16> to vector<8x512xbf16>
    %361 = vector.broadcast %c4_i32 : i32 to vector<8x128xi32>
    %362 = arith.cmpi slt, %361, %0 : vector<8x128xi32>
    %363 = arith.extf %360 : vector<8x512xbf16> to vector<8x512xf32>
    %364 = arith.truncf %310 : vector<8x128xf32> to vector<8x128xbf16>
    %365 = arith.index_cast %c0_i32 : i32 to index
    %c0_102 = arith.constant 0 : index
    %c0_103 = arith.constant 0 : index
    %366 = vector.load %arg3[%365, %c0_102, %c0_103] : memref<2x128x512xbf16, #tpu.memory_space<vmem>>, vector<1x128x512xbf16>
    %367 = vector.shape_cast %366 : vector<1x128x512xbf16> to vector<128x512xbf16>
    %cst_104 = arith.constant dense<0.000000e+00> : vector<8x512xf32>
    %368 = tpu.matmul %364, %367, %cst_104 {dimension_numbers = #tpu.dot_dimension_numbers<[1], [0], [0], [1], [0, 0, 1, 1], [], []>} : vector<8x128xbf16>, vector<128x512xbf16>, vector<8x512xf32> -> vector<8x512xf32>
    %369 = arith.addf %363, %368 : vector<8x512xf32>
    %370 = vector.extract_strided_slice %369 {offsets = [0, 0], sizes = [8, 128], strides = [1, 1]} : vector<8x512xf32> to vector<8x128xf32>
    %371 = arith.negf %370 : vector<8x128xf32>
    %372 = math.exp %371 : vector<8x128xf32>
    %cst_105 = arith.constant 1.000000e+00 : f32
    %373 = vector.broadcast %cst_105 : f32 to vector<8x128xf32>
    %374 = arith.addf %373, %372 : vector<8x128xf32>
    %375 = arith.divf %373, %374 : vector<8x128xf32>
    %376 = vector.extract_strided_slice %369 {offsets = [0, 128], sizes = [8, 128], strides = [1, 1]} : vector<8x512xf32> to vector<8x128xf32>
    %377 = arith.negf %376 : vector<8x128xf32>
    %378 = math.exp %377 : vector<8x128xf32>
    %cst_106 = arith.constant 1.000000e+00 : f32
    %379 = vector.broadcast %cst_106 : f32 to vector<8x128xf32>
    %380 = arith.addf %379, %378 : vector<8x128xf32>
    %381 = arith.divf %379, %380 : vector<8x128xf32>
    %382 = vector.extract_strided_slice %369 {offsets = [0, 256], sizes = [8, 128], strides = [1, 1]} : vector<8x512xf32> to vector<8x128xf32>
    %383 = math.tanh %382 : vector<8x128xf32>
    %384 = vector.extract_strided_slice %369 {offsets = [0, 384], sizes = [8, 128], strides = [1, 1]} : vector<8x512xf32> to vector<8x128xf32>
    %385 = arith.negf %384 : vector<8x128xf32>
    %386 = math.exp %385 : vector<8x128xf32>
    %cst_107 = arith.constant 1.000000e+00 : f32
    %387 = vector.broadcast %cst_107 : f32 to vector<8x128xf32>
    %388 = arith.addf %387, %386 : vector<8x128xf32>
    %389 = arith.divf %387, %388 : vector<8x128xf32>
    %390 = arith.mulf %381, %311 : vector<8x128xf32>
    %391 = arith.mulf %375, %383 : vector<8x128xf32>
    %392 = arith.addf %390, %391 : vector<8x128xf32>
    %393 = math.tanh %392 : vector<8x128xf32>
    %394 = arith.mulf %389, %393 : vector<8x128xf32>
    %395 = arith.select %362, %394, %310 : vector<8x128xi1>, vector<8x128xf32>
    %396 = arith.select %362, %392, %311 : vector<8x128xi1>, vector<8x128xf32>
    %397 = arith.index_cast %357 : i32 to index
    %c0_108 = arith.constant 0 : index
    %c0_109 = arith.constant 0 : index
    %398 = vector.load %arg11[%397, %c0_108, %c0_109] : memref<8x8x512xbf16, #tpu.memory_space<vmem>>, vector<1x8x512xbf16>
    %399 = vector.shape_cast %398 : vector<1x8x512xbf16> to vector<8x512xbf16>
    %400 = vector.broadcast %357 : i32 to vector<8x128xi32>
    %401 = arith.cmpi slt, %400, %0 : vector<8x128xi32>
    %402 = arith.extf %399 : vector<8x512xbf16> to vector<8x512xf32>
    %403 = arith.truncf %349 : vector<8x128xf32> to vector<8x128xbf16>
    %404 = arith.index_cast %c1_i32 : i32 to index
    %c0_110 = arith.constant 0 : index
    %c0_111 = arith.constant 0 : index
    %405 = vector.load %arg3[%404, %c0_110, %c0_111] : memref<2x128x512xbf16, #tpu.memory_space<vmem>>, vector<1x128x512xbf16>
    %406 = vector.shape_cast %405 : vector<1x128x512xbf16> to vector<128x512xbf16>
    %cst_112 = arith.constant dense<0.000000e+00> : vector<8x512xf32>
    %407 = tpu.matmul %403, %406, %cst_112 {dimension_numbers = #tpu.dot_dimension_numbers<[1], [0], [0], [1], [0, 0, 1, 1], [], []>} : vector<8x128xbf16>, vector<128x512xbf16>, vector<8x512xf32> -> vector<8x512xf32>
    %408 = arith.addf %402, %407 : vector<8x512xf32>
    %409 = vector.extract_strided_slice %408 {offsets = [0, 0], sizes = [8, 128], strides = [1, 1]} : vector<8x512xf32> to vector<8x128xf32>
    %410 = arith.negf %409 : vector<8x128xf32>
    %411 = math.exp %410 : vector<8x128xf32>
    %cst_113 = arith.constant 1.000000e+00 : f32
    %412 = vector.broadcast %cst_113 : f32 to vector<8x128xf32>
    %413 = arith.addf %412, %411 : vector<8x128xf32>
    %414 = arith.divf %412, %413 : vector<8x128xf32>
    %415 = vector.extract_strided_slice %408 {offsets = [0, 128], sizes = [8, 128], strides = [1, 1]} : vector<8x512xf32> to vector<8x128xf32>
    %416 = arith.negf %415 : vector<8x128xf32>
    %417 = math.exp %416 : vector<8x128xf32>
    %cst_114 = arith.constant 1.000000e+00 : f32
    %418 = vector.broadcast %cst_114 : f32 to vector<8x128xf32>
    %419 = arith.addf %418, %417 : vector<8x128xf32>
    %420 = arith.divf %418, %419 : vector<8x128xf32>
    %421 = vector.extract_strided_slice %408 {offsets = [0, 256], sizes = [8, 128], strides = [1, 1]} : vector<8x512xf32> to vector<8x128xf32>
    %422 = math.tanh %421 : vector<8x128xf32>
    %423 = vector.extract_strided_slice %408 {offsets = [0, 384], sizes = [8, 128], strides = [1, 1]} : vector<8x512xf32> to vector<8x128xf32>
    %424 = arith.negf %423 : vector<8x128xf32>
    %425 = math.exp %424 : vector<8x128xf32>
    %cst_115 = arith.constant 1.000000e+00 : f32
    %426 = vector.broadcast %cst_115 : f32 to vector<8x128xf32>
    %427 = arith.addf %426, %425 : vector<8x128xf32>
    %428 = arith.divf %426, %427 : vector<8x128xf32>
    %429 = arith.mulf %420, %350 : vector<8x128xf32>
    %430 = arith.mulf %414, %422 : vector<8x128xf32>
    %431 = arith.addf %429, %430 : vector<8x128xf32>
    %432 = math.tanh %431 : vector<8x128xf32>
    %433 = arith.mulf %428, %432 : vector<8x128xf32>
    %434 = arith.select %401, %433, %349 : vector<8x128xi1>, vector<8x128xf32>
    %435 = arith.select %401, %431, %350 : vector<8x128xi1>, vector<8x128xf32>
    %436 = vector.shape_cast %395 : vector<8x128xf32> to vector<1x8x128xf32>
    %437 = arith.index_cast %c4_i32 : i32 to index
    %c0_116 = arith.constant 0 : index
    %c0_117 = arith.constant 0 : index
    %438 = vector.load %arg12[%437, %c0_116, %c0_117] : memref<8x8x256xf32, #tpu.memory_space<vmem>>, vector<1x8x128xf32>
    tpu.vector_store %arg12[%437, %c0_116, %c0_117], %436 {strides = array<i32>} : memref<8x8x256xf32, #tpu.memory_space<vmem>>, vector<1x8x128xf32>,
    %439 = vector.shape_cast %434 : vector<8x128xf32> to vector<1x8x128xf32>
    %440 = arith.index_cast %357 : i32 to index
    %c0_118 = arith.constant 0 : index
    %c128_119 = arith.constant 128 : index
    %441 = vector.load %arg12[%440, %c0_118, %c128_119] : memref<8x8x256xf32, #tpu.memory_space<vmem>>, vector<1x8x128xf32>
    tpu.vector_store %arg12[%440, %c0_118, %c128_119], %439 {strides = array<i32>} : memref<8x8x256xf32, #tpu.memory_space<vmem>>, vector<1x8x128xf32>,
    %c5_i32 = arith.constant 5 : i32
    %c7_i32_120 = arith.constant 7 : i32
    %442 = arith.subi %c7_i32_120, %c5_i32 : i32
    %443 = arith.index_cast %c5_i32 : i32 to index
    %c0_121 = arith.constant 0 : index
    %c0_122 = arith.constant 0 : index
    %444 = vector.load %arg10[%443, %c0_121, %c0_122] : memref<8x8x512xbf16, #tpu.memory_space<vmem>>, vector<1x8x512xbf16>
    %445 = vector.shape_cast %444 : vector<1x8x512xbf16> to vector<8x512xbf16>
    %446 = vector.broadcast %c5_i32 : i32 to vector<8x128xi32>
    %447 = arith.cmpi slt, %446, %0 : vector<8x128xi32>
    %448 = arith.extf %445 : vector<8x512xbf16> to vector<8x512xf32>
    %449 = arith.truncf %395 : vector<8x128xf32> to vector<8x128xbf16>
    %450 = arith.index_cast %c0_i32 : i32 to index
    %c0_123 = arith.constant 0 : index
    %c0_124 = arith.constant 0 : index
    %451 = vector.load %arg3[%450, %c0_123, %c0_124] : memref<2x128x512xbf16, #tpu.memory_space<vmem>>, vector<1x128x512xbf16>
    %452 = vector.shape_cast %451 : vector<1x128x512xbf16> to vector<128x512xbf16>
    %cst_125 = arith.constant dense<0.000000e+00> : vector<8x512xf32>
    %453 = tpu.matmul %449, %452, %cst_125 {dimension_numbers = #tpu.dot_dimension_numbers<[1], [0], [0], [1], [0, 0, 1, 1], [], []>} : vector<8x128xbf16>, vector<128x512xbf16>, vector<8x512xf32> -> vector<8x512xf32>
    %454 = arith.addf %448, %453 : vector<8x512xf32>
    %455 = vector.extract_strided_slice %454 {offsets = [0, 0], sizes = [8, 128], strides = [1, 1]} : vector<8x512xf32> to vector<8x128xf32>
    %456 = arith.negf %455 : vector<8x128xf32>
    %457 = math.exp %456 : vector<8x128xf32>
    %cst_126 = arith.constant 1.000000e+00 : f32
    %458 = vector.broadcast %cst_126 : f32 to vector<8x128xf32>
    %459 = arith.addf %458, %457 : vector<8x128xf32>
    %460 = arith.divf %458, %459 : vector<8x128xf32>
    %461 = vector.extract_strided_slice %454 {offsets = [0, 128], sizes = [8, 128], strides = [1, 1]} : vector<8x512xf32> to vector<8x128xf32>
    %462 = arith.negf %461 : vector<8x128xf32>
    %463 = math.exp %462 : vector<8x128xf32>
    %cst_127 = arith.constant 1.000000e+00 : f32
    %464 = vector.broadcast %cst_127 : f32 to vector<8x128xf32>
    %465 = arith.addf %464, %463 : vector<8x128xf32>
    %466 = arith.divf %464, %465 : vector<8x128xf32>
    %467 = vector.extract_strided_slice %454 {offsets = [0, 256], sizes = [8, 128], strides = [1, 1]} : vector<8x512xf32> to vector<8x128xf32>
    %468 = math.tanh %467 : vector<8x128xf32>
    %469 = vector.extract_strided_slice %454 {offsets = [0, 384], sizes = [8, 128], strides = [1, 1]} : vector<8x512xf32> to vector<8x128xf32>
    %470 = arith.negf %469 : vector<8x128xf32>
    %471 = math.exp %470 : vector<8x128xf32>
    %cst_128 = arith.constant 1.000000e+00 : f32
    %472 = vector.broadcast %cst_128 : f32 to vector<8x128xf32>
    %473 = arith.addf %472, %471 : vector<8x128xf32>
    %474 = arith.divf %472, %473 : vector<8x128xf32>
    %475 = arith.mulf %466, %396 : vector<8x128xf32>
    %476 = arith.mulf %460, %468 : vector<8x128xf32>
    %477 = arith.addf %475, %476 : vector<8x128xf32>
    %478 = math.tanh %477 : vector<8x128xf32>
    %479 = arith.mulf %474, %478 : vector<8x128xf32>
    %480 = arith.select %447, %479, %395 : vector<8x128xi1>, vector<8x128xf32>
    %481 = arith.select %447, %477, %396 : vector<8x128xi1>, vector<8x128xf32>
    %482 = arith.index_cast %442 : i32 to index
    %c0_129 = arith.constant 0 : index
    %c0_130 = arith.constant 0 : index
    %483 = vector.load %arg11[%482, %c0_129, %c0_130] : memref<8x8x512xbf16, #tpu.memory_space<vmem>>, vector<1x8x512xbf16>
    %484 = vector.shape_cast %483 : vector<1x8x512xbf16> to vector<8x512xbf16>
    %485 = vector.broadcast %442 : i32 to vector<8x128xi32>
    %486 = arith.cmpi slt, %485, %0 : vector<8x128xi32>
    %487 = arith.extf %484 : vector<8x512xbf16> to vector<8x512xf32>
    %488 = arith.truncf %434 : vector<8x128xf32> to vector<8x128xbf16>
    %489 = arith.index_cast %c1_i32 : i32 to index
    %c0_131 = arith.constant 0 : index
    %c0_132 = arith.constant 0 : index
    %490 = vector.load %arg3[%489, %c0_131, %c0_132] : memref<2x128x512xbf16, #tpu.memory_space<vmem>>, vector<1x128x512xbf16>
    %491 = vector.shape_cast %490 : vector<1x128x512xbf16> to vector<128x512xbf16>
    %cst_133 = arith.constant dense<0.000000e+00> : vector<8x512xf32>
    %492 = tpu.matmul %488, %491, %cst_133 {dimension_numbers = #tpu.dot_dimension_numbers<[1], [0], [0], [1], [0, 0, 1, 1], [], []>} : vector<8x128xbf16>, vector<128x512xbf16>, vector<8x512xf32> -> vector<8x512xf32>
    %493 = arith.addf %487, %492 : vector<8x512xf32>
    %494 = vector.extract_strided_slice %493 {offsets = [0, 0], sizes = [8, 128], strides = [1, 1]} : vector<8x512xf32> to vector<8x128xf32>
    %495 = arith.negf %494 : vector<8x128xf32>
    %496 = math.exp %495 : vector<8x128xf32>
    %cst_134 = arith.constant 1.000000e+00 : f32
    %497 = vector.broadcast %cst_134 : f32 to vector<8x128xf32>
    %498 = arith.addf %497, %496 : vector<8x128xf32>
    %499 = arith.divf %497, %498 : vector<8x128xf32>
    %500 = vector.extract_strided_slice %493 {offsets = [0, 128], sizes = [8, 128], strides = [1, 1]} : vector<8x512xf32> to vector<8x128xf32>
    %501 = arith.negf %500 : vector<8x128xf32>
    %502 = math.exp %501 : vector<8x128xf32>
    %cst_135 = arith.constant 1.000000e+00 : f32
    %503 = vector.broadcast %cst_135 : f32 to vector<8x128xf32>
    %504 = arith.addf %503, %502 : vector<8x128xf32>
    %505 = arith.divf %503, %504 : vector<8x128xf32>
    %506 = vector.extract_strided_slice %493 {offsets = [0, 256], sizes = [8, 128], strides = [1, 1]} : vector<8x512xf32> to vector<8x128xf32>
    %507 = math.tanh %506 : vector<8x128xf32>
    %508 = vector.extract_strided_slice %493 {offsets = [0, 384], sizes = [8, 128], strides = [1, 1]} : vector<8x512xf32> to vector<8x128xf32>
    %509 = arith.negf %508 : vector<8x128xf32>
    %510 = math.exp %509 : vector<8x128xf32>
    %cst_136 = arith.constant 1.000000e+00 : f32
    %511 = vector.broadcast %cst_136 : f32 to vector<8x128xf32>
    %512 = arith.addf %511, %510 : vector<8x128xf32>
    %513 = arith.divf %511, %512 : vector<8x128xf32>
    %514 = arith.mulf %505, %435 : vector<8x128xf32>
    %515 = arith.mulf %499, %507 : vector<8x128xf32>
    %516 = arith.addf %514, %515 : vector<8x128xf32>
    %517 = math.tanh %516 : vector<8x128xf32>
    %518 = arith.mulf %513, %517 : vector<8x128xf32>
    %519 = arith.select %486, %518, %434 : vector<8x128xi1>, vector<8x128xf32>
    %520 = arith.select %486, %516, %435 : vector<8x128xi1>, vector<8x128xf32>
    %521 = vector.shape_cast %480 : vector<8x128xf32> to vector<1x8x128xf32>
    %522 = arith.index_cast %c5_i32 : i32 to index
    %c0_137 = arith.constant 0 : index
    %c0_138 = arith.constant 0 : index
    %523 = vector.load %arg12[%522, %c0_137, %c0_138] : memref<8x8x256xf32, #tpu.memory_space<vmem>>, vector<1x8x128xf32>
    tpu.vector_store %arg12[%522, %c0_137, %c0_138], %521 {strides = array<i32>} : memref<8x8x256xf32, #tpu.memory_space<vmem>>, vector<1x8x128xf32>,
    %524 = vector.shape_cast %519 : vector<8x128xf32> to vector<1x8x128xf32>
    %525 = arith.index_cast %442 : i32 to index
    %c0_139 = arith.constant 0 : index
    %c128_140 = arith.constant 128 : index
    %526 = vector.load %arg12[%525, %c0_139, %c128_140] : memref<8x8x256xf32, #tpu.memory_space<vmem>>, vector<1x8x128xf32>
    tpu.vector_store %arg12[%525, %c0_139, %c128_140], %524 {strides = array<i32>} : memref<8x8x256xf32, #tpu.memory_space<vmem>>, vector<1x8x128xf32>,
    %c6_i32 = arith.constant 6 : i32
    %c7_i32_141 = arith.constant 7 : i32
    %527 = arith.subi %c7_i32_141, %c6_i32 : i32
    %528 = arith.index_cast %c6_i32 : i32 to index
    %c0_142 = arith.constant 0 : index
    %c0_143 = arith.constant 0 : index
    %529 = vector.load %arg10[%528, %c0_142, %c0_143] : memref<8x8x512xbf16, #tpu.memory_space<vmem>>, vector<1x8x512xbf16>
    %530 = vector.shape_cast %529 : vector<1x8x512xbf16> to vector<8x512xbf16>
    %531 = vector.broadcast %c6_i32 : i32 to vector<8x128xi32>
    %532 = arith.cmpi slt, %531, %0 : vector<8x128xi32>
    %533 = arith.extf %530 : vector<8x512xbf16> to vector<8x512xf32>
    %534 = arith.truncf %480 : vector<8x128xf32> to vector<8x128xbf16>
    %535 = arith.index_cast %c0_i32 : i32 to index
    %c0_144 = arith.constant 0 : index
    %c0_145 = arith.constant 0 : index
    %536 = vector.load %arg3[%535, %c0_144, %c0_145] : memref<2x128x512xbf16, #tpu.memory_space<vmem>>, vector<1x128x512xbf16>
    %537 = vector.shape_cast %536 : vector<1x128x512xbf16> to vector<128x512xbf16>
    %cst_146 = arith.constant dense<0.000000e+00> : vector<8x512xf32>
    %538 = tpu.matmul %534, %537, %cst_146 {dimension_numbers = #tpu.dot_dimension_numbers<[1], [0], [0], [1], [0, 0, 1, 1], [], []>} : vector<8x128xbf16>, vector<128x512xbf16>, vector<8x512xf32> -> vector<8x512xf32>
    %539 = arith.addf %533, %538 : vector<8x512xf32>
    %540 = vector.extract_strided_slice %539 {offsets = [0, 0], sizes = [8, 128], strides = [1, 1]} : vector<8x512xf32> to vector<8x128xf32>
    %541 = arith.negf %540 : vector<8x128xf32>
    %542 = math.exp %541 : vector<8x128xf32>
    %cst_147 = arith.constant 1.000000e+00 : f32
    %543 = vector.broadcast %cst_147 : f32 to vector<8x128xf32>
    %544 = arith.addf %543, %542 : vector<8x128xf32>
    %545 = arith.divf %543, %544 : vector<8x128xf32>
    %546 = vector.extract_strided_slice %539 {offsets = [0, 128], sizes = [8, 128], strides = [1, 1]} : vector<8x512xf32> to vector<8x128xf32>
    %547 = arith.negf %546 : vector<8x128xf32>
    %548 = math.exp %547 : vector<8x128xf32>
    %cst_148 = arith.constant 1.000000e+00 : f32
    %549 = vector.broadcast %cst_148 : f32 to vector<8x128xf32>
    %550 = arith.addf %549, %548 : vector<8x128xf32>
    %551 = arith.divf %549, %550 : vector<8x128xf32>
    %552 = vector.extract_strided_slice %539 {offsets = [0, 256], sizes = [8, 128], strides = [1, 1]} : vector<8x512xf32> to vector<8x128xf32>
    %553 = math.tanh %552 : vector<8x128xf32>
    %554 = vector.extract_strided_slice %539 {offsets = [0, 384], sizes = [8, 128], strides = [1, 1]} : vector<8x512xf32> to vector<8x128xf32>
    %555 = arith.negf %554 : vector<8x128xf32>
    %556 = math.exp %555 : vector<8x128xf32>
    %cst_149 = arith.constant 1.000000e+00 : f32
    %557 = vector.broadcast %cst_149 : f32 to vector<8x128xf32>
    %558 = arith.addf %557, %556 : vector<8x128xf32>
    %559 = arith.divf %557, %558 : vector<8x128xf32>
    %560 = arith.mulf %551, %481 : vector<8x128xf32>
    %561 = arith.mulf %545, %553 : vector<8x128xf32>
    %562 = arith.addf %560, %561 : vector<8x128xf32>
    %563 = math.tanh %562 : vector<8x128xf32>
    %564 = arith.mulf %559, %563 : vector<8x128xf32>
    %565 = arith.select %532, %564, %480 : vector<8x128xi1>, vector<8x128xf32>
    %566 = arith.select %532, %562, %481 : vector<8x128xi1>, vector<8x128xf32>
    %567 = arith.index_cast %527 : i32 to index
    %c0_150 = arith.constant 0 : index
    %c0_151 = arith.constant 0 : index
    %568 = vector.load %arg11[%567, %c0_150, %c0_151] : memref<8x8x512xbf16, #tpu.memory_space<vmem>>, vector<1x8x512xbf16>
    %569 = vector.shape_cast %568 : vector<1x8x512xbf16> to vector<8x512xbf16>
    %570 = vector.broadcast %527 : i32 to vector<8x128xi32>
    %571 = arith.cmpi slt, %570, %0 : vector<8x128xi32>
    %572 = arith.extf %569 : vector<8x512xbf16> to vector<8x512xf32>
    %573 = arith.truncf %519 : vector<8x128xf32> to vector<8x128xbf16>
    %574 = arith.index_cast %c1_i32 : i32 to index
    %c0_152 = arith.constant 0 : index
    %c0_153 = arith.constant 0 : index
    %575 = vector.load %arg3[%574, %c0_152, %c0_153] : memref<2x128x512xbf16, #tpu.memory_space<vmem>>, vector<1x128x512xbf16>
    %576 = vector.shape_cast %575 : vector<1x128x512xbf16> to vector<128x512xbf16>
    %cst_154 = arith.constant dense<0.000000e+00> : vector<8x512xf32>
    %577 = tpu.matmul %573, %576, %cst_154 {dimension_numbers = #tpu.dot_dimension_numbers<[1], [0], [0], [1], [0, 0, 1, 1], [], []>} : vector<8x128xbf16>, vector<128x512xbf16>, vector<8x512xf32> -> vector<8x512xf32>
    %578 = arith.addf %572, %577 : vector<8x512xf32>
    %579 = vector.extract_strided_slice %578 {offsets = [0, 0], sizes = [8, 128], strides = [1, 1]} : vector<8x512xf32> to vector<8x128xf32>
    %580 = arith.negf %579 : vector<8x128xf32>
    %581 = math.exp %580 : vector<8x128xf32>
    %cst_155 = arith.constant 1.000000e+00 : f32
    %582 = vector.broadcast %cst_155 : f32 to vector<8x128xf32>
    %583 = arith.addf %582, %581 : vector<8x128xf32>
    %584 = arith.divf %582, %583 : vector<8x128xf32>
    %585 = vector.extract_strided_slice %578 {offsets = [0, 128], sizes = [8, 128], strides = [1, 1]} : vector<8x512xf32> to vector<8x128xf32>
    %586 = arith.negf %585 : vector<8x128xf32>
    %587 = math.exp %586 : vector<8x128xf32>
    %cst_156 = arith.constant 1.000000e+00 : f32
    %588 = vector.broadcast %cst_156 : f32 to vector<8x128xf32>
    %589 = arith.addf %588, %587 : vector<8x128xf32>
    %590 = arith.divf %588, %589 : vector<8x128xf32>
    %591 = vector.extract_strided_slice %578 {offsets = [0, 256], sizes = [8, 128], strides = [1, 1]} : vector<8x512xf32> to vector<8x128xf32>
    %592 = math.tanh %591 : vector<8x128xf32>
    %593 = vector.extract_strided_slice %578 {offsets = [0, 384], sizes = [8, 128], strides = [1, 1]} : vector<8x512xf32> to vector<8x128xf32>
    %594 = arith.negf %593 : vector<8x128xf32>
    %595 = math.exp %594 : vector<8x128xf32>
    %cst_157 = arith.constant 1.000000e+00 : f32
    %596 = vector.broadcast %cst_157 : f32 to vector<8x128xf32>
    %597 = arith.addf %596, %595 : vector<8x128xf32>
    %598 = arith.divf %596, %597 : vector<8x128xf32>
    %599 = arith.mulf %590, %520 : vector<8x128xf32>
    %600 = arith.mulf %584, %592 : vector<8x128xf32>
    %601 = arith.addf %599, %600 : vector<8x128xf32>
    %602 = math.tanh %601 : vector<8x128xf32>
    %603 = arith.mulf %598, %602 : vector<8x128xf32>
    %604 = arith.select %571, %603, %519 : vector<8x128xi1>, vector<8x128xf32>
    %605 = arith.select %571, %601, %520 : vector<8x128xi1>, vector<8x128xf32>
    %606 = vector.shape_cast %565 : vector<8x128xf32> to vector<1x8x128xf32>
    %607 = arith.index_cast %c6_i32 : i32 to index
    %c0_158 = arith.constant 0 : index
    %c0_159 = arith.constant 0 : index
    %608 = vector.load %arg12[%607, %c0_158, %c0_159] : memref<8x8x256xf32, #tpu.memory_space<vmem>>, vector<1x8x128xf32>
    tpu.vector_store %arg12[%607, %c0_158, %c0_159], %606 {strides = array<i32>} : memref<8x8x256xf32, #tpu.memory_space<vmem>>, vector<1x8x128xf32>,
    %609 = vector.shape_cast %604 : vector<8x128xf32> to vector<1x8x128xf32>
    %610 = arith.index_cast %527 : i32 to index
    %c0_160 = arith.constant 0 : index
    %c128_161 = arith.constant 128 : index
    %611 = vector.load %arg12[%610, %c0_160, %c128_161] : memref<8x8x256xf32, #tpu.memory_space<vmem>>, vector<1x8x128xf32>
    tpu.vector_store %arg12[%610, %c0_160, %c128_161], %609 {strides = array<i32>} : memref<8x8x256xf32, #tpu.memory_space<vmem>>, vector<1x8x128xf32>,
    %c7_i32_162 = arith.constant 7 : i32
    %c7_i32_163 = arith.constant 7 : i32
    %612 = arith.subi %c7_i32_163, %c7_i32_162 : i32
    %613 = arith.index_cast %c7_i32_162 : i32 to index
    %c0_164 = arith.constant 0 : index
    %c0_165 = arith.constant 0 : index
    %614 = vector.load %arg10[%613, %c0_164, %c0_165] : memref<8x8x512xbf16, #tpu.memory_space<vmem>>, vector<1x8x512xbf16>
    %615 = vector.shape_cast %614 : vector<1x8x512xbf16> to vector<8x512xbf16>
    %616 = vector.broadcast %c7_i32_162 : i32 to vector<8x128xi32>
    %617 = arith.cmpi slt, %616, %0 : vector<8x128xi32>
    %618 = arith.extf %615 : vector<8x512xbf16> to vector<8x512xf32>
    %619 = arith.truncf %565 : vector<8x128xf32> to vector<8x128xbf16>
    %620 = arith.index_cast %c0_i32 : i32 to index
    %c0_166 = arith.constant 0 : index
    %c0_167 = arith.constant 0 : index
    %621 = vector.load %arg3[%620, %c0_166, %c0_167] : memref<2x128x512xbf16, #tpu.memory_space<vmem>>, vector<1x128x512xbf16>
    %622 = vector.shape_cast %621 : vector<1x128x512xbf16> to vector<128x512xbf16>
    %cst_168 = arith.constant dense<0.000000e+00> : vector<8x512xf32>
    %623 = tpu.matmul %619, %622, %cst_168 {dimension_numbers = #tpu.dot_dimension_numbers<[1], [0], [0], [1], [0, 0, 1, 1], [], []>} : vector<8x128xbf16>, vector<128x512xbf16>, vector<8x512xf32> -> vector<8x512xf32>
    %624 = arith.addf %618, %623 : vector<8x512xf32>
    %625 = vector.extract_strided_slice %624 {offsets = [0, 0], sizes = [8, 128], strides = [1, 1]} : vector<8x512xf32> to vector<8x128xf32>
    %626 = arith.negf %625 : vector<8x128xf32>
    %627 = math.exp %626 : vector<8x128xf32>
    %cst_169 = arith.constant 1.000000e+00 : f32
    %628 = vector.broadcast %cst_169 : f32 to vector<8x128xf32>
    %629 = arith.addf %628, %627 : vector<8x128xf32>
    %630 = arith.divf %628, %629 : vector<8x128xf32>
    %631 = vector.extract_strided_slice %624 {offsets = [0, 128], sizes = [8, 128], strides = [1, 1]} : vector<8x512xf32> to vector<8x128xf32>
    %632 = arith.negf %631 : vector<8x128xf32>
    %633 = math.exp %632 : vector<8x128xf32>
    %cst_170 = arith.constant 1.000000e+00 : f32
    %634 = vector.broadcast %cst_170 : f32 to vector<8x128xf32>
    %635 = arith.addf %634, %633 : vector<8x128xf32>
    %636 = arith.divf %634, %635 : vector<8x128xf32>
    %637 = vector.extract_strided_slice %624 {offsets = [0, 256], sizes = [8, 128], strides = [1, 1]} : vector<8x512xf32> to vector<8x128xf32>
    %638 = math.tanh %637 : vector<8x128xf32>
    %639 = vector.extract_strided_slice %624 {offsets = [0, 384], sizes = [8, 128], strides = [1, 1]} : vector<8x512xf32> to vector<8x128xf32>
    %640 = arith.negf %639 : vector<8x128xf32>
    %641 = math.exp %640 : vector<8x128xf32>
    %cst_171 = arith.constant 1.000000e+00 : f32
    %642 = vector.broadcast %cst_171 : f32 to vector<8x128xf32>
    %643 = arith.addf %642, %641 : vector<8x128xf32>
    %644 = arith.divf %642, %643 : vector<8x128xf32>
    %645 = arith.mulf %636, %566 : vector<8x128xf32>
    %646 = arith.mulf %630, %638 : vector<8x128xf32>
    %647 = arith.addf %645, %646 : vector<8x128xf32>
    %648 = math.tanh %647 : vector<8x128xf32>
    %649 = arith.mulf %644, %648 : vector<8x128xf32>
    %650 = arith.select %617, %649, %565 : vector<8x128xi1>, vector<8x128xf32>
    %651 = arith.select %617, %647, %566 : vector<8x128xi1>, vector<8x128xf32>
    %652 = arith.index_cast %612 : i32 to index
    %c0_172 = arith.constant 0 : index
    %c0_173 = arith.constant 0 : index
    %653 = vector.load %arg11[%652, %c0_172, %c0_173] : memref<8x8x512xbf16, #tpu.memory_space<vmem>>, vector<1x8x512xbf16>
    %654 = vector.shape_cast %653 : vector<1x8x512xbf16> to vector<8x512xbf16>
    %655 = vector.broadcast %612 : i32 to vector<8x128xi32>
    %656 = arith.cmpi slt, %655, %0 : vector<8x128xi32>
    %657 = arith.extf %654 : vector<8x512xbf16> to vector<8x512xf32>
    %658 = arith.truncf %604 : vector<8x128xf32> to vector<8x128xbf16>
    %659 = arith.index_cast %c1_i32 : i32 to index
    %c0_174 = arith.constant 0 : index
    %c0_175 = arith.constant 0 : index
    %660 = vector.load %arg3[%659, %c0_174, %c0_175] : memref<2x128x512xbf16, #tpu.memory_space<vmem>>, vector<1x128x512xbf16>
    %661 = vector.shape_cast %660 : vector<1x128x512xbf16> to vector<128x512xbf16>
    %cst_176 = arith.constant dense<0.000000e+00> : vector<8x512xf32>
    %662 = tpu.matmul %658, %661, %cst_176 {dimension_numbers = #tpu.dot_dimension_numbers<[1], [0], [0], [1], [0, 0, 1, 1], [], []>} : vector<8x128xbf16>, vector<128x512xbf16>, vector<8x512xf32> -> vector<8x512xf32>
    %663 = arith.addf %657, %662 : vector<8x512xf32>
    %664 = vector.extract_strided_slice %663 {offsets = [0, 0], sizes = [8, 128], strides = [1, 1]} : vector<8x512xf32> to vector<8x128xf32>
    %665 = arith.negf %664 : vector<8x128xf32>
    %666 = math.exp %665 : vector<8x128xf32>
    %cst_177 = arith.constant 1.000000e+00 : f32
    %667 = vector.broadcast %cst_177 : f32 to vector<8x128xf32>
    %668 = arith.addf %667, %666 : vector<8x128xf32>
    %669 = arith.divf %667, %668 : vector<8x128xf32>
    %670 = vector.extract_strided_slice %663 {offsets = [0, 128], sizes = [8, 128], strides = [1, 1]} : vector<8x512xf32> to vector<8x128xf32>
    %671 = arith.negf %670 : vector<8x128xf32>
    %672 = math.exp %671 : vector<8x128xf32>
    %cst_178 = arith.constant 1.000000e+00 : f32
    %673 = vector.broadcast %cst_178 : f32 to vector<8x128xf32>
    %674 = arith.addf %673, %672 : vector<8x128xf32>
    %675 = arith.divf %673, %674 : vector<8x128xf32>
    %676 = vector.extract_strided_slice %663 {offsets = [0, 256], sizes = [8, 128], strides = [1, 1]} : vector<8x512xf32> to vector<8x128xf32>
    %677 = math.tanh %676 : vector<8x128xf32>
    %678 = vector.extract_strided_slice %663 {offsets = [0, 384], sizes = [8, 128], strides = [1, 1]} : vector<8x512xf32> to vector<8x128xf32>
    %679 = arith.negf %678 : vector<8x128xf32>
    %680 = math.exp %679 : vector<8x128xf32>
    %cst_179 = arith.constant 1.000000e+00 : f32
    %681 = vector.broadcast %cst_179 : f32 to vector<8x128xf32>
    %682 = arith.addf %681, %680 : vector<8x128xf32>
    %683 = arith.divf %681, %682 : vector<8x128xf32>
    %684 = arith.mulf %675, %605 : vector<8x128xf32>
    %685 = arith.mulf %669, %677 : vector<8x128xf32>
    %686 = arith.addf %684, %685 : vector<8x128xf32>
    %687 = math.tanh %686 : vector<8x128xf32>
    %688 = arith.mulf %683, %687 : vector<8x128xf32>
    %689 = arith.select %656, %688, %604 : vector<8x128xi1>, vector<8x128xf32>
    %690 = arith.select %656, %686, %605 : vector<8x128xi1>, vector<8x128xf32>
    %691 = vector.shape_cast %650 : vector<8x128xf32> to vector<1x8x128xf32>
    %692 = arith.index_cast %c7_i32_162 : i32 to index
    %c0_180 = arith.constant 0 : index
    %c0_181 = arith.constant 0 : index
    %693 = vector.load %arg12[%692, %c0_180, %c0_181] : memref<8x8x256xf32, #tpu.memory_space<vmem>>, vector<1x8x128xf32>
    tpu.vector_store %arg12[%692, %c0_180, %c0_181], %691 {strides = array<i32>} : memref<8x8x256xf32, #tpu.memory_space<vmem>>, vector<1x8x128xf32>,
    %694 = vector.shape_cast %689 : vector<8x128xf32> to vector<1x8x128xf32>
    %695 = arith.index_cast %612 : i32 to index
    %c0_182 = arith.constant 0 : index
    %c128_183 = arith.constant 128 : index
    %696 = vector.load %arg12[%695, %c0_182, %c128_183] : memref<8x8x256xf32, #tpu.memory_space<vmem>>, vector<1x8x128xf32>
    tpu.vector_store %arg12[%695, %c0_182, %c128_183], %694 {strides = array<i32>} : memref<8x8x256xf32, #tpu.memory_space<vmem>>, vector<1x8x128xf32>,
    %c8_i32 = arith.constant 8 : i32
    %c0_184 = arith.constant 0 : index
    %c0_185 = arith.constant 0 : index
    %c0_186 = arith.constant 0 : index
    %697 = vector.load %arg12[%c0_184, %c0_185, %c0_186] : memref<8x8x256xf32, #tpu.memory_space<vmem>>, vector<8x8x256xf32>
    %698 = vector.shape_cast %697 : vector<8x8x256xf32> to vector<64x256xf32>
    %699 = arith.truncf %698 : vector<64x256xf32> to vector<64x256xbf16>
    %c0_187 = arith.constant 0 : index
    %c0_188 = arith.constant 0 : index
    %700 = vector.load %arg5[%c0_187, %c0_188] : memref<256x1024xbf16, #tpu.memory_space<vmem>>, vector<256x1024xbf16>
    %cst_189 = arith.constant dense<0.000000e+00> : vector<64x1024xf32>
    %701 = tpu.matmul %699, %700, %cst_189 {dimension_numbers = #tpu.dot_dimension_numbers<[1], [0], [0], [1], [0, 0, 1, 1], [], []>} : vector<64x256xbf16>, vector<256x1024xbf16>, vector<64x1024xf32> -> vector<64x1024xf32>
    %c0_190 = arith.constant 0 : index
    %c0_191 = arith.constant 0 : index
    %702 = vector.load %arg7[%c0_190, %c0_191] : memref<1x1024xf32, #tpu.memory_space<vmem>>, vector<1x1024xf32>
    %703 = vector.broadcast %702 : vector<1x1024xf32> to vector<64x1024xf32>
    %704 = arith.addf %701, %703 : vector<64x1024xf32>
    %705 = vector.shape_cast %704 : vector<64x1024xf32> to vector<8x8x1024xf32>
    %706 = vector.extract_strided_slice %705 {offsets = [0, 0, 0], sizes = [8, 8, 512], strides = [1, 1, 1]} : vector<8x8x1024xf32> to vector<8x8x512xf32>
    %707 = arith.truncf %706 : vector<8x8x512xf32> to vector<8x8x512xbf16>
    %c0_192 = arith.constant 0 : index
    %c0_193 = arith.constant 0 : index
    %c0_194 = arith.constant 0 : index
    %708 = vector.load %arg10[%c0_192, %c0_193, %c0_194] : memref<8x8x512xbf16, #tpu.memory_space<vmem>>, vector<8x8x512xbf16>
    tpu.vector_store %arg10[%c0_192, %c0_193, %c0_194], %707 {strides = array<i32>} : memref<8x8x512xbf16, #tpu.memory_space<vmem>>, vector<8x8x512xbf16>,
    %709 = vector.extract_strided_slice %705 {offsets = [0, 0, 512], sizes = [8, 8, 512], strides = [1, 1, 1]} : vector<8x8x1024xf32> to vector<8x8x512xf32>
    %710 = arith.truncf %709 : vector<8x8x512xf32> to vector<8x8x512xbf16>
    %c0_195 = arith.constant 0 : index
    %c0_196 = arith.constant 0 : index
    %c0_197 = arith.constant 0 : index
    %711 = vector.load %arg11[%c0_195, %c0_196, %c0_197] : memref<8x8x512xbf16, #tpu.memory_space<vmem>>, vector<8x8x512xbf16>
    tpu.vector_store %arg11[%c0_195, %c0_196, %c0_197], %710 {strides = array<i32>} : memref<8x8x512xbf16, #tpu.memory_space<vmem>>, vector<8x8x512xbf16>,
    %cst_198 = arith.constant 0.000000e+00 : f32
    %712 = vector.broadcast %cst_198 : f32 to vector<8x128xf32>
    %c0_i32_199 = arith.constant 0 : i32
    %c1_i32_200 = arith.constant 1 : i32
    %c0_i32_201 = arith.constant 0 : i32
    %c7_i32_202 = arith.constant 7 : i32
    %713 = arith.subi %c7_i32_202, %c0_i32_201 : i32
    %714 = arith.index_cast %c0_i32_201 : i32 to index
    %c0_203 = arith.constant 0 : index
    %c0_204 = arith.constant 0 : index
    %715 = vector.load %arg10[%714, %c0_203, %c0_204] : memref<8x8x512xbf16, #tpu.memory_space<vmem>>, vector<1x8x512xbf16>
    %716 = vector.shape_cast %715 : vector<1x8x512xbf16> to vector<8x512xbf16>
    %717 = vector.broadcast %c0_i32_201 : i32 to vector<8x128xi32>
    %718 = arith.cmpi slt, %717, %0 : vector<8x128xi32>
    %719 = arith.extf %716 : vector<8x512xbf16> to vector<8x512xf32>
    %720 = arith.truncf %712 : vector<8x128xf32> to vector<8x128xbf16>
    %721 = arith.index_cast %c0_i32_199 : i32 to index
    %c0_205 = arith.constant 0 : index
    %c0_206 = arith.constant 0 : index
    %722 = vector.load %arg6[%721, %c0_205, %c0_206] : memref<2x128x512xbf16, #tpu.memory_space<vmem>>, vector<1x128x512xbf16>
    %723 = vector.shape_cast %722 : vector<1x128x512xbf16> to vector<128x512xbf16>
    %cst_207 = arith.constant dense<0.000000e+00> : vector<8x512xf32>
    %724 = tpu.matmul %720, %723, %cst_207 {dimension_numbers = #tpu.dot_dimension_numbers<[1], [0], [0], [1], [0, 0, 1, 1], [], []>} : vector<8x128xbf16>, vector<128x512xbf16>, vector<8x512xf32> -> vector<8x512xf32>
    %725 = arith.addf %719, %724 : vector<8x512xf32>
    %726 = vector.extract_strided_slice %725 {offsets = [0, 0], sizes = [8, 128], strides = [1, 1]} : vector<8x512xf32> to vector<8x128xf32>
    %727 = arith.negf %726 : vector<8x128xf32>
    %728 = math.exp %727 : vector<8x128xf32>
    %cst_208 = arith.constant 1.000000e+00 : f32
    %729 = vector.broadcast %cst_208 : f32 to vector<8x128xf32>
    %730 = arith.addf %729, %728 : vector<8x128xf32>
    %731 = arith.divf %729, %730 : vector<8x128xf32>
    %732 = vector.extract_strided_slice %725 {offsets = [0, 128], sizes = [8, 128], strides = [1, 1]} : vector<8x512xf32> to vector<8x128xf32>
    %733 = arith.negf %732 : vector<8x128xf32>
    %734 = math.exp %733 : vector<8x128xf32>
    %cst_209 = arith.constant 1.000000e+00 : f32
    %735 = vector.broadcast %cst_209 : f32 to vector<8x128xf32>
    %736 = arith.addf %735, %734 : vector<8x128xf32>
    %737 = arith.divf %735, %736 : vector<8x128xf32>
    %738 = vector.extract_strided_slice %725 {offsets = [0, 256], sizes = [8, 128], strides = [1, 1]} : vector<8x512xf32> to vector<8x128xf32>
    %739 = math.tanh %738 : vector<8x128xf32>
    %740 = vector.extract_strided_slice %725 {offsets = [0, 384], sizes = [8, 128], strides = [1, 1]} : vector<8x512xf32> to vector<8x128xf32>
    %741 = arith.negf %740 : vector<8x128xf32>
    %742 = math.exp %741 : vector<8x128xf32>
    %cst_210 = arith.constant 1.000000e+00 : f32
    %743 = vector.broadcast %cst_210 : f32 to vector<8x128xf32>
    %744 = arith.addf %743, %742 : vector<8x128xf32>
    %745 = arith.divf %743, %744 : vector<8x128xf32>
    %746 = arith.mulf %737, %712 : vector<8x128xf32>
    %747 = arith.mulf %731, %739 : vector<8x128xf32>
    %748 = arith.addf %746, %747 : vector<8x128xf32>
    %749 = math.tanh %748 : vector<8x128xf32>
    %750 = arith.mulf %745, %749 : vector<8x128xf32>
    %751 = arith.select %718, %750, %712 : vector<8x128xi1>, vector<8x128xf32>
    %752 = arith.select %718, %748, %712 : vector<8x128xi1>, vector<8x128xf32>
    %753 = arith.index_cast %713 : i32 to index
    %c0_211 = arith.constant 0 : index
    %c0_212 = arith.constant 0 : index
    %754 = vector.load %arg11[%753, %c0_211, %c0_212] : memref<8x8x512xbf16, #tpu.memory_space<vmem>>, vector<1x8x512xbf16>
    %755 = vector.shape_cast %754 : vector<1x8x512xbf16> to vector<8x512xbf16>
    %756 = vector.broadcast %713 : i32 to vector<8x128xi32>
    %757 = arith.cmpi slt, %756, %0 : vector<8x128xi32>
    %758 = arith.extf %755 : vector<8x512xbf16> to vector<8x512xf32>
    %759 = arith.truncf %712 : vector<8x128xf32> to vector<8x128xbf16>
    %760 = arith.index_cast %c1_i32_200 : i32 to index
    %c0_213 = arith.constant 0 : index
    %c0_214 = arith.constant 0 : index
    %761 = vector.load %arg6[%760, %c0_213, %c0_214] : memref<2x128x512xbf16, #tpu.memory_space<vmem>>, vector<1x128x512xbf16>
    %762 = vector.shape_cast %761 : vector<1x128x512xbf16> to vector<128x512xbf16>
    %cst_215 = arith.constant dense<0.000000e+00> : vector<8x512xf32>
    %763 = tpu.matmul %759, %762, %cst_215 {dimension_numbers = #tpu.dot_dimension_numbers<[1], [0], [0], [1], [0, 0, 1, 1], [], []>} : vector<8x128xbf16>, vector<128x512xbf16>, vector<8x512xf32> -> vector<8x512xf32>
    %764 = arith.addf %758, %763 : vector<8x512xf32>
    %765 = vector.extract_strided_slice %764 {offsets = [0, 0], sizes = [8, 128], strides = [1, 1]} : vector<8x512xf32> to vector<8x128xf32>
    %766 = arith.negf %765 : vector<8x128xf32>
    %767 = math.exp %766 : vector<8x128xf32>
    %cst_216 = arith.constant 1.000000e+00 : f32
    %768 = vector.broadcast %cst_216 : f32 to vector<8x128xf32>
    %769 = arith.addf %768, %767 : vector<8x128xf32>
    %770 = arith.divf %768, %769 : vector<8x128xf32>
    %771 = vector.extract_strided_slice %764 {offsets = [0, 128], sizes = [8, 128], strides = [1, 1]} : vector<8x512xf32> to vector<8x128xf32>
    %772 = arith.negf %771 : vector<8x128xf32>
    %773 = math.exp %772 : vector<8x128xf32>
    %cst_217 = arith.constant 1.000000e+00 : f32
    %774 = vector.broadcast %cst_217 : f32 to vector<8x128xf32>
    %775 = arith.addf %774, %773 : vector<8x128xf32>
    %776 = arith.divf %774, %775 : vector<8x128xf32>
    %777 = vector.extract_strided_slice %764 {offsets = [0, 256], sizes = [8, 128], strides = [1, 1]} : vector<8x512xf32> to vector<8x128xf32>
    %778 = math.tanh %777 : vector<8x128xf32>
    %779 = vector.extract_strided_slice %764 {offsets = [0, 384], sizes = [8, 128], strides = [1, 1]} : vector<8x512xf32> to vector<8x128xf32>
    %780 = arith.negf %779 : vector<8x128xf32>
    %781 = math.exp %780 : vector<8x128xf32>
    %cst_218 = arith.constant 1.000000e+00 : f32
    %782 = vector.broadcast %cst_218 : f32 to vector<8x128xf32>
    %783 = arith.addf %782, %781 : vector<8x128xf32>
    %784 = arith.divf %782, %783 : vector<8x128xf32>
    %785 = arith.mulf %776, %712 : vector<8x128xf32>
    %786 = arith.mulf %770, %778 : vector<8x128xf32>
    %787 = arith.addf %785, %786 : vector<8x128xf32>
    %788 = math.tanh %787 : vector<8x128xf32>
    %789 = arith.mulf %784, %788 : vector<8x128xf32>
    %790 = arith.select %757, %789, %712 : vector<8x128xi1>, vector<8x128xf32>
    %791 = arith.select %757, %787, %712 : vector<8x128xi1>, vector<8x128xf32>
    %c1_i32_219 = arith.constant 1 : i32
    %c7_i32_220 = arith.constant 7 : i32
    %792 = arith.subi %c7_i32_220, %c1_i32_219 : i32
    %793 = arith.index_cast %c1_i32_219 : i32 to index
    %c0_221 = arith.constant 0 : index
    %c0_222 = arith.constant 0 : index
    %794 = vector.load %arg10[%793, %c0_221, %c0_222] : memref<8x8x512xbf16, #tpu.memory_space<vmem>>, vector<1x8x512xbf16>
    %795 = vector.shape_cast %794 : vector<1x8x512xbf16> to vector<8x512xbf16>
    %796 = vector.broadcast %c1_i32_219 : i32 to vector<8x128xi32>
    %797 = arith.cmpi slt, %796, %0 : vector<8x128xi32>
    %798 = arith.extf %795 : vector<8x512xbf16> to vector<8x512xf32>
    %799 = arith.truncf %751 : vector<8x128xf32> to vector<8x128xbf16>
    %800 = arith.index_cast %c0_i32_199 : i32 to index
    %c0_223 = arith.constant 0 : index
    %c0_224 = arith.constant 0 : index
    %801 = vector.load %arg6[%800, %c0_223, %c0_224] : memref<2x128x512xbf16, #tpu.memory_space<vmem>>, vector<1x128x512xbf16>
    %802 = vector.shape_cast %801 : vector<1x128x512xbf16> to vector<128x512xbf16>
    %cst_225 = arith.constant dense<0.000000e+00> : vector<8x512xf32>
    %803 = tpu.matmul %799, %802, %cst_225 {dimension_numbers = #tpu.dot_dimension_numbers<[1], [0], [0], [1], [0, 0, 1, 1], [], []>} : vector<8x128xbf16>, vector<128x512xbf16>, vector<8x512xf32> -> vector<8x512xf32>
    %804 = arith.addf %798, %803 : vector<8x512xf32>
    %805 = vector.extract_strided_slice %804 {offsets = [0, 0], sizes = [8, 128], strides = [1, 1]} : vector<8x512xf32> to vector<8x128xf32>
    %806 = arith.negf %805 : vector<8x128xf32>
    %807 = math.exp %806 : vector<8x128xf32>
    %cst_226 = arith.constant 1.000000e+00 : f32
    %808 = vector.broadcast %cst_226 : f32 to vector<8x128xf32>
    %809 = arith.addf %808, %807 : vector<8x128xf32>
    %810 = arith.divf %808, %809 : vector<8x128xf32>
    %811 = vector.extract_strided_slice %804 {offsets = [0, 128], sizes = [8, 128], strides = [1, 1]} : vector<8x512xf32> to vector<8x128xf32>
    %812 = arith.negf %811 : vector<8x128xf32>
    %813 = math.exp %812 : vector<8x128xf32>
    %cst_227 = arith.constant 1.000000e+00 : f32
    %814 = vector.broadcast %cst_227 : f32 to vector<8x128xf32>
    %815 = arith.addf %814, %813 : vector<8x128xf32>
    %816 = arith.divf %814, %815 : vector<8x128xf32>
    %817 = vector.extract_strided_slice %804 {offsets = [0, 256], sizes = [8, 128], strides = [1, 1]} : vector<8x512xf32> to vector<8x128xf32>
    %818 = math.tanh %817 : vector<8x128xf32>
    %819 = vector.extract_strided_slice %804 {offsets = [0, 384], sizes = [8, 128], strides = [1, 1]} : vector<8x512xf32> to vector<8x128xf32>
    %820 = arith.negf %819 : vector<8x128xf32>
    %821 = math.exp %820 : vector<8x128xf32>
    %cst_228 = arith.constant 1.000000e+00 : f32
    %822 = vector.broadcast %cst_228 : f32 to vector<8x128xf32>
    %823 = arith.addf %822, %821 : vector<8x128xf32>
    %824 = arith.divf %822, %823 : vector<8x128xf32>
    %825 = arith.mulf %816, %752 : vector<8x128xf32>
    %826 = arith.mulf %810, %818 : vector<8x128xf32>
    %827 = arith.addf %825, %826 : vector<8x128xf32>
    %828 = math.tanh %827 : vector<8x128xf32>
    %829 = arith.mulf %824, %828 : vector<8x128xf32>
    %830 = arith.select %797, %829, %751 : vector<8x128xi1>, vector<8x128xf32>
    %831 = arith.select %797, %827, %752 : vector<8x128xi1>, vector<8x128xf32>
    %832 = arith.index_cast %792 : i32 to index
    %c0_229 = arith.constant 0 : index
    %c0_230 = arith.constant 0 : index
    %833 = vector.load %arg11[%832, %c0_229, %c0_230] : memref<8x8x512xbf16, #tpu.memory_space<vmem>>, vector<1x8x512xbf16>
    %834 = vector.shape_cast %833 : vector<1x8x512xbf16> to vector<8x512xbf16>
    %835 = vector.broadcast %792 : i32 to vector<8x128xi32>
    %836 = arith.cmpi slt, %835, %0 : vector<8x128xi32>
    %837 = arith.extf %834 : vector<8x512xbf16> to vector<8x512xf32>
    %838 = arith.truncf %790 : vector<8x128xf32> to vector<8x128xbf16>
    %839 = arith.index_cast %c1_i32_200 : i32 to index
    %c0_231 = arith.constant 0 : index
    %c0_232 = arith.constant 0 : index
    %840 = vector.load %arg6[%839, %c0_231, %c0_232] : memref<2x128x512xbf16, #tpu.memory_space<vmem>>, vector<1x128x512xbf16>
    %841 = vector.shape_cast %840 : vector<1x128x512xbf16> to vector<128x512xbf16>
    %cst_233 = arith.constant dense<0.000000e+00> : vector<8x512xf32>
    %842 = tpu.matmul %838, %841, %cst_233 {dimension_numbers = #tpu.dot_dimension_numbers<[1], [0], [0], [1], [0, 0, 1, 1], [], []>} : vector<8x128xbf16>, vector<128x512xbf16>, vector<8x512xf32> -> vector<8x512xf32>
    %843 = arith.addf %837, %842 : vector<8x512xf32>
    %844 = vector.extract_strided_slice %843 {offsets = [0, 0], sizes = [8, 128], strides = [1, 1]} : vector<8x512xf32> to vector<8x128xf32>
    %845 = arith.negf %844 : vector<8x128xf32>
    %846 = math.exp %845 : vector<8x128xf32>
    %cst_234 = arith.constant 1.000000e+00 : f32
    %847 = vector.broadcast %cst_234 : f32 to vector<8x128xf32>
    %848 = arith.addf %847, %846 : vector<8x128xf32>
    %849 = arith.divf %847, %848 : vector<8x128xf32>
    %850 = vector.extract_strided_slice %843 {offsets = [0, 128], sizes = [8, 128], strides = [1, 1]} : vector<8x512xf32> to vector<8x128xf32>
    %851 = arith.negf %850 : vector<8x128xf32>
    %852 = math.exp %851 : vector<8x128xf32>
    %cst_235 = arith.constant 1.000000e+00 : f32
    %853 = vector.broadcast %cst_235 : f32 to vector<8x128xf32>
    %854 = arith.addf %853, %852 : vector<8x128xf32>
    %855 = arith.divf %853, %854 : vector<8x128xf32>
    %856 = vector.extract_strided_slice %843 {offsets = [0, 256], sizes = [8, 128], strides = [1, 1]} : vector<8x512xf32> to vector<8x128xf32>
    %857 = math.tanh %856 : vector<8x128xf32>
    %858 = vector.extract_strided_slice %843 {offsets = [0, 384], sizes = [8, 128], strides = [1, 1]} : vector<8x512xf32> to vector<8x128xf32>
    %859 = arith.negf %858 : vector<8x128xf32>
    %860 = math.exp %859 : vector<8x128xf32>
    %cst_236 = arith.constant 1.000000e+00 : f32
    %861 = vector.broadcast %cst_236 : f32 to vector<8x128xf32>
    %862 = arith.addf %861, %860 : vector<8x128xf32>
    %863 = arith.divf %861, %862 : vector<8x128xf32>
    %864 = arith.mulf %855, %791 : vector<8x128xf32>
    %865 = arith.mulf %849, %857 : vector<8x128xf32>
    %866 = arith.addf %864, %865 : vector<8x128xf32>
    %867 = math.tanh %866 : vector<8x128xf32>
    %868 = arith.mulf %863, %867 : vector<8x128xf32>
    %869 = arith.select %836, %868, %790 : vector<8x128xi1>, vector<8x128xf32>
    %870 = arith.select %836, %866, %791 : vector<8x128xi1>, vector<8x128xf32>
    %c2_i32_237 = arith.constant 2 : i32
    %c7_i32_238 = arith.constant 7 : i32
    %871 = arith.subi %c7_i32_238, %c2_i32_237 : i32
    %872 = arith.index_cast %c2_i32_237 : i32 to index
    %c0_239 = arith.constant 0 : index
    %c0_240 = arith.constant 0 : index
    %873 = vector.load %arg10[%872, %c0_239, %c0_240] : memref<8x8x512xbf16, #tpu.memory_space<vmem>>, vector<1x8x512xbf16>
    %874 = vector.shape_cast %873 : vector<1x8x512xbf16> to vector<8x512xbf16>
    %875 = vector.broadcast %c2_i32_237 : i32 to vector<8x128xi32>
    %876 = arith.cmpi slt, %875, %0 : vector<8x128xi32>
    %877 = arith.extf %874 : vector<8x512xbf16> to vector<8x512xf32>
    %878 = arith.truncf %830 : vector<8x128xf32> to vector<8x128xbf16>
    %879 = arith.index_cast %c0_i32_199 : i32 to index
    %c0_241 = arith.constant 0 : index
    %c0_242 = arith.constant 0 : index
    %880 = vector.load %arg6[%879, %c0_241, %c0_242] : memref<2x128x512xbf16, #tpu.memory_space<vmem>>, vector<1x128x512xbf16>
    %881 = vector.shape_cast %880 : vector<1x128x512xbf16> to vector<128x512xbf16>
    %cst_243 = arith.constant dense<0.000000e+00> : vector<8x512xf32>
    %882 = tpu.matmul %878, %881, %cst_243 {dimension_numbers = #tpu.dot_dimension_numbers<[1], [0], [0], [1], [0, 0, 1, 1], [], []>} : vector<8x128xbf16>, vector<128x512xbf16>, vector<8x512xf32> -> vector<8x512xf32>
    %883 = arith.addf %877, %882 : vector<8x512xf32>
    %884 = vector.extract_strided_slice %883 {offsets = [0, 0], sizes = [8, 128], strides = [1, 1]} : vector<8x512xf32> to vector<8x128xf32>
    %885 = arith.negf %884 : vector<8x128xf32>
    %886 = math.exp %885 : vector<8x128xf32>
    %cst_244 = arith.constant 1.000000e+00 : f32
    %887 = vector.broadcast %cst_244 : f32 to vector<8x128xf32>
    %888 = arith.addf %887, %886 : vector<8x128xf32>
    %889 = arith.divf %887, %888 : vector<8x128xf32>
    %890 = vector.extract_strided_slice %883 {offsets = [0, 128], sizes = [8, 128], strides = [1, 1]} : vector<8x512xf32> to vector<8x128xf32>
    %891 = arith.negf %890 : vector<8x128xf32>
    %892 = math.exp %891 : vector<8x128xf32>
    %cst_245 = arith.constant 1.000000e+00 : f32
    %893 = vector.broadcast %cst_245 : f32 to vector<8x128xf32>
    %894 = arith.addf %893, %892 : vector<8x128xf32>
    %895 = arith.divf %893, %894 : vector<8x128xf32>
    %896 = vector.extract_strided_slice %883 {offsets = [0, 256], sizes = [8, 128], strides = [1, 1]} : vector<8x512xf32> to vector<8x128xf32>
    %897 = math.tanh %896 : vector<8x128xf32>
    %898 = vector.extract_strided_slice %883 {offsets = [0, 384], sizes = [8, 128], strides = [1, 1]} : vector<8x512xf32> to vector<8x128xf32>
    %899 = arith.negf %898 : vector<8x128xf32>
    %900 = math.exp %899 : vector<8x128xf32>
    %cst_246 = arith.constant 1.000000e+00 : f32
    %901 = vector.broadcast %cst_246 : f32 to vector<8x128xf32>
    %902 = arith.addf %901, %900 : vector<8x128xf32>
    %903 = arith.divf %901, %902 : vector<8x128xf32>
    %904 = arith.mulf %895, %831 : vector<8x128xf32>
    %905 = arith.mulf %889, %897 : vector<8x128xf32>
    %906 = arith.addf %904, %905 : vector<8x128xf32>
    %907 = math.tanh %906 : vector<8x128xf32>
    %908 = arith.mulf %903, %907 : vector<8x128xf32>
    %909 = arith.select %876, %908, %830 : vector<8x128xi1>, vector<8x128xf32>
    %910 = arith.select %876, %906, %831 : vector<8x128xi1>, vector<8x128xf32>
    %911 = arith.index_cast %871 : i32 to index
    %c0_247 = arith.constant 0 : index
    %c0_248 = arith.constant 0 : index
    %912 = vector.load %arg11[%911, %c0_247, %c0_248] : memref<8x8x512xbf16, #tpu.memory_space<vmem>>, vector<1x8x512xbf16>
    %913 = vector.shape_cast %912 : vector<1x8x512xbf16> to vector<8x512xbf16>
    %914 = vector.broadcast %871 : i32 to vector<8x128xi32>
    %915 = arith.cmpi slt, %914, %0 : vector<8x128xi32>
    %916 = arith.extf %913 : vector<8x512xbf16> to vector<8x512xf32>
    %917 = arith.truncf %869 : vector<8x128xf32> to vector<8x128xbf16>
    %918 = arith.index_cast %c1_i32_200 : i32 to index
    %c0_249 = arith.constant 0 : index
    %c0_250 = arith.constant 0 : index
    %919 = vector.load %arg6[%918, %c0_249, %c0_250] : memref<2x128x512xbf16, #tpu.memory_space<vmem>>, vector<1x128x512xbf16>
    %920 = vector.shape_cast %919 : vector<1x128x512xbf16> to vector<128x512xbf16>
    %cst_251 = arith.constant dense<0.000000e+00> : vector<8x512xf32>
    %921 = tpu.matmul %917, %920, %cst_251 {dimension_numbers = #tpu.dot_dimension_numbers<[1], [0], [0], [1], [0, 0, 1, 1], [], []>} : vector<8x128xbf16>, vector<128x512xbf16>, vector<8x512xf32> -> vector<8x512xf32>
    %922 = arith.addf %916, %921 : vector<8x512xf32>
    %923 = vector.extract_strided_slice %922 {offsets = [0, 0], sizes = [8, 128], strides = [1, 1]} : vector<8x512xf32> to vector<8x128xf32>
    %924 = arith.negf %923 : vector<8x128xf32>
    %925 = math.exp %924 : vector<8x128xf32>
    %cst_252 = arith.constant 1.000000e+00 : f32
    %926 = vector.broadcast %cst_252 : f32 to vector<8x128xf32>
    %927 = arith.addf %926, %925 : vector<8x128xf32>
    %928 = arith.divf %926, %927 : vector<8x128xf32>
    %929 = vector.extract_strided_slice %922 {offsets = [0, 128], sizes = [8, 128], strides = [1, 1]} : vector<8x512xf32> to vector<8x128xf32>
    %930 = arith.negf %929 : vector<8x128xf32>
    %931 = math.exp %930 : vector<8x128xf32>
    %cst_253 = arith.constant 1.000000e+00 : f32
    %932 = vector.broadcast %cst_253 : f32 to vector<8x128xf32>
    %933 = arith.addf %932, %931 : vector<8x128xf32>
    %934 = arith.divf %932, %933 : vector<8x128xf32>
    %935 = vector.extract_strided_slice %922 {offsets = [0, 256], sizes = [8, 128], strides = [1, 1]} : vector<8x512xf32> to vector<8x128xf32>
    %936 = math.tanh %935 : vector<8x128xf32>
    %937 = vector.extract_strided_slice %922 {offsets = [0, 384], sizes = [8, 128], strides = [1, 1]} : vector<8x512xf32> to vector<8x128xf32>
    %938 = arith.negf %937 : vector<8x128xf32>
    %939 = math.exp %938 : vector<8x128xf32>
    %cst_254 = arith.constant 1.000000e+00 : f32
    %940 = vector.broadcast %cst_254 : f32 to vector<8x128xf32>
    %941 = arith.addf %940, %939 : vector<8x128xf32>
    %942 = arith.divf %940, %941 : vector<8x128xf32>
    %943 = arith.mulf %934, %870 : vector<8x128xf32>
    %944 = arith.mulf %928, %936 : vector<8x128xf32>
    %945 = arith.addf %943, %944 : vector<8x128xf32>
    %946 = math.tanh %945 : vector<8x128xf32>
    %947 = arith.mulf %942, %946 : vector<8x128xf32>
    %948 = arith.select %915, %947, %869 : vector<8x128xi1>, vector<8x128xf32>
    %949 = arith.select %915, %945, %870 : vector<8x128xi1>, vector<8x128xf32>
    %c3_i32_255 = arith.constant 3 : i32
    %c7_i32_256 = arith.constant 7 : i32
    %950 = arith.subi %c7_i32_256, %c3_i32_255 : i32
    %951 = arith.index_cast %c3_i32_255 : i32 to index
    %c0_257 = arith.constant 0 : index
    %c0_258 = arith.constant 0 : index
    %952 = vector.load %arg10[%951, %c0_257, %c0_258] : memref<8x8x512xbf16, #tpu.memory_space<vmem>>, vector<1x8x512xbf16>
    %953 = vector.shape_cast %952 : vector<1x8x512xbf16> to vector<8x512xbf16>
    %954 = vector.broadcast %c3_i32_255 : i32 to vector<8x128xi32>
    %955 = arith.cmpi slt, %954, %0 : vector<8x128xi32>
    %956 = arith.extf %953 : vector<8x512xbf16> to vector<8x512xf32>
    %957 = arith.truncf %909 : vector<8x128xf32> to vector<8x128xbf16>
    %958 = arith.index_cast %c0_i32_199 : i32 to index
    %c0_259 = arith.constant 0 : index
    %c0_260 = arith.constant 0 : index
    %959 = vector.load %arg6[%958, %c0_259, %c0_260] : memref<2x128x512xbf16, #tpu.memory_space<vmem>>, vector<1x128x512xbf16>
    %960 = vector.shape_cast %959 : vector<1x128x512xbf16> to vector<128x512xbf16>
    %cst_261 = arith.constant dense<0.000000e+00> : vector<8x512xf32>
    %961 = tpu.matmul %957, %960, %cst_261 {dimension_numbers = #tpu.dot_dimension_numbers<[1], [0], [0], [1], [0, 0, 1, 1], [], []>} : vector<8x128xbf16>, vector<128x512xbf16>, vector<8x512xf32> -> vector<8x512xf32>
    %962 = arith.addf %956, %961 : vector<8x512xf32>
    %963 = vector.extract_strided_slice %962 {offsets = [0, 0], sizes = [8, 128], strides = [1, 1]} : vector<8x512xf32> to vector<8x128xf32>
    %964 = arith.negf %963 : vector<8x128xf32>
    %965 = math.exp %964 : vector<8x128xf32>
    %cst_262 = arith.constant 1.000000e+00 : f32
    %966 = vector.broadcast %cst_262 : f32 to vector<8x128xf32>
    %967 = arith.addf %966, %965 : vector<8x128xf32>
    %968 = arith.divf %966, %967 : vector<8x128xf32>
    %969 = vector.extract_strided_slice %962 {offsets = [0, 128], sizes = [8, 128], strides = [1, 1]} : vector<8x512xf32> to vector<8x128xf32>
    %970 = arith.negf %969 : vector<8x128xf32>
    %971 = math.exp %970 : vector<8x128xf32>
    %cst_263 = arith.constant 1.000000e+00 : f32
    %972 = vector.broadcast %cst_263 : f32 to vector<8x128xf32>
    %973 = arith.addf %972, %971 : vector<8x128xf32>
    %974 = arith.divf %972, %973 : vector<8x128xf32>
    %975 = vector.extract_strided_slice %962 {offsets = [0, 256], sizes = [8, 128], strides = [1, 1]} : vector<8x512xf32> to vector<8x128xf32>
    %976 = math.tanh %975 : vector<8x128xf32>
    %977 = vector.extract_strided_slice %962 {offsets = [0, 384], sizes = [8, 128], strides = [1, 1]} : vector<8x512xf32> to vector<8x128xf32>
    %978 = arith.negf %977 : vector<8x128xf32>
    %979 = math.exp %978 : vector<8x128xf32>
    %cst_264 = arith.constant 1.000000e+00 : f32
    %980 = vector.broadcast %cst_264 : f32 to vector<8x128xf32>
    %981 = arith.addf %980, %979 : vector<8x128xf32>
    %982 = arith.divf %980, %981 : vector<8x128xf32>
    %983 = arith.mulf %974, %910 : vector<8x128xf32>
    %984 = arith.mulf %968, %976 : vector<8x128xf32>
    %985 = arith.addf %983, %984 : vector<8x128xf32>
    %986 = math.tanh %985 : vector<8x128xf32>
    %987 = arith.mulf %982, %986 : vector<8x128xf32>
    %988 = arith.select %955, %987, %909 : vector<8x128xi1>, vector<8x128xf32>
    %989 = arith.select %955, %985, %910 : vector<8x128xi1>, vector<8x128xf32>
    %990 = arith.index_cast %950 : i32 to index
    %c0_265 = arith.constant 0 : index
    %c0_266 = arith.constant 0 : index
    %991 = vector.load %arg11[%990, %c0_265, %c0_266] : memref<8x8x512xbf16, #tpu.memory_space<vmem>>, vector<1x8x512xbf16>
    %992 = vector.shape_cast %991 : vector<1x8x512xbf16> to vector<8x512xbf16>
    %993 = vector.broadcast %950 : i32 to vector<8x128xi32>
    %994 = arith.cmpi slt, %993, %0 : vector<8x128xi32>
    %995 = arith.extf %992 : vector<8x512xbf16> to vector<8x512xf32>
    %996 = arith.truncf %948 : vector<8x128xf32> to vector<8x128xbf16>
    %997 = arith.index_cast %c1_i32_200 : i32 to index
    %c0_267 = arith.constant 0 : index
    %c0_268 = arith.constant 0 : index
    %998 = vector.load %arg6[%997, %c0_267, %c0_268] : memref<2x128x512xbf16, #tpu.memory_space<vmem>>, vector<1x128x512xbf16>
    %999 = vector.shape_cast %998 : vector<1x128x512xbf16> to vector<128x512xbf16>
    %cst_269 = arith.constant dense<0.000000e+00> : vector<8x512xf32>
    %1000 = tpu.matmul %996, %999, %cst_269 {dimension_numbers = #tpu.dot_dimension_numbers<[1], [0], [0], [1], [0, 0, 1, 1], [], []>} : vector<8x128xbf16>, vector<128x512xbf16>, vector<8x512xf32> -> vector<8x512xf32>
    %1001 = arith.addf %995, %1000 : vector<8x512xf32>
    %1002 = vector.extract_strided_slice %1001 {offsets = [0, 0], sizes = [8, 128], strides = [1, 1]} : vector<8x512xf32> to vector<8x128xf32>
    %1003 = arith.negf %1002 : vector<8x128xf32>
    %1004 = math.exp %1003 : vector<8x128xf32>
    %cst_270 = arith.constant 1.000000e+00 : f32
    %1005 = vector.broadcast %cst_270 : f32 to vector<8x128xf32>
    %1006 = arith.addf %1005, %1004 : vector<8x128xf32>
    %1007 = arith.divf %1005, %1006 : vector<8x128xf32>
    %1008 = vector.extract_strided_slice %1001 {offsets = [0, 128], sizes = [8, 128], strides = [1, 1]} : vector<8x512xf32> to vector<8x128xf32>
    %1009 = arith.negf %1008 : vector<8x128xf32>
    %1010 = math.exp %1009 : vector<8x128xf32>
    %cst_271 = arith.constant 1.000000e+00 : f32
    %1011 = vector.broadcast %cst_271 : f32 to vector<8x128xf32>
    %1012 = arith.addf %1011, %1010 : vector<8x128xf32>
    %1013 = arith.divf %1011, %1012 : vector<8x128xf32>
    %1014 = vector.extract_strided_slice %1001 {offsets = [0, 256], sizes = [8, 128], strides = [1, 1]} : vector<8x512xf32> to vector<8x128xf32>
    %1015 = math.tanh %1014 : vector<8x128xf32>
    %1016 = vector.extract_strided_slice %1001 {offsets = [0, 384], sizes = [8, 128], strides = [1, 1]} : vector<8x512xf32> to vector<8x128xf32>
    %1017 = arith.negf %1016 : vector<8x128xf32>
    %1018 = math.exp %1017 : vector<8x128xf32>
    %cst_272 = arith.constant 1.000000e+00 : f32
    %1019 = vector.broadcast %cst_272 : f32 to vector<8x128xf32>
    %1020 = arith.addf %1019, %1018 : vector<8x128xf32>
    %1021 = arith.divf %1019, %1020 : vector<8x128xf32>
    %1022 = arith.mulf %1013, %949 : vector<8x128xf32>
    %1023 = arith.mulf %1007, %1015 : vector<8x128xf32>
    %1024 = arith.addf %1022, %1023 : vector<8x128xf32>
    %1025 = math.tanh %1024 : vector<8x128xf32>
    %1026 = arith.mulf %1021, %1025 : vector<8x128xf32>
    %1027 = arith.select %994, %1026, %948 : vector<8x128xi1>, vector<8x128xf32>
    %1028 = arith.select %994, %1024, %949 : vector<8x128xi1>, vector<8x128xf32>
    %c4_i32_273 = arith.constant 4 : i32
    %c7_i32_274 = arith.constant 7 : i32
    %1029 = arith.subi %c7_i32_274, %c4_i32_273 : i32
    %1030 = arith.index_cast %c4_i32_273 : i32 to index
    %c0_275 = arith.constant 0 : index
    %c0_276 = arith.constant 0 : index
    %1031 = vector.load %arg10[%1030, %c0_275, %c0_276] : memref<8x8x512xbf16, #tpu.memory_space<vmem>>, vector<1x8x512xbf16>
    %1032 = vector.shape_cast %1031 : vector<1x8x512xbf16> to vector<8x512xbf16>
    %1033 = vector.broadcast %c4_i32_273 : i32 to vector<8x128xi32>
    %1034 = arith.cmpi slt, %1033, %0 : vector<8x128xi32>
    %1035 = arith.extf %1032 : vector<8x512xbf16> to vector<8x512xf32>
    %1036 = arith.truncf %988 : vector<8x128xf32> to vector<8x128xbf16>
    %1037 = arith.index_cast %c0_i32_199 : i32 to index
    %c0_277 = arith.constant 0 : index
    %c0_278 = arith.constant 0 : index
    %1038 = vector.load %arg6[%1037, %c0_277, %c0_278] : memref<2x128x512xbf16, #tpu.memory_space<vmem>>, vector<1x128x512xbf16>
    %1039 = vector.shape_cast %1038 : vector<1x128x512xbf16> to vector<128x512xbf16>
    %cst_279 = arith.constant dense<0.000000e+00> : vector<8x512xf32>
    %1040 = tpu.matmul %1036, %1039, %cst_279 {dimension_numbers = #tpu.dot_dimension_numbers<[1], [0], [0], [1], [0, 0, 1, 1], [], []>} : vector<8x128xbf16>, vector<128x512xbf16>, vector<8x512xf32> -> vector<8x512xf32>
    %1041 = arith.addf %1035, %1040 : vector<8x512xf32>
    %1042 = vector.extract_strided_slice %1041 {offsets = [0, 0], sizes = [8, 128], strides = [1, 1]} : vector<8x512xf32> to vector<8x128xf32>
    %1043 = arith.negf %1042 : vector<8x128xf32>
    %1044 = math.exp %1043 : vector<8x128xf32>
    %cst_280 = arith.constant 1.000000e+00 : f32
    %1045 = vector.broadcast %cst_280 : f32 to vector<8x128xf32>
    %1046 = arith.addf %1045, %1044 : vector<8x128xf32>
    %1047 = arith.divf %1045, %1046 : vector<8x128xf32>
    %1048 = vector.extract_strided_slice %1041 {offsets = [0, 128], sizes = [8, 128], strides = [1, 1]} : vector<8x512xf32> to vector<8x128xf32>
    %1049 = arith.negf %1048 : vector<8x128xf32>
    %1050 = math.exp %1049 : vector<8x128xf32>
    %cst_281 = arith.constant 1.000000e+00 : f32
    %1051 = vector.broadcast %cst_281 : f32 to vector<8x128xf32>
    %1052 = arith.addf %1051, %1050 : vector<8x128xf32>
    %1053 = arith.divf %1051, %1052 : vector<8x128xf32>
    %1054 = vector.extract_strided_slice %1041 {offsets = [0, 256], sizes = [8, 128], strides = [1, 1]} : vector<8x512xf32> to vector<8x128xf32>
    %1055 = math.tanh %1054 : vector<8x128xf32>
    %1056 = vector.extract_strided_slice %1041 {offsets = [0, 384], sizes = [8, 128], strides = [1, 1]} : vector<8x512xf32> to vector<8x128xf32>
    %1057 = arith.negf %1056 : vector<8x128xf32>
    %1058 = math.exp %1057 : vector<8x128xf32>
    %cst_282 = arith.constant 1.000000e+00 : f32
    %1059 = vector.broadcast %cst_282 : f32 to vector<8x128xf32>
    %1060 = arith.addf %1059, %1058 : vector<8x128xf32>
    %1061 = arith.divf %1059, %1060 : vector<8x128xf32>
    %1062 = arith.mulf %1053, %989 : vector<8x128xf32>
    %1063 = arith.mulf %1047, %1055 : vector<8x128xf32>
    %1064 = arith.addf %1062, %1063 : vector<8x128xf32>
    %1065 = math.tanh %1064 : vector<8x128xf32>
    %1066 = arith.mulf %1061, %1065 : vector<8x128xf32>
    %1067 = arith.select %1034, %1066, %988 : vector<8x128xi1>, vector<8x128xf32>
    %1068 = arith.select %1034, %1064, %989 : vector<8x128xi1>, vector<8x128xf32>
    %1069 = arith.index_cast %1029 : i32 to index
    %c0_283 = arith.constant 0 : index
    %c0_284 = arith.constant 0 : index
    %1070 = vector.load %arg11[%1069, %c0_283, %c0_284] : memref<8x8x512xbf16, #tpu.memory_space<vmem>>, vector<1x8x512xbf16>
    %1071 = vector.shape_cast %1070 : vector<1x8x512xbf16> to vector<8x512xbf16>
    %1072 = vector.broadcast %1029 : i32 to vector<8x128xi32>
    %1073 = arith.cmpi slt, %1072, %0 : vector<8x128xi32>
    %1074 = arith.extf %1071 : vector<8x512xbf16> to vector<8x512xf32>
    %1075 = arith.truncf %1027 : vector<8x128xf32> to vector<8x128xbf16>
    %1076 = arith.index_cast %c1_i32_200 : i32 to index
    %c0_285 = arith.constant 0 : index
    %c0_286 = arith.constant 0 : index
    %1077 = vector.load %arg6[%1076, %c0_285, %c0_286] : memref<2x128x512xbf16, #tpu.memory_space<vmem>>, vector<1x128x512xbf16>
    %1078 = vector.shape_cast %1077 : vector<1x128x512xbf16> to vector<128x512xbf16>
    %cst_287 = arith.constant dense<0.000000e+00> : vector<8x512xf32>
    %1079 = tpu.matmul %1075, %1078, %cst_287 {dimension_numbers = #tpu.dot_dimension_numbers<[1], [0], [0], [1], [0, 0, 1, 1], [], []>} : vector<8x128xbf16>, vector<128x512xbf16>, vector<8x512xf32> -> vector<8x512xf32>
    %1080 = arith.addf %1074, %1079 : vector<8x512xf32>
    %1081 = vector.extract_strided_slice %1080 {offsets = [0, 0], sizes = [8, 128], strides = [1, 1]} : vector<8x512xf32> to vector<8x128xf32>
    %1082 = arith.negf %1081 : vector<8x128xf32>
    %1083 = math.exp %1082 : vector<8x128xf32>
    %cst_288 = arith.constant 1.000000e+00 : f32
    %1084 = vector.broadcast %cst_288 : f32 to vector<8x128xf32>
    %1085 = arith.addf %1084, %1083 : vector<8x128xf32>
    %1086 = arith.divf %1084, %1085 : vector<8x128xf32>
    %1087 = vector.extract_strided_slice %1080 {offsets = [0, 128], sizes = [8, 128], strides = [1, 1]} : vector<8x512xf32> to vector<8x128xf32>
    %1088 = arith.negf %1087 : vector<8x128xf32>
    %1089 = math.exp %1088 : vector<8x128xf32>
    %cst_289 = arith.constant 1.000000e+00 : f32
    %1090 = vector.broadcast %cst_289 : f32 to vector<8x128xf32>
    %1091 = arith.addf %1090, %1089 : vector<8x128xf32>
    %1092 = arith.divf %1090, %1091 : vector<8x128xf32>
    %1093 = vector.extract_strided_slice %1080 {offsets = [0, 256], sizes = [8, 128], strides = [1, 1]} : vector<8x512xf32> to vector<8x128xf32>
    %1094 = math.tanh %1093 : vector<8x128xf32>
    %1095 = vector.extract_strided_slice %1080 {offsets = [0, 384], sizes = [8, 128], strides = [1, 1]} : vector<8x512xf32> to vector<8x128xf32>
    %1096 = arith.negf %1095 : vector<8x128xf32>
    %1097 = math.exp %1096 : vector<8x128xf32>
    %cst_290 = arith.constant 1.000000e+00 : f32
    %1098 = vector.broadcast %cst_290 : f32 to vector<8x128xf32>
    %1099 = arith.addf %1098, %1097 : vector<8x128xf32>
    %1100 = arith.divf %1098, %1099 : vector<8x128xf32>
    %1101 = arith.mulf %1092, %1028 : vector<8x128xf32>
    %1102 = arith.mulf %1086, %1094 : vector<8x128xf32>
    %1103 = arith.addf %1101, %1102 : vector<8x128xf32>
    %1104 = math.tanh %1103 : vector<8x128xf32>
    %1105 = arith.mulf %1100, %1104 : vector<8x128xf32>
    %1106 = arith.select %1073, %1105, %1027 : vector<8x128xi1>, vector<8x128xf32>
    %1107 = arith.select %1073, %1103, %1028 : vector<8x128xi1>, vector<8x128xf32>
    %c5_i32_291 = arith.constant 5 : i32
    %c7_i32_292 = arith.constant 7 : i32
    %1108 = arith.subi %c7_i32_292, %c5_i32_291 : i32
    %1109 = arith.index_cast %c5_i32_291 : i32 to index
    %c0_293 = arith.constant 0 : index
    %c0_294 = arith.constant 0 : index
    %1110 = vector.load %arg10[%1109, %c0_293, %c0_294] : memref<8x8x512xbf16, #tpu.memory_space<vmem>>, vector<1x8x512xbf16>
    %1111 = vector.shape_cast %1110 : vector<1x8x512xbf16> to vector<8x512xbf16>
    %1112 = vector.broadcast %c5_i32_291 : i32 to vector<8x128xi32>
    %1113 = arith.cmpi slt, %1112, %0 : vector<8x128xi32>
    %1114 = arith.extf %1111 : vector<8x512xbf16> to vector<8x512xf32>
    %1115 = arith.truncf %1067 : vector<8x128xf32> to vector<8x128xbf16>
    %1116 = arith.index_cast %c0_i32_199 : i32 to index
    %c0_295 = arith.constant 0 : index
    %c0_296 = arith.constant 0 : index
    %1117 = vector.load %arg6[%1116, %c0_295, %c0_296] : memref<2x128x512xbf16, #tpu.memory_space<vmem>>, vector<1x128x512xbf16>
    %1118 = vector.shape_cast %1117 : vector<1x128x512xbf16> to vector<128x512xbf16>
    %cst_297 = arith.constant dense<0.000000e+00> : vector<8x512xf32>
    %1119 = tpu.matmul %1115, %1118, %cst_297 {dimension_numbers = #tpu.dot_dimension_numbers<[1], [0], [0], [1], [0, 0, 1, 1], [], []>} : vector<8x128xbf16>, vector<128x512xbf16>, vector<8x512xf32> -> vector<8x512xf32>
    %1120 = arith.addf %1114, %1119 : vector<8x512xf32>
    %1121 = vector.extract_strided_slice %1120 {offsets = [0, 0], sizes = [8, 128], strides = [1, 1]} : vector<8x512xf32> to vector<8x128xf32>
    %1122 = arith.negf %1121 : vector<8x128xf32>
    %1123 = math.exp %1122 : vector<8x128xf32>
    %cst_298 = arith.constant 1.000000e+00 : f32
    %1124 = vector.broadcast %cst_298 : f32 to vector<8x128xf32>
    %1125 = arith.addf %1124, %1123 : vector<8x128xf32>
    %1126 = arith.divf %1124, %1125 : vector<8x128xf32>
    %1127 = vector.extract_strided_slice %1120 {offsets = [0, 128], sizes = [8, 128], strides = [1, 1]} : vector<8x512xf32> to vector<8x128xf32>
    %1128 = arith.negf %1127 : vector<8x128xf32>
    %1129 = math.exp %1128 : vector<8x128xf32>
    %cst_299 = arith.constant 1.000000e+00 : f32
    %1130 = vector.broadcast %cst_299 : f32 to vector<8x128xf32>
    %1131 = arith.addf %1130, %1129 : vector<8x128xf32>
    %1132 = arith.divf %1130, %1131 : vector<8x128xf32>
    %1133 = vector.extract_strided_slice %1120 {offsets = [0, 256], sizes = [8, 128], strides = [1, 1]} : vector<8x512xf32> to vector<8x128xf32>
    %1134 = math.tanh %1133 : vector<8x128xf32>
    %1135 = vector.extract_strided_slice %1120 {offsets = [0, 384], sizes = [8, 128], strides = [1, 1]} : vector<8x512xf32> to vector<8x128xf32>
    %1136 = arith.negf %1135 : vector<8x128xf32>
    %1137 = math.exp %1136 : vector<8x128xf32>
    %cst_300 = arith.constant 1.000000e+00 : f32
    %1138 = vector.broadcast %cst_300 : f32 to vector<8x128xf32>
    %1139 = arith.addf %1138, %1137 : vector<8x128xf32>
    %1140 = arith.divf %1138, %1139 : vector<8x128xf32>
    %1141 = arith.mulf %1132, %1068 : vector<8x128xf32>
    %1142 = arith.mulf %1126, %1134 : vector<8x128xf32>
    %1143 = arith.addf %1141, %1142 : vector<8x128xf32>
    %1144 = math.tanh %1143 : vector<8x128xf32>
    %1145 = arith.mulf %1140, %1144 : vector<8x128xf32>
    %1146 = arith.select %1113, %1145, %1067 : vector<8x128xi1>, vector<8x128xf32>
    %1147 = arith.select %1113, %1143, %1068 : vector<8x128xi1>, vector<8x128xf32>
    %1148 = arith.index_cast %1108 : i32 to index
    %c0_301 = arith.constant 0 : index
    %c0_302 = arith.constant 0 : index
    %1149 = vector.load %arg11[%1148, %c0_301, %c0_302] : memref<8x8x512xbf16, #tpu.memory_space<vmem>>, vector<1x8x512xbf16>
    %1150 = vector.shape_cast %1149 : vector<1x8x512xbf16> to vector<8x512xbf16>
    %1151 = vector.broadcast %1108 : i32 to vector<8x128xi32>
    %1152 = arith.cmpi slt, %1151, %0 : vector<8x128xi32>
    %1153 = arith.extf %1150 : vector<8x512xbf16> to vector<8x512xf32>
    %1154 = arith.truncf %1106 : vector<8x128xf32> to vector<8x128xbf16>
    %1155 = arith.index_cast %c1_i32_200 : i32 to index
    %c0_303 = arith.constant 0 : index
    %c0_304 = arith.constant 0 : index
    %1156 = vector.load %arg6[%1155, %c0_303, %c0_304] : memref<2x128x512xbf16, #tpu.memory_space<vmem>>, vector<1x128x512xbf16>
    %1157 = vector.shape_cast %1156 : vector<1x128x512xbf16> to vector<128x512xbf16>
    %cst_305 = arith.constant dense<0.000000e+00> : vector<8x512xf32>
    %1158 = tpu.matmul %1154, %1157, %cst_305 {dimension_numbers = #tpu.dot_dimension_numbers<[1], [0], [0], [1], [0, 0, 1, 1], [], []>} : vector<8x128xbf16>, vector<128x512xbf16>, vector<8x512xf32> -> vector<8x512xf32>
    %1159 = arith.addf %1153, %1158 : vector<8x512xf32>
    %1160 = vector.extract_strided_slice %1159 {offsets = [0, 0], sizes = [8, 128], strides = [1, 1]} : vector<8x512xf32> to vector<8x128xf32>
    %1161 = arith.negf %1160 : vector<8x128xf32>
    %1162 = math.exp %1161 : vector<8x128xf32>
    %cst_306 = arith.constant 1.000000e+00 : f32
    %1163 = vector.broadcast %cst_306 : f32 to vector<8x128xf32>
    %1164 = arith.addf %1163, %1162 : vector<8x128xf32>
    %1165 = arith.divf %1163, %1164 : vector<8x128xf32>
    %1166 = vector.extract_strided_slice %1159 {offsets = [0, 128], sizes = [8, 128], strides = [1, 1]} : vector<8x512xf32> to vector<8x128xf32>
    %1167 = arith.negf %1166 : vector<8x128xf32>
    %1168 = math.exp %1167 : vector<8x128xf32>
    %cst_307 = arith.constant 1.000000e+00 : f32
    %1169 = vector.broadcast %cst_307 : f32 to vector<8x128xf32>
    %1170 = arith.addf %1169, %1168 : vector<8x128xf32>
    %1171 = arith.divf %1169, %1170 : vector<8x128xf32>
    %1172 = vector.extract_strided_slice %1159 {offsets = [0, 256], sizes = [8, 128], strides = [1, 1]} : vector<8x512xf32> to vector<8x128xf32>
    %1173 = math.tanh %1172 : vector<8x128xf32>
    %1174 = vector.extract_strided_slice %1159 {offsets = [0, 384], sizes = [8, 128], strides = [1, 1]} : vector<8x512xf32> to vector<8x128xf32>
    %1175 = arith.negf %1174 : vector<8x128xf32>
    %1176 = math.exp %1175 : vector<8x128xf32>
    %cst_308 = arith.constant 1.000000e+00 : f32
    %1177 = vector.broadcast %cst_308 : f32 to vector<8x128xf32>
    %1178 = arith.addf %1177, %1176 : vector<8x128xf32>
    %1179 = arith.divf %1177, %1178 : vector<8x128xf32>
    %1180 = arith.mulf %1171, %1107 : vector<8x128xf32>
    %1181 = arith.mulf %1165, %1173 : vector<8x128xf32>
    %1182 = arith.addf %1180, %1181 : vector<8x128xf32>
    %1183 = math.tanh %1182 : vector<8x128xf32>
    %1184 = arith.mulf %1179, %1183 : vector<8x128xf32>
    %1185 = arith.select %1152, %1184, %1106 : vector<8x128xi1>, vector<8x128xf32>
    %1186 = arith.select %1152, %1182, %1107 : vector<8x128xi1>, vector<8x128xf32>
    %c6_i32_309 = arith.constant 6 : i32
    %c7_i32_310 = arith.constant 7 : i32
    %1187 = arith.subi %c7_i32_310, %c6_i32_309 : i32
    %1188 = arith.index_cast %c6_i32_309 : i32 to index
    %c0_311 = arith.constant 0 : index
    %c0_312 = arith.constant 0 : index
    %1189 = vector.load %arg10[%1188, %c0_311, %c0_312] : memref<8x8x512xbf16, #tpu.memory_space<vmem>>, vector<1x8x512xbf16>
    %1190 = vector.shape_cast %1189 : vector<1x8x512xbf16> to vector<8x512xbf16>
    %1191 = vector.broadcast %c6_i32_309 : i32 to vector<8x128xi32>
    %1192 = arith.cmpi slt, %1191, %0 : vector<8x128xi32>
    %1193 = arith.extf %1190 : vector<8x512xbf16> to vector<8x512xf32>
    %1194 = arith.truncf %1146 : vector<8x128xf32> to vector<8x128xbf16>
    %1195 = arith.index_cast %c0_i32_199 : i32 to index
    %c0_313 = arith.constant 0 : index
    %c0_314 = arith.constant 0 : index
    %1196 = vector.load %arg6[%1195, %c0_313, %c0_314] : memref<2x128x512xbf16, #tpu.memory_space<vmem>>, vector<1x128x512xbf16>
    %1197 = vector.shape_cast %1196 : vector<1x128x512xbf16> to vector<128x512xbf16>
    %cst_315 = arith.constant dense<0.000000e+00> : vector<8x512xf32>
    %1198 = tpu.matmul %1194, %1197, %cst_315 {dimension_numbers = #tpu.dot_dimension_numbers<[1], [0], [0], [1], [0, 0, 1, 1], [], []>} : vector<8x128xbf16>, vector<128x512xbf16>, vector<8x512xf32> -> vector<8x512xf32>
    %1199 = arith.addf %1193, %1198 : vector<8x512xf32>
    %1200 = vector.extract_strided_slice %1199 {offsets = [0, 0], sizes = [8, 128], strides = [1, 1]} : vector<8x512xf32> to vector<8x128xf32>
    %1201 = arith.negf %1200 : vector<8x128xf32>
    %1202 = math.exp %1201 : vector<8x128xf32>
    %cst_316 = arith.constant 1.000000e+00 : f32
    %1203 = vector.broadcast %cst_316 : f32 to vector<8x128xf32>
    %1204 = arith.addf %1203, %1202 : vector<8x128xf32>
    %1205 = arith.divf %1203, %1204 : vector<8x128xf32>
    %1206 = vector.extract_strided_slice %1199 {offsets = [0, 128], sizes = [8, 128], strides = [1, 1]} : vector<8x512xf32> to vector<8x128xf32>
    %1207 = arith.negf %1206 : vector<8x128xf32>
    %1208 = math.exp %1207 : vector<8x128xf32>
    %cst_317 = arith.constant 1.000000e+00 : f32
    %1209 = vector.broadcast %cst_317 : f32 to vector<8x128xf32>
    %1210 = arith.addf %1209, %1208 : vector<8x128xf32>
    %1211 = arith.divf %1209, %1210 : vector<8x128xf32>
    %1212 = vector.extract_strided_slice %1199 {offsets = [0, 256], sizes = [8, 128], strides = [1, 1]} : vector<8x512xf32> to vector<8x128xf32>
    %1213 = math.tanh %1212 : vector<8x128xf32>
    %1214 = vector.extract_strided_slice %1199 {offsets = [0, 384], sizes = [8, 128], strides = [1, 1]} : vector<8x512xf32> to vector<8x128xf32>
    %1215 = arith.negf %1214 : vector<8x128xf32>
    %1216 = math.exp %1215 : vector<8x128xf32>
    %cst_318 = arith.constant 1.000000e+00 : f32
    %1217 = vector.broadcast %cst_318 : f32 to vector<8x128xf32>
    %1218 = arith.addf %1217, %1216 : vector<8x128xf32>
    %1219 = arith.divf %1217, %1218 : vector<8x128xf32>
    %1220 = arith.mulf %1211, %1147 : vector<8x128xf32>
    %1221 = arith.mulf %1205, %1213 : vector<8x128xf32>
    %1222 = arith.addf %1220, %1221 : vector<8x128xf32>
    %1223 = math.tanh %1222 : vector<8x128xf32>
    %1224 = arith.mulf %1219, %1223 : vector<8x128xf32>
    %1225 = arith.select %1192, %1224, %1146 : vector<8x128xi1>, vector<8x128xf32>
    %1226 = arith.select %1192, %1222, %1147 : vector<8x128xi1>, vector<8x128xf32>
    %1227 = arith.index_cast %1187 : i32 to index
    %c0_319 = arith.constant 0 : index
    %c0_320 = arith.constant 0 : index
    %1228 = vector.load %arg11[%1227, %c0_319, %c0_320] : memref<8x8x512xbf16, #tpu.memory_space<vmem>>, vector<1x8x512xbf16>
    %1229 = vector.shape_cast %1228 : vector<1x8x512xbf16> to vector<8x512xbf16>
    %1230 = vector.broadcast %1187 : i32 to vector<8x128xi32>
    %1231 = arith.cmpi slt, %1230, %0 : vector<8x128xi32>
    %1232 = arith.extf %1229 : vector<8x512xbf16> to vector<8x512xf32>
    %1233 = arith.truncf %1185 : vector<8x128xf32> to vector<8x128xbf16>
    %1234 = arith.index_cast %c1_i32_200 : i32 to index
    %c0_321 = arith.constant 0 : index
    %c0_322 = arith.constant 0 : index
    %1235 = vector.load %arg6[%1234, %c0_321, %c0_322] : memref<2x128x512xbf16, #tpu.memory_space<vmem>>, vector<1x128x512xbf16>
    %1236 = vector.shape_cast %1235 : vector<1x128x512xbf16> to vector<128x512xbf16>
    %cst_323 = arith.constant dense<0.000000e+00> : vector<8x512xf32>
    %1237 = tpu.matmul %1233, %1236, %cst_323 {dimension_numbers = #tpu.dot_dimension_numbers<[1], [0], [0], [1], [0, 0, 1, 1], [], []>} : vector<8x128xbf16>, vector<128x512xbf16>, vector<8x512xf32> -> vector<8x512xf32>
    %1238 = arith.addf %1232, %1237 : vector<8x512xf32>
    %1239 = vector.extract_strided_slice %1238 {offsets = [0, 0], sizes = [8, 128], strides = [1, 1]} : vector<8x512xf32> to vector<8x128xf32>
    %1240 = arith.negf %1239 : vector<8x128xf32>
    %1241 = math.exp %1240 : vector<8x128xf32>
    %cst_324 = arith.constant 1.000000e+00 : f32
    %1242 = vector.broadcast %cst_324 : f32 to vector<8x128xf32>
    %1243 = arith.addf %1242, %1241 : vector<8x128xf32>
    %1244 = arith.divf %1242, %1243 : vector<8x128xf32>
    %1245 = vector.extract_strided_slice %1238 {offsets = [0, 128], sizes = [8, 128], strides = [1, 1]} : vector<8x512xf32> to vector<8x128xf32>
    %1246 = arith.negf %1245 : vector<8x128xf32>
    %1247 = math.exp %1246 : vector<8x128xf32>
    %cst_325 = arith.constant 1.000000e+00 : f32
    %1248 = vector.broadcast %cst_325 : f32 to vector<8x128xf32>
    %1249 = arith.addf %1248, %1247 : vector<8x128xf32>
    %1250 = arith.divf %1248, %1249 : vector<8x128xf32>
    %1251 = vector.extract_strided_slice %1238 {offsets = [0, 256], sizes = [8, 128], strides = [1, 1]} : vector<8x512xf32> to vector<8x128xf32>
    %1252 = math.tanh %1251 : vector<8x128xf32>
    %1253 = vector.extract_strided_slice %1238 {offsets = [0, 384], sizes = [8, 128], strides = [1, 1]} : vector<8x512xf32> to vector<8x128xf32>
    %1254 = arith.negf %1253 : vector<8x128xf32>
    %1255 = math.exp %1254 : vector<8x128xf32>
    %cst_326 = arith.constant 1.000000e+00 : f32
    %1256 = vector.broadcast %cst_326 : f32 to vector<8x128xf32>
    %1257 = arith.addf %1256, %1255 : vector<8x128xf32>
    %1258 = arith.divf %1256, %1257 : vector<8x128xf32>
    %1259 = arith.mulf %1250, %1186 : vector<8x128xf32>
    %1260 = arith.mulf %1244, %1252 : vector<8x128xf32>
    %1261 = arith.addf %1259, %1260 : vector<8x128xf32>
    %1262 = math.tanh %1261 : vector<8x128xf32>
    %1263 = arith.mulf %1258, %1262 : vector<8x128xf32>
    %1264 = arith.select %1231, %1263, %1185 : vector<8x128xi1>, vector<8x128xf32>
    %1265 = arith.select %1231, %1261, %1186 : vector<8x128xi1>, vector<8x128xf32>
    %c7_i32_327 = arith.constant 7 : i32
    %c7_i32_328 = arith.constant 7 : i32
    %1266 = arith.subi %c7_i32_328, %c7_i32_327 : i32
    %1267 = arith.index_cast %c7_i32_327 : i32 to index
    %c0_329 = arith.constant 0 : index
    %c0_330 = arith.constant 0 : index
    %1268 = vector.load %arg10[%1267, %c0_329, %c0_330] : memref<8x8x512xbf16, #tpu.memory_space<vmem>>, vector<1x8x512xbf16>
    %1269 = vector.shape_cast %1268 : vector<1x8x512xbf16> to vector<8x512xbf16>
    %1270 = vector.broadcast %c7_i32_327 : i32 to vector<8x128xi32>
    %1271 = arith.cmpi slt, %1270, %0 : vector<8x128xi32>
    %1272 = arith.extf %1269 : vector<8x512xbf16> to vector<8x512xf32>
    %1273 = arith.truncf %1225 : vector<8x128xf32> to vector<8x128xbf16>
    %1274 = arith.index_cast %c0_i32_199 : i32 to index
    %c0_331 = arith.constant 0 : index
    %c0_332 = arith.constant 0 : index
    %1275 = vector.load %arg6[%1274, %c0_331, %c0_332] : memref<2x128x512xbf16, #tpu.memory_space<vmem>>, vector<1x128x512xbf16>
    %1276 = vector.shape_cast %1275 : vector<1x128x512xbf16> to vector<128x512xbf16>
    %cst_333 = arith.constant dense<0.000000e+00> : vector<8x512xf32>
    %1277 = tpu.matmul %1273, %1276, %cst_333 {dimension_numbers = #tpu.dot_dimension_numbers<[1], [0], [0], [1], [0, 0, 1, 1], [], []>} : vector<8x128xbf16>, vector<128x512xbf16>, vector<8x512xf32> -> vector<8x512xf32>
    %1278 = arith.addf %1272, %1277 : vector<8x512xf32>
    %1279 = vector.extract_strided_slice %1278 {offsets = [0, 0], sizes = [8, 128], strides = [1, 1]} : vector<8x512xf32> to vector<8x128xf32>
    %1280 = arith.negf %1279 : vector<8x128xf32>
    %1281 = math.exp %1280 : vector<8x128xf32>
    %cst_334 = arith.constant 1.000000e+00 : f32
    %1282 = vector.broadcast %cst_334 : f32 to vector<8x128xf32>
    %1283 = arith.addf %1282, %1281 : vector<8x128xf32>
    %1284 = arith.divf %1282, %1283 : vector<8x128xf32>
    %1285 = vector.extract_strided_slice %1278 {offsets = [0, 128], sizes = [8, 128], strides = [1, 1]} : vector<8x512xf32> to vector<8x128xf32>
    %1286 = arith.negf %1285 : vector<8x128xf32>
    %1287 = math.exp %1286 : vector<8x128xf32>
    %cst_335 = arith.constant 1.000000e+00 : f32
    %1288 = vector.broadcast %cst_335 : f32 to vector<8x128xf32>
    %1289 = arith.addf %1288, %1287 : vector<8x128xf32>
    %1290 = arith.divf %1288, %1289 : vector<8x128xf32>
    %1291 = vector.extract_strided_slice %1278 {offsets = [0, 256], sizes = [8, 128], strides = [1, 1]} : vector<8x512xf32> to vector<8x128xf32>
    %1292 = math.tanh %1291 : vector<8x128xf32>
    %1293 = vector.extract_strided_slice %1278 {offsets = [0, 384], sizes = [8, 128], strides = [1, 1]} : vector<8x512xf32> to vector<8x128xf32>
    %1294 = arith.negf %1293 : vector<8x128xf32>
    %1295 = math.exp %1294 : vector<8x128xf32>
    %cst_336 = arith.constant 1.000000e+00 : f32
    %1296 = vector.broadcast %cst_336 : f32 to vector<8x128xf32>
    %1297 = arith.addf %1296, %1295 : vector<8x128xf32>
    %1298 = arith.divf %1296, %1297 : vector<8x128xf32>
    %1299 = arith.mulf %1290, %1226 : vector<8x128xf32>
    %1300 = arith.mulf %1284, %1292 : vector<8x128xf32>
    %1301 = arith.addf %1299, %1300 : vector<8x128xf32>
    %1302 = math.tanh %1301 : vector<8x128xf32>
    %1303 = arith.mulf %1298, %1302 : vector<8x128xf32>
    %1304 = arith.select %1271, %1303, %1225 : vector<8x128xi1>, vector<8x128xf32>
    %1305 = arith.select %1271, %1301, %1226 : vector<8x128xi1>, vector<8x128xf32>
    %1306 = arith.index_cast %1266 : i32 to index
    %c0_337 = arith.constant 0 : index
    %c0_338 = arith.constant 0 : index
    %1307 = vector.load %arg11[%1306, %c0_337, %c0_338] : memref<8x8x512xbf16, #tpu.memory_space<vmem>>, vector<1x8x512xbf16>
    %1308 = vector.shape_cast %1307 : vector<1x8x512xbf16> to vector<8x512xbf16>
    %1309 = vector.broadcast %1266 : i32 to vector<8x128xi32>
    %1310 = arith.cmpi slt, %1309, %0 : vector<8x128xi32>
    %1311 = arith.extf %1308 : vector<8x512xbf16> to vector<8x512xf32>
    %1312 = arith.truncf %1264 : vector<8x128xf32> to vector<8x128xbf16>
    %1313 = arith.index_cast %c1_i32_200 : i32 to index
    %c0_339 = arith.constant 0 : index
    %c0_340 = arith.constant 0 : index
    %1314 = vector.load %arg6[%1313, %c0_339, %c0_340] : memref<2x128x512xbf16, #tpu.memory_space<vmem>>, vector<1x128x512xbf16>
    %1315 = vector.shape_cast %1314 : vector<1x128x512xbf16> to vector<128x512xbf16>
    %cst_341 = arith.constant dense<0.000000e+00> : vector<8x512xf32>
    %1316 = tpu.matmul %1312, %1315, %cst_341 {dimension_numbers = #tpu.dot_dimension_numbers<[1], [0], [0], [1], [0, 0, 1, 1], [], []>} : vector<8x128xbf16>, vector<128x512xbf16>, vector<8x512xf32> -> vector<8x512xf32>
    %1317 = arith.addf %1311, %1316 : vector<8x512xf32>
    %1318 = vector.extract_strided_slice %1317 {offsets = [0, 0], sizes = [8, 128], strides = [1, 1]} : vector<8x512xf32> to vector<8x128xf32>
    %1319 = arith.negf %1318 : vector<8x128xf32>
    %1320 = math.exp %1319 : vector<8x128xf32>
    %cst_342 = arith.constant 1.000000e+00 : f32
    %1321 = vector.broadcast %cst_342 : f32 to vector<8x128xf32>
    %1322 = arith.addf %1321, %1320 : vector<8x128xf32>
    %1323 = arith.divf %1321, %1322 : vector<8x128xf32>
    %1324 = vector.extract_strided_slice %1317 {offsets = [0, 128], sizes = [8, 128], strides = [1, 1]} : vector<8x512xf32> to vector<8x128xf32>
    %1325 = arith.negf %1324 : vector<8x128xf32>
    %1326 = math.exp %1325 : vector<8x128xf32>
    %cst_343 = arith.constant 1.000000e+00 : f32
    %1327 = vector.broadcast %cst_343 : f32 to vector<8x128xf32>
    %1328 = arith.addf %1327, %1326 : vector<8x128xf32>
    %1329 = arith.divf %1327, %1328 : vector<8x128xf32>
    %1330 = vector.extract_strided_slice %1317 {offsets = [0, 256], sizes = [8, 128], strides = [1, 1]} : vector<8x512xf32> to vector<8x128xf32>
    %1331 = math.tanh %1330 : vector<8x128xf32>
    %1332 = vector.extract_strided_slice %1317 {offsets = [0, 384], sizes = [8, 128], strides = [1, 1]} : vector<8x512xf32> to vector<8x128xf32>
    %1333 = arith.negf %1332 : vector<8x128xf32>
    %1334 = math.exp %1333 : vector<8x128xf32>
    %cst_344 = arith.constant 1.000000e+00 : f32
    %1335 = vector.broadcast %cst_344 : f32 to vector<8x128xf32>
    %1336 = arith.addf %1335, %1334 : vector<8x128xf32>
    %1337 = arith.divf %1335, %1336 : vector<8x128xf32>
    %1338 = arith.mulf %1329, %1265 : vector<8x128xf32>
    %1339 = arith.mulf %1323, %1331 : vector<8x128xf32>
    %1340 = arith.addf %1338, %1339 : vector<8x128xf32>
    %1341 = math.tanh %1340 : vector<8x128xf32>
    %1342 = arith.mulf %1337, %1341 : vector<8x128xf32>
    %1343 = arith.select %1310, %1342, %1264 : vector<8x128xi1>, vector<8x128xf32>
    %1344 = arith.select %1310, %1340, %1265 : vector<8x128xi1>, vector<8x128xf32>
    %c8_i32_345 = arith.constant 8 : i32
    %c0_346 = arith.constant 0 : index
    %c0_347 = arith.constant 0 : index
    %1345 = vector.load %arg9[%c0_346, %c0_347] : memref<8x256xf32, #tpu.memory_space<vmem>>, vector<8x128xf32>
    tpu.vector_store %arg9[%c0_346, %c0_347], %1304 {strides = array<i32>} : memref<8x256xf32, #tpu.memory_space<vmem>>, vector<8x128xf32>,
    %c0_348 = arith.constant 0 : index
    %c128_349 = arith.constant 128 : index
    %1346 = vector.load %arg9[%c0_348, %c128_349] : memref<8x256xf32, #tpu.memory_space<vmem>>, vector<8x128xf32>
    tpu.vector_store %arg9[%c0_348, %c128_349], %1343 {strides = array<i32>} : memref<8x256xf32, #tpu.memory_space<vmem>>, vector<8x128xf32>,
    return
  }
  func.func @transform_0(%arg0: i32) -> (i32, i32, i32) {
    %c0_i32 = arith.constant 0 : i32
    %c0_i32_0 = arith.constant 0 : i32
    %c0_i32_1 = arith.constant 0 : i32
    return %c0_i32, %arg0, %c0_i32_0 : i32, i32, i32
  }
  func.func @transform_1(%arg0: i32) -> (i32, i32) {
    %c0_i32 = arith.constant 0 : i32
    %c0_i32_0 = arith.constant 0 : i32
    %c0_i32_1 = arith.constant 0 : i32
    return %c0_i32, %c0_i32_0 : i32, i32
  }
  func.func @transform_2(%arg0: i32) -> (i32, i32, i32) {
    %c0_i32 = arith.constant 0 : i32
    %c0_i32_0 = arith.constant 0 : i32
    %c0_i32_1 = arith.constant 0 : i32
    %c0_i32_2 = arith.constant 0 : i32
    return %c0_i32, %c0_i32_0, %c0_i32_1 : i32, i32, i32
  }
  func.func @transform_3(%arg0: i32) -> (i32, i32) {
    %c0_i32 = arith.constant 0 : i32
    %c0_i32_0 = arith.constant 0 : i32
    %c0_i32_1 = arith.constant 0 : i32
    return %c0_i32, %c0_i32_0 : i32, i32
  }
  func.func @transform_4(%arg0: i32) -> (i32, i32) {
    %c0_i32 = arith.constant 0 : i32
    %c0_i32_0 = arith.constant 0 : i32
    %c0_i32_1 = arith.constant 0 : i32
    return %c0_i32, %c0_i32_0 : i32, i32
  }
  func.func @transform_5(%arg0: i32) -> (i32, i32, i32) {
    %c0_i32 = arith.constant 0 : i32
    %c0_i32_0 = arith.constant 0 : i32
    %c0_i32_1 = arith.constant 0 : i32
    %c0_i32_2 = arith.constant 0 : i32
    return %c0_i32, %c0_i32_0, %c0_i32_1 : i32, i32, i32
  }
  func.func @transform_6(%arg0: i32) -> (i32, i32) {
    %c0_i32 = arith.constant 0 : i32
    %c0_i32_0 = arith.constant 0 : i32
    %c0_i32_1 = arith.constant 0 : i32
    return %c0_i32, %c0_i32_0 : i32, i32
  }
  func.func @transform_7(%arg0: i32) -> (i32, i32) {
    %c0_i32 = arith.constant 0 : i32
    %c0_i32_0 = arith.constant 0 : i32
    return %arg0, %c0_i32 : i32, i32
  }
  func.func @transform_8(%arg0: i32) -> (i32, i32) {
    %c0_i32 = arith.constant 0 : i32
    %c0_i32_0 = arith.constant 0 : i32
    return %arg0, %c0_i32 : i32, i32
  }
}

</mosaic_0001>

<bundles_post_ra>
// kernel: sketch_lstm_forward.1
= control target key start
LH: loop header
LB: loop body
LE: loop exit
PB: predicated region body
PF: predicated region fallthrough
CT: control target
= control target key end

     0   :  { %13 = vsyncpa [#allocation6], 0  ;;  %s14607_s0 = inlined_call_operand.vmem [shape: f32[8,8,8], index: 0, kind: input, shape index: {}]   ;;  %s14608_s1 = inlined_call_operand.vmem [shape: bf16[8,1024], index: 1, kind: input, shape index: {}]   ;;  %s14609_s2 = inlined_call_operand.hbm [shape: bf16[2,128,512], index: 2, kind: input, shape index: {}]   ;;  %s14610_s3 = inlined_call_operand.vmem [shape: f32[1,1024], index: 3, kind: input, shape index: {}]   ;;  %s14611_s4 = inlined_call_operand.hbm [shape: bf16[256,1024], index: 4, kind: input, shape index: {}]   ;;  %s14612_s5 = inlined_call_operand.hbm [shape: bf16[2,128,512], index: 5, kind: input, shape index: {}]   ;;  %s14613_s6 = inlined_call_operand.vmem [shape: f32[1,1024], index: 6, kind: input, shape index: {}]   ;;  %s14614_s7 = inlined_call_operand.vmem [shape: s32[8,128], index: 7, kind: input, shape index: {}]   ;;  %s14615_s8 = inlined_call_operand.vmem [shape: f32[8,256], index: 8, kind: output, shape index: {}]  }
   0x1   :  { %14 = vsyncpa [#allocation8], 0  ;;  %s11715_s27 = smov [#allocation7]  }
   0x2   :  { %s38_s28 = sshll.u32 %s11715_s27, 4  ;;  %s39_s28 = int_to_ptr.vmem [resolvable:$true] %s38_s28 }
   0x3   :  { %s11659_s29 = scalar_lea.vmem %s39_s28, 16384  ;;  %p11664_p1 = scmp.lt.s32.totalorder %s39_s28, %s39_s28 }
   0x4   :  { %p11660_p0 = scmp.ne.s32.totalorder %s39_s28, %s11659_s29  ;;  %p11665_p2 = scmp.lt.s32.totalorder %s11659_s29, %s11659_s29 }
   0x6   :  { %p11666_p3 = por %p11665_p2, %p11664_p1 }
   0x8   :  { %p11667_p4 = pnand %p11666_p3, %p11660_p0 }
   0xa   :  { %11670 = shalt.err (!%p11667_p4)
}
   0xb   :  { %s11716_s30 = smov 512   ;;  %s11717_s9 = smov 32  }
   0xc   :  { %44 = dma.hbm_to_vmem [thread:$0]  %s14611_s4, 16384, %s39_s28, [#allocation8], %s11716_s30, %s11716_s30, %s11717_s9  }
   0xd   :  { %s11718_s12 = smov [#allocation5]  }
   0xe   :  { %s24_s13 = sshll.u32 %s11718_s12, 4  ;;  %s25_s13 = int_to_ptr.vmem [resolvable:$true] %s24_s13 }
   0xf   :  { %s11679_s14 = scalar_lea.vmem %s25_s13, 8192  ;;  %p11684_p6 = scmp.lt.s32.totalorder %s25_s13, %s25_s13 }
  0x10   :  { %p11680_p5 = scmp.ne.s32.totalorder %s25_s13, %s11679_s14  ;;  %p11685_p7 = scmp.lt.s32.totalorder %s11679_s14, %s11679_s14 }
  0x12   :  { %p11686_p8 = por %p11685_p7, %p11684_p6 }
  0x14   :  { %p11687_p9 = pnand %p11686_p8, %p11680_p5 }
  0x16   :  { %11690 = shalt.err (!%p11687_p9)
}
  0x17   :  { %s11719_s15 = smov 256   ;;  %s11720_s16 = smov 16  }
  0x18   :  { %30 = dma.hbm_to_vmem [thread:$0]  %s14609_s2, 8192, %s25_s13, [#allocation6], %s11719_s15, %s11719_s15, %s11720_s16  }
  0x19   :  { %s11721_s19 = smov [#allocation9]  }
  0x1a   :  { %s50_s20 = sshll.u32 %s11721_s19, 4  ;;  %s51_s20 = int_to_ptr.vmem [resolvable:$true] %s50_s20 }
  0x1b   :  { %s11699_s4 = scalar_lea.vmem %s51_s20, 8192  ;;  %p11704_p11 = scmp.lt.s32.totalorder %s51_s20, %s51_s20 }
  0x1c   :  { %p11700_p10 = scmp.ne.s32.totalorder %s51_s20, %s11699_s4  ;;  %p11705_p12 = scmp.lt.s32.totalorder %s11699_s4, %s11699_s4 }
  0x1e   :  { %p11706_p13 = por %p11705_p12, %p11704_p11 }
  0x20   :  { %p11707_p0 = pnand %p11706_p13, %p11700_p10 }
  0x22   :  { %11710 = shalt.err (!%p11707_p0)
}
  0x23   :  { %56 = dma.hbm_to_vmem [thread:$0]  %s14612_s5, 8192, %s51_s20, [#allocation8], %s11719_s15, %s11719_s15, %s11720_s16  }
  0x24   :  { %11711 = dma.done.wait [#allocation6], 8192  }
  0x25   :  { %11712 = vsyncadd [#allocation6], 4294959104 }
  0x26   :  { %11713 = dma.done.wait [#allocation8], 24576  }
  0x27   :  { %11714 = vsyncadd [#allocation8], 4294942720  ;;  %v14624_v0 = vmov 0   ;;  %v84_v1 = vld [vmem:[%s14608_s1] sm:$0xff]  ;;  %vm163_vm0 = vcmask 1043456   ;;  %v85_v2 = vld [vmem:[%s14608_s1 + $0x8] sm:$0xff] }
  0x28   :  { %220 = vmatprep.mubr.bf16.mxu0 %v14624_v0  ;;  %293 = vmatprep.mubr.bf16.mxu1 %v14624_v0  ;;  %v72_v3 = vld [vmem:[%s14607_s0] sm:$0xff]  ;;  %v9494_v4 = vcombine.high %v84_v1, %v84_v1  ;;  %v9496_v5 = vcombine.high %v85_v2, %v85_v2  ;;  %v9493_v6 = vcombine.low %v84_v1, %v84_v1  ;;  %v73_v8 = vld [vmem:[%s14607_s0 + $0x8] sm:$0xff]  ;;  %v86_v9 = vld [vmem:[%s14608_s1 + $0x10] sm:$0xff]  ;;  %vm150_vm1 = vcmask 64512  }
  0x29   :  { %v9495_v7 = vcombine.low %v85_v2, %v85_v2  ;;  %v9498_v10 = vcombine.high %v86_v9, %v86_v9  ;;  %v9497_v11 = vcombine.low %v86_v9, %v86_v9  ;;  %v80_v14 = vpack.c.bf16 %v73_v8, %v72_v3  ;;  %v87_v15 = vld [vmem:[%s14608_s1 + $0x18] sm:$0xff]  ;;  %v11806_v20 = vld [vmem:[#allocation5 + $0xe4] ss:$16 sps:$4 sm:$0xff]   ;;  %v77_v26 = vld [vmem:[%s14607_s0 + $0x28] sm:$0xff] }
  0x2a   :  { %9501 = vmatprep.subr.msk.bf16.mxu0 %vm163_vm0, %v9494_v4  ;;  %9506 = vmatprep.subr.msk.bf16.mxu1 %vm163_vm0, %v9496_v5  ;;  %v165_v12 = vsel %vm163_vm0, %v9493_v6, 0  ;;  %v9500_v16 = vcombine.high %v87_v15, %v87_v15  ;;  %v9499_v17 = vcombine.low %v87_v15, %v87_v15  ;;  %v11808_v21 = vld [vmem:[#allocation5 + $0xec] ss:$16 sps:$4 sm:$0xff]   ;;  %v74_v22 = vld [vmem:[%s14607_s0 + $0x10] sm:$0xff]  ;;  %v76_v25 = vld [vmem:[%s14607_s0 + $0x20] sm:$0xff]  ;;  %vm11723_vm12 = vmmov 1  }
  0x2b   :  { %v171_v13 = vsel %vm163_vm0, %v9495_v7, 0  ;;  %203 = vmatpush1.bf16.msra.mxu0 %v165_v12  ;;  %v177_v18 = vsel %vm163_vm0, %v9497_v11, 0  ;;  %v75_v23 = vld [vmem:[%s14607_s0 + $0x18] sm:$0xff]  ;;  %v82_v27 = vpack.c.bf16 %v77_v26, %v76_v25  ;;  %v78_v28 = vld [vmem:[%s14607_s0 + $0x30] sm:$0xff] }
  0x2c   :  { %276 = vmatpush1.bf16.msra.mxu1 %v171_v13  ;;  %9511 = vmatprep.subr.msk.bf16.mxu0 %vm163_vm0, %v9498_v10  ;;  %v183_v19 = vsel %vm163_vm0, %v9499_v17, 0  ;;  %v81_v24 = vpack.c.bf16 %v75_v23, %v74_v22  ;;  %v79_v29 = vld [vmem:[%s14607_s0 + $0x38] sm:$0xff]  ;;  %v11850_v31 = vld [vmem:[#allocation5 + $0xe0] ss:$16 sps:$4 sm:$0xff]   ;;  %v11854_v33 = vld [vmem:[#allocation5 + $0xc4] ss:$16 sps:$4 sm:$0xff]  }
  0x2d   :  { %9516 = vmatprep.subr.msk.bf16.mxu1 %vm163_vm0, %v9500_v16  ;;  %v11842_v30 = vpack.c.bf16 %v79_v29, %v78_v28  ;;  %v11852_v32 = vld [vmem:[#allocation5 + $0xe8] ss:$16 sps:$4 sm:$0xff]   ;;  %v11856_v34 = vld [vmem:[#allocation5 + $0xcc] ss:$16 sps:$4 sm:$0xff]   ;;  %v11860_v35 = vld [vmem:[#allocation5 + $0xc0] ss:$16 sps:$4 sm:$0xff]  }
  0x2e   :  { %9502 = vmatmul.mubr.msk.bf16.vlgmr.msra.gmra.mxu0 %vm150_vm1, %v80_v14  ;;  %v11862_v36 = vld [vmem:[#allocation5 + $0xc8] ss:$16 sps:$4 sm:$0xff]   ;;  %v11866_v37 = vld [vmem:[#allocation5 + $0xa4] ss:$16 sps:$4 sm:$0xff]   ;;  %v11870_v38 = vld [vmem:[#allocation5 + $0xac] ss:$16 sps:$4 sm:$0xff]  }
  0x2f   :  { %9507 = vmatmul.mubr.msk.bf16.vlgmr.msra.gmra.mxu1 %vm150_vm1, %v80_v14  ;;  %349 = vmatpush1.bf16.msra.mxu0 %v177_v18  ;;  %v11874_v39 = vld [vmem:[#allocation5 + $0xa0] ss:$16 sps:$4 sm:$0xff]   ;;  %v11876_v40 = vld [vmem:[#allocation5 + $0xa8] ss:$16 sps:$4 sm:$0xff]   ;;  %v11880_v41 = vld [vmem:[#allocation5 + $0x84] ss:$16 sps:$4 sm:$0xff]  }
  0x30   :  { %230 = vmatprep.mubr.bf16.mxu0 %v14624_v0  ;;  %303 = vmatprep.mubr.bf16.mxu1 %v14624_v0  ;;  %v11884_v42 = vld [vmem:[#allocation5 + $0x8c] ss:$16 sps:$4 sm:$0xff]   ;;  %v11886_v43 = vld [vmem:[#allocation5 + $0x80] ss:$16 sps:$4 sm:$0xff]   ;;  %v11888_v44 = vld [vmem:[#allocation5 + $0x88] ss:$16 sps:$4 sm:$0xff]  }
  0x31   :  { %422 = vmatpush1.bf16.msra.mxu1 %v183_v19  ;;  %967 = vmatprep.subr.bf16.mxu0 %v11806_v20  ;;  %v11892_v45 = vld [vmem:[#allocation5 + $0x64] ss:$16 sps:$4 sm:$0xff]   ;;  %v11894_v46 = vld [vmem:[#allocation5 + $0x6c] ss:$16 sps:$4 sm:$0xff]   ;;  %v11902_v47 = vld [vmem:[#allocation5 + $0x60] ss:$16 sps:$4 sm:$0xff]  }
  0x32   :  { %1008 = vmatprep.subr.bf16.mxu1 %v11808_v21  ;;  %v11904_v48 = vld [vmem:[#allocation5 + $0x68] ss:$16 sps:$4 sm:$0xff]   ;;  %v11906_v49 = vld [vmem:[#allocation5 + $0x44] ss:$16 sps:$4 sm:$0xff]   ;;  %v11908_v50 = vld [vmem:[#allocation5 + $0x4c] ss:$16 sps:$4 sm:$0xff]  }
  0x33   :  { %v11914_v51 = vld [vmem:[#allocation5 + $0x40] ss:$16 sps:$4 sm:$0xff]   ;;  %v11916_v52 = vld [vmem:[#allocation5 + $0x48] ss:$16 sps:$4 sm:$0xff]   ;;  %v11920_v53 = vld [vmem:[#allocation5 + $0x24] ss:$16 sps:$4 sm:$0xff]  }
  0x34   :  { %v11922_v54 = vld [vmem:[#allocation5 + $0x2c] ss:$16 sps:$4 sm:$0xff]   ;;  %v11930_v55 = vld [vmem:[#allocation5 + $0x20] ss:$16 sps:$4 sm:$0xff]   ;;  %v11932_v56 = vld [vmem:[#allocation5 + $0x28] ss:$16 sps:$4 sm:$0xff]  }
  0x35   :  { %v11934_v57 = vld [vmem:[#allocation5 + $0x4] ss:$16 sps:$4 sm:$0xff]   ;;  %v11936_v58 = vld [vmem:[#allocation5 + $0xc] ss:$16 sps:$4 sm:$0xff]   ;;  %v11942_v59 = vld [vmem:[#allocation5] ss:$16 sps:$4 sm:$0xff]  }
  0x36   :  { %9503 = vmatmul.mubr.msk.bf16.gmra.mxu0 %vm150_vm1, %v81_v24  ;;  %v11944_v60 = vld [vmem:[#allocation5 + $0x8] ss:$16 sps:$4 sm:$0xff]   ;;  %v11950_v61 = vld [vmem:[#allocation5 + $0x1e4] ss:$16 sps:$4 sm:$0xff]   ;;  %v11952_v62 = vld [vmem:[#allocation5 + $0x1ec] ss:$16 sps:$4 sm:$0xff]  }
  0x37   :  { %9508 = vmatmul.mubr.msk.bf16.gmra.mxu1 %vm150_vm1, %v81_v24  ;;  %240 = vmatprep.mubr.bf16.mxu0 %v14624_v0  ;;  %v10562_v63 = vld [vmem:[#allocation5 + $0x1e0] ss:$16 sps:$4 sm:$0xff]   ;;  %v10565_v1 = vld [vmem:[#allocation5 + $0x1e8] ss:$16 sps:$4 sm:$0xff]   ;;  %v10570_v2 = vld [vmem:[#allocation5 + $0x1c4] ss:$16 sps:$4 sm:$0xff]  }
  0x38   :  { %313 = vmatprep.mubr.bf16.mxu1 %v14624_v0  ;;  %v10573_v3 = vld [vmem:[#allocation5 + $0x1cc] ss:$16 sps:$4 sm:$0xff]   ;;  %v10568_v4 = vld [vmem:[#allocation5 + $0x1c0] ss:$16 sps:$4 sm:$0xff]   ;;  %v10571_v5 = vld [vmem:[#allocation5 + $0x1c8] ss:$16 sps:$4 sm:$0xff]  }
  0x39   :  { %v10576_v6 = vld [vmem:[#allocation5 + $0x1a4] ss:$16 sps:$4 sm:$0xff]   ;;  %v10579_v7 = vld [vmem:[#allocation5 + $0x1ac] ss:$16 sps:$4 sm:$0xff]   ;;  %v10574_v8 = vld [vmem:[#allocation5 + $0x1a0] ss:$16 sps:$4 sm:$0xff]  }
  0x3a   :  { %v10577_v9 = vld [vmem:[#allocation5 + $0x1a8] ss:$16 sps:$4 sm:$0xff]   ;;  %v10582_v10 = vld [vmem:[#allocation5 + $0x184] ss:$16 sps:$4 sm:$0xff]   ;;  %v10585_v11 = vld [vmem:[#allocation5 + $0x18c] ss:$16 sps:$4 sm:$0xff]  }
  0x3b   :  { %v10580_v12 = vld [vmem:[#allocation5 + $0x180] ss:$16 sps:$4 sm:$0xff]   ;;  %v10583_v13 = vld [vmem:[#allocation5 + $0x188] ss:$16 sps:$4 sm:$0xff]   ;;  %v10591_v15 = vld [vmem:[#allocation5 + $0x16c] ss:$16 sps:$4 sm:$0xff]  }
  0x3c   :  { %v11968_v16 = vld [vmem:[#allocation5 + $0x160] ss:$16 sps:$4 sm:$0xff]   ;;  %v11970_v17 = vld [vmem:[#allocation5 + $0x168] ss:$16 sps:$4 sm:$0xff]   ;;  %v11972_v18 = vld [vmem:[#allocation5 + $0x144] ss:$16 sps:$4 sm:$0xff]  }
  0x3d   :  { %v11974_v19 = vld [vmem:[#allocation5 + $0x14c] ss:$16 sps:$4 sm:$0xff]   ;;  %v11976_v22 = vld [vmem:[#allocation5 + $0x140] ss:$16 sps:$4 sm:$0xff]   ;;  %v11978_v23 = vld [vmem:[#allocation5 + $0x148] ss:$16 sps:$4 sm:$0xff]  }
  0x3e   :  { %9504 = vmatmul.mubr.msk.bf16.gmra.mxu0 %vm150_vm1, %v82_v27  ;;  %v11982_v25 = vld [vmem:[#allocation5 + $0x12c] ss:$16 sps:$4 sm:$0xff]   ;;  %v11988_v26 = vld [vmem:[#allocation5 + $0x120] ss:$16 sps:$4 sm:$0xff]   ;;  %v11992_v28 = vld [vmem:[#allocation5 + $0x104] ss:$16 sps:$4 sm:$0xff]  }
  0x3f   :  { %9509 = vmatmul.mubr.msk.bf16.gmra.mxu1 %vm150_vm1, %v82_v27  ;;  %250 = vmatprep.mubr.bf16.mxu0 %v14624_v0  ;;  %v11994_v29 = vld [vmem:[#allocation5 + $0x10c] ss:$16 sps:$4 sm:$0xff]  }
  0x40   :  { %323 = vmatprep.mubr.bf16.mxu1 %v14624_v0 }
  0x46   :  { %9505 = vmatmul.mubr.msk.bf16.gmra.mxu0 %vm150_vm1, %v11842_v30 }
  0x47   :  { %9510 = vmatmul.mubr.msk.bf16.gmra.mxu1 %vm150_vm1, %v11842_v30  ;;  %366 = vmatprep.mubr.bf16.mxu0 %v14624_v0 }
  0x48   :  { %439 = vmatprep.mubr.bf16.mxu1 %v14624_v0 }
  0x4e   :  { %9512 = vmatmul.mubr.msk.bf16.vlgmr.msra.gmra.mxu0 %vm150_vm1, %v80_v14 }
  0x4f   :  { %9517 = vmatmul.mubr.msk.bf16.vlgmr.msra.gmra.mxu1 %vm150_vm1, %v80_v14  ;;  %968 = vmatpush1.bf16.msra.mxu0 %v11850_v31  ;;  %v10588_v14 = vld [vmem:[#allocation5 + $0x164] ss:$16 sps:$4 sm:$0xff]  }
  0x50   :  { %1009 = vmatpush1.bf16.msra.mxu1 %v11852_v32  ;;  %969 = vmatprep.subr.bf16.mxu0 %v11854_v33 }
  0x51   :  { %1010 = vmatprep.subr.bf16.mxu1 %v11856_v34  ;;  %376 = vmatprep.mubr.bf16.mxu0 %v14624_v0 }
  0x52   :  { %449 = vmatprep.mubr.bf16.mxu1 %v14624_v0 }
  0x53   :  { %970 = vmatpush1.bf16.msra.mxu0 %v11860_v35 }
  0x54   :  { %1011 = vmatpush1.bf16.msra.mxu1 %v11862_v36  ;;  %971 = vmatprep.subr.bf16.mxu0 %v11866_v37 }
  0x55   :  { %1012 = vmatprep.subr.bf16.mxu1 %v11870_v38 }
  0x56   :  { %9513 = vmatmul.mubr.msk.bf16.gmra.mxu0 %vm150_vm1, %v81_v24 }
  0x57   :  { %9518 = vmatmul.mubr.msk.bf16.gmra.mxu1 %vm150_vm1, %v81_v24  ;;  %972 = vmatpush1.bf16.msra.mxu0 %v11874_v39  ;;  %v11980_v24 = vld [vmem:[#allocation5 + $0x124] ss:$16 sps:$4 sm:$0xff]  }
  0x58   :  { %1013 = vmatpush1.bf16.msra.mxu1 %v11876_v40  ;;  %973 = vmatprep.subr.bf16.mxu0 %v11880_v41 }
  0x59   :  { %1014 = vmatprep.subr.bf16.mxu1 %v11884_v42  ;;  %386 = vmatprep.mubr.bf16.mxu0 %v14624_v0 }
  0x5a   :  { %459 = vmatprep.mubr.bf16.mxu1 %v14624_v0 }
  0x5b   :  { %974 = vmatpush1.bf16.msra.mxu0 %v11886_v43 }
  0x5c   :  { %1015 = vmatpush1.bf16.msra.mxu1 %v11888_v44  ;;  %975 = vmatprep.subr.bf16.mxu0 %v11892_v45 }
  0x5d   :  { %1016 = vmatprep.subr.bf16.mxu1 %v11894_v46 }
  0x5e   :  { %9514 = vmatmul.mubr.msk.bf16.gmra.mxu0 %vm150_vm1, %v82_v27 }
  0x5f   :  { %9519 = vmatmul.mubr.msk.bf16.gmra.mxu1 %vm150_vm1, %v82_v27  ;;  %976 = vmatpush1.bf16.msra.mxu0 %v11902_v47  ;;  %v11990_v27 = vld [vmem:[#allocation5 + $0x128] ss:$16 sps:$4 sm:$0xff]  }
  0x60   :  { %1017 = vmatpush1.bf16.msra.mxu1 %v11904_v48  ;;  %977 = vmatprep.subr.bf16.mxu0 %v11906_v49 }
  0x61   :  { %1018 = vmatprep.subr.bf16.mxu1 %v11908_v50  ;;  %396 = vmatprep.mubr.bf16.mxu0 %v14624_v0 }
  0x62   :  { %469 = vmatprep.mubr.bf16.mxu1 %v14624_v0 }
  0x63   :  { %978 = vmatpush1.bf16.msra.mxu0 %v11914_v51 }
  0x64   :  { %1019 = vmatpush1.bf16.msra.mxu1 %v11916_v52  ;;  %979 = vmatprep.subr.bf16.mxu0 %v11920_v53 }
  0x65   :  { %1020 = vmatprep.subr.bf16.mxu1 %v11922_v54 }
  0x66   :  { %9515 = vmatmul.mubr.msk.bf16.gmra.mxu0 %vm150_vm1, %v11842_v30 }
  0x67   :  { %9520 = vmatmul.mubr.msk.bf16.gmra.mxu1 %vm150_vm1, %v11842_v30  ;;  %980 = vmatpush1.bf16.msra.mxu0 %v11930_v55  ;;  %v12000_v30 = vld [vmem:[#allocation5 + $0x100] ss:$16 sps:$4 sm:$0xff]  }
  0x68   :  { %1021 = vmatpush1.bf16.msra.mxu1 %v11932_v56  ;;  %981 = vmatprep.subr.bf16.mxu0 %v11934_v57 }
  0x69   :  { %1022 = vmatprep.subr.bf16.mxu1 %v11936_v58  ;;  %999 = vmatprep.mubr.bf16.mxu0 %v14624_v0 }
  0x6a   :  { %1040 = vmatprep.mubr.bf16.mxu1 %v14624_v0 }
  0x6b   :  { %982 = vmatpush1.bf16.msra.mxu0 %v11942_v59 }
  0x6c   :  { %1023 = vmatpush1.bf16.msra.mxu1 %v11944_v60  ;;  %1280 = vmatprep.subr.bf16.mxu0 %v11950_v61 }
  0x6d   :  { %1321 = vmatprep.subr.bf16.mxu1 %v11952_v62 }
  0x6e   :  { %1000 = vmatmul.mubr.bf16.vlgmr.msra.gmra.mxu0 %v14624_v0 }
  0x6f   :  { %1041 = vmatmul.mubr.bf16.vlgmr.msra.gmra.mxu1 %v14624_v0  ;;  %1281 = vmatpush1.bf16.msra.mxu0 %v10562_v63  ;;  %v12002_v63 = vld [vmem:[#allocation5 + $0x108] ss:$16 sps:$4 sm:$0xff]  }
  0x70   :  { %1322 = vmatpush1.bf16.msra.mxu1 %v10565_v1  ;;  %1282 = vmatprep.subr.bf16.mxu0 %v10570_v2 }
  0x71   :  { %1323 = vmatprep.subr.bf16.mxu1 %v10573_v3  ;;  %1312 = vmatprep.mubr.bf16.mxu0 %v14624_v0 }
  0x72   :  { %1353 = vmatprep.mubr.bf16.mxu1 %v14624_v0 }
  0x73   :  { %1283 = vmatpush1.bf16.msra.mxu0 %v10568_v4 }
  0x74   :  { %1324 = vmatpush1.bf16.msra.mxu1 %v10571_v5  ;;  %1284 = vmatprep.subr.bf16.mxu0 %v10576_v6 }
  0x75   :  { %1325 = vmatprep.subr.bf16.mxu1 %v10579_v7 }
  0x77   :  { %1285 = vmatpush1.bf16.msra.mxu0 %v10574_v8 }
  0x78   :  { %1326 = vmatpush1.bf16.msra.mxu1 %v10577_v9  ;;  %1286 = vmatprep.subr.bf16.mxu0 %v10582_v10 }
  0x79   :  { %1327 = vmatprep.subr.bf16.mxu1 %v10585_v11 }
  0x7b   :  { %1287 = vmatpush1.bf16.msra.mxu0 %v10580_v12 }
  0x7c   :  { %1328 = vmatpush1.bf16.msra.mxu1 %v10583_v13  ;;  %1288 = vmatprep.subr.bf16.mxu0 %v10588_v14 }
  0x7d   :  { %1329 = vmatprep.subr.bf16.mxu1 %v10591_v15 }
  0x7f   :  { %1289 = vmatpush1.bf16.msra.mxu0 %v11968_v16 }
  0x80   :  { %1330 = vmatpush1.bf16.msra.mxu1 %v11970_v17  ;;  %1290 = vmatprep.subr.bf16.mxu0 %v11972_v18 }
  0x81   :  { %1331 = vmatprep.subr.bf16.mxu1 %v11974_v19 }
  0x83   :  { %1291 = vmatpush1.bf16.msra.mxu0 %v11976_v22 }
  0x84   :  { %1332 = vmatpush1.bf16.msra.mxu1 %v11978_v23  ;;  %1292 = vmatprep.subr.bf16.mxu0 %v11980_v24 }
  0x85   :  { %1333 = vmatprep.subr.bf16.mxu1 %v11982_v25 }
  0x87   :  { %1293 = vmatpush1.bf16.msra.mxu0 %v11988_v26 }
  0x88   :  { %1334 = vmatpush1.bf16.msra.mxu1 %v11990_v27  ;;  %1294 = vmatprep.subr.bf16.mxu0 %v11992_v28 }
  0x89   :  { %1335 = vmatprep.subr.bf16.mxu1 %v11994_v29 }
  0x8b   :  { %1295 = vmatpush1.bf16.msra.mxu0 %v12000_v30 }
  0x8c   :  { %1336 = vmatpush1.bf16.msra.mxu1 %v12002_v63  ;;  %1596 = vmatprep.subr.bf16.mxu0 %v11806_v20  ;;  %v90_v20 = vlaneseq }
  0x8d   :  { %1637 = vmatprep.subr.bf16.mxu1 %v11808_v21 }
  0x8e   :  { %1313 = vmatmul.mubr.bf16.vlgmr.msra.gmra.mxu0 %v14624_v0  ;;  %v12048_v21 = vshrl.u32 %v90_v20, 7 }
  0x8f   :  { %1354 = vmatmul.mubr.bf16.vlgmr.msra.gmra.mxu1 %v14624_v0  ;;  %1597 = vmatpush1.bf16.msra.mxu0 %v11850_v31 }
  0x90   :  { %1638 = vmatpush1.bf16.msra.mxu1 %v11852_v32  ;;  %1598 = vmatprep.subr.bf16.mxu0 %v11854_v33  ;;  %14832 = vst [vmem:[#allocation12_spill] sm:$0xff] %v12048_v21  ;;  %v14623_v31 = vsub.s32 2, %v12048_v21  ;;  %v14622_v32 = vsub.s32 3, %v12048_v21  ;;  %v12055_v33 = vld [vmem:[%s14610_s3] sm:$0xff] }
  0x91   :  { %1639 = vmatprep.subr.bf16.mxu1 %v11856_v34  ;;  %1628 = vmatprep.mubr.bf16.mxu0 %v14624_v0 }
  0x92   :  { %1669 = vmatprep.mubr.bf16.mxu1 %v14624_v0  ;;  %v12060_v34 = vrot.slane %v12055_v33, %v14623_v31 }
  0x93   :  { %1599 = vmatpush1.bf16.msra.mxu0 %v11860_v35  ;;  %v14621_v35 = vsub.s32 0, %v12048_v21 }
  0x94   :  { %1640 = vmatpush1.bf16.msra.mxu1 %v11862_v36  ;;  %1600 = vmatprep.subr.bf16.mxu0 %v11866_v37  ;;  %v12066_v36 = vrot.slane %v12055_v33, %v14622_v32 }
  0x95   :  { %1641 = vmatprep.subr.bf16.mxu1 %v11870_v38 }
  0x97   :  { %1601 = vmatpush1.bf16.msra.mxu0 %v11874_v39 }
  0x98   :  { %1642 = vmatpush1.bf16.msra.mxu1 %v11876_v40  ;;  %1602 = vmatprep.subr.bf16.mxu0 %v11880_v41  ;;  %v14620_v40 = vsub.s32 1, %v12048_v21 }
  0x99   :  { %1643 = vmatprep.subr.bf16.mxu1 %v11884_v42 }
  0x9b   :  { %1603 = vmatpush1.bf16.msra.mxu0 %v11886_v43  ;;  %v12077_v43 = vrot.slane %v12055_v33, %v14621_v35 }
  0x9c   :  { %1644 = vmatpush1.bf16.msra.mxu1 %v11888_v44  ;;  %1604 = vmatprep.subr.bf16.mxu0 %v11892_v45 }
  0x9d   :  { %1645 = vmatprep.subr.bf16.mxu1 %v11894_v46 }
  0x9f   :  { %1605 = vmatpush1.bf16.msra.mxu0 %v11902_v47  ;;  %v12083_v47 = vrot.slane %v12055_v33, %v14620_v40 }
  0xa0   :  { %1646 = vmatpush1.bf16.msra.mxu1 %v11904_v48  ;;  %1606 = vmatprep.subr.bf16.mxu0 %v11906_v49 }
  0xa1   :  { %1647 = vmatprep.subr.bf16.mxu1 %v11908_v50 }
  0xa3   :  { %1607 = vmatpush1.bf16.msra.mxu0 %v11914_v51 }
  0xa4   :  { %1648 = vmatpush1.bf16.msra.mxu1 %v11916_v52  ;;  %1608 = vmatprep.subr.bf16.mxu0 %v11920_v53 }
  0xa5   :  { %1649 = vmatprep.subr.bf16.mxu1 %v11922_v54 }
  0xa7   :  { %1609 = vmatpush1.bf16.msra.mxu0 %v11930_v55 }
  0xa8   :  { %1650 = vmatpush1.bf16.msra.mxu1 %v11932_v56  ;;  %1610 = vmatprep.subr.bf16.mxu0 %v11934_v57 }
  0xa9   :  { %1651 = vmatprep.subr.bf16.mxu1 %v11936_v58 }
  0xab   :  { %1611 = vmatpush1.bf16.msra.mxu0 %v11942_v59 }
  0xac   :  { %1652 = vmatpush1.bf16.msra.mxu1 %v11944_v60  ;;  %1909 = vmatprep.subr.bf16.mxu0 %v11950_v61 }
  0xad   :  { %1950 = vmatprep.subr.bf16.mxu1 %v11952_v62 }
  0xee   :  { %v12068_v37 = vpop.f32.mrf.mxu0 }
  0xef   :  { %v295_v38 = vpop.f32.mrf.mxu1 }
  0xf0   :  { %v296_v39 = vadd.f32 %v295_v38, %v12060_v34  ;;  %v12072_v41 = vpop.f32.mrf.mxu0 }
  0xf1   :  { %v297_v42 = vpop.f32.mrf.mxu1 }
  0xf2   :  { %v298_v44 = vadd.f32 %v297_v42, %v12066_v36  ;;  %v226_v45 = vpop.f32.mrf.mxu0 }
  0xf3   :  { %v299_v46 = vpop.f32.mrf.mxu1  ;;  %v227_v49 = vadd.f32 %v226_v45, %v12077_v43 }
  0xf4   :  { %v12085_v48 = vpack.c.bf16 %v298_v44, %v296_v39  ;;  %v300_v50 = vadd.f32 %v299_v46, %v12060_v34  ;;  %v228_v51 = vpop.f32.mrf.mxu0 }
  0xf5   :  { %v301_v52 = vpop.f32.mrf.mxu1  ;;  %v229_v53 = vadd.f32 %v228_v51, %v12083_v47 }
  0xf6   :  { %v302_v54 = vadd.f32 %v301_v52, %v12066_v36  ;;  %v232_v55 = vpop.f32.mrf.mxu0 }
  0xf7   :  { %v305_v56 = vpop.f32.mrf.mxu1  ;;  %v12091_v57 = vpack.c.bf16 %v229_v53, %v227_v49  ;;  %v233_v59 = vadd.f32 %v232_v55, %v12077_v43 }
  0xf8   :  { %v12093_v58 = vpack.c.bf16 %v302_v54, %v300_v50  ;;  %v306_v60 = vadd.f32 %v305_v56, %v12060_v34  ;;  %v234_v61 = vpop.f32.mrf.mxu0 }
  0xf9   :  { %v307_v62 = vpop.f32.mrf.mxu1  ;;  %v235_v1 = vadd.f32 %v234_v61, %v12083_v47 }
  0xfa   :  { %v308_v2 = vadd.f32 %v307_v62, %v12066_v36  ;;  %v236_v3 = vpop.f32.mrf.mxu0 }
  0xfb   :  { %v309_v4 = vpop.f32.mrf.mxu1  ;;  %v12099_v5 = vpack.c.bf16 %v235_v1, %v233_v59  ;;  %v237_v7 = vadd.f32 %v236_v3, %v12077_v43  ;;  %v14619_v1 = vsub.s32 4, %v12048_v21 }
  0xfc   :  { %v12101_v6 = vpack.c.bf16 %v308_v2, %v306_v60  ;;  %v310_v8 = vadd.f32 %v309_v4, %v12060_v34  ;;  %v238_v9 = vpop.f32.mrf.mxu0  ;;  %v14618_v2 = vsub.s32 6, %v12048_v21 }
  0xfd   :  { %v311_v10 = vpop.f32.mrf.mxu1  ;;  %v239_v11 = vadd.f32 %v238_v9, %v12083_v47 }
  0xfe   :  { %14833 = vst [vmem:[#allocation13_spill] sm:$0xff] %v12101_v6  ;;  %v312_v12 = vadd.f32 %v311_v10, %v12066_v36  ;;  %v242_v13 = vpop.f32.mrf.mxu0 }
  0xff   :  { %v315_v14 = vpop.f32.mrf.mxu1  ;;  %v12107_v15 = vpack.c.bf16 %v239_v11, %v237_v7  ;;  %v243_v38 = vadd.f32 %v242_v13, %v12077_v43  ;;  %v14617_v13 = vsub.s32 5, %v12048_v21 }
 0x100   :  { %v12109_v20 = vpack.c.bf16 %v312_v12, %v310_v8  ;;  %v316_v39 = vadd.f32 %v315_v14, %v12060_v34  ;;  %v244_v42 = vpop.f32.mrf.mxu0  ;;  %v14616_v14 = vsub.s32 7, %v12048_v21 }
 0x101   :  { %14834 = vst [vmem:[#allocation14_spill] sm:$0xff] %v12107_v15  ;;  %v317_v44 = vpop.f32.mrf.mxu1  ;;  %v245_v45 = vadd.f32 %v244_v42, %v12083_v47  ;;  %v12138_v42 = vrot.slane %v12055_v33, %v14619_v1 }
 0x102   :  { %14835 = vst [vmem:[#allocation15_spill] sm:$0xff] %v12109_v20  ;;  %v318_v46 = vadd.f32 %v317_v44, %v12066_v36  ;;  %v246_v49 = vpop.f32.mrf.mxu0  ;;  %v12143_v44 = vrot.slane %v12055_v33, %v14618_v2  ;;  %v1402_v20 = vunpack.c.h.bf16 %v12093_v58 }
 0x103   :  { %v319_v50 = vpop.f32.mrf.mxu1  ;;  %v12115_v51 = vpack.c.bf16 %v245_v45, %v243_v38  ;;  %v247_v53 = vadd.f32 %v246_v49, %v12077_v43 }
 0x104   :  { %v12117_v52 = vpack.c.bf16 %v318_v46, %v316_v39  ;;  %v320_v54 = vadd.f32 %v319_v50, %v12060_v34  ;;  %v248_v55 = vpop.f32.mrf.mxu0 }
 0x105   :  { %14836 = vst [vmem:[#allocation16_spill] sm:$0xff] %v12115_v51  ;;  %v321_v56 = vpop.f32.mrf.mxu1  ;;  %v249_v59 = vadd.f32 %v248_v55, %v12083_v47 }
 0x106   :  { %14837 = vst [vmem:[#allocation17_spill] sm:$0xff] %v12117_v52  ;;  %v322_v60 = vadd.f32 %v321_v56, %v12066_v36  ;;  %v252_v61 = vpop.f32.mrf.mxu0 }
 0x107   :  { %v325_v62 = vpop.f32.mrf.mxu1  ;;  %v12125_v3 = vpack.c.bf16 %v249_v59, %v247_v53  ;;  %v253_v7 = vadd.f32 %v252_v61, %v12077_v43  ;;  %v12156_v59 = vrot.slane %v12055_v33, %v14617_v13 }
 0x108   :  { %v12127_v4 = vpack.c.bf16 %v322_v60, %v320_v54  ;;  %v326_v8 = vadd.f32 %v325_v62, %v12060_v34  ;;  %v254_v9 = vpop.f32.mrf.mxu0  ;;  %v12161_v60 = vrot.slane %v12055_v33, %v14616_v14 }
 0x109   :  { %14838 = vst [vmem:[#allocation18_spill] sm:$0xff] %v12125_v3  ;;  %v327_v10 = vpop.f32.mrf.mxu1  ;;  %v255_v11 = vadd.f32 %v254_v9, %v12083_v47 }
 0x10a   :  { %14839 = vst [vmem:[#allocation19_spill] sm:$0xff] %v12127_v4  ;;  %v328_v12 = vadd.f32 %v327_v10, %v12066_v36  ;;  %v256_v38 = vpop.f32.mrf.mxu0 }
 0x10b   :  { %v329_v39 = vpop.f32.mrf.mxu1  ;;  %v12145_v45 = vpack.c.bf16 %v255_v11, %v253_v7  ;;  %v257_v49 = vadd.f32 %v256_v38, %v12077_v43 }
 0x10c   :  { %v12147_v46 = vpack.c.bf16 %v328_v12, %v326_v8  ;;  %v330_v50 = vadd.f32 %v329_v39, %v12060_v34  ;;  %v258_v53 = vpop.f32.mrf.mxu0 }
 0x10d   :  { %14840 = vst [vmem:[#allocation20_spill] sm:$0xff] %v12145_v45  ;;  %v331_v54 = vpop.f32.mrf.mxu1  ;;  %v259_v55 = vadd.f32 %v258_v53, %v12083_v47 }
 0x10e   :  { %14841 = vst [vmem:[#allocation21_spill] sm:$0xff] %v12147_v46  ;;  %v332_v56 = vadd.f32 %v331_v54, %v12066_v36  ;;  %v368_v61 = vpop.f32.mrf.mxu0 }
 0x10f   :  { %v441_v62 = vpop.f32.mrf.mxu1  ;;  %v12163_v7 = vpack.c.bf16 %v259_v55, %v257_v49  ;;  %v369_v8 = vadd.f32 %v368_v61, %v12138_v42 }
 0x110   :  { %v12165_v34 = vpack.c.bf16 %v332_v56, %v330_v50  ;;  %v442_v36 = vadd.f32 %v441_v62, %v12143_v44  ;;  %v370_v9 = vpop.f32.mrf.mxu0 }
 0x111   :  { %14842 = vst [vmem:[#allocation22_spill] sm:$0xff] %v12163_v7  ;;  %v443_v10 = vpop.f32.mrf.mxu1  ;;  %v371_v11 = vadd.f32 %v370_v9, %v12156_v59 }
 0x112   :  { %14843 = vst [vmem:[#allocation23_spill] sm:$0xff] %v12165_v34  ;;  %v444_v12 = vadd.f32 %v443_v10, %v12161_v60  ;;  %v372_v38 = vpop.f32.mrf.mxu0 }
 0x113   :  { %v445_v39 = vpop.f32.mrf.mxu1  ;;  %v12171_v33 = vpack.c.bf16 %v371_v11, %v369_v8  ;;  %v373_v49 = vadd.f32 %v372_v38, %v12138_v42 }
 0x114   :  { %v12173_v53 = vpack.c.bf16 %v444_v12, %v442_v36  ;;  %v446_v50 = vadd.f32 %v445_v39, %v12143_v44  ;;  %v374_v54 = vpop.f32.mrf.mxu0 }
 0x115   :  { %14844 = vst [vmem:[#allocation24_spill] sm:$0xff] %v12171_v33  ;;  %v447_v55 = vpop.f32.mrf.mxu1  ;;  %v375_v56 = vadd.f32 %v374_v54, %v12156_v59 }
 0x116   :  { %14845 = vst [vmem:[#allocation25_spill] sm:$0xff] %v12173_v53  ;;  %v448_v61 = vadd.f32 %v447_v55, %v12161_v60  ;;  %v378_v62 = vpop.f32.mrf.mxu0 }
 0x117   :  { %v451_v9 = vpop.f32.mrf.mxu1  ;;  %v12179_v14 = vpack.c.bf16 %v375_v56, %v373_v49  ;;  %v379_v8 = vadd.f32 %v378_v62, %v12138_v42 }
 0x118   :  { %v12181_v10 = vpack.c.bf16 %v448_v61, %v446_v50  ;;  %v452_v36 = vadd.f32 %v451_v9, %v12143_v44  ;;  %v380_v11 = vpop.f32.mrf.mxu0 }
 0x119   :  { %14846 = vst [vmem:[#allocation26_spill] sm:$0xff] %v12179_v14  ;;  %v453_v12 = vpop.f32.mrf.mxu1  ;;  %v381_v38 = vadd.f32 %v380_v11, %v12156_v59 }
 0x11a   :  { %14847 = vst [vmem:[#allocation27_spill] sm:$0xff] %v12181_v10  ;;  %v454_v39 = vadd.f32 %v453_v12, %v12161_v60  ;;  %v382_v13 = vpop.f32.mrf.mxu0 }
 0x11b   :  { %v455_v54 = vpop.f32.mrf.mxu1  ;;  %v12187_v2 = vpack.c.bf16 %v381_v38, %v379_v8  ;;  %v383_v49 = vadd.f32 %v382_v13, %v12138_v42 }
 0x11c   :  { %v12189_v55 = vpack.c.bf16 %v454_v39, %v452_v36  ;;  %v456_v50 = vadd.f32 %v455_v54, %v12143_v44  ;;  %v384_v56 = vpop.f32.mrf.mxu0 }
 0x11d   :  { %14848 = vst [vmem:[#allocation28_spill] sm:$0xff] %v12187_v2  ;;  %v457_v61 = vpop.f32.mrf.mxu1  ;;  %v385_v62 = vadd.f32 %v384_v56, %v12156_v59 }
 0x11e   :  { %14849 = vst [vmem:[#allocation29_spill] sm:$0xff] %v12189_v55  ;;  %v458_v9 = vadd.f32 %v457_v61, %v12161_v60  ;;  %v388_v1 = vpop.f32.mrf.mxu0  ;;  %v1400_v55 = vunpack.c.h.bf16 %v12091_v57 }
 0x11f   :  { %v461_v11 = vpop.f32.mrf.mxu1  ;;  %v12195_v40 = vpack.c.bf16 %v385_v62, %v383_v49  ;;  %v389_v8 = vadd.f32 %v388_v1, %v12138_v42 }
 0x120   :  { %v12197_v12 = vpack.c.bf16 %v458_v9, %v456_v50  ;;  %v462_v36 = vadd.f32 %v461_v11, %v12143_v44  ;;  %v390_v38 = vpop.f32.mrf.mxu0  ;;  %v225_v9 = vadd.f32 %v12072_v41, %v12083_v47 }
 0x121   :  { %14850 = vst [vmem:[#allocation30_spill] sm:$0xff] %v12195_v40  ;;  %v463_v13 = vpop.f32.mrf.mxu1  ;;  %v391_v39 = vadd.f32 %v390_v38, %v12156_v59 }
 0x122   :  { %14851 = vst [vmem:[#allocation31_spill] sm:$0xff] %v12197_v12  ;;  %v464_v54 = vadd.f32 %v463_v13, %v12161_v60  ;;  %v392_v35 = vpop.f32.mrf.mxu0  ;;  %v223_v13 = vadd.f32 %v12068_v37, %v12077_v43 }
 0x123   :  { %v465_v56 = vpop.f32.mrf.mxu1  ;;  %v12203_v32 = vpack.c.bf16 %v391_v39, %v389_v8  ;;  %v393_v49 = vadd.f32 %v392_v35, %v12138_v42 }
 0x124   :  { %v12205_v61 = vpack.c.bf16 %v464_v54, %v462_v36  ;;  %v466_v50 = vadd.f32 %v465_v56, %v12143_v44  ;;  %v394_v62 = vpop.f32.mrf.mxu0  ;;  %v10409_v41 = vpack.c.bf16 %v225_v9, %v223_v13 }
 0x125   :  { %14852 = vst [vmem:[#allocation32_spill] sm:$0xff] %v12203_v32  ;;  %v467_v1 = vpop.f32.mrf.mxu1  ;;  %v395_v11 = vadd.f32 %v394_v62, %v12156_v59 }
 0x126   :  { %14853 = vst [vmem:[#allocation33_spill] sm:$0xff] %v12205_v61  ;;  %v468_v38 = vadd.f32 %v467_v1, %v12161_v60  ;;  %v398_v8 = vpop.f32.mrf.mxu0 }
 0x127   :  { %v471_v39 = vpop.f32.mrf.mxu1  ;;  %v12215_v36 = vpack.c.bf16 %v395_v11, %v393_v49  ;;  %v399_v35 = vadd.f32 %v398_v8, %v12138_v42  ;;  %v771_v11 = vunpack.c.l.bf16 %v10409_v41 }
 0x128   :  { %v12217_v54 = vpack.c.bf16 %v468_v38, %v466_v50  ;;  %v472_v56 = vadd.f32 %v471_v39, %v12143_v44  ;;  %v400_v31 = vpop.f32.mrf.mxu0  ;;  %v772_v39 = vunpack.c.h.bf16 %v10409_v41 }
 0x129   :  { %14854 = vst [vmem:[#allocation34_spill] sm:$0xff] %v12215_v36  ;;  %v473_v0 = vpop.f32.mrf.mxu1  ;;  %v401_v47 = vadd.f32 %v400_v31, %v12156_v59 }
 0x12a   :  { %14855 = vst [vmem:[#allocation35_spill] sm:$0xff] %v12217_v54  ;;  %v474_v62 = vadd.f32 %v473_v0, %v12161_v60  ;;  %v402_v1 = vpop.f32.mrf.mxu0  ;;  %v1401_v54 = vunpack.c.l.bf16 %v12093_v58 }
 0x12b   :  { %v475_v21 = vpop.f32.mrf.mxu1  ;;  %v12223_v37 = vpack.c.bf16 %v401_v47, %v399_v35 }
 0x12c   :  { %v12225_v43 = vpack.c.bf16 %v474_v62, %v472_v56  ;;  %v404_v49 = vpop.f32.mrf.mxu0  ;;  %v774_v56 = vunpack.c.h.bf16 %v12085_v48  ;;  %v773_v62 = vunpack.c.l.bf16 %v12085_v48 }
 0x12d   :  { %v477_v50 = vpop.f32.mrf.mxu1 }
 0x12e   :  { %v1001_v38 = vpop.f32.mrf.mxu0 }
 0x12f   :  { %v1042_v8 = vpop.f32.mrf.mxu1  ;;  %v1049_v53 = vadd.f32 %v1001_v38, %v771_v11 }
 0x130   :  { %v1003_v33 = vpop.f32.mrf.mxu0  ;;  %v1051_v11 = vadd.f32 %v1042_v8, %v773_v62 }
 0x131   :  { %v1044_v34 = vpop.f32.mrf.mxu1  ;;  %v9585_v9 = vmul.f32 -1.442695, %v1049_v53  ;;  %v1050_v13 = vadd.f32 %v1003_v33, %v772_v39  ;;  %v403_v53 = vadd.f32 %v402_v1, %v12138_v42 }
 0x132   :  { %v1005_v31 = vpop.f32.mrf.mxu0  ;;  %v1052_v47 = vadd.f32 %v1044_v34, %v774_v56 }
 0x133   :  { %v1046_v7 = vpop.f32.mrf.mxu1  ;;  %10994 = vpow2.f32 %v9585_v9  ;;  %v9586_v0 = vmul.f32 -1.442695, %v1050_v13 }
 0x134   :  { %v1006_v10 = vpop.f32.mrf.mxu0  ;;  %v9587_v14 = vmul.f32 -1.442695, %v1052_v47  ;;  %v405_v7 = vadd.f32 %v404_v49, %v12156_v59 }
 0x135   :  { %v1047_v35 = vpop.f32.mrf.mxu1  ;;  %10996 = vpow2.f32 %v9586_v0 }
 0x136   :  { %10998 = vpow2.f32 %v9587_v14  ;;  %v10439_v10 = vpack.c.bf16 %v405_v7, %v403_v53  ;;  %v478_v14 = vadd.f32 %v477_v50, %v12161_v60 }
 0x138   :  { %v1083_v39 = vunpack.c.l.bf16 %v10439_v10  ;;  %v1084_v31 = vunpack.c.h.bf16 %v10439_v10 }
 0x140   :  { %v10995_v46 = vpop.eup %10994 }
 0x141   :  { %v1056_v41 = vadd.f32 1.0, %v10995_v46  ;;  %v476_v46 = vadd.f32 %v475_v21, %v12143_v44 }
 0x142   :  { %v10997_v38 = vpop.eup %10996 }
 0x143   :  { %11000 = vrcp.f32 %v1056_v41  ;;  %v1062_v33 = vadd.f32 1.0, %v10997_v38  ;;  %v10999_v13 = vpop.eup %10998 }
 0x144   :  { %11002 = vtanh.f32 %v1051_v11  ;;  %v1069_v62 = vadd.f32 1.0, %v10999_v13 }
 0x145   :  { %11004 = vrcp.f32 %v1062_v33  ;;  %v10440_v33 = vpack.c.bf16 %v478_v14, %v476_v46 }
 0x147   :  { %v1086_v21 = vunpack.c.h.bf16 %v10440_v33  ;;  %v1085_v60 = vunpack.c.l.bf16 %v10440_v33 }
 0x14e   :  { %v1314_v9 = vpop.f32.mrf.mxu0 }
 0x14f   :  { %v1355_v34 = vpop.f32.mrf.mxu1  ;;  %v1362_v48 = vadd.f32 %v1314_v9, %v1083_v39 }
 0x150   :  { %v11001_v0 = vpop.eup %11000  ;;  %v1316_v8 = vpop.f32.mrf.mxu0  ;;  %v1364_v9 = vadd.f32 %v1355_v34, %v1085_v60  ;;  %v14858_v34 = vmov 0  ;;  %v11515_v60 = vld [vmem:[#allocation5 + $0x1a8] ss:$16 sps:$4 sm:$0xff]  }
 0x151   :  { %v1357_v35 = vpop.f32.mrf.mxu1  ;;  %v11003_v56 = vpop.eup %11002  ;;  %v9620_v47 = vmul.f32 -1.442695, %v1362_v48  ;;  %v1363_v59 = vadd.f32 %v1316_v8, %v1084_v31  ;;  %v12239_v31 = vld [vmem:[%s14614_s7] sm:$0xff] }
 0x152   :  { %v11005_v49 = vpop.eup %11004  ;;  %v1318_v42 = vpop.f32.mrf.mxu0  ;;  %v1073_v41 = vmul.f32 %v11003_v56, %v11001_v0  ;;  %v1365_v44 = vadd.f32 %v1357_v35, %v1086_v21  ;;  %14856 = vst [vmem:[#allocation36_spill] sm:$0xff] %v12239_v31  ;;  %vm770_vm2 = vcmp.gt.s32.totalorder %v12239_v31, 0  ;;  %v11506_v56 = vld [vmem:[#allocation5 + $0x1e0] ss:$16 sps:$4 sm:$0xff]   ;;  %vm1082_vm4 = vcmp.gt.s32.totalorder %v12239_v31, 7 }
 0x153   :  { %v1359_v1 = vpop.f32.mrf.mxu1  ;;  %v1072_v11 = vmul.f32 0.0, %v11005_v49  ;;  %11006 = vpow2.f32 %v9620_v47  ;;  %v9621_v38 = vmul.f32 -1.442695, %v1363_v59  ;;  %vm12247_vm3 = vmpackc.low %vm770_vm2, %vm770_vm2  ;;  %v11507_v47 = vld [vmem:[#allocation5 + $0x1e8] ss:$16 sps:$4 sm:$0xff]   ;;  %vm1398_vm6 = vcmp.gt.s32.totalorder %v12239_v31, 1 }
 0x154   :  { %v1319_v7 = vpop.f32.mrf.mxu0  ;;  %v9622_v50 = vmul.f32 -1.442695, %v1365_v44  ;;  %v14859_v34 = vsel %vm12247_vm3, 4294967295, %v14858_v34  ;;  %v11508_v59 = vld [vmem:[#allocation5 + $0x1c4] ss:$16 sps:$4 sm:$0xff]   ;;  %vm12282_vm5 = vmpackc.low %vm1082_vm4, %vm1082_vm4  ;;  %vm1711_vm7 = vcmp.gt.s32.totalorder %v12239_v31, 6 }
 0x155   :  { %v1360_v53 = vpop.f32.mrf.mxu1  ;;  %v12233_v10 = vadd.f32 %v1073_v41, %v1072_v11  ;;  %11008 = vpow2.f32 %v9621_v38  ;;  %14860 = vst [vmem:[#allocation38_spill] sm:$0xff] %v14859_v34  ;;  %v11509_v49 = vld [vmem:[#allocation5 + $0x1cc] ss:$16 sps:$4 sm:$0xff]   ;;  %v11510_v42 = vld [vmem:[#allocation5 + $0x1c0] ss:$16 sps:$4 sm:$0xff]   ;;  %vm2028_vm8 = vcmp.gt.s32.totalorder %v12239_v31, 2  ;;  %vm13342_vm13 = vmpackc.low %vm11723_vm12, %vm770_vm2 }
 0x156   :  { %11010 = vrcp.f32 %v1069_v62  ;;  %v14861_v62 = vmov 0   ;;  %v11511_v1 = vld [vmem:[#allocation5 + $0x1c8] ss:$16 sps:$4 sm:$0xff]   ;;  %v11512_v41 = vld [vmem:[#allocation5 + $0x1a4] ss:$16 sps:$4 sm:$0xff]   ;;  %vm2341_vm9 = vcmp.gt.s32.totalorder %v12239_v31, 5  ;;  %vm13389_vm14 = vmpackc.low %vm1082_vm4, %vm11723_vm12 }
 0x157   :  { %11012 = vtanh.f32 %v12233_v10  ;;  %v11513_v38 = vld [vmem:[#allocation5 + $0x1ac] ss:$16 sps:$4 sm:$0xff]   ;;  %v11514_v44 = vld [vmem:[#allocation5 + $0x1a0] ss:$16 sps:$4 sm:$0xff]   ;;  %v12834_v31 = vld [vmem:[#allocation5 + $0x148] ss:$16 sps:$4 sm:$0xff]  }
 0x158   :  { %11014 = vpow2.f32 %v9622_v50 }
 0x160   :  { %v11007_v39 = vpop.eup %11006 }
 0x161   :  { %v1369_v13 = vadd.f32 1.0, %v11007_v39 }
 0x162   :  { %v11009_v48 = vpop.eup %11008 }
 0x163   :  { %v11011_v0 = vpop.eup %11010  ;;  %11016 = vrcp.f32 %v1369_v13  ;;  %v1375_v46 = vadd.f32 1.0, %v11009_v48  ;;  %v11517_v13 = vld [vmem:[#allocation5 + $0x18c] ss:$16 sps:$4 sm:$0xff]  }
 0x164   :  { %v11013_v14 = vpop.eup %11012  ;;  %11018 = vtanh.f32 %v1364_v9  ;;  %v11516_v9 = vld [vmem:[#allocation5 + $0x184] ss:$16 sps:$4 sm:$0xff]  }
 0x165   :  { %11020 = vrcp.f32 %v1375_v46  ;;  %v12242_v8 = vmul.f32 %v11013_v14, %v11011_v0  ;;  %v11015_v11 = vpop.eup %11014  ;;  %v11518_v0 = vld [vmem:[#allocation5 + $0x180] ss:$16 sps:$4 sm:$0xff]   ;;  %v11519_v46 = vld [vmem:[#allocation5 + $0x188] ss:$16 sps:$4 sm:$0xff]   ;;  %v11520_v14 = vld [vmem:[#allocation5 + $0x164] ss:$16 sps:$4 sm:$0xff]  }
 0x166   :  { %v1382_v21 = vadd.f32 1.0, %v11015_v11  ;;  %v12336_v11 = vld [vmem:[#allocation5 + $0x88] ss:$16 sps:$4 sm:$0xff]  }
 0x167   :  { %14857 = vst [vmem:[#allocation37_spill] sm:$0xff] %v12242_v8  ;;  %v9656_v35 = vpack.c.bf16 %v12242_v8, %v12242_v8 }
 0x168   :  { %11022 = vrcp.f32 %v1382_v21  ;;  %v12356_v21 = vld [vmem:[#allocation5 + $0x4c] ss:$16 sps:$4 sm:$0xff]  }
 0x169   :  { %9657 = vmatmul.mubr.msk.bf16.vlgmr.msra.gmra.mxu0 %vm12247_vm3, %v9656_v35  ;;  %9660 = vmatmul.mubr.msk.bf16.vlgmr.msra.gmra.mxu1 %vm12247_vm3, %v9656_v35  ;;  %v11521_v35 = vld [vmem:[#allocation5 + $0x16c] ss:$16 sps:$4 sm:$0xff]  }
 0x16a   :  { %1910 = vmatpush1.bf16.msra.mxu0 %v11506_v56  ;;  %1951 = vmatpush1.bf16.msra.mxu1 %v11507_v47  ;;  %v12322_v47 = vld [vmem:[#allocation5 + $0xa0] ss:$16 sps:$4 sm:$0xff]  }
 0x16b   :  { %1911 = vmatprep.subr.bf16.mxu0 %v11508_v59  ;;  %1952 = vmatprep.subr.bf16.mxu1 %v11509_v49  ;;  %v12324_v59 = vld [vmem:[#allocation5 + $0xa8] ss:$16 sps:$4 sm:$0xff]   ;;  %v12330_v49 = vld [vmem:[#allocation5 + $0x84] ss:$16 sps:$4 sm:$0xff]  }
 0x16c   :  { %1941 = vmatprep.mubr.bf16.mxu0 %v14861_v62  ;;  %1982 = vmatprep.mubr.bf16.mxu1 %v14861_v62 }
 0x16e   :  { %1912 = vmatpush1.bf16.msra.mxu0 %v11510_v42  ;;  %1953 = vmatpush1.bf16.msra.mxu1 %v11511_v1  ;;  %v12332_v42 = vld [vmem:[#allocation5 + $0x8c] ss:$16 sps:$4 sm:$0xff]   ;;  %v12334_v1 = vld [vmem:[#allocation5 + $0x80] ss:$16 sps:$4 sm:$0xff]  }
 0x16f   :  { %1913 = vmatprep.subr.bf16.mxu0 %v11512_v41  ;;  %1954 = vmatprep.subr.bf16.mxu1 %v11513_v38  ;;  %v12342_v41 = vld [vmem:[#allocation5 + $0x64] ss:$16 sps:$4 sm:$0xff]   ;;  %v12344_v38 = vld [vmem:[#allocation5 + $0x6c] ss:$16 sps:$4 sm:$0xff]  }
 0x170   :  { %v11017_v33 = vpop.eup %11016 }
 0x171   :  { %v11019_v7 = vpop.eup %11018 }
 0x172   :  { %v11021_v53 = vpop.eup %11020  ;;  %1914 = vmatpush1.bf16.msra.mxu0 %v11514_v44  ;;  %1955 = vmatpush1.bf16.msra.mxu1 %v11515_v60  ;;  %v1386_v39 = vmul.f32 %v11019_v7, %v11017_v33  ;;  %v12346_v33 = vld [vmem:[#allocation5 + $0x60] ss:$16 sps:$4 sm:$0xff]   ;;  %v12348_v7 = vld [vmem:[#allocation5 + $0x68] ss:$16 sps:$4 sm:$0xff]  }
 0x173   :  { %v1385_v50 = vmul.f32 0.0, %v11021_v53  ;;  %1915 = vmatprep.subr.bf16.mxu0 %v11516_v9  ;;  %1956 = vmatprep.subr.bf16.mxu1 %v11517_v13  ;;  %v12354_v53 = vld [vmem:[#allocation5 + $0x44] ss:$16 sps:$4 sm:$0xff]   ;;  %v12358_v44 = vld [vmem:[#allocation5 + $0x40] ss:$16 sps:$4 sm:$0xff]  }
 0x174   :  { %v12360_v60 = vld [vmem:[#allocation5 + $0x48] ss:$16 sps:$4 sm:$0xff]   ;;  %v12370_v9 = vld [vmem:[#allocation5 + $0x20] ss:$16 sps:$4 sm:$0xff]  }
 0x175   :  { %v12259_v48 = vadd.f32 %v1386_v39, %v1385_v50  ;;  %v11023_v56 = vpop.eup %11022  ;;  %v12366_v50 = vld [vmem:[#allocation5 + $0x24] ss:$16 sps:$4 sm:$0xff]   ;;  %v12368_v39 = vld [vmem:[#allocation5 + $0x2c] ss:$16 sps:$4 sm:$0xff]   ;;  %v12372_v13 = vld [vmem:[#allocation5 + $0x28] ss:$16 sps:$4 sm:$0xff]  }
 0x176   :  { %1916 = vmatpush1.bf16.msra.mxu0 %v11518_v0  ;;  %1957 = vmatpush1.bf16.msra.mxu1 %v11519_v46  ;;  %v12378_v0 = vld [vmem:[#allocation5 + $0x4] ss:$16 sps:$4 sm:$0xff]   ;;  %v12380_v46 = vld [vmem:[#allocation5 + $0xc] ss:$16 sps:$4 sm:$0xff]  }
 0x177   :  { %11024 = vtanh.f32 %v12259_v48  ;;  %1917 = vmatprep.subr.bf16.mxu0 %v11520_v14  ;;  %1958 = vmatprep.subr.bf16.mxu1 %v11521_v35  ;;  %v12382_v14 = vld [vmem:[#allocation5] ss:$16 sps:$4 sm:$0xff]   ;;  %v12384_v35 = vld [vmem:[#allocation5 + $0x8] ss:$16 sps:$4 sm:$0xff]  }
 0x17a   :  { %1918 = vmatpush1.bf16.msra.mxu0 %v11968_v16  ;;  %1959 = vmatpush1.bf16.msra.mxu1 %v11970_v17 }
 0x17b   :  { %1919 = vmatprep.subr.bf16.mxu0 %v11972_v18  ;;  %1960 = vmatprep.subr.bf16.mxu1 %v11974_v19  ;;  %v14863_v18 = vmov 0 }
 0x17c   :  { %v14864_v18 = vsel %vm12282_vm5, 4294967295, %v14863_v18 }
 0x17d   :  { %14865 = vst [vmem:[#allocation40_spill] sm:$0xff] %v14864_v18 }
 0x17e   :  { %1920 = vmatpush1.bf16.msra.mxu0 %v11976_v22  ;;  %1961 = vmatpush1.bf16.msra.mxu1 %v11978_v23  ;;  %v12294_v22 = vld [vmem:[#allocation5 + $0xe4] ss:$16 sps:$4 sm:$0xff]   ;;  %v12296_v23 = vld [vmem:[#allocation5 + $0xec] ss:$16 sps:$4 sm:$0xff]  }
 0x17f   :  { %1921 = vmatprep.subr.bf16.mxu0 %v11980_v24  ;;  %1962 = vmatprep.subr.bf16.mxu1 %v11982_v25  ;;  %v12298_v24 = vld [vmem:[#allocation5 + $0xe0] ss:$16 sps:$4 sm:$0xff]   ;;  %v12300_v25 = vld [vmem:[#allocation5 + $0xe8] ss:$16 sps:$4 sm:$0xff]  }
 0x182   :  { %1922 = vmatpush1.bf16.msra.mxu0 %v11988_v26  ;;  %1963 = vmatpush1.bf16.msra.mxu1 %v11990_v27  ;;  %v12306_v26 = vld [vmem:[#allocation5 + $0xc4] ss:$16 sps:$4 sm:$0xff]   ;;  %v12308_v27 = vld [vmem:[#allocation5 + $0xcc] ss:$16 sps:$4 sm:$0xff]  }
 0x183   :  { %1923 = vmatprep.subr.bf16.mxu0 %v11992_v28  ;;  %1964 = vmatprep.subr.bf16.mxu1 %v11994_v29  ;;  %v12310_v28 = vld [vmem:[#allocation5 + $0xc0] ss:$16 sps:$4 sm:$0xff]   ;;  %v12312_v29 = vld [vmem:[#allocation5 + $0xc8] ss:$16 sps:$4 sm:$0xff]  }
 0x184   :  { %v11025_v16 = vpop.eup %11024 }
 0x185   :  { %v12275_v17 = vmul.f32 %v11025_v16, %v11023_v56  ;;  %v12390_v56 = vld [vmem:[#allocation5 + $0x1e4] ss:$16 sps:$4 sm:$0xff]   ;;  %v12392_v16 = vld [vmem:[#allocation5 + $0x1ec] ss:$16 sps:$4 sm:$0xff]  }
 0x186   :  { %1924 = vmatpush1.bf16.msra.mxu0 %v12000_v30  ;;  %1965 = vmatpush1.bf16.msra.mxu1 %v12002_v63  ;;  %v12318_v30 = vld [vmem:[#allocation5 + $0xa4] ss:$16 sps:$4 sm:$0xff]   ;;  %v12320_v63 = vld [vmem:[#allocation5 + $0xac] ss:$16 sps:$4 sm:$0xff]  }
 0x187   :  { %14862 = vst [vmem:[#allocation39_spill] sm:$0xff] %v12275_v17  ;;  %v9697_v19 = vpack.c.bf16 %v12275_v17, %v12275_v17  ;;  %2226 = vmatprep.subr.bf16.mxu0 %v12294_v22  ;;  %2267 = vmatprep.subr.bf16.mxu1 %v12296_v23 }
 0x189   :  { %9698 = vmatmul.mubr.msk.bf16.vlgmr.msra.gmra.mxu0 %vm12282_vm5, %v9697_v19  ;;  %9701 = vmatmul.mubr.msk.bf16.vlgmr.msra.gmra.mxu1 %vm12282_vm5, %v9697_v19  ;;  %v1399_v19 = vunpack.c.l.bf16 %v12091_v57 }
 0x18a   :  { %2258 = vmatprep.mubr.bf16.mxu0 %v14861_v62  ;;  %2299 = vmatprep.mubr.bf16.mxu1 %v14861_v62 }
 0x18b   :  { %2227 = vmatpush1.bf16.msra.mxu0 %v12298_v24  ;;  %2268 = vmatpush1.bf16.msra.mxu1 %v12300_v25 }
 0x18c   :  { %2228 = vmatprep.subr.bf16.mxu0 %v12306_v26  ;;  %2269 = vmatprep.subr.bf16.mxu1 %v12308_v27 }
 0x18f   :  { %2229 = vmatpush1.bf16.msra.mxu0 %v12310_v28  ;;  %2270 = vmatpush1.bf16.msra.mxu1 %v12312_v29 }
 0x190   :  { %2230 = vmatprep.subr.bf16.mxu0 %v12318_v30  ;;  %2271 = vmatprep.subr.bf16.mxu1 %v12320_v63 }
 0x193   :  { %2231 = vmatpush1.bf16.msra.mxu0 %v12322_v47  ;;  %2272 = vmatpush1.bf16.msra.mxu1 %v12324_v59 }
 0x194   :  { %2232 = vmatprep.subr.bf16.mxu0 %v12330_v49  ;;  %2273 = vmatprep.subr.bf16.mxu1 %v12332_v42 }
 0x197   :  { %2233 = vmatpush1.bf16.msra.mxu0 %v12334_v1  ;;  %2274 = vmatpush1.bf16.msra.mxu1 %v12336_v11 }
 0x198   :  { %2234 = vmatprep.subr.bf16.mxu0 %v12342_v41  ;;  %2275 = vmatprep.subr.bf16.mxu1 %v12344_v38 }
 0x19b   :  { %2235 = vmatpush1.bf16.msra.mxu0 %v12346_v33  ;;  %2276 = vmatpush1.bf16.msra.mxu1 %v12348_v7 }
 0x19c   :  { %2236 = vmatprep.subr.bf16.mxu0 %v12354_v53  ;;  %2277 = vmatprep.subr.bf16.mxu1 %v12356_v21 }
 0x19f   :  { %2237 = vmatpush1.bf16.msra.mxu0 %v12358_v44  ;;  %2278 = vmatpush1.bf16.msra.mxu1 %v12360_v60 }
 0x1a0   :  { %2238 = vmatprep.subr.bf16.mxu0 %v12366_v50  ;;  %2279 = vmatprep.subr.bf16.mxu1 %v12368_v39 }
 0x1a3   :  { %2239 = vmatpush1.bf16.msra.mxu0 %v12370_v9  ;;  %2280 = vmatpush1.bf16.msra.mxu1 %v12372_v13 }
 0x1a4   :  { %2240 = vmatprep.subr.bf16.mxu0 %v12378_v0  ;;  %2281 = vmatprep.subr.bf16.mxu1 %v12380_v46 }
 0x1a7   :  { %2241 = vmatpush1.bf16.msra.mxu0 %v12382_v14  ;;  %2282 = vmatpush1.bf16.msra.mxu1 %v12384_v35 }
 0x1a8   :  { %2539 = vmatprep.subr.bf16.mxu0 %v12390_v56  ;;  %2580 = vmatprep.subr.bf16.mxu1 %v12392_v16 }
 0x229   :  { %v1630_v18 = vpop.f32.mrf.mxu0  ;;  %v1671_v34 = vpop.f32.mrf.mxu1 }
 0x22a   :  { %v1678_v45 = vadd.f32 %v1630_v18, %v1399_v19  ;;  %v1680_v36 = vadd.f32 %v1671_v34, %v1401_v54 }
 0x22b   :  { %v1632_v2 = vpop.f32.mrf.mxu0  ;;  %v1673_v4 = vpop.f32.mrf.mxu1 }
 0x22c   :  { %v9661_v3 = vmul.f32 -1.442695, %v1678_v45  ;;  %v1679_v12 = vadd.f32 %v1632_v2, %v1400_v55  ;;  %v1681_v15 = vadd.f32 %v1673_v4, %v1402_v20  ;;  %v1713_v20 = vunpack.c.h.bf16 %v12223_v37 }
 0x22d   :  { %v1634_v40 = vpop.f32.mrf.mxu0  ;;  %v1675_v52 = vpop.f32.mrf.mxu1 }
 0x22e   :  { %11026 = vpow2.f32 %v9661_v3  ;;  %v9662_v51 = vmul.f32 -1.442695, %v1679_v12  ;;  %v9663_v18 = vmul.f32 -1.442695, %v1681_v15  ;;  %v1712_v52 = vunpack.c.l.bf16 %v12223_v37 }
 0x22f   :  { %v1635_v61 = vpop.f32.mrf.mxu0  ;;  %v1676_v32 = vpop.f32.mrf.mxu1 }
 0x230   :  { %11028 = vpow2.f32 %v9662_v51 }
 0x231   :  { %11030 = vtanh.f32 %v1680_v36 }
 0x232   :  { %11032 = vpow2.f32 %v9663_v18 }
 0x23b   :  { %v11027_v19 = vpop.eup %11026 }
 0x23c   :  { %v1685_v57 = vadd.f32 1.0, %v11027_v19 }
 0x23d   :  { %v11029_v6 = vpop.eup %11028 }
 0x23e   :  { %11034 = vrcp.f32 %v1685_v57  ;;  %v1691_v40 = vadd.f32 1.0, %v11029_v6  ;;  %v11031_v2 = vpop.eup %11030  ;;  %v1078_v6 = vsel %vm770_vm2, %v12233_v10, 0.0  ;;  %v1715_v10 = vunpack.c.h.bf16 %v12225_v43 }
 0x23f   :  { %v11033_v3 = vpop.eup %11032 }
 0x240   :  { %11036 = vrcp.f32 %v1691_v40  ;;  %v1698_v54 = vadd.f32 1.0, %v11033_v3  ;;  %v1714_v3 = vunpack.c.l.bf16 %v12225_v43  ;;  %v12417_v43 = vld [vmem:[#allocation5 + $0x1e8] ss:$16 sps:$4 sm:$0xff]  }
 0x249   :  { %v1943_v32 = vpop.f32.mrf.mxu0  ;;  %v1984_v51 = vpop.f32.mrf.mxu1 }
 0x24a   :  { %v1991_v45 = vadd.f32 %v1943_v32, %v1712_v52 }
 0x24b   :  { %v11035_v58 = vpop.eup %11034  ;;  %v1945_v4 = vpop.f32.mrf.mxu0 }
 0x24c   :  { %v1986_v15 = vpop.f32.mrf.mxu1  ;;  %v1702_v55 = vmul.f32 %v11035_v58, %v11031_v2  ;;  %v9702_v12 = vmul.f32 -1.442695, %v1991_v45  ;;  %v1992_v61 = vadd.f32 %v1945_v4, %v1713_v20  ;;  %v1993_v45 = vadd.f32 %v1984_v51, %v1714_v3  ;;  %v12445_v3 = vld [vmem:[#allocation5 + $0x1a0] ss:$16 sps:$4 sm:$0xff]  }
 0x24d   :  { %v11037_v36 = vpop.eup %11036  ;;  %v1947_v34 = vpop.f32.mrf.mxu0  ;;  %v1994_v32 = vadd.f32 %v1986_v15, %v1715_v10  ;;  %v12415_v15 = vld [vmem:[#allocation5 + $0x1e0] ss:$16 sps:$4 sm:$0xff]  }
 0x24e   :  { %v1988_v18 = vpop.f32.mrf.mxu1  ;;  %v1701_v19 = vmul.f32 %v11037_v36, %v1078_v6  ;;  %11038 = vpow2.f32 %v9702_v12  ;;  %v9703_v57 = vmul.f32 -1.442695, %v1992_v61 }
 0x24f   :  { %v1948_v40 = vpop.f32.mrf.mxu0  ;;  %v9704_v20 = vmul.f32 -1.442695, %v1994_v32  ;;  %v12425_v18 = vld [vmem:[#allocation5 + $0x1c4] ss:$16 sps:$4 sm:$0xff]  }
 0x250   :  { %v1989_v52 = vpop.f32.mrf.mxu1  ;;  %v1703_v37 = vadd.f32 %v1702_v55, %v1701_v19  ;;  %11040 = vpow2.f32 %v9703_v57  ;;  %v12427_v19 = vld [vmem:[#allocation5 + $0x1cc] ss:$16 sps:$4 sm:$0xff]   ;;  %v12431_v57 = vld [vmem:[#allocation5 + $0x1c0] ss:$16 sps:$4 sm:$0xff]   ;;  %v12433_v40 = vld [vmem:[#allocation5 + $0x1c8] ss:$16 sps:$4 sm:$0xff]  }
 0x251   :  { %11042 = vrcp.f32 %v1698_v54  ;;  %v12437_v52 = vld [vmem:[#allocation5 + $0x1a4] ss:$16 sps:$4 sm:$0xff]  }
 0x252   :  { %11044 = vtanh.f32 %v1703_v37  ;;  %v12408_v2 = vsel %vm1398_vm6, %v1703_v37, %v1078_v6  ;;  %v1077_v6 = vsel %vm770_vm2, %v12242_v8, 0.0  ;;  %v12439_v37 = vld [vmem:[#allocation5 + $0x1ac] ss:$16 sps:$4 sm:$0xff]  }
 0x253   :  { %11046 = vtanh.f32 %v1993_v45  ;;  %v12447_v45 = vld [vmem:[#allocation5 + $0x1a8] ss:$16 sps:$4 sm:$0xff]  }
 0x254   :  { %11048 = vpow2.f32 %v9704_v20 }
 0x25b   :  { %v11039_v58 = vpop.eup %11038 }
 0x25c   :  { %v1998_v4 = vadd.f32 1.0, %v11039_v58  ;;  %v12451_v58 = vld [vmem:[#allocation5 + $0x184] ss:$16 sps:$4 sm:$0xff]  }
 0x25d   :  { %v11041_v12 = vpop.eup %11040 }
 0x25e   :  { %v11043_v55 = vpop.eup %11042  ;;  %11050 = vrcp.f32 %v1998_v4  ;;  %v2004_v61 = vadd.f32 1.0, %v11041_v12  ;;  %v12453_v4 = vld [vmem:[#allocation5 + $0x18c] ss:$16 sps:$4 sm:$0xff]  }
 0x25f   :  { %v11045_v36 = vpop.eup %11044  ;;  %14867 = vst [vmem:[#allocation42_spill] sm:$0xff] %v12453_v4 }
 0x260   :  { %11052 = vrcp.f32 %v2004_v61  ;;  %v1705_v54 = vmul.f32 %v11045_v36, %v11043_v55  ;;  %v11047_v10 = vpop.eup %11046  ;;  %v1391_v61 = vsel %vm1082_vm4, %v12259_v48, 0.0 }
 0x261   :  { %v11049_v32 = vpop.eup %11048 }
 0x262   :  { %v12421_v51 = vsel %vm1398_vm6, %v1705_v54, %v1077_v6  ;;  %v2011_v36 = vadd.f32 1.0, %v11049_v32  ;;  %v12460_v6 = vld [vmem:[#allocation5 + $0x180] ss:$16 sps:$4 sm:$0xff]  }
 0x263   :  { %14866 = vst [vmem:[#allocation41_spill] sm:$0xff] %v12421_v51  ;;  %v2033_v34 = vpack.c.bf16 %v12421_v51, %v12421_v51  ;;  %v12473_v32 = vld [vmem:[#allocation5 + $0x160] ss:$16 sps:$4 sm:$0xff]  }
 0x264   :  { %11054 = vrcp.f32 %v2011_v36  ;;  %14870 = vst [vmem:[#allocation45_spill] sm:$0xff] %v12473_v32  ;;  %v12489_v36 = vld [vmem:[#allocation5 + $0x140] ss:$16 sps:$4 sm:$0xff]  }
 0x265   :  { %2259 = vmatmul.mubr.bf16.vlgmr.msra.gmra.mxu0 %v2033_v34  ;;  %2300 = vmatmul.mubr.bf16.vlgmr.msra.gmra.mxu1 %v2033_v34  ;;  %v12462_v34 = vld [vmem:[#allocation5 + $0x188] ss:$16 sps:$4 sm:$0xff]   ;;  %14874 = vst [vmem:[#allocation49_spill] sm:$0xff] %v12489_v36 }
 0x266   :  { %2540 = vmatpush1.bf16.msra.mxu0 %v12415_v15  ;;  %2581 = vmatpush1.bf16.msra.mxu1 %v12417_v43 }
 0x267   :  { %2541 = vmatprep.subr.bf16.mxu0 %v12425_v18  ;;  %2582 = vmatprep.subr.bf16.mxu1 %v12427_v19 }
 0x268   :  { %2571 = vmatprep.mubr.bf16.mxu0 %v14861_v62  ;;  %2612 = vmatprep.mubr.bf16.mxu1 %v14861_v62 }
 0x26a   :  { %2542 = vmatpush1.bf16.msra.mxu0 %v12431_v57  ;;  %2583 = vmatpush1.bf16.msra.mxu1 %v12433_v40 }
 0x26b   :  { %v11051_v20 = vpop.eup %11050  ;;  %2543 = vmatprep.subr.bf16.mxu0 %v12437_v52  ;;  %2584 = vmatprep.subr.bf16.mxu1 %v12439_v37 }
 0x26c   :  { %v2015_v12 = vmul.f32 %v11051_v20, %v11047_v10  ;;  %v12466_v10 = vld [vmem:[#allocation5 + $0x164] ss:$16 sps:$4 sm:$0xff]   ;;  %v12468_v20 = vld [vmem:[#allocation5 + $0x16c] ss:$16 sps:$4 sm:$0xff]  }
 0x26d   :  { %v11053_v55 = vpop.eup %11052  ;;  %14868 = vst [vmem:[#allocation43_spill] sm:$0xff] %v12466_v10  ;;  %14869 = vst [vmem:[#allocation44_spill] sm:$0xff] %v12468_v20 }
 0x26e   :  { %v2014_v54 = vmul.f32 %v11053_v55, %v1391_v61  ;;  %2544 = vmatpush1.bf16.msra.mxu0 %v12445_v3  ;;  %2585 = vmatpush1.bf16.msra.mxu1 %v12447_v45  ;;  %v12475_v55 = vld [vmem:[#allocation5 + $0x168] ss:$16 sps:$4 sm:$0xff]  }
 0x26f   :  { %2545 = vmatprep.subr.bf16.mxu0 %v12451_v58  ;;  %2586 = vmatprep.subr.bf16.mxu1 %v12453_v4  ;;  %14871 = vst [vmem:[#allocation46_spill] sm:$0xff] %v12475_v55  ;;  %v12483_v4 = vld [vmem:[#allocation5 + $0x144] ss:$16 sps:$4 sm:$0xff]  }
 0x270   :  { %v2016_v48 = vadd.f32 %v2015_v12, %v2014_v54  ;;  %14872 = vst [vmem:[#allocation47_spill] sm:$0xff] %v12483_v4  ;;  %v12485_v12 = vld [vmem:[#allocation5 + $0x14c] ss:$16 sps:$4 sm:$0xff]   ;;  %v12491_v54 = vld [vmem:[#allocation5 + $0x148] ss:$16 sps:$4 sm:$0xff]  }
 0x271   :  { %14873 = vst [vmem:[#allocation48_spill] sm:$0xff] %v12485_v12  ;;  %14875 = vst [vmem:[#allocation50_spill] sm:$0xff] %v12491_v54 }
 0x272   :  { %11056 = vtanh.f32 %v2016_v48  ;;  %2546 = vmatpush1.bf16.msra.mxu0 %v12460_v6  ;;  %2587 = vmatpush1.bf16.msra.mxu1 %v12462_v34  ;;  %v12479_v8 = vsel %vm1711_vm7, %v2016_v48, %v1391_v61  ;;  %v12495_v61 = vld [vmem:[#allocation5 + $0x124] ss:$16 sps:$4 sm:$0xff]   ;;  %v12497_v48 = vld [vmem:[#allocation5 + $0x12c] ss:$16 sps:$4 sm:$0xff]  }
 0x273   :  { %2547 = vmatprep.subr.bf16.mxu0 %v12466_v10  ;;  %2588 = vmatprep.subr.bf16.mxu1 %v12468_v20  ;;  %14876 = vst [vmem:[#allocation51_spill] sm:$0xff] %v12495_v61  ;;  %14877 = vst [vmem:[#allocation52_spill] sm:$0xff] %v12497_v48  ;;  %v12501_v20 = vld [vmem:[#allocation5 + $0x120] ss:$16 sps:$4 sm:$0xff]  }
 0x274   :  { %14878 = vst [vmem:[#allocation53_spill] sm:$0xff] %v12501_v20 }
 0x276   :  { %2548 = vmatpush1.bf16.msra.mxu0 %v12473_v32  ;;  %2589 = vmatpush1.bf16.msra.mxu1 %v12475_v55  ;;  %v12503_v32 = vld [vmem:[#allocation5 + $0x128] ss:$16 sps:$4 sm:$0xff]   ;;  %v12507_v55 = vld [vmem:[#allocation5 + $0x104] ss:$16 sps:$4 sm:$0xff]  }
 0x277   :  { %2549 = vmatprep.subr.bf16.mxu0 %v12483_v4  ;;  %2590 = vmatprep.subr.bf16.mxu1 %v12485_v12  ;;  %14879 = vst [vmem:[#allocation54_spill] sm:$0xff] %v12503_v32  ;;  %v12509_v4 = vld [vmem:[#allocation5 + $0x10c] ss:$16 sps:$4 sm:$0xff]   ;;  %v11055_v12 = vpop.eup %11054 }
 0x27a   :  { %2550 = vmatpush1.bf16.msra.mxu0 %v12489_v36  ;;  %2591 = vmatpush1.bf16.msra.mxu1 %v12491_v54  ;;  %v12513_v36 = vld [vmem:[#allocation5 + $0x100] ss:$16 sps:$4 sm:$0xff]   ;;  %v12515_v54 = vld [vmem:[#allocation5 + $0x108] ss:$16 sps:$4 sm:$0xff]  }
 0x27b   :  { %2551 = vmatprep.subr.bf16.mxu0 %v12495_v61  ;;  %2592 = vmatprep.subr.bf16.mxu1 %v12497_v48  ;;  %v1390_v48 = vsel %vm1082_vm4, %v12275_v17, 0.0 }
 0x27e   :  { %2552 = vmatpush1.bf16.msra.mxu0 %v12501_v20  ;;  %2593 = vmatpush1.bf16.msra.mxu1 %v12503_v32 }
 0x27f   :  { %v11057_v10 = vpop.eup %11056  ;;  %2553 = vmatprep.subr.bf16.mxu0 %v12507_v55  ;;  %2594 = vmatprep.subr.bf16.mxu1 %v12509_v4 }
 0x280   :  { %v2018_v61 = vmul.f32 %v11057_v10, %v11055_v12 }
 0x282   :  { %2554 = vmatpush1.bf16.msra.mxu0 %v12513_v36  ;;  %2595 = vmatpush1.bf16.msra.mxu1 %v12515_v54  ;;  %v12526_v32 = vsel %vm1711_vm7, %v2018_v61, %v1390_v48 }
 0x283   :  { %14880 = vst [vmem:[#allocation55_spill] sm:$0xff] %v12526_v32  ;;  %v2346_v20 = vpack.c.bf16 %v12526_v32, %v12526_v32  ;;  %2856 = vmatprep.subr.bf16.mxu0 %v12294_v22  ;;  %2897 = vmatprep.subr.bf16.mxu1 %v12296_v23  ;;  %v2029_v22 = vunpack.c.l.bf16 %v12099_v5 }
 0x285   :  { %2572 = vmatmul.mubr.bf16.vlgmr.msra.gmra.mxu0 %v2346_v20  ;;  %2613 = vmatmul.mubr.bf16.vlgmr.msra.gmra.mxu1 %v2346_v20 }
 0x286   :  { %2857 = vmatpush1.bf16.msra.mxu0 %v12298_v24  ;;  %2898 = vmatpush1.bf16.msra.mxu1 %v12300_v25 }
 0x287   :  { %2858 = vmatprep.subr.bf16.mxu0 %v12306_v26  ;;  %2899 = vmatprep.subr.bf16.mxu1 %v12308_v27  ;;  %v2030_v26 = vunpack.c.h.bf16 %v12099_v5 }
 0x288   :  { %2888 = vmatprep.mubr.bf16.mxu0 %v14861_v62  ;;  %2929 = vmatprep.mubr.bf16.mxu1 %v14861_v62 }
 0x28a   :  { %2859 = vmatpush1.bf16.msra.mxu0 %v12310_v28  ;;  %2900 = vmatpush1.bf16.msra.mxu1 %v12312_v29 }
 0x28b   :  { %2860 = vmatprep.subr.bf16.mxu0 %v12318_v30  ;;  %2901 = vmatprep.subr.bf16.mxu1 %v12320_v63 }
 0x28e   :  { %2861 = vmatpush1.bf16.msra.mxu0 %v12322_v47  ;;  %2902 = vmatpush1.bf16.msra.mxu1 %v12324_v59 }
 0x28f   :  { %2862 = vmatprep.subr.bf16.mxu0 %v12330_v49  ;;  %2903 = vmatprep.subr.bf16.mxu1 %v12332_v42 }
 0x292   :  { %2863 = vmatpush1.bf16.msra.mxu0 %v12334_v1  ;;  %2904 = vmatpush1.bf16.msra.mxu1 %v12336_v11  ;;  %v14881_v1 = vld [vmem:[#allocation13_spill] sm:$0xff] }
 0x293   :  { %2864 = vmatprep.subr.bf16.mxu0 %v12342_v41  ;;  %2905 = vmatprep.subr.bf16.mxu1 %v12344_v38  ;;  %v2032_v11 = vunpack.c.h.bf16 %v14881_v1  ;;  %v2031_v38 = vunpack.c.l.bf16 %v14881_v1 }
 0x296   :  { %2865 = vmatpush1.bf16.msra.mxu0 %v12346_v33  ;;  %2906 = vmatpush1.bf16.msra.mxu1 %v12348_v7 }
 0x297   :  { %2866 = vmatprep.subr.bf16.mxu0 %v12354_v53  ;;  %2907 = vmatprep.subr.bf16.mxu1 %v12356_v21 }
 0x29a   :  { %2867 = vmatpush1.bf16.msra.mxu0 %v12358_v44  ;;  %2908 = vmatpush1.bf16.msra.mxu1 %v12360_v60  ;;  %v14882_v60 = vld [vmem:[#allocation34_spill] sm:$0xff] }
 0x29b   :  { %2868 = vmatprep.subr.bf16.mxu0 %v12366_v50  ;;  %2909 = vmatprep.subr.bf16.mxu1 %v12368_v39  ;;  %v2342_v50 = vunpack.c.l.bf16 %v14882_v60 }
 0x29e   :  { %2869 = vmatpush1.bf16.msra.mxu0 %v12370_v9  ;;  %2910 = vmatpush1.bf16.msra.mxu1 %v12372_v13 }
 0x29f   :  { %2870 = vmatprep.subr.bf16.mxu0 %v12378_v0  ;;  %2911 = vmatprep.subr.bf16.mxu1 %v12380_v46 }
 0x2a2   :  { %2871 = vmatpush1.bf16.msra.mxu0 %v12382_v14  ;;  %2912 = vmatpush1.bf16.msra.mxu1 %v12384_v35  ;;  %v2343_v14 = vunpack.c.h.bf16 %v14882_v60 }
 0x2a3   :  { %3169 = vmatprep.subr.bf16.mxu0 %v12390_v56  ;;  %3210 = vmatprep.subr.bf16.mxu1 %v12392_v16 }
 0x325   :  { %v2260_v23 = vpop.f32.mrf.mxu0  ;;  %v2301_v24 = vpop.f32.mrf.mxu1 }
 0x326   :  { %v2308_v25 = vadd.f32 %v2260_v23, %v2029_v22  ;;  %v2310_v33 = vadd.f32 %v2301_v24, %v2031_v38 }
 0x327   :  { %v2262_v27 = vpop.f32.mrf.mxu0  ;;  %v2303_v28 = vpop.f32.mrf.mxu1 }
 0x328   :  { %v9737_v29 = vmul.f32 -1.442695, %v2308_v25  ;;  %v2309_v30 = vadd.f32 %v2262_v27, %v2030_v26  ;;  %v2311_v41 = vadd.f32 %v2303_v28, %v2032_v11 }
 0x329   :  { %v2264_v63 = vpop.f32.mrf.mxu0  ;;  %v2305_v47 = vpop.f32.mrf.mxu1 }
 0x32a   :  { %11058 = vpow2.f32 %v9737_v29  ;;  %v9738_v59 = vmul.f32 -1.442695, %v2309_v30  ;;  %v9739_v7 = vmul.f32 -1.442695, %v2311_v41  ;;  %v14883_v30 = vld [vmem:[#allocation35_spill] sm:$0xff] }
 0x32b   :  { %v2265_v49 = vpop.f32.mrf.mxu0  ;;  %v2306_v42 = vpop.f32.mrf.mxu1  ;;  %v2345_v63 = vunpack.c.h.bf16 %v14883_v30 }
 0x32c   :  { %11060 = vpow2.f32 %v9738_v59  ;;  %v2344_v59 = vunpack.c.l.bf16 %v14883_v30  ;;  %v12684_v30 = vld [vmem:[#allocation5 + $0x64] ss:$16 sps:$4 sm:$0xff]  }
 0x32d   :  { %11062 = vtanh.f32 %v2310_v33 }
 0x32e   :  { %11064 = vpow2.f32 %v9739_v7 }
 0x337   :  { %v11059_v53 = vpop.eup %11058 }
 0x338   :  { %v2315_v5 = vadd.f32 1.0, %v11059_v53 }
 0x339   :  { %v11061_v21 = vpop.eup %11060 }
 0x33a   :  { %11066 = vrcp.f32 %v2315_v5  ;;  %v2321_v44 = vadd.f32 1.0, %v11061_v21  ;;  %v11063_v39 = vpop.eup %11062 }
 0x33b   :  { %v11065_v0 = vpop.eup %11064 }
 0x33c   :  { %11068 = vrcp.f32 %v2321_v44  ;;  %v2328_v48 = vadd.f32 1.0, %v11065_v0  ;;  %v14896_v0 = vld [vmem:[#allocation53_spill] sm:$0xff] }
 0x345   :  { %v2573_v9 = vpop.f32.mrf.mxu0  ;;  %v2614_v13 = vpop.f32.mrf.mxu1 }
 0x346   :  { %v2621_v46 = vadd.f32 %v2573_v9, %v2342_v50  ;;  %v2623_v49 = vadd.f32 %v2614_v13, %v2344_v59  ;;  %v14885_v50 = vld [vmem:[#allocation42_spill] sm:$0xff]  ;;  %v14894_v9 = vld [vmem:[#allocation51_spill] sm:$0xff] }
 0x347   :  { %v11067_v35 = vpop.eup %11066  ;;  %v2575_v56 = vpop.f32.mrf.mxu0  ;;  %v12690_v59 = vld [vmem:[#allocation5 + $0x68] ss:$16 sps:$4 sm:$0xff]  }
 0x348   :  { %v2616_v16 = vpop.f32.mrf.mxu1  ;;  %v2332_v10 = vmul.f32 %v11067_v35, %v11063_v39  ;;  %v9772_v20 = vmul.f32 -1.442695, %v2621_v46  ;;  %v2622_v12 = vadd.f32 %v2575_v56, %v2343_v14  ;;  %v14891_v39 = vld [vmem:[#allocation48_spill] sm:$0xff]  ;;  %v14897_v46 = vld [vmem:[#allocation54_spill] sm:$0xff] }
 0x349   :  { %v11069_v61 = vpop.eup %11068  ;;  %v2577_v22 = vpop.f32.mrf.mxu0  ;;  %v2624_v47 = vadd.f32 %v2616_v16, %v2345_v63  ;;  %v12686_v63 = vld [vmem:[#allocation5 + $0x6c] ss:$16 sps:$4 sm:$0xff]  }
 0x34a   :  { %v2618_v23 = vpop.f32.mrf.mxu1  ;;  %v2331_v24 = vmul.f32 %v11069_v61, %v12408_v2  ;;  %11070 = vpow2.f32 %v9772_v20  ;;  %v9773_v25 = vmul.f32 -1.442695, %v2622_v12  ;;  %v12650_v20 = vld [vmem:[#allocation5 + $0xcc] ss:$16 sps:$4 sm:$0xff]   ;;  %v12652_v12 = vld [vmem:[#allocation5 + $0xc0] ss:$16 sps:$4 sm:$0xff]  }
 0x34b   :  { %v2578_v26 = vpop.f32.mrf.mxu0  ;;  %v9774_v42 = vmul.f32 -1.442695, %v2624_v47  ;;  %v12654_v61 = vld [vmem:[#allocation5 + $0xc8] ss:$16 sps:$4 sm:$0xff]   ;;  %v12662_v22 = vld [vmem:[#allocation5 + $0xac] ss:$16 sps:$4 sm:$0xff]  }
 0x34c   :  { %v2619_v27 = vpop.f32.mrf.mxu1  ;;  %v2333_v28 = vadd.f32 %v2332_v10, %v2331_v24  ;;  %11072 = vpow2.f32 %v9773_v25  ;;  %v12648_v10 = vld [vmem:[#allocation5 + $0xc4] ss:$16 sps:$4 sm:$0xff]   ;;  %v12664_v23 = vld [vmem:[#allocation5 + $0xa0] ss:$16 sps:$4 sm:$0xff]   ;;  %v12666_v24 = vld [vmem:[#allocation5 + $0xa8] ss:$16 sps:$4 sm:$0xff]  }
 0x34d   :  { %11074 = vrcp.f32 %v2328_v48  ;;  %v12660_v48 = vld [vmem:[#allocation5 + $0xa4] ss:$16 sps:$4 sm:$0xff]   ;;  %v12674_v26 = vld [vmem:[#allocation5 + $0x8c] ss:$16 sps:$4 sm:$0xff]   ;;  %v12676_v27 = vld [vmem:[#allocation5 + $0x80] ss:$16 sps:$4 sm:$0xff]  }
 0x34e   :  { %11076 = vtanh.f32 %v2333_v28  ;;  %v12577_v29 = vsel %vm2028_vm8, %v2333_v28, %v12408_v2  ;;  %v12672_v25 = vld [vmem:[#allocation5 + $0x84] ss:$16 sps:$4 sm:$0xff]   ;;  %v12678_v28 = vld [vmem:[#allocation5 + $0x88] ss:$16 sps:$4 sm:$0xff]   ;;  %v12688_v47 = vld [vmem:[#allocation5 + $0x60] ss:$16 sps:$4 sm:$0xff]  }
 0x34f   :  { %11078 = vtanh.f32 %v2623_v49  ;;  %v12696_v49 = vld [vmem:[#allocation5 + $0x44] ss:$16 sps:$4 sm:$0xff]  }
 0x350   :  { %11080 = vpow2.f32 %v9774_v42  ;;  %v12698_v42 = vld [vmem:[#allocation5 + $0x4c] ss:$16 sps:$4 sm:$0xff]  }
 0x357   :  { %v11071_v1 = vpop.eup %11070 }
 0x358   :  { %v2628_v11 = vadd.f32 1.0, %v11071_v1  ;;  %v12700_v1 = vld [vmem:[#allocation5 + $0x40] ss:$16 sps:$4 sm:$0xff]  }
 0x359   :  { %v11073_v41 = vpop.eup %11072 }
 0x35a   :  { %v11075_v38 = vpop.eup %11074  ;;  %11082 = vrcp.f32 %v2628_v11  ;;  %v2634_v33 = vadd.f32 1.0, %v11073_v41  ;;  %v12702_v11 = vld [vmem:[#allocation5 + $0x48] ss:$16 sps:$4 sm:$0xff]   ;;  %v12708_v41 = vld [vmem:[#allocation5 + $0x24] ss:$16 sps:$4 sm:$0xff]  }
 0x35b   :  { %v11077_v7 = vpop.eup %11076 }
 0x35c   :  { %11084 = vrcp.f32 %v2634_v33  ;;  %v2335_v53 = vmul.f32 %v11077_v7, %v11075_v38  ;;  %v11079_v21 = vpop.eup %11078  ;;  %v12710_v38 = vld [vmem:[#allocation5 + $0x2c] ss:$16 sps:$4 sm:$0xff]   ;;  %v12712_v33 = vld [vmem:[#allocation5 + $0x20] ss:$16 sps:$4 sm:$0xff]   ;;  %v12714_v7 = vld [vmem:[#allocation5 + $0x28] ss:$16 sps:$4 sm:$0xff]  }
 0x35d   :  { %v11081_v44 = vpop.eup %11080 }
 0x35e   :  { %v12584_v2 = vsel %vm2028_vm8, %v2335_v53, %v12421_v51  ;;  %v12720_v53 = vld [vmem:[#allocation5 + $0x4] ss:$16 sps:$4 sm:$0xff]   ;;  %v12810_v51 = vld [vmem:[#allocation5 + $0x16c] ss:$16 sps:$4 sm:$0xff]  }
 0x35f   :  { %14884 = vst [vmem:[#allocation13_spill] sm:$0xff] %v12584_v2  ;;  %v2663_v5 = vpack.c.bf16 %v12584_v2, %v12584_v2 }
 0x361   :  { %2889 = vmatmul.mubr.bf16.vlgmr.msra.gmra.mxu0 %v2663_v5  ;;  %2930 = vmatmul.mubr.bf16.vlgmr.msra.gmra.mxu1 %v2663_v5  ;;  %v12722_v5 = vld [vmem:[#allocation5 + $0xc] ss:$16 sps:$4 sm:$0xff]  }
 0x362   :  { %3170 = vmatpush1.bf16.msra.mxu0 %v12415_v15  ;;  %3211 = vmatpush1.bf16.msra.mxu1 %v12417_v43 }
 0x363   :  { %3171 = vmatprep.subr.bf16.mxu0 %v12425_v18  ;;  %3212 = vmatprep.subr.bf16.mxu1 %v12427_v19  ;;  %v2641_v18 = vadd.f32 1.0, %v11081_v44  ;;  %v12726_v44 = vld [vmem:[#allocation5 + $0x8] ss:$16 sps:$4 sm:$0xff]  }
 0x364   :  { %3201 = vmatprep.mubr.bf16.mxu0 %v14861_v62  ;;  %3242 = vmatprep.mubr.bf16.mxu1 %v14861_v62 }
 0x365   :  { %11086 = vrcp.f32 %v2641_v18 }
 0x366   :  { %3172 = vmatpush1.bf16.msra.mxu0 %v12431_v57  ;;  %3213 = vmatpush1.bf16.msra.mxu1 %v12433_v40 }
 0x367   :  { %v11083_v60 = vpop.eup %11082  ;;  %3173 = vmatprep.subr.bf16.mxu0 %v12437_v52  ;;  %3214 = vmatprep.subr.bf16.mxu1 %v12439_v37  ;;  %v14886_v52 = vld [vmem:[#allocation43_spill] sm:$0xff]  ;;  %v14887_v37 = vld [vmem:[#allocation44_spill] sm:$0xff] }
 0x368   :  { %v2645_v15 = vmul.f32 %v11083_v60, %v11079_v21  ;;  %v12724_v21 = vld [vmem:[#allocation5] ss:$16 sps:$4 sm:$0xff]   ;;  %v12732_v60 = vld [vmem:[#allocation5 + $0x1e4] ss:$16 sps:$4 sm:$0xff]   ;;  %14906 = vst [vmem:[#allocation44_spill] sm:$0xff] %v12810_v51 }
 0x369   :  { %v11085_v43 = vpop.eup %11084 }
 0x36a   :  { %v2644_v19 = vmul.f32 %v11085_v43, %v12479_v8  ;;  %3174 = vmatpush1.bf16.msra.mxu0 %v12445_v3  ;;  %3215 = vmatpush1.bf16.msra.mxu1 %v12447_v45  ;;  %v14888_v3 = vld [vmem:[#allocation45_spill] sm:$0xff]  ;;  %v14889_v45 = vld [vmem:[#allocation46_spill] sm:$0xff] }
 0x36b   :  { %3175 = vmatprep.subr.bf16.mxu0 %v12451_v58  ;;  %3216 = vmatprep.subr.bf16.mxu1 %v14885_v50  ;;  %v14890_v58 = vld [vmem:[#allocation47_spill] sm:$0xff]  ;;  %v14899_v43 = vld [vmem:[#allocation14_spill] sm:$0xff] }
 0x36c   :  { %v2646_v57 = vadd.f32 %v2645_v15, %v2644_v19  ;;  %v12734_v15 = vld [vmem:[#allocation5 + $0x1ec] ss:$16 sps:$4 sm:$0xff]   ;;  %v2659_v18 = vunpack.c.l.bf16 %v14899_v43 }
 0x36e   :  { %11088 = vtanh.f32 %v2646_v57  ;;  %3176 = vmatpush1.bf16.msra.mxu0 %v12460_v6  ;;  %3217 = vmatpush1.bf16.msra.mxu1 %v12462_v34  ;;  %v12609_v40 = vsel %vm2341_vm9, %v2646_v57, %v12479_v8  ;;  %v14892_v6 = vld [vmem:[#allocation49_spill] sm:$0xff]  ;;  %v14893_v34 = vld [vmem:[#allocation50_spill] sm:$0xff]  ;;  %v14895_v8 = vld [vmem:[#allocation52_spill] sm:$0xff] }
 0x36f   :  { %3177 = vmatprep.subr.bf16.mxu0 %v14886_v52  ;;  %3218 = vmatprep.subr.bf16.mxu1 %v14887_v37  ;;  %v2660_v52 = vunpack.c.h.bf16 %v14899_v43  ;;  %14912 = vst [vmem:[#allocation50_spill] sm:$0xff] %v12834_v31 }
 0x372   :  { %3178 = vmatpush1.bf16.msra.mxu0 %v14888_v3  ;;  %3219 = vmatpush1.bf16.msra.mxu1 %v14889_v45  ;;  %v11087_v13 = vpop.eup %11086 }
 0x373   :  { %3179 = vmatprep.subr.bf16.mxu0 %v14890_v58  ;;  %3220 = vmatprep.subr.bf16.mxu1 %v14891_v39 }
 0x376   :  { %3180 = vmatpush1.bf16.msra.mxu0 %v14892_v6  ;;  %3221 = vmatpush1.bf16.msra.mxu1 %v14893_v34 }
 0x377   :  { %3181 = vmatprep.subr.bf16.mxu0 %v14894_v9  ;;  %3222 = vmatprep.subr.bf16.mxu1 %v14895_v8 }
 0x37a   :  { %3182 = vmatpush1.bf16.msra.mxu0 %v14896_v0  ;;  %3223 = vmatpush1.bf16.msra.mxu1 %v14897_v46 }
 0x37b   :  { %v11089_v14 = vpop.eup %11088  ;;  %3183 = vmatprep.subr.bf16.mxu0 %v12507_v55  ;;  %3224 = vmatprep.subr.bf16.mxu1 %v12509_v4  ;;  %v12636_v4 = vld [vmem:[#allocation5 + $0xe4] ss:$16 sps:$4 sm:$0xff]   ;;  %v12638_v55 = vld [vmem:[#allocation5 + $0xec] ss:$16 sps:$4 sm:$0xff]  }
 0x37c   :  { %v2648_v35 = vmul.f32 %v11089_v14, %v11087_v13  ;;  %v14900_v13 = vld [vmem:[#allocation15_spill] sm:$0xff] }
 0x37d   :  { %v2662_v0 = vunpack.c.h.bf16 %v14900_v13  ;;  %v2661_v14 = vunpack.c.l.bf16 %v14900_v13 }
 0x37e   :  { %3184 = vmatpush1.bf16.msra.mxu0 %v12513_v36  ;;  %3225 = vmatpush1.bf16.msra.mxu1 %v12515_v54  ;;  %v12630_v56 = vsel %vm2341_vm9, %v2648_v35, %v12526_v32  ;;  %v12640_v36 = vld [vmem:[#allocation5 + $0xe0] ss:$16 sps:$4 sm:$0xff]   ;;  %v12642_v54 = vld [vmem:[#allocation5 + $0xe8] ss:$16 sps:$4 sm:$0xff]  }
 0x37f   :  { %14898 = vst [vmem:[#allocation34_spill] sm:$0xff] %v12630_v56  ;;  %v2976_v16 = vpack.c.bf16 %v12630_v56, %v12630_v56  ;;  %3485 = vmatprep.subr.bf16.mxu0 %v12636_v4  ;;  %3526 = vmatprep.subr.bf16.mxu1 %v12638_v55  ;;  %v12804_v32 = vld [vmem:[#allocation5 + $0x188] ss:$16 sps:$4 sm:$0xff]  }
 0x381   :  { %3202 = vmatmul.mubr.bf16.vlgmr.msra.gmra.mxu0 %v2976_v16  ;;  %3243 = vmatmul.mubr.bf16.vlgmr.msra.gmra.mxu1 %v2976_v16 }
 0x382   :  { %3517 = vmatprep.mubr.bf16.mxu0 %v14861_v62  ;;  %3558 = vmatprep.mubr.bf16.mxu1 %v14861_v62 }
 0x383   :  { %3486 = vmatpush1.bf16.msra.mxu0 %v12640_v36  ;;  %3527 = vmatpush1.bf16.msra.mxu1 %v12642_v54 }
 0x384   :  { %3487 = vmatprep.subr.bf16.mxu0 %v12648_v10  ;;  %3528 = vmatprep.subr.bf16.mxu1 %v12650_v20 }
 0x387   :  { %3488 = vmatpush1.bf16.msra.mxu0 %v12652_v12  ;;  %3529 = vmatpush1.bf16.msra.mxu1 %v12654_v61 }
 0x388   :  { %3489 = vmatprep.subr.bf16.mxu0 %v12660_v48  ;;  %3530 = vmatprep.subr.bf16.mxu1 %v12662_v22 }
 0x38b   :  { %3490 = vmatpush1.bf16.msra.mxu0 %v12664_v23  ;;  %3531 = vmatpush1.bf16.msra.mxu1 %v12666_v24 }
 0x38c   :  { %3491 = vmatprep.subr.bf16.mxu0 %v12672_v25  ;;  %3532 = vmatprep.subr.bf16.mxu1 %v12674_v26 }
 0x38f   :  { %3492 = vmatpush1.bf16.msra.mxu0 %v12676_v27  ;;  %3533 = vmatpush1.bf16.msra.mxu1 %v12678_v28 }
 0x390   :  { %3493 = vmatprep.subr.bf16.mxu0 %v12684_v30  ;;  %3534 = vmatprep.subr.bf16.mxu1 %v12686_v63 }
 0x393   :  { %3494 = vmatpush1.bf16.msra.mxu0 %v12688_v47  ;;  %3535 = vmatpush1.bf16.msra.mxu1 %v12690_v59 }
 0x394   :  { %3495 = vmatprep.subr.bf16.mxu0 %v12696_v49  ;;  %3536 = vmatprep.subr.bf16.mxu1 %v12698_v42 }
 0x397   :  { %3496 = vmatpush1.bf16.msra.mxu0 %v12700_v1  ;;  %3537 = vmatpush1.bf16.msra.mxu1 %v12702_v11 }
 0x398   :  { %3497 = vmatprep.subr.bf16.mxu0 %v12708_v41  ;;  %3538 = vmatprep.subr.bf16.mxu1 %v12710_v38 }
 0x39b   :  { %3498 = vmatpush1.bf16.msra.mxu0 %v12712_v33  ;;  %3539 = vmatpush1.bf16.msra.mxu1 %v12714_v7 }
 0x39c   :  { %3499 = vmatprep.subr.bf16.mxu0 %v12720_v53  ;;  %3540 = vmatprep.subr.bf16.mxu1 %v12722_v5 }
 0x39f   :  { %3500 = vmatpush1.bf16.msra.mxu0 %v12724_v21  ;;  %3541 = vmatpush1.bf16.msra.mxu1 %v12726_v44 }
 0x3a0   :  { %3797 = vmatprep.subr.bf16.mxu0 %v12732_v60  ;;  %3838 = vmatprep.subr.bf16.mxu1 %v12734_v15 }
 0x421   :  { %v2890_v19 = vpop.f32.mrf.mxu0  ;;  %v2931_v50 = vpop.f32.mrf.mxu1 }
 0x422   :  { %v2938_v57 = vadd.f32 %v2890_v19, %v2659_v18  ;;  %v2940_v35 = vadd.f32 %v2931_v50, %v2661_v14 }
 0x423   :  { %v2892_v37 = vpop.f32.mrf.mxu0  ;;  %v2933_v3 = vpop.f32.mrf.mxu1 }
 0x424   :  { %v9807_v45 = vmul.f32 -1.442695, %v2938_v57  ;;  %v2939_v58 = vadd.f32 %v2892_v37, %v2660_v52  ;;  %v2941_v46 = vadd.f32 %v2933_v3, %v2662_v0  ;;  %v14901_v52 = vld [vmem:[#allocation32_spill] sm:$0xff] }
 0x425   :  { %v2894_v39 = vpop.f32.mrf.mxu0  ;;  %v2935_v6 = vpop.f32.mrf.mxu1  ;;  %v2972_v37 = vunpack.c.l.bf16 %v14901_v52  ;;  %v2973_v3 = vunpack.c.h.bf16 %v14901_v52  ;;  %v12748_v52 = vld [vmem:[%s14614_s7] sm:$0xff] }
 0x426   :  { %11090 = vpow2.f32 %v9807_v45  ;;  %v9808_v34 = vmul.f32 -1.442695, %v2939_v58  ;;  %v9809_v16 = vmul.f32 -1.442695, %v2941_v46  ;;  %14902 = vst [vmem:[#allocation35_spill] sm:$0xff] %v12748_v52  ;;  %vm2658_vm10 = vcmp.gt.s32.totalorder %v12748_v52, 3 }
 0x427   :  { %v2895_v9 = vpop.f32.mrf.mxu0  ;;  %v2936_v8 = vpop.f32.mrf.mxu1  ;;  %vm2971_vm11 = vcmp.gt.s32.totalorder %v12748_v52, 4 }
 0x428   :  { %11092 = vpow2.f32 %v9808_v34 }
 0x429   :  { %11094 = vtanh.f32 %v2940_v35 }
 0x42a   :  { %11096 = vpow2.f32 %v9809_v16 }
 0x433   :  { %v11091_v18 = vpop.eup %11090 }
 0x434   :  { %v2945_v43 = vadd.f32 1.0, %v11091_v18 }
 0x435   :  { %v11093_v19 = vpop.eup %11092 }
 0x436   :  { %11098 = vrcp.f32 %v2945_v43  ;;  %v2951_v57 = vadd.f32 1.0, %v11093_v19  ;;  %v11095_v45 = vpop.eup %11094 }
 0x437   :  { %v11097_v6 = vpop.eup %11096 }
 0x438   :  { %11100 = vrcp.f32 %v2951_v57  ;;  %v2958_v35 = vadd.f32 1.0, %v11097_v6 }
 0x441   :  { %v3203_v58 = vpop.f32.mrf.mxu0  ;;  %v3244_v39 = vpop.f32.mrf.mxu1 }
 0x442   :  { %v3251_v34 = vadd.f32 %v3203_v58, %v2972_v37  ;;  %v14903_v58 = vld [vmem:[#allocation33_spill] sm:$0xff] }
 0x443   :  { %v11099_v9 = vpop.eup %11098  ;;  %v3205_v50 = vpop.f32.mrf.mxu0  ;;  %v2975_v6 = vunpack.c.h.bf16 %v14903_v58 }
 0x444   :  { %v3246_v8 = vpop.f32.mrf.mxu1  ;;  %v2962_v13 = vmul.f32 %v11099_v9, %v11095_v45  ;;  %v9842_v0 = vmul.f32 -1.442695, %v3251_v34  ;;  %v3252_v46 = vadd.f32 %v3205_v50, %v2973_v3 }
 0x445   :  { %v11101_v14 = vpop.eup %11100  ;;  %v3207_v16 = vpop.f32.mrf.mxu0  ;;  %v3254_v34 = vadd.f32 %v3246_v8, %v2975_v6  ;;  %v12783_v6 = vld [vmem:[#allocation5 + $0x1ac] ss:$16 sps:$4 sm:$0xff]  }
 0x446   :  { %v3248_v18 = vpop.f32.mrf.mxu1  ;;  %v2961_v43 = vmul.f32 %v11101_v14, %v12577_v29  ;;  %11102 = vpow2.f32 %v9842_v0  ;;  %v9843_v19 = vmul.f32 -1.442695, %v3252_v46 }
 0x447   :  { %v3208_v57 = vpop.f32.mrf.mxu0  ;;  %v9844_v9 = vmul.f32 -1.442695, %v3254_v34  ;;  %v12760_v18 = vld [vmem:[#allocation5 + $0x1e8] ss:$16 sps:$4 sm:$0xff]  }
 0x448   :  { %v3249_v17 = vpop.f32.mrf.mxu1  ;;  %v2963_v37 = vadd.f32 %v2962_v13, %v2961_v43  ;;  %11104 = vpow2.f32 %v9843_v19  ;;  %v12769_v43 = vld [vmem:[#allocation5 + $0x1c4] ss:$16 sps:$4 sm:$0xff]   ;;  %v12771_v19 = vld [vmem:[#allocation5 + $0x1cc] ss:$16 sps:$4 sm:$0xff]   ;;  %v12775_v57 = vld [vmem:[#allocation5 + $0x1c0] ss:$16 sps:$4 sm:$0xff]  }
 0x449   :  { %11106 = vrcp.f32 %v2958_v35  ;;  %v2974_v17 = vunpack.c.l.bf16 %v14903_v58  ;;  %v12781_v58 = vld [vmem:[#allocation5 + $0x1a4] ss:$16 sps:$4 sm:$0xff]  }
 0x44a   :  { %11108 = vtanh.f32 %v2963_v37  ;;  %v12754_v45 = vsel %vm2658_vm10, %v2963_v37, %v12577_v29  ;;  %v12758_v29 = vld [vmem:[#allocation5 + $0x1e0] ss:$16 sps:$4 sm:$0xff]   ;;  %v12777_v37 = vld [vmem:[#allocation5 + $0x1c8] ss:$16 sps:$4 sm:$0xff]  }
 0x44b   :  { %v3253_v3 = vadd.f32 %v3244_v39, %v2974_v17 }
 0x44d   :  { %11110 = vtanh.f32 %v3253_v3  ;;  %v12789_v3 = vld [vmem:[#allocation5 + $0x1a0] ss:$16 sps:$4 sm:$0xff]  }
 0x44e   :  { %11112 = vpow2.f32 %v9844_v9  ;;  %v12791_v9 = vld [vmem:[#allocation5 + $0x1a8] ss:$16 sps:$4 sm:$0xff]  }
 0x453   :  { %v11103_v50 = vpop.eup %11102 }
 0x454   :  { %v3258_v0 = vadd.f32 1.0, %v11103_v50 }
 0x455   :  { %v11105_v46 = vpop.eup %11104 }
 0x456   :  { %v11107_v13 = vpop.eup %11106  ;;  %11114 = vrcp.f32 %v3258_v0  ;;  %v3264_v14 = vadd.f32 1.0, %v11105_v46  ;;  %v12795_v0 = vld [vmem:[#allocation5 + $0x184] ss:$16 sps:$4 sm:$0xff]   ;;  %v12797_v46 = vld [vmem:[#allocation5 + $0x18c] ss:$16 sps:$4 sm:$0xff]  }
 0x457   :  { %v11109_v35 = vpop.eup %11108 }
 0x458   :  { %11116 = vrcp.f32 %v3264_v14  ;;  %v2965_v16 = vmul.f32 %v11109_v35, %v11107_v13 }
 0x45a   :  { %v12765_v39 = vsel %vm2658_vm10, %v2965_v16, %v12584_v2  ;;  %v11111_v34 = vpop.eup %11110  ;;  %v12808_v2 = vld [vmem:[#allocation5 + $0x164] ss:$16 sps:$4 sm:$0xff]  }
 0x45b   :  { %14904 = vst [vmem:[#allocation42_spill] sm:$0xff] %v12765_v39  ;;  %v3292_v8 = vpack.c.bf16 %v12765_v39, %v12765_v39  ;;  %v11113_v17 = vpop.eup %11112  ;;  %14905 = vst [vmem:[#allocation43_spill] sm:$0xff] %v12808_v2 }
 0x45c   :  { %v3271_v35 = vadd.f32 1.0, %v11113_v17  ;;  %v12815_v17 = vld [vmem:[#allocation5 + $0x160] ss:$16 sps:$4 sm:$0xff]  }
 0x45d   :  { %3518 = vmatmul.mubr.bf16.vlgmr.msra.gmra.mxu0 %v3292_v8  ;;  %3559 = vmatmul.mubr.bf16.vlgmr.msra.gmra.mxu1 %v3292_v8  ;;  %v12802_v8 = vld [vmem:[#allocation5 + $0x180] ss:$16 sps:$4 sm:$0xff]   ;;  %14907 = vst [vmem:[#allocation45_spill] sm:$0xff] %v12815_v17 }
 0x45e   :  { %3798 = vmatpush1.bf16.msra.mxu0 %v12758_v29  ;;  %3839 = vmatpush1.bf16.msra.mxu1 %v12760_v18  ;;  %11118 = vrcp.f32 %v3271_v35  ;;  %v12828_v35 = vld [vmem:[#allocation5 + $0x14c] ss:$16 sps:$4 sm:$0xff]  }
 0x45f   :  { %3799 = vmatprep.subr.bf16.mxu0 %v12769_v43  ;;  %3840 = vmatprep.subr.bf16.mxu1 %v12771_v19  ;;  %14910 = vst [vmem:[#allocation48_spill] sm:$0xff] %v12828_v35 }
 0x460   :  { %3829 = vmatprep.mubr.bf16.mxu0 %v14861_v62  ;;  %3870 = vmatprep.mubr.bf16.mxu1 %v14861_v62 }
 0x462   :  { %3800 = vmatpush1.bf16.msra.mxu0 %v12775_v57  ;;  %3841 = vmatpush1.bf16.msra.mxu1 %v12777_v37 }
 0x463   :  { %v11115_v50 = vpop.eup %11114  ;;  %3801 = vmatprep.subr.bf16.mxu0 %v12781_v58  ;;  %3842 = vmatprep.subr.bf16.mxu1 %v12783_v6 }
 0x464   :  { %v3275_v13 = vmul.f32 %v11115_v50, %v11111_v34  ;;  %v12817_v50 = vld [vmem:[#allocation5 + $0x168] ss:$16 sps:$4 sm:$0xff]  }
 0x465   :  { %v11117_v14 = vpop.eup %11116  ;;  %14908 = vst [vmem:[#allocation46_spill] sm:$0xff] %v12817_v50 }
 0x466   :  { %v3274_v16 = vmul.f32 %v11117_v14, %v12609_v40  ;;  %3802 = vmatpush1.bf16.msra.mxu0 %v12789_v3  ;;  %3843 = vmatpush1.bf16.msra.mxu1 %v12791_v9 }
 0x467   :  { %3803 = vmatprep.subr.bf16.mxu0 %v12795_v0  ;;  %3844 = vmatprep.subr.bf16.mxu1 %v12797_v46 }
 0x468   :  { %v3276_v34 = vadd.f32 %v3275_v13, %v3274_v16  ;;  %v12826_v13 = vld [vmem:[#allocation5 + $0x144] ss:$16 sps:$4 sm:$0xff]   ;;  %v12832_v16 = vld [vmem:[#allocation5 + $0x140] ss:$16 sps:$4 sm:$0xff]  }
 0x469   :  { %14909 = vst [vmem:[#allocation47_spill] sm:$0xff] %v12826_v13  ;;  %14911 = vst [vmem:[#allocation49_spill] sm:$0xff] %v12832_v16 }
 0x46a   :  { %11120 = vtanh.f32 %v3276_v34  ;;  %3804 = vmatpush1.bf16.msra.mxu0 %v12802_v8  ;;  %3845 = vmatpush1.bf16.msra.mxu1 %v12804_v32  ;;  %v12822_v14 = vsel %vm2971_vm11, %v3276_v34, %v12609_v40  ;;  %v12838_v40 = vld [vmem:[#allocation5 + $0x124] ss:$16 sps:$4 sm:$0xff]   ;;  %v12840_v34 = vld [vmem:[#allocation5 + $0x12c] ss:$16 sps:$4 sm:$0xff]  }
 0x46b   :  { %3805 = vmatprep.subr.bf16.mxu0 %v12808_v2  ;;  %3846 = vmatprep.subr.bf16.mxu1 %v12810_v51  ;;  %14913 = vst [vmem:[#allocation51_spill] sm:$0xff] %v12838_v40  ;;  %v12844_v51 = vld [vmem:[#allocation5 + $0x120] ss:$16 sps:$4 sm:$0xff]  }
 0x46c   :  { %14914 = vst [vmem:[#allocation52_spill] sm:$0xff] %v12844_v51 }
 0x46e   :  { %3806 = vmatpush1.bf16.msra.mxu0 %v12815_v17  ;;  %3847 = vmatpush1.bf16.msra.mxu1 %v12817_v50  ;;  %v12846_v17 = vld [vmem:[#allocation5 + $0x128] ss:$16 sps:$4 sm:$0xff]   ;;  %v12850_v50 = vld [vmem:[#allocation5 + $0x104] ss:$16 sps:$4 sm:$0xff]  }
 0x46f   :  { %3807 = vmatprep.subr.bf16.mxu0 %v12826_v13  ;;  %3848 = vmatprep.subr.bf16.mxu1 %v12828_v35  ;;  %14915 = vst [vmem:[#allocation53_spill] sm:$0xff] %v12846_v17  ;;  %v12852_v13 = vld [vmem:[#allocation5 + $0x10c] ss:$16 sps:$4 sm:$0xff]   ;;  %v11119_v35 = vpop.eup %11118 }
 0x472   :  { %3808 = vmatpush1.bf16.msra.mxu0 %v12832_v16  ;;  %3849 = vmatpush1.bf16.msra.mxu1 %v12834_v31  ;;  %v12856_v16 = vld [vmem:[#allocation5 + $0x100] ss:$16 sps:$4 sm:$0xff]   ;;  %v12858_v31 = vld [vmem:[#allocation5 + $0x108] ss:$16 sps:$4 sm:$0xff]  }
 0x473   :  { %3809 = vmatprep.subr.bf16.mxu0 %v12838_v40  ;;  %3850 = vmatprep.subr.bf16.mxu1 %v12840_v34 }
 0x476   :  { %3810 = vmatpush1.bf16.msra.mxu0 %v12844_v51  ;;  %3851 = vmatpush1.bf16.msra.mxu1 %v12846_v17 }
 0x477   :  { %v11121_v2 = vpop.eup %11120  ;;  %3811 = vmatprep.subr.bf16.mxu0 %v12850_v50  ;;  %3852 = vmatprep.subr.bf16.mxu1 %v12852_v13 }
 0x478   :  { %v3278_v40 = vmul.f32 %v11121_v2, %v11119_v35  ;;  %v14917_v2 = vld [vmem:[#allocation16_spill] sm:$0xff] }
 0x47a   :  { %3812 = vmatpush1.bf16.msra.mxu0 %v12856_v16  ;;  %3853 = vmatpush1.bf16.msra.mxu1 %v12858_v31  ;;  %v12867_v51 = vsel %vm2971_vm11, %v3278_v40, %v12630_v56 }
 0x47b   :  { %14916 = vst [vmem:[#allocation54_spill] sm:$0xff] %v12867_v51  ;;  %v3604_v17 = vpack.c.bf16 %v12867_v51, %v12867_v51  ;;  %4111 = vmatprep.subr.bf16.mxu0 %v12636_v4  ;;  %4152 = vmatprep.subr.bf16.mxu1 %v12638_v55  ;;  %v3288_v4 = vunpack.c.l.bf16 %v14917_v2 }
 0x47d   :  { %3830 = vmatmul.mubr.bf16.vlgmr.msra.gmra.mxu0 %v3604_v17  ;;  %3871 = vmatmul.mubr.bf16.vlgmr.msra.gmra.mxu1 %v3604_v17 }
 0x47e   :  { %4112 = vmatpush1.bf16.msra.mxu0 %v12640_v36  ;;  %4153 = vmatpush1.bf16.msra.mxu1 %v12642_v54 }
 0x47f   :  { %4113 = vmatprep.subr.bf16.mxu0 %v12648_v10  ;;  %4154 = vmatprep.subr.bf16.mxu1 %v12650_v20  ;;  %v3289_v10 = vunpack.c.h.bf16 %v14917_v2 }
 0x480   :  { %4143 = vmatprep.mubr.bf16.mxu0 %v14861_v62  ;;  %4184 = vmatprep.mubr.bf16.mxu1 %v14861_v62 }
 0x482   :  { %4114 = vmatpush1.bf16.msra.mxu0 %v12652_v12  ;;  %4155 = vmatpush1.bf16.msra.mxu1 %v12654_v61 }
 0x483   :  { %4115 = vmatprep.subr.bf16.mxu0 %v12660_v48  ;;  %4156 = vmatprep.subr.bf16.mxu1 %v12662_v22 }
 0x486   :  { %4116 = vmatpush1.bf16.msra.mxu0 %v12664_v23  ;;  %4157 = vmatpush1.bf16.msra.mxu1 %v12666_v24 }
 0x487   :  { %4117 = vmatprep.subr.bf16.mxu0 %v12672_v25  ;;  %4158 = vmatprep.subr.bf16.mxu1 %v12674_v26 }
 0x48a   :  { %4118 = vmatpush1.bf16.msra.mxu0 %v12676_v27  ;;  %4159 = vmatpush1.bf16.msra.mxu1 %v12678_v28  ;;  %v14918_v27 = vld [vmem:[#allocation17_spill] sm:$0xff] }
 0x48b   :  { %4119 = vmatprep.subr.bf16.mxu0 %v12684_v30  ;;  %4160 = vmatprep.subr.bf16.mxu1 %v12686_v63  ;;  %v3291_v28 = vunpack.c.h.bf16 %v14918_v27  ;;  %v3290_v63 = vunpack.c.l.bf16 %v14918_v27 }
 0x48e   :  { %4120 = vmatpush1.bf16.msra.mxu0 %v12688_v47  ;;  %4161 = vmatpush1.bf16.msra.mxu1 %v12690_v59 }
 0x48f   :  { %4121 = vmatprep.subr.bf16.mxu0 %v12696_v49  ;;  %4162 = vmatprep.subr.bf16.mxu1 %v12698_v42 }
 0x492   :  { %4122 = vmatpush1.bf16.msra.mxu0 %v12700_v1  ;;  %4163 = vmatpush1.bf16.msra.mxu1 %v12702_v11 }
 0x493   :  { %4123 = vmatprep.subr.bf16.mxu0 %v12708_v41  ;;  %4164 = vmatprep.subr.bf16.mxu1 %v12710_v38  ;;  %v14919_v41 = vld [vmem:[#allocation30_spill] sm:$0xff] }
 0x494   :  { %v3600_v38 = vunpack.c.l.bf16 %v14919_v41 }
 0x496   :  { %4124 = vmatpush1.bf16.msra.mxu0 %v12712_v33  ;;  %4165 = vmatpush1.bf16.msra.mxu1 %v12714_v7 }
 0x497   :  { %4125 = vmatprep.subr.bf16.mxu0 %v12720_v53  ;;  %4166 = vmatprep.subr.bf16.mxu1 %v12722_v5 }
 0x49a   :  { %4126 = vmatpush1.bf16.msra.mxu0 %v12724_v21  ;;  %4167 = vmatpush1.bf16.msra.mxu1 %v12726_v44  ;;  %v3601_v44 = vunpack.c.h.bf16 %v14919_v41 }
 0x49b   :  { %4423 = vmatprep.subr.bf16.mxu0 %v12732_v60  ;;  %4464 = vmatprep.subr.bf16.mxu1 %v12734_v15 }
 0x51d   :  { %v3519_v55 = vpop.f32.mrf.mxu0  ;;  %v3560_v36 = vpop.f32.mrf.mxu1 }
 0x51e   :  { %v3567_v54 = vadd.f32 %v3519_v55, %v3288_v4  ;;  %v3569_v47 = vadd.f32 %v3560_v36, %v3290_v63 }
 0x51f   :  { %v3521_v20 = vpop.f32.mrf.mxu0  ;;  %v3562_v12 = vpop.f32.mrf.mxu1 }
 0x520   :  { %v9877_v61 = vmul.f32 -1.442695, %v3567_v54  ;;  %v3568_v48 = vadd.f32 %v3521_v20, %v3289_v10  ;;  %v3570_v30 = vadd.f32 %v3562_v12, %v3291_v28 }
 0x521   :  { %v3523_v22 = vpop.f32.mrf.mxu0  ;;  %v3564_v23 = vpop.f32.mrf.mxu1 }
 0x522   :  { %11122 = vpow2.f32 %v9877_v61  ;;  %v9878_v24 = vmul.f32 -1.442695, %v3568_v48  ;;  %v9879_v59 = vmul.f32 -1.442695, %v3570_v30  ;;  %v14920_v23 = vld [vmem:[#allocation31_spill] sm:$0xff] }
 0x523   :  { %v3524_v25 = vpop.f32.mrf.mxu0  ;;  %v3565_v26 = vpop.f32.mrf.mxu1 }
 0x524   :  { %11124 = vpow2.f32 %v9878_v24  ;;  %v3603_v24 = vunpack.c.h.bf16 %v14920_v23  ;;  %v3602_v26 = vunpack.c.l.bf16 %v14920_v23  ;;  %v13027_v23 = vld [vmem:[#allocation5 + $0x60] ss:$16 sps:$4 sm:$0xff]  }
 0x525   :  { %11126 = vtanh.f32 %v3569_v47 }
 0x526   :  { %11128 = vpow2.f32 %v9879_v59 }
 0x52f   :  { %v11123_v49 = vpop.eup %11122 }
 0x530   :  { %v3574_v42 = vadd.f32 1.0, %v11123_v49 }
 0x531   :  { %v11125_v1 = vpop.eup %11124 }
 0x532   :  { %11130 = vrcp.f32 %v3574_v42  ;;  %v3580_v11 = vadd.f32 1.0, %v11125_v1  ;;  %v11127_v33 = vpop.eup %11126 }
 0x533   :  { %v11129_v5 = vpop.eup %11128 }
 0x534   :  { %11132 = vrcp.f32 %v3580_v11  ;;  %v3587_v55 = vadd.f32 1.0, %v11129_v5  ;;  %v14932_v5 = vld [vmem:[#allocation53_spill] sm:$0xff] }
 0x53d   :  { %v3831_v7 = vpop.f32.mrf.mxu0  ;;  %v3872_v53 = vpop.f32.mrf.mxu1 }
 0x53e   :  { %v3879_v21 = vadd.f32 %v3831_v7, %v3600_v38  ;;  %v3881_v27 = vadd.f32 %v3872_v53, %v3602_v26  ;;  %v14930_v7 = vld [vmem:[#allocation51_spill] sm:$0xff]  ;;  %v14931_v53 = vld [vmem:[#allocation52_spill] sm:$0xff] }
 0x53f   :  { %v11131_v60 = vpop.eup %11130  ;;  %v3833_v15 = vpop.f32.mrf.mxu0  ;;  %v13037_v26 = vld [vmem:[#allocation5 + $0x4c] ss:$16 sps:$4 sm:$0xff]  }
 0x540   :  { %v3874_v17 = vpop.f32.mrf.mxu1  ;;  %v3591_v35 = vmul.f32 %v11131_v60, %v11127_v33  ;;  %v9912_v40 = vmul.f32 -1.442695, %v3879_v21  ;;  %v3880_v2 = vadd.f32 %v3833_v15, %v3601_v44  ;;  %v12987_v15 = vld [vmem:[#allocation5 + $0xc4] ss:$16 sps:$4 sm:$0xff]  }
 0x541   :  { %v11133_v4 = vpop.eup %11132  ;;  %v3835_v36 = vpop.f32.mrf.mxu0  ;;  %v3882_v25 = vadd.f32 %v3874_v17, %v3603_v24  ;;  %v12989_v17 = vld [vmem:[#allocation5 + $0xcc] ss:$16 sps:$4 sm:$0xff]   ;;  %v13029_v24 = vld [vmem:[#allocation5 + $0x68] ss:$16 sps:$4 sm:$0xff]  }
 0x542   :  { %v3876_v54 = vpop.f32.mrf.mxu1  ;;  %v3590_v10 = vmul.f32 %v11133_v4, %v12754_v45  ;;  %11134 = vpow2.f32 %v9912_v40  ;;  %v9913_v20 = vmul.f32 -1.442695, %v3880_v2  ;;  %v12993_v40 = vld [vmem:[#allocation5 + $0xc8] ss:$16 sps:$4 sm:$0xff]   ;;  %v12999_v2 = vld [vmem:[#allocation5 + $0xa4] ss:$16 sps:$4 sm:$0xff]  }
 0x543   :  { %v3836_v12 = vpop.f32.mrf.mxu0  ;;  %v9914_v28 = vmul.f32 -1.442695, %v3882_v25  ;;  %v13001_v4 = vld [vmem:[#allocation5 + $0xac] ss:$16 sps:$4 sm:$0xff]   ;;  %v13005_v36 = vld [vmem:[#allocation5 + $0xa8] ss:$16 sps:$4 sm:$0xff]  }
 0x544   :  { %v3877_v61 = vpop.f32.mrf.mxu1  ;;  %v3592_v48 = vadd.f32 %v3591_v35, %v3590_v10  ;;  %11136 = vpow2.f32 %v9913_v20  ;;  %v12991_v35 = vld [vmem:[#allocation5 + $0xc0] ss:$16 sps:$4 sm:$0xff]   ;;  %v13011_v54 = vld [vmem:[#allocation5 + $0x84] ss:$16 sps:$4 sm:$0xff]   ;;  %v13013_v10 = vld [vmem:[#allocation5 + $0x8c] ss:$16 sps:$4 sm:$0xff]  }
 0x545   :  { %11138 = vrcp.f32 %v3587_v55  ;;  %v13003_v55 = vld [vmem:[#allocation5 + $0xa0] ss:$16 sps:$4 sm:$0xff]   ;;  %v13017_v12 = vld [vmem:[#allocation5 + $0x88] ss:$16 sps:$4 sm:$0xff]   ;;  %v13023_v61 = vld [vmem:[#allocation5 + $0x64] ss:$16 sps:$4 sm:$0xff]  }
 0x546   :  { %11140 = vtanh.f32 %v3592_v48  ;;  %v12917_v22 = vsel %vm2971_vm11, %v3592_v48, %v12754_v45  ;;  %v13015_v20 = vld [vmem:[#allocation5 + $0x80] ss:$16 sps:$4 sm:$0xff]   ;;  %v13025_v48 = vld [vmem:[#allocation5 + $0x6c] ss:$16 sps:$4 sm:$0xff]   ;;  %v13035_v25 = vld [vmem:[#allocation5 + $0x44] ss:$16 sps:$4 sm:$0xff]  }
 0x547   :  { %11142 = vtanh.f32 %v3881_v27  ;;  %v13039_v27 = vld [vmem:[#allocation5 + $0x40] ss:$16 sps:$4 sm:$0xff]  }
 0x548   :  { %11144 = vpow2.f32 %v9914_v28  ;;  %v13041_v28 = vld [vmem:[#allocation5 + $0x48] ss:$16 sps:$4 sm:$0xff]  }
 0x54f   :  { %v11135_v30 = vpop.eup %11134 }
 0x550   :  { %v3886_v63 = vadd.f32 1.0, %v11135_v30  ;;  %v13047_v30 = vld [vmem:[#allocation5 + $0x24] ss:$16 sps:$4 sm:$0xff]  }
 0x551   :  { %v11137_v47 = vpop.eup %11136 }
 0x552   :  { %v11139_v59 = vpop.eup %11138  ;;  %11146 = vrcp.f32 %v3886_v63  ;;  %v3892_v49 = vadd.f32 1.0, %v11137_v47  ;;  %v13049_v63 = vld [vmem:[#allocation5 + $0x2c] ss:$16 sps:$4 sm:$0xff]   ;;  %v13051_v47 = vld [vmem:[#allocation5 + $0x20] ss:$16 sps:$4 sm:$0xff]  }
 0x553   :  { %v11141_v42 = vpop.eup %11140 }
 0x554   :  { %11148 = vrcp.f32 %v3892_v49  ;;  %v3594_v1 = vmul.f32 %v11141_v42, %v11139_v59  ;;  %v11143_v41 = vpop.eup %11142  ;;  %v13053_v59 = vld [vmem:[#allocation5 + $0x28] ss:$16 sps:$4 sm:$0xff]   ;;  %v13059_v49 = vld [vmem:[#allocation5 + $0x4] ss:$16 sps:$4 sm:$0xff]   ;;  %v13061_v42 = vld [vmem:[#allocation5 + $0xc] ss:$16 sps:$4 sm:$0xff]  }
 0x555   :  { %v11145_v38 = vpop.eup %11144 }
 0x556   :  { %v12924_v45 = vsel %vm2971_vm11, %v3594_v1, %v12765_v39  ;;  %v13063_v1 = vld [vmem:[#allocation5] ss:$16 sps:$4 sm:$0xff]   ;;  %v13166_v39 = vld [vmem:[#allocation5 + $0x148] ss:$16 sps:$4 sm:$0xff]  }
 0x557   :  { %14921 = vst [vmem:[#allocation14_spill] sm:$0xff] %v12924_v45  ;;  %v3918_v11 = vpack.c.bf16 %v12924_v45, %v12924_v45 }
 0x559   :  { %4144 = vmatmul.mubr.bf16.vlgmr.msra.gmra.mxu0 %v3918_v11  ;;  %4185 = vmatmul.mubr.bf16.vlgmr.msra.gmra.mxu1 %v3918_v11  ;;  %v13065_v11 = vld [vmem:[#allocation5 + $0x8] ss:$16 sps:$4 sm:$0xff]  }
 0x55a   :  { %4424 = vmatpush1.bf16.msra.mxu0 %v12758_v29  ;;  %4465 = vmatpush1.bf16.msra.mxu1 %v12760_v18 }
 0x55b   :  { %4425 = vmatprep.subr.bf16.mxu0 %v12769_v43  ;;  %4466 = vmatprep.subr.bf16.mxu1 %v12771_v19  ;;  %v3899_v43 = vadd.f32 1.0, %v11145_v38  ;;  %v13073_v38 = vld [vmem:[#allocation5 + $0x1ec] ss:$16 sps:$4 sm:$0xff]  }
 0x55c   :  { %4455 = vmatprep.mubr.bf16.mxu0 %v14861_v62  ;;  %4496 = vmatprep.mubr.bf16.mxu1 %v14861_v62 }
 0x55d   :  { %11150 = vrcp.f32 %v3899_v43 }
 0x55e   :  { %4426 = vmatpush1.bf16.msra.mxu0 %v12775_v57  ;;  %4467 = vmatpush1.bf16.msra.mxu1 %v12777_v37 }
 0x55f   :  { %v11147_v33 = vpop.eup %11146  ;;  %4427 = vmatprep.subr.bf16.mxu0 %v12781_v58  ;;  %4468 = vmatprep.subr.bf16.mxu1 %v12783_v6  ;;  %v14922_v58 = vld [vmem:[#allocation43_spill] sm:$0xff]  ;;  %v14923_v6 = vld [vmem:[#allocation44_spill] sm:$0xff] }
 0x560   :  { %v3903_v29 = vmul.f32 %v11147_v33, %v11143_v41  ;;  %v13071_v41 = vld [vmem:[#allocation5 + $0x1e4] ss:$16 sps:$4 sm:$0xff]   ;;  %14945 = vst [vmem:[#allocation43_spill] sm:$0xff] %v13166_v39 }
 0x561   :  { %v11149_v18 = vpop.eup %11148  ;;  %v14933_v33 = vld [vmem:[#allocation18_spill] sm:$0xff] }
 0x562   :  { %v3902_v19 = vmul.f32 %v11149_v18, %v12822_v14  ;;  %4428 = vmatpush1.bf16.msra.mxu0 %v12789_v3  ;;  %4469 = vmatpush1.bf16.msra.mxu1 %v12791_v9  ;;  %v14924_v3 = vld [vmem:[#allocation45_spill] sm:$0xff]  ;;  %v14925_v9 = vld [vmem:[#allocation46_spill] sm:$0xff] }
 0x563   :  { %4429 = vmatprep.subr.bf16.mxu0 %v12795_v0  ;;  %4470 = vmatprep.subr.bf16.mxu1 %v12797_v46  ;;  %v14926_v0 = vld [vmem:[#allocation47_spill] sm:$0xff]  ;;  %v14927_v46 = vld [vmem:[#allocation48_spill] sm:$0xff] }
 0x564   :  { %v3904_v57 = vadd.f32 %v3903_v29, %v3902_v19  ;;  %v3914_v29 = vunpack.c.l.bf16 %v14933_v33 }
 0x566   :  { %11152 = vtanh.f32 %v3904_v57  ;;  %4430 = vmatpush1.bf16.msra.mxu0 %v12802_v8  ;;  %4471 = vmatpush1.bf16.msra.mxu1 %v12804_v32  ;;  %v12948_v37 = vsel %vm2658_vm10, %v3904_v57, %v12822_v14  ;;  %v14928_v8 = vld [vmem:[#allocation49_spill] sm:$0xff]  ;;  %v14929_v32 = vld [vmem:[#allocation50_spill] sm:$0xff]  ;;  %v3915_v57 = vunpack.c.h.bf16 %v14933_v33 }
 0x567   :  { %4431 = vmatprep.subr.bf16.mxu0 %v14922_v58  ;;  %4472 = vmatprep.subr.bf16.mxu1 %v14923_v6 }
 0x56a   :  { %4432 = vmatpush1.bf16.msra.mxu0 %v14924_v3  ;;  %4473 = vmatpush1.bf16.msra.mxu1 %v14925_v9  ;;  %v11151_v14 = vpop.eup %11150 }
 0x56b   :  { %4433 = vmatprep.subr.bf16.mxu0 %v14926_v0  ;;  %4474 = vmatprep.subr.bf16.mxu1 %v14927_v46 }
 0x56e   :  { %4434 = vmatpush1.bf16.msra.mxu0 %v14928_v8  ;;  %4475 = vmatpush1.bf16.msra.mxu1 %v14929_v32 }
 0x56f   :  { %4435 = vmatprep.subr.bf16.mxu0 %v14930_v7  ;;  %4476 = vmatprep.subr.bf16.mxu1 %v12840_v34 }
 0x572   :  { %4436 = vmatpush1.bf16.msra.mxu0 %v14931_v53  ;;  %4477 = vmatpush1.bf16.msra.mxu1 %v14932_v5 }
 0x573   :  { %v11153_v21 = vpop.eup %11152  ;;  %4437 = vmatprep.subr.bf16.mxu0 %v12850_v50  ;;  %4478 = vmatprep.subr.bf16.mxu1 %v12852_v13  ;;  %v12975_v50 = vld [vmem:[#allocation5 + $0xe4] ss:$16 sps:$4 sm:$0xff]   ;;  %v12977_v13 = vld [vmem:[#allocation5 + $0xec] ss:$16 sps:$4 sm:$0xff]  }
 0x574   :  { %v3906_v44 = vmul.f32 %v11153_v21, %v11151_v14  ;;  %v14934_v14 = vld [vmem:[#allocation19_spill] sm:$0xff] }
 0x575   :  { %v3917_v53 = vunpack.c.h.bf16 %v14934_v14  ;;  %v3916_v21 = vunpack.c.l.bf16 %v14934_v14 }
 0x576   :  { %4438 = vmatpush1.bf16.msra.mxu0 %v12856_v16  ;;  %4479 = vmatpush1.bf16.msra.mxu1 %v12858_v31  ;;  %v12969_v60 = vsel %vm2658_vm10, %v3906_v44, %v12867_v51  ;;  %v12979_v16 = vld [vmem:[#allocation5 + $0xe0] ss:$16 sps:$4 sm:$0xff]   ;;  %v12981_v31 = vld [vmem:[#allocation5 + $0xe8] ss:$16 sps:$4 sm:$0xff]   ;;  %v13143_v51 = vld [vmem:[#allocation5 + $0x16c] ss:$16 sps:$4 sm:$0xff]  }
 0x577   :  { %v4230_v34 = vpack.c.bf16 %v12969_v60, %v12969_v60  ;;  %4737 = vmatprep.subr.bf16.mxu0 %v12975_v50  ;;  %4778 = vmatprep.subr.bf16.mxu1 %v12977_v13  ;;  %14939 = vst [vmem:[#allocation32_spill] sm:$0xff] %v13143_v51 }
 0x579   :  { %4456 = vmatmul.mubr.bf16.vlgmr.msra.gmra.mxu0 %v4230_v34  ;;  %4497 = vmatmul.mubr.bf16.vlgmr.msra.gmra.mxu1 %v4230_v34 }
 0x57a   :  { %4769 = vmatprep.mubr.bf16.mxu0 %v14861_v62  ;;  %4810 = vmatprep.mubr.bf16.mxu1 %v14861_v62 }
 0x57b   :  { %4738 = vmatpush1.bf16.msra.mxu0 %v12979_v16  ;;  %4779 = vmatpush1.bf16.msra.mxu1 %v12981_v31 }
 0x57c   :  { %4739 = vmatprep.subr.bf16.mxu0 %v12987_v15  ;;  %4780 = vmatprep.subr.bf16.mxu1 %v12989_v17 }
 0x57f   :  { %4740 = vmatpush1.bf16.msra.mxu0 %v12991_v35  ;;  %4781 = vmatpush1.bf16.msra.mxu1 %v12993_v40 }
 0x580   :  { %4741 = vmatprep.subr.bf16.mxu0 %v12999_v2  ;;  %4782 = vmatprep.subr.bf16.mxu1 %v13001_v4 }
 0x583   :  { %4742 = vmatpush1.bf16.msra.mxu0 %v13003_v55  ;;  %4783 = vmatpush1.bf16.msra.mxu1 %v13005_v36 }
 0x584   :  { %4743 = vmatprep.subr.bf16.mxu0 %v13011_v54  ;;  %4784 = vmatprep.subr.bf16.mxu1 %v13013_v10 }
 0x587   :  { %4744 = vmatpush1.bf16.msra.mxu0 %v13015_v20  ;;  %4785 = vmatpush1.bf16.msra.mxu1 %v13017_v12 }
 0x588   :  { %4745 = vmatprep.subr.bf16.mxu0 %v13023_v61  ;;  %4786 = vmatprep.subr.bf16.mxu1 %v13025_v48 }
 0x58b   :  { %4746 = vmatpush1.bf16.msra.mxu0 %v13027_v23  ;;  %4787 = vmatpush1.bf16.msra.mxu1 %v13029_v24 }
 0x58c   :  { %4747 = vmatprep.subr.bf16.mxu0 %v13035_v25  ;;  %4788 = vmatprep.subr.bf16.mxu1 %v13037_v26 }
 0x58f   :  { %4748 = vmatpush1.bf16.msra.mxu0 %v13039_v27  ;;  %4789 = vmatpush1.bf16.msra.mxu1 %v13041_v28 }
 0x590   :  { %4749 = vmatprep.subr.bf16.mxu0 %v13047_v30  ;;  %4790 = vmatprep.subr.bf16.mxu1 %v13049_v63 }
 0x593   :  { %4750 = vmatpush1.bf16.msra.mxu0 %v13051_v47  ;;  %4791 = vmatpush1.bf16.msra.mxu1 %v13053_v59 }
 0x594   :  { %4751 = vmatprep.subr.bf16.mxu0 %v13059_v49  ;;  %4792 = vmatprep.subr.bf16.mxu1 %v13061_v42 }
 0x597   :  { %4752 = vmatpush1.bf16.msra.mxu0 %v13063_v1  ;;  %4793 = vmatpush1.bf16.msra.mxu1 %v13065_v11 }
 0x598   :  { %5049 = vmatprep.subr.bf16.mxu0 %v13071_v41  ;;  %5090 = vmatprep.subr.bf16.mxu1 %v13073_v38 }
 0x619   :  { %v4145_v18 = vpop.f32.mrf.mxu0  ;;  %v4186_v43 = vpop.f32.mrf.mxu1 }
 0x61a   :  { %v4193_v19 = vadd.f32 %v4145_v18, %v3914_v29  ;;  %v4195_v44 = vadd.f32 %v4186_v43, %v3916_v21 }
 0x61b   :  { %v4147_v58 = vpop.f32.mrf.mxu0  ;;  %v4188_v6 = vpop.f32.mrf.mxu1 }
 0x61c   :  { %v9947_v3 = vmul.f32 -1.442695, %v4193_v19  ;;  %v4194_v9 = vadd.f32 %v4147_v58, %v3915_v57  ;;  %v4196_v5 = vadd.f32 %v4188_v6, %v3917_v53  ;;  %v14935_v57 = vld [vmem:[#allocation28_spill] sm:$0xff] }
 0x61d   :  { %v4149_v0 = vpop.f32.mrf.mxu0  ;;  %v4190_v46 = vpop.f32.mrf.mxu1  ;;  %v4226_v58 = vunpack.c.l.bf16 %v14935_v57  ;;  %v4227_v6 = vunpack.c.h.bf16 %v14935_v57  ;;  %v13628_v57 = vld [vmem:[#allocation9 + $0x100] ss:$16 sps:$4 sm:$0xff]  }
 0x61e   :  { %11154 = vpow2.f32 %v9947_v3  ;;  %v9948_v8 = vmul.f32 -1.442695, %v4194_v9  ;;  %v9949_v34 = vmul.f32 -1.442695, %v4196_v5 }
 0x61f   :  { %v4150_v32 = vpop.f32.mrf.mxu0  ;;  %v4191_v7 = vpop.f32.mrf.mxu1 }
 0x620   :  { %11156 = vpow2.f32 %v9948_v8 }
 0x621   :  { %11158 = vtanh.f32 %v4195_v44 }
 0x622   :  { %11160 = vpow2.f32 %v9949_v34 }
 0x62b   :  { %v11155_v29 = vpop.eup %11154 }
 0x62c   :  { %v4200_v33 = vadd.f32 1.0, %v11155_v29 }
 0x62d   :  { %v11157_v18 = vpop.eup %11156 }
 0x62e   :  { %11162 = vrcp.f32 %v4200_v33  ;;  %v4206_v19 = vadd.f32 1.0, %v11157_v18  ;;  %v11159_v3 = vpop.eup %11158 }
 0x62f   :  { %v11161_v46 = vpop.eup %11160 }
 0x630   :  { %11164 = vrcp.f32 %v4206_v19  ;;  %v4213_v44 = vadd.f32 1.0, %v11161_v46 }
 0x639   :  { %v4457_v9 = vpop.f32.mrf.mxu0  ;;  %v4498_v0 = vpop.f32.mrf.mxu1 }
 0x63a   :  { %v4505_v8 = vadd.f32 %v4457_v9, %v4226_v58 }
 0x63b   :  { %v11163_v32 = vpop.eup %11162  ;;  %v4459_v43 = vpop.f32.mrf.mxu0 }
 0x63c   :  { %v4500_v7 = vpop.f32.mrf.mxu1  ;;  %v4217_v14 = vmul.f32 %v11163_v32, %v11159_v3  ;;  %v9982_v53 = vmul.f32 -1.442695, %v4505_v8  ;;  %v4506_v5 = vadd.f32 %v4459_v43, %v4227_v6  ;;  %v14937_v3 = vld [vmem:[#allocation29_spill] sm:$0xff] }
 0x63d   :  { %v11165_v21 = vpop.eup %11164  ;;  %v4461_v34 = vpop.f32.mrf.mxu0  ;;  %v4229_v9 = vunpack.c.h.bf16 %v14937_v3  ;;  %v4228_v8 = vunpack.c.l.bf16 %v14937_v3  ;;  %v13116_v3 = vld [vmem:[#allocation5 + $0x1ac] ss:$16 sps:$4 sm:$0xff]  }
 0x63e   :  { %v4502_v29 = vpop.f32.mrf.mxu1  ;;  %v4216_v33 = vmul.f32 %v11165_v21, %v12917_v22  ;;  %11166 = vpow2.f32 %v9982_v53  ;;  %v9983_v18 = vmul.f32 -1.442695, %v4506_v5  ;;  %v13102_v34 = vld [vmem:[#allocation5 + $0x1c4] ss:$16 sps:$4 sm:$0xff]  }
 0x63f   :  { %v4462_v19 = vpop.f32.mrf.mxu0  ;;  %v4508_v46 = vadd.f32 %v4500_v7, %v4229_v9  ;;  %v4507_v6 = vadd.f32 %v4498_v0, %v4228_v8  ;;  %v13104_v29 = vld [vmem:[#allocation5 + $0x1cc] ss:$16 sps:$4 sm:$0xff]   ;;  %v13122_v8 = vld [vmem:[#allocation5 + $0x1a0] ss:$16 sps:$4 sm:$0xff]  }
 0x640   :  { %v4503_v52 = vpop.f32.mrf.mxu1  ;;  %v4218_v56 = vadd.f32 %v4217_v14, %v4216_v33  ;;  %11168 = vpow2.f32 %v9983_v18  ;;  %v13108_v33 = vld [vmem:[#allocation5 + $0x1c0] ss:$16 sps:$4 sm:$0xff]   ;;  %v13110_v18 = vld [vmem:[#allocation5 + $0x1c8] ss:$16 sps:$4 sm:$0xff]   ;;  %v13114_v19 = vld [vmem:[#allocation5 + $0x1a4] ss:$16 sps:$4 sm:$0xff]  }
 0x641   :  { %11170 = vrcp.f32 %v4213_v44  ;;  %v9984_v32 = vmul.f32 -1.442695, %v4508_v46 }
 0x642   :  { %11172 = vtanh.f32 %v4218_v56  ;;  %v13087_v58 = vsel %vm2341_vm9, %v4218_v56, %v12917_v22  ;;  %v13091_v56 = vld [vmem:[#allocation5 + $0x1e0] ss:$16 sps:$4 sm:$0xff]   ;;  %v13093_v22 = vld [vmem:[#allocation5 + $0x1e8] ss:$16 sps:$4 sm:$0xff]  }
 0x643   :  { %11174 = vtanh.f32 %v4507_v6  ;;  %v13124_v6 = vld [vmem:[#allocation5 + $0x1a8] ss:$16 sps:$4 sm:$0xff]  }
 0x644   :  { %11176 = vpow2.f32 %v9984_v32 }
 0x64b   :  { %v11167_v43 = vpop.eup %11166 }
 0x64c   :  { %v4512_v53 = vadd.f32 1.0, %v11167_v43  ;;  %v13128_v43 = vld [vmem:[#allocation5 + $0x184] ss:$16 sps:$4 sm:$0xff]  }
 0x64d   :  { %v11169_v52 = vpop.eup %11168 }
 0x64e   :  { %v11171_v14 = vpop.eup %11170  ;;  %11178 = vrcp.f32 %v4512_v53  ;;  %v4518_v5 = vadd.f32 1.0, %v11169_v52  ;;  %v13130_v53 = vld [vmem:[#allocation5 + $0x18c] ss:$16 sps:$4 sm:$0xff]  }
 0x64f   :  { %v11173_v21 = vpop.eup %11172 }
 0x650   :  { %11180 = vrcp.f32 %v4518_v5  ;;  %v4220_v44 = vmul.f32 %v11173_v21, %v11171_v14  ;;  %v11175_v9 = vpop.eup %11174 }
 0x651   :  { %v11177_v46 = vpop.eup %11176 }
 0x652   :  { %v13098_v0 = vsel %vm2341_vm9, %v4220_v44, %v12924_v45  ;;  %v4525_v5 = vadd.f32 1.0, %v11177_v46  ;;  %v13135_v44 = vld [vmem:[#allocation5 + $0x180] ss:$16 sps:$4 sm:$0xff]   ;;  %v13141_v45 = vld [vmem:[#allocation5 + $0x164] ss:$16 sps:$4 sm:$0xff]  }
 0x653   :  { %v4544_v7 = vpack.c.bf16 %v13098_v0, %v13098_v0  ;;  %14938 = vst [vmem:[#allocation15_spill] sm:$0xff] %v13141_v45  ;;  %v13147_v46 = vld [vmem:[#allocation5 + $0x160] ss:$16 sps:$4 sm:$0xff]  }
 0x654   :  { %11182 = vrcp.f32 %v4525_v5  ;;  %14940 = vst [vmem:[#allocation33_spill] sm:$0xff] %v13147_v46  ;;  %v13160_v5 = vld [vmem:[#allocation5 + $0x14c] ss:$16 sps:$4 sm:$0xff]  }
 0x655   :  { %4770 = vmatmul.mubr.bf16.vlgmr.msra.gmra.mxu0 %v4544_v7  ;;  %4811 = vmatmul.mubr.bf16.vlgmr.msra.gmra.mxu1 %v4544_v7  ;;  %v13137_v7 = vld [vmem:[#allocation5 + $0x188] ss:$16 sps:$4 sm:$0xff]   ;;  %14943 = vst [vmem:[#allocation30_spill] sm:$0xff] %v13160_v5 }
 0x656   :  { %5050 = vmatpush1.bf16.msra.mxu0 %v13091_v56  ;;  %5091 = vmatpush1.bf16.msra.mxu1 %v13093_v22 }
 0x657   :  { %5051 = vmatprep.subr.bf16.mxu0 %v13102_v34  ;;  %5092 = vmatprep.subr.bf16.mxu1 %v13104_v29 }
 0x658   :  { %5081 = vmatprep.mubr.bf16.mxu0 %v14861_v62  ;;  %5122 = vmatprep.mubr.bf16.mxu1 %v14861_v62 }
 0x65a   :  { %5052 = vmatpush1.bf16.msra.mxu0 %v13108_v33  ;;  %5093 = vmatpush1.bf16.msra.mxu1 %v13110_v18 }
 0x65b   :  { %v11179_v32 = vpop.eup %11178  ;;  %5053 = vmatprep.subr.bf16.mxu0 %v13114_v19  ;;  %5094 = vmatprep.subr.bf16.mxu1 %v13116_v3 }
 0x65c   :  { %v4529_v52 = vmul.f32 %v11179_v32, %v11175_v9  ;;  %v13149_v32 = vld [vmem:[#allocation5 + $0x168] ss:$16 sps:$4 sm:$0xff]  }
 0x65d   :  { %v11181_v14 = vpop.eup %11180  ;;  %14941 = vst [vmem:[#allocation16_spill] sm:$0xff] %v13149_v32 }
 0x65e   :  { %v4528_v21 = vmul.f32 %v11181_v14, %v12948_v37  ;;  %5054 = vmatpush1.bf16.msra.mxu0 %v13122_v8  ;;  %5095 = vmatpush1.bf16.msra.mxu1 %v13124_v6 }
 0x65f   :  { %5055 = vmatprep.subr.bf16.mxu0 %v13128_v43  ;;  %5096 = vmatprep.subr.bf16.mxu1 %v13130_v53 }
 0x660   :  { %v4530_v9 = vadd.f32 %v4529_v52, %v4528_v21  ;;  %v13158_v52 = vld [vmem:[#allocation5 + $0x144] ss:$16 sps:$4 sm:$0xff]   ;;  %v13164_v21 = vld [vmem:[#allocation5 + $0x140] ss:$16 sps:$4 sm:$0xff]  }
 0x661   :  { %14942 = vst [vmem:[#allocation17_spill] sm:$0xff] %v13158_v52  ;;  %14944 = vst [vmem:[#allocation31_spill] sm:$0xff] %v13164_v21 }
 0x662   :  { %11184 = vtanh.f32 %v4530_v9  ;;  %5056 = vmatpush1.bf16.msra.mxu0 %v13135_v44  ;;  %5097 = vmatpush1.bf16.msra.mxu1 %v13137_v7  ;;  %v13154_v14 = vsel %vm2028_vm8, %v4530_v9, %v12948_v37  ;;  %v13170_v37 = vld [vmem:[#allocation5 + $0x124] ss:$16 sps:$4 sm:$0xff]   ;;  %v13172_v9 = vld [vmem:[#allocation5 + $0x12c] ss:$16 sps:$4 sm:$0xff]  }
 0x663   :  { %5057 = vmatprep.subr.bf16.mxu0 %v13141_v45  ;;  %5098 = vmatprep.subr.bf16.mxu1 %v13143_v51  ;;  %14946 = vst [vmem:[#allocation44_spill] sm:$0xff] %v13170_v37  ;;  %v13176_v51 = vld [vmem:[#allocation5 + $0x120] ss:$16 sps:$4 sm:$0xff]  }
 0x664   :  { %14947 = vst [vmem:[#allocation45_spill] sm:$0xff] %v13176_v51 }
 0x666   :  { %5058 = vmatpush1.bf16.msra.mxu0 %v13147_v46  ;;  %5099 = vmatpush1.bf16.msra.mxu1 %v13149_v32  ;;  %v13178_v46 = vld [vmem:[#allocation5 + $0x128] ss:$16 sps:$4 sm:$0xff]   ;;  %v13182_v32 = vld [vmem:[#allocation5 + $0x104] ss:$16 sps:$4 sm:$0xff]  }
 0x667   :  { %5059 = vmatprep.subr.bf16.mxu0 %v13158_v52  ;;  %5100 = vmatprep.subr.bf16.mxu1 %v13160_v5  ;;  %14948 = vst [vmem:[#allocation46_spill] sm:$0xff] %v13178_v46  ;;  %v13184_v52 = vld [vmem:[#allocation5 + $0x10c] ss:$16 sps:$4 sm:$0xff]   ;;  %v11183_v5 = vpop.eup %11182 }
 0x66a   :  { %5060 = vmatpush1.bf16.msra.mxu0 %v13164_v21  ;;  %5101 = vmatpush1.bf16.msra.mxu1 %v13166_v39  ;;  %v13188_v21 = vld [vmem:[#allocation5 + $0x100] ss:$16 sps:$4 sm:$0xff]   ;;  %v13190_v39 = vld [vmem:[#allocation5 + $0x108] ss:$16 sps:$4 sm:$0xff]  }
 0x66b   :  { %5061 = vmatprep.subr.bf16.mxu0 %v13170_v37  ;;  %5102 = vmatprep.subr.bf16.mxu1 %v13172_v9 }
 0x66e   :  { %5062 = vmatpush1.bf16.msra.mxu0 %v13176_v51  ;;  %5103 = vmatpush1.bf16.msra.mxu1 %v13178_v46 }
 0x66f   :  { %v11185_v45 = vpop.eup %11184  ;;  %5063 = vmatprep.subr.bf16.mxu0 %v13182_v32  ;;  %5104 = vmatprep.subr.bf16.mxu1 %v13184_v52 }
 0x670   :  { %v4532_v37 = vmul.f32 %v11185_v45, %v11183_v5  ;;  %v14949_v45 = vld [vmem:[#allocation20_spill] sm:$0xff] }
 0x672   :  { %5064 = vmatpush1.bf16.msra.mxu0 %v13188_v21  ;;  %5105 = vmatpush1.bf16.msra.mxu1 %v13190_v39  ;;  %v13199_v51 = vsel %vm2028_vm8, %v4532_v37, %v12969_v60 }
 0x673   :  { %v4856_v46 = vpack.c.bf16 %v13199_v51, %v13199_v51  ;;  %5363 = vmatprep.subr.bf16.mxu0 %v12975_v50  ;;  %5404 = vmatprep.subr.bf16.mxu1 %v12977_v13  ;;  %v4540_v50 = vunpack.c.l.bf16 %v14949_v45 }
 0x675   :  { %5082 = vmatmul.mubr.bf16.vlgmr.msra.gmra.mxu0 %v4856_v46  ;;  %5123 = vmatmul.mubr.bf16.vlgmr.msra.gmra.mxu1 %v4856_v46 }
 0x676   :  { %5364 = vmatpush1.bf16.msra.mxu0 %v12979_v16  ;;  %5405 = vmatpush1.bf16.msra.mxu1 %v12981_v31 }
 0x677   :  { %5365 = vmatprep.subr.bf16.mxu0 %v12987_v15  ;;  %5406 = vmatprep.subr.bf16.mxu1 %v12989_v17  ;;  %v4541_v15 = vunpack.c.h.bf16 %v14949_v45 }
 0x678   :  { %5395 = vmatprep.mubr.bf16.mxu0 %v14861_v62  ;;  %5436 = vmatprep.mubr.bf16.mxu1 %v14861_v62 }
 0x67a   :  { %5366 = vmatpush1.bf16.msra.mxu0 %v12991_v35  ;;  %5407 = vmatpush1.bf16.msra.mxu1 %v12993_v40 }
 0x67b   :  { %5367 = vmatprep.subr.bf16.mxu0 %v12999_v2  ;;  %5408 = vmatprep.subr.bf16.mxu1 %v13001_v4 }
 0x67e   :  { %5368 = vmatpush1.bf16.msra.mxu0 %v13003_v55  ;;  %5409 = vmatpush1.bf16.msra.mxu1 %v13005_v36 }
 0x67f   :  { %5369 = vmatprep.subr.bf16.mxu0 %v13011_v54  ;;  %5410 = vmatprep.subr.bf16.mxu1 %v13013_v10 }
 0x682   :  { %5370 = vmatpush1.bf16.msra.mxu0 %v13015_v20  ;;  %5411 = vmatpush1.bf16.msra.mxu1 %v13017_v12  ;;  %v14950_v20 = vld [vmem:[#allocation21_spill] sm:$0xff] }
 0x683   :  { %5371 = vmatprep.subr.bf16.mxu0 %v13023_v61  ;;  %5412 = vmatprep.subr.bf16.mxu1 %v13025_v48  ;;  %v4543_v12 = vunpack.c.h.bf16 %v14950_v20  ;;  %v4542_v48 = vunpack.c.l.bf16 %v14950_v20 }
 0x686   :  { %5372 = vmatpush1.bf16.msra.mxu0 %v13027_v23  ;;  %5413 = vmatpush1.bf16.msra.mxu1 %v13029_v24 }
 0x687   :  { %5373 = vmatprep.subr.bf16.mxu0 %v13035_v25  ;;  %5414 = vmatprep.subr.bf16.mxu1 %v13037_v26 }
 0x68a   :  { %5374 = vmatpush1.bf16.msra.mxu0 %v13039_v27  ;;  %5415 = vmatpush1.bf16.msra.mxu1 %v13041_v28 }
 0x68b   :  { %5375 = vmatprep.subr.bf16.mxu0 %v13047_v30  ;;  %5416 = vmatprep.subr.bf16.mxu1 %v13049_v63  ;;  %v14951_v30 = vld [vmem:[#allocation26_spill] sm:$0xff] }
 0x68c   :  { %v4852_v63 = vunpack.c.l.bf16 %v14951_v30 }
 0x68e   :  { %5376 = vmatpush1.bf16.msra.mxu0 %v13051_v47  ;;  %5417 = vmatpush1.bf16.msra.mxu1 %v13053_v59 }
 0x68f   :  { %5377 = vmatprep.subr.bf16.mxu0 %v13059_v49  ;;  %5418 = vmatprep.subr.bf16.mxu1 %v13061_v42 }
 0x692   :  { %5378 = vmatpush1.bf16.msra.mxu0 %v13063_v1  ;;  %5419 = vmatpush1.bf16.msra.mxu1 %v13065_v11  ;;  %v4853_v11 = vunpack.c.h.bf16 %v14951_v30 }
 0x693   :  { %5673 = vmatprep.subr.bf16.mxu0 %v13071_v41  ;;  %5714 = vmatprep.subr.bf16.mxu1 %v13073_v38 }
 0x715   :  { %v4771_v13 = vpop.f32.mrf.mxu0  ;;  %v4812_v16 = vpop.f32.mrf.mxu1 }
 0x716   :  { %v4819_v31 = vadd.f32 %v4771_v13, %v4540_v50  ;;  %v4821_v23 = vadd.f32 %v4812_v16, %v4542_v48 }
 0x717   :  { %v4773_v17 = vpop.f32.mrf.mxu0  ;;  %v4814_v35 = vpop.f32.mrf.mxu1 }
 0x718   :  { %v10017_v40 = vmul.f32 -1.442695, %v4819_v31  ;;  %v4820_v2 = vadd.f32 %v4773_v17, %v4541_v15  ;;  %v4822_v61 = vadd.f32 %v4814_v35, %v4543_v12 }
 0x719   :  { %v4775_v4 = vpop.f32.mrf.mxu0  ;;  %v4816_v55 = vpop.f32.mrf.mxu1 }
 0x71a   :  { %11186 = vpow2.f32 %v10017_v40  ;;  %v10018_v36 = vmul.f32 -1.442695, %v4820_v2  ;;  %v10019_v24 = vmul.f32 -1.442695, %v4822_v61  ;;  %v14952_v55 = vld [vmem:[#allocation27_spill] sm:$0xff] }
 0x71b   :  { %v4776_v54 = vpop.f32.mrf.mxu0  ;;  %v4817_v10 = vpop.f32.mrf.mxu1 }
 0x71c   :  { %11188 = vpow2.f32 %v10018_v36  ;;  %v4855_v36 = vunpack.c.h.bf16 %v14952_v55  ;;  %v4854_v10 = vunpack.c.l.bf16 %v14952_v55  ;;  %v5851_v55 = vld [vmem:[#allocation7 + $0x148] sm:$0xff] }
 0x71d   :  { %11190 = vtanh.f32 %v4821_v23 }
 0x71e   :  { %11192 = vpow2.f32 %v10019_v24 }
 0x727   :  { %v11187_v25 = vpop.eup %11186 }
 0x728   :  { %v4826_v26 = vadd.f32 1.0, %v11187_v25 }
 0x729   :  { %v11189_v27 = vpop.eup %11188 }
 0x72a   :  { %11194 = vrcp.f32 %v4826_v26  ;;  %v4832_v28 = vadd.f32 1.0, %v11189_v27  ;;  %v11191_v47 = vpop.eup %11190 }
 0x72b   :  { %v11193_v42 = vpop.eup %11192 }
 0x72c   :  { %11196 = vrcp.f32 %v4832_v28  ;;  %v4839_v13 = vadd.f32 1.0, %v11193_v42  ;;  %v14963_v42 = vld [vmem:[#allocation46_spill] sm:$0xff] }
 0x735   :  { %v5083_v59 = vpop.f32.mrf.mxu0  ;;  %v5124_v49 = vpop.f32.mrf.mxu1 }
 0x736   :  { %v5131_v1 = vadd.f32 %v5083_v59, %v4852_v63  ;;  %v5133_v20 = vadd.f32 %v5124_v49, %v4854_v10  ;;  %v14961_v59 = vld [vmem:[#allocation44_spill] sm:$0xff]  ;;  %v14962_v49 = vld [vmem:[#allocation45_spill] sm:$0xff] }
 0x737   :  { %v11195_v41 = vpop.eup %11194  ;;  %v5085_v38 = vpop.f32.mrf.mxu0 }
 0x738   :  { %v5126_v46 = vpop.f32.mrf.mxu1  ;;  %v4843_v5 = vmul.f32 %v11195_v41, %v11191_v47  ;;  %v10052_v37 = vmul.f32 -1.442695, %v5131_v1  ;;  %v5132_v45 = vadd.f32 %v5085_v38, %v4853_v11  ;;  %v5866_v38 = vld [vmem:[#allocation7 + $0x1c0] sm:$0xff] }
 0x739   :  { %v11197_v50 = vpop.eup %11196  ;;  %v5087_v16 = vpop.f32.mrf.mxu0  ;;  %v5134_v54 = vadd.f32 %v5126_v46, %v4855_v36  ;;  %v5870_v46 = vld [vmem:[#allocation7 + $0x1e0] sm:$0xff] }
 0x73a   :  { %v5128_v31 = vpop.f32.mrf.mxu1  ;;  %v4842_v15 = vmul.f32 %v11197_v50, %v13087_v58  ;;  %11198 = vpow2.f32 %v10052_v37  ;;  %v10053_v17 = vmul.f32 -1.442695, %v5132_v45  ;;  %v10181_v37 = vcombine.low %v5866_v38, %v5870_v46  ;;  %v5862_v50 = vld [vmem:[#allocation7 + $0x1a0] sm:$0xff] }
 0x73b   :  { %v5088_v35 = vpop.f32.mrf.mxu0  ;;  %v10054_v12 = vmul.f32 -1.442695, %v5134_v54  ;;  %v5863_v31 = vld [vmem:[#allocation7 + $0x1a8] sm:$0xff] }
 0x73c   :  { %v5129_v40 = vpop.f32.mrf.mxu1  ;;  %v4844_v2 = vadd.f32 %v4843_v5, %v4842_v15  ;;  %11200 = vpow2.f32 %v10053_v17  ;;  %v10182_v5 = vcombine.high %v5866_v38, %v5870_v46  ;;  %v5855_v54 = vld [vmem:[#allocation7 + $0x168] sm:$0xff]  ;;  %v5810_v46 = vld [vmem:[#allocation7] sm:$0xff] }
 0x73d   :  { %11202 = vrcp.f32 %v4839_v13  ;;  %v5859_v13 = vld [vmem:[#allocation7 + $0x188] sm:$0xff]  ;;  %v5850_v40 = vld [vmem:[#allocation7 + $0x140] sm:$0xff] }
 0x73e   :  { %11204 = vtanh.f32 %v4844_v2  ;;  %v13249_v4 = vsel %vm1711_vm7, %v4844_v2, %v13087_v58  ;;  %v10175_v17 = vcombine.low %v5859_v13, %v5863_v31  ;;  %v10176_v35 = vcombine.high %v5859_v13, %v5863_v31  ;;  %v5854_v2 = vld [vmem:[#allocation7 + $0x160] sm:$0xff] }
 0x73f   :  { %11206 = vtanh.f32 %v5133_v20  ;;  %v10166_v36 = vcombine.high %v5850_v40, %v5854_v2  ;;  %v10165_v10 = vcombine.low %v5850_v40, %v5854_v2  ;;  %v10167_v20 = vcombine.low %v5851_v55, %v5855_v54  ;;  %v5934_v13 = vld [vmem:[#allocation7 + $0x3e0] sm:$0xff] }
 0x740   :  { %11208 = vpow2.f32 %v10054_v12  ;;  %v10168_v12 = vcombine.high %v5851_v55, %v5855_v54  ;;  %v5922_v2 = vld [vmem:[#allocation7 + $0x380] sm:$0xff] }
 0x741   :  { %v5926_v55 = vld [vmem:[#allocation7 + $0x3a0] sm:$0xff] }
 0x742   :  { %v10238_v54 = vcombine.high %v5922_v2, %v5926_v55 }
 0x747   :  { %v11199_v61 = vpop.eup %11198 }
 0x748   :  { %v5138_v48 = vadd.f32 1.0, %v11199_v61  ;;  %v5842_v61 = vld [vmem:[#allocation7 + $0x100] sm:$0xff] }
 0x749   :  { %v11201_v23 = vpop.eup %11200 }
 0x74a   :  { %v11203_v24 = vpop.eup %11202  ;;  %11210 = vrcp.f32 %v5138_v48  ;;  %v5144_v25 = vadd.f32 1.0, %v11201_v23  ;;  %v5846_v48 = vld [vmem:[#allocation7 + $0x120] sm:$0xff]  ;;  %v5843_v23 = vld [vmem:[#allocation7 + $0x108] sm:$0xff] }
 0x74b   :  { %v11205_v26 = vpop.eup %11204 }
 0x74c   :  { %11212 = vrcp.f32 %v5144_v25  ;;  %v4846_v27 = vmul.f32 %v11205_v26, %v11203_v24  ;;  %v11207_v30 = vpop.eup %11206  ;;  %v10158_v24 = vcombine.high %v5842_v61, %v5846_v48  ;;  %v5847_v25 = vld [vmem:[#allocation7 + $0x128] sm:$0xff]  ;;  %v10157_v26 = vcombine.low %v5842_v61, %v5846_v48  ;;  %v5914_v48 = vld [vmem:[#allocation7 + $0x340] sm:$0xff] }
 0x74d   :  { %v11209_v63 = vpop.eup %11208 }
 0x74e   :  { %v13256_v58 = vsel %vm1711_vm7, %v4846_v27, %v13098_v0  ;;  %v10159_v27 = vcombine.low %v5843_v23, %v5847_v25 }
 0x74f   :  { %v5170_v28 = vpack.c.bf16 %v13256_v58, %v13256_v58 }
 0x751   :  { %5396 = vmatmul.mubr.bf16.vlgmr.msra.gmra.mxu0 %v5170_v28  ;;  %5437 = vmatmul.mubr.bf16.vlgmr.msra.gmra.mxu1 %v5170_v28  ;;  %v10160_v28 = vcombine.high %v5843_v23, %v5847_v25  ;;  %v5918_v23 = vld [vmem:[#allocation7 + $0x360] sm:$0xff] }
 0x752   :  { %5674 = vmatpush1.bf16.msra.mxu0 %v13091_v56  ;;  %5715 = vmatpush1.bf16.msra.mxu1 %v13093_v22  ;;  %v10230_v25 = vcombine.high %v5914_v48, %v5918_v23 }
 0x753   :  { %5675 = vmatprep.subr.bf16.mxu0 %v13102_v34  ;;  %5716 = vmatprep.subr.bf16.mxu1 %v13104_v29  ;;  %v5151_v34 = vadd.f32 1.0, %v11209_v63  ;;  %v5838_v63 = vld [vmem:[#allocation7 + $0xe0] sm:$0xff] }
 0x754   :  { %5705 = vmatprep.mubr.bf16.mxu0 %v14861_v62  ;;  %5746 = vmatprep.mubr.bf16.mxu1 %v14861_v62 }
 0x755   :  { %11214 = vrcp.f32 %v5151_v34 }
 0x756   :  { %5676 = vmatpush1.bf16.msra.mxu0 %v13108_v33  ;;  %5717 = vmatpush1.bf16.msra.mxu1 %v13110_v18 }
 0x757   :  { %v11211_v47 = vpop.eup %11210  ;;  %5677 = vmatprep.subr.bf16.mxu0 %v13114_v19  ;;  %5718 = vmatprep.subr.bf16.mxu1 %v13116_v3  ;;  %v14953_v19 = vld [vmem:[#allocation15_spill] sm:$0xff]  ;;  %v14954_v3 = vld [vmem:[#allocation32_spill] sm:$0xff] }
 0x758   :  { %v5155_v56 = vmul.f32 %v11211_v47, %v11207_v30  ;;  %v5834_v30 = vld [vmem:[#allocation7 + $0xc0] sm:$0xff]  ;;  %v5835_v47 = vld [vmem:[#allocation7 + $0xc8] sm:$0xff] }
 0x759   :  { %v11213_v22 = vpop.eup %11212  ;;  %v10149_v34 = vcombine.low %v5834_v30, %v5838_v63 }
 0x75a   :  { %v5154_v29 = vmul.f32 %v11213_v22, %v13154_v14  ;;  %5678 = vmatpush1.bf16.msra.mxu0 %v13122_v8  ;;  %5719 = vmatpush1.bf16.msra.mxu1 %v13124_v6  ;;  %v14955_v8 = vld [vmem:[#allocation33_spill] sm:$0xff]  ;;  %v14956_v6 = vld [vmem:[#allocation16_spill] sm:$0xff] }
 0x75b   :  { %5679 = vmatprep.subr.bf16.mxu0 %v13128_v43  ;;  %5720 = vmatprep.subr.bf16.mxu1 %v13130_v53  ;;  %v14957_v43 = vld [vmem:[#allocation17_spill] sm:$0xff]  ;;  %v14958_v53 = vld [vmem:[#allocation30_spill] sm:$0xff] }
 0x75c   :  { %v5156_v33 = vadd.f32 %v5155_v56, %v5154_v29  ;;  %v10150_v56 = vcombine.high %v5834_v30, %v5838_v63  ;;  %v5839_v22 = vld [vmem:[#allocation7 + $0xe8] sm:$0xff]  ;;  %v5906_v63 = vld [vmem:[#allocation7 + $0x300] sm:$0xff] }
 0x75d   :  { %v10151_v29 = vcombine.low %v5835_v47, %v5839_v22 }
 0x75e   :  { %11216 = vtanh.f32 %v5156_v33  ;;  %5680 = vmatpush1.bf16.msra.mxu0 %v13135_v44  ;;  %5721 = vmatpush1.bf16.msra.mxu1 %v13137_v7  ;;  %v13280_v18 = vsel %vm1398_vm6, %v5156_v33, %v13154_v14  ;;  %v14959_v44 = vld [vmem:[#allocation31_spill] sm:$0xff]  ;;  %v10152_v33 = vcombine.high %v5835_v47, %v5839_v22  ;;  %v5910_v47 = vld [vmem:[#allocation7 + $0x320] sm:$0xff] }
 0x75f   :  { %5681 = vmatprep.subr.bf16.mxu0 %v14953_v19  ;;  %5722 = vmatprep.subr.bf16.mxu1 %v14954_v3  ;;  %v14960_v7 = vld [vmem:[#allocation43_spill] sm:$0xff]  ;;  %v5826_v19 = vld [vmem:[#allocation7 + $0x80] sm:$0xff]  ;;  %v10222_v22 = vcombine.high %v5906_v63, %v5910_v47 }
 0x760   :  { %v5830_v3 = vld [vmem:[#allocation7 + $0xa0] sm:$0xff] }
 0x762   :  { %5682 = vmatpush1.bf16.msra.mxu0 %v14955_v8  ;;  %5723 = vmatpush1.bf16.msra.mxu1 %v14956_v6  ;;  %v11215_v14 = vpop.eup %11214  ;;  %v5827_v8 = vld [vmem:[#allocation7 + $0x88] sm:$0xff]  ;;  %v10142_v6 = vcombine.high %v5826_v19, %v5830_v3 }
 0x763   :  { %5683 = vmatprep.subr.bf16.mxu0 %v14957_v43  ;;  %5724 = vmatprep.subr.bf16.mxu1 %v14958_v53  ;;  %v5831_v43 = vld [vmem:[#allocation7 + $0xa8] sm:$0xff]  ;;  %v10141_v53 = vcombine.low %v5826_v19, %v5830_v3  ;;  %v5898_v3 = vld [vmem:[#allocation7 + $0x2c0] sm:$0xff] }
 0x766   :  { %5684 = vmatpush1.bf16.msra.mxu0 %v14959_v44  ;;  %5725 = vmatpush1.bf16.msra.mxu1 %v14960_v7  ;;  %v10143_v44 = vcombine.low %v5827_v8, %v5831_v43  ;;  %v10144_v7 = vcombine.high %v5827_v8, %v5831_v43  ;;  %v5902_v8 = vld [vmem:[#allocation7 + $0x2e0] sm:$0xff] }
 0x767   :  { %5685 = vmatprep.subr.bf16.mxu0 %v14961_v59  ;;  %5726 = vmatprep.subr.bf16.mxu1 %v13172_v9  ;;  %v5818_v59 = vld [vmem:[#allocation7 + $0x40] sm:$0xff]  ;;  %v10213_v43 = vcombine.low %v5898_v3, %v5902_v8 }
 0x76a   :  { %5686 = vmatpush1.bf16.msra.mxu0 %v14962_v49  ;;  %5727 = vmatpush1.bf16.msra.mxu1 %v14963_v42  ;;  %v5819_v49 = vld [vmem:[#allocation7 + $0x48] sm:$0xff] }
 0x76b   :  { %v11217_v1 = vpop.eup %11216  ;;  %5687 = vmatprep.subr.bf16.mxu0 %v13182_v32  ;;  %5728 = vmatprep.subr.bf16.mxu1 %v13184_v52  ;;  %v5867_v32 = vld [vmem:[#allocation7 + $0x1c8] sm:$0xff] }
 0x76c   :  { %v5158_v11 = vmul.f32 %v11217_v1, %v11215_v14  ;;  %v5871_v52 = vld [vmem:[#allocation7 + $0x1e8] sm:$0xff]  ;;  %v5822_v14 = vld [vmem:[#allocation7 + $0x60] sm:$0xff] }
 0x76d   :  { %v10183_v45 = vcombine.low %v5867_v32, %v5871_v52  ;;  %v10134_v42 = vcombine.high %v5818_v59, %v5822_v14  ;;  %v5823_v1 = vld [vmem:[#allocation7 + $0x68] sm:$0xff] }
 0x76e   :  { %5688 = vmatpush1.bf16.msra.mxu0 %v13188_v21  ;;  %5729 = vmatpush1.bf16.msra.mxu1 %v13190_v39  ;;  %v13301_v41 = vsel %vm1398_vm6, %v5158_v11, %v13199_v51  ;;  %v10184_v21 = vcombine.high %v5867_v32, %v5871_v52  ;;  %v5858_v39 = vld [vmem:[#allocation7 + $0x180] sm:$0xff]  ;;  %v10133_v11 = vcombine.low %v5818_v59, %v5822_v14 }
 0x76f   :  { %v5480_v9 = vpack.c.bf16 %v13301_v41, %v13301_v41  ;;  %6620 = vmatprep.subr.bf16.mxu0 %v10182_v5  ;;  %v10174_v16 = vcombine.high %v5858_v39, %v5862_v50  ;;  %v10173_v15 = vcombine.low %v5858_v39, %v5862_v50  ;;  %v10136_v38 = vcombine.high %v5819_v49, %v5823_v1  ;;  %v5814_v32 = vld [vmem:[#allocation7 + $0x20] sm:$0xff]  ;;  %v5811_v5 = vld [vmem:[#allocation7 + $0x8] sm:$0xff] }
 0x770   :  { %6693 = vmatprep.subr.bf16.mxu1 %v10184_v21  ;;  %v10126_v52 = vcombine.high %v5810_v46, %v5814_v32  ;;  %v5930_v50 = vld [vmem:[#allocation7 + $0x3c0] sm:$0xff] }
 0x771   :  { %5706 = vmatmul.mubr.bf16.vlgmr.msra.gmra.mxu0 %v5480_v9  ;;  %5747 = vmatmul.mubr.bf16.vlgmr.msra.gmra.mxu1 %v5480_v9  ;;  %v10135_v9 = vcombine.low %v5819_v49, %v5823_v1  ;;  %v10246_v31 = vcombine.high %v5930_v50, %v5934_v13  ;;  %v5894_v59 = vld [vmem:[#allocation7 + $0x2a0] sm:$0xff]  ;;  %v5891_v1 = vld [vmem:[#allocation7 + $0x288] sm:$0xff] }
 0x772   :  { %6621 = vmatpush1.bf16.msra.mxu0 %v10181_v37  ;;  %6694 = vmatpush1.bf16.msra.mxu1 %v10183_v45  ;;  %v5815_v37 = vld [vmem:[#allocation7 + $0x28] sm:$0xff]  ;;  %v10125_v45 = vcombine.low %v5810_v46, %v5814_v32  ;;  %v5886_v46 = vld [vmem:[#allocation7 + $0x260] sm:$0xff] }
 0x773   :  { %6622 = vmatprep.subr.bf16.mxu0 %v10174_v16  ;;  %6695 = vmatprep.subr.bf16.mxu1 %v10176_v35  ;;  %v10127_v21 = vcombine.low %v5811_v5, %v5815_v37  ;;  %v10128_v39 = vcombine.high %v5811_v5, %v5815_v37  ;;  %v5931_v16 = vld [vmem:[#allocation7 + $0x3c8] sm:$0xff] }
 0x774   :  { %v5883_v32 = vld [vmem:[#allocation7 + $0x248] sm:$0xff] }
 0x775   :  { %v5887_v5 = vld [vmem:[#allocation7 + $0x268] sm:$0xff] }
 0x776   :  { %6623 = vmatpush1.bf16.msra.mxu0 %v10173_v15  ;;  %6696 = vmatpush1.bf16.msra.mxu1 %v10175_v17  ;;  %v5935_v15 = vld [vmem:[#allocation7 + $0x3e8] sm:$0xff]  ;;  %v10245_v17 = vcombine.low %v5930_v50, %v5934_v13  ;;  %v5878_v50 = vld [vmem:[#allocation7 + $0x220] sm:$0xff] }
 0x777   :  { %6624 = vmatprep.subr.bf16.mxu0 %v10166_v36  ;;  %6697 = vmatprep.subr.bf16.mxu1 %v10168_v12  ;;  %v10247_v35 = vcombine.low %v5931_v16, %v5935_v15  ;;  %v10248_v40 = vcombine.high %v5931_v16, %v5935_v15  ;;  %v5923_v36 = vld [vmem:[#allocation7 + $0x388] sm:$0xff]  ;;  %v10199_v15 = vcombine.low %v5883_v32, %v5887_v5 }
 0x778   :  { %v5875_v13 = vld [vmem:[#allocation7 + $0x208] sm:$0xff] }
 0x779   :  { %v5879_v16 = vld [vmem:[#allocation7 + $0x228] sm:$0xff] }
 0x77a   :  { %6625 = vmatpush1.bf16.msra.mxu0 %v10165_v10  ;;  %6698 = vmatpush1.bf16.msra.mxu1 %v10167_v20  ;;  %v5927_v10 = vld [vmem:[#allocation7 + $0x3a8] sm:$0xff]  ;;  %v10237_v20 = vcombine.low %v5922_v2, %v5926_v55  ;;  %v10191_v2 = vcombine.low %v5875_v13, %v5879_v16  ;;  %v13305_v55 = vld [vmem:[#allocation7 + $0x1d0] sm:$0xff] }
 0x77b   :  { %6626 = vmatprep.subr.bf16.mxu0 %v10158_v24  ;;  %6699 = vmatprep.subr.bf16.mxu1 %v10160_v28  ;;  %v10239_v12 = vcombine.low %v5923_v36, %v5927_v10  ;;  %v10240_v61 = vcombine.high %v5923_v36, %v5927_v10  ;;  %v5915_v24 = vld [vmem:[#allocation7 + $0x348] sm:$0xff]  ;;  %v13307_v36 = vld [vmem:[#allocation7 + $0x1f0] sm:$0xff] }
 0x77c   :  { %v10186_v10 = vcombine.high %v13305_v55, %v13307_v36 }
 0x77e   :  { %6627 = vmatpush1.bf16.msra.mxu0 %v10157_v26  ;;  %6700 = vmatpush1.bf16.msra.mxu1 %v10159_v27  ;;  %v5919_v26 = vld [vmem:[#allocation7 + $0x368] sm:$0xff]  ;;  %v10229_v27 = vcombine.low %v5914_v48, %v5918_v23  ;;  %v14964_v23 = vld [vmem:[#allocation22_spill] sm:$0xff] }
 0x77f   :  { %6628 = vmatprep.subr.bf16.mxu0 %v10150_v56  ;;  %6701 = vmatprep.subr.bf16.mxu1 %v10152_v33  ;;  %v10231_v28 = vcombine.low %v5915_v24, %v5919_v26  ;;  %v10232_v30 = vcombine.high %v5915_v24, %v5919_v26  ;;  %v5907_v56 = vld [vmem:[#allocation7 + $0x308] sm:$0xff]  ;;  %v5166_v24 = vunpack.c.l.bf16 %v14964_v23 }
 0x782   :  { %6629 = vmatpush1.bf16.msra.mxu0 %v10149_v34  ;;  %6702 = vmatpush1.bf16.msra.mxu1 %v10151_v29  ;;  %v5911_v34 = vld [vmem:[#allocation7 + $0x328] sm:$0xff]  ;;  %v10221_v29 = vcombine.low %v5906_v63, %v5910_v47  ;;  %v5167_v47 = vunpack.c.h.bf16 %v14964_v23 }
 0x783   :  { %6630 = vmatprep.subr.bf16.mxu0 %v10142_v6  ;;  %6703 = vmatprep.subr.bf16.mxu1 %v10144_v7  ;;  %v10223_v33 = vcombine.low %v5907_v56, %v5911_v34  ;;  %v10224_v19 = vcombine.high %v5907_v56, %v5911_v34  ;;  %v5899_v6 = vld [vmem:[#allocation7 + $0x2c8] sm:$0xff]  ;;  %v5890_v7 = vld [vmem:[#allocation7 + $0x280] sm:$0xff] }
 0x786   :  { %6631 = vmatpush1.bf16.msra.mxu0 %v10141_v53  ;;  %6704 = vmatpush1.bf16.msra.mxu1 %v10143_v44  ;;  %v10214_v53 = vcombine.high %v5898_v3, %v5902_v8  ;;  %v5903_v44 = vld [vmem:[#allocation7 + $0x2e8] sm:$0xff] }
 0x787   :  { %6632 = vmatprep.subr.bf16.mxu0 %v10134_v42  ;;  %6705 = vmatprep.subr.bf16.mxu1 %v10136_v38  ;;  %v10215_v14 = vcombine.low %v5899_v6, %v5903_v44  ;;  %v10216_v49 = vcombine.high %v5899_v6, %v5903_v44  ;;  %v10206_v42 = vcombine.high %v5890_v7, %v5894_v59  ;;  %v5882_v38 = vld [vmem:[#allocation7 + $0x240] sm:$0xff] }
 0x78a   :  { %6633 = vmatpush1.bf16.msra.mxu0 %v10133_v11  ;;  %6706 = vmatpush1.bf16.msra.mxu1 %v10135_v9  ;;  %v5895_v11 = vld [vmem:[#allocation7 + $0x2a8] sm:$0xff] }
 0x78b   :  { %6634 = vmatprep.subr.bf16.mxu0 %v10126_v52  ;;  %6707 = vmatprep.subr.bf16.mxu1 %v10128_v39  ;;  %v10208_v9 = vcombine.high %v5891_v1, %v5895_v11  ;;  %v10205_v52 = vcombine.low %v5890_v7, %v5894_v59  ;;  %v10207_v37 = vcombine.low %v5891_v1, %v5895_v11  ;;  %v5874_v39 = vld [vmem:[#allocation7 + $0x200] sm:$0xff] }
 0x78e   :  { %6635 = vmatpush1.bf16.msra.mxu0 %v10125_v45  ;;  %6708 = vmatpush1.bf16.msra.mxu1 %v10127_v21  ;;  %v10198_v45 = vcombine.high %v5882_v38, %v5886_v46  ;;  %v10200_v21 = vcombine.high %v5883_v32, %v5887_v5 }
 0x78f   :  { %6636 = vmatprep.subr.bf16.mxu0 %v10246_v31  ;;  %6709 = vmatprep.subr.bf16.mxu1 %v10248_v40  ;;  %v10197_v31 = vcombine.low %v5882_v38, %v5886_v46  ;;  %v10189_v40 = vcombine.low %v5874_v39, %v5878_v50 }
 0x792   :  { %6637 = vmatpush2.bf16.msra.mxu0 %v10245_v17  ;;  %6710 = vmatpush2.bf16.msra.mxu1 %v10247_v35  ;;  %v10190_v17 = vcombine.high %v5874_v39, %v5878_v50  ;;  %v10192_v35 = vcombine.high %v5875_v13, %v5879_v16 }
 0x793   :  { %6638 = vmatprep.subr.bf16.mxu0 %v10238_v54  ;;  %6711 = vmatprep.subr.bf16.mxu1 %v10240_v61  ;;  %v13309_v54 = vld [vmem:[#allocation7 + $0x1d8] sm:$0xff] }
 0x796   :  { %6639 = vmatpush2.bf16.msra.mxu0 %v10237_v20  ;;  %6712 = vmatpush2.bf16.msra.mxu1 %v10239_v12  ;;  %v13313_v20 = vld [vmem:[#allocation7 + $0x1f8] sm:$0xff]  ;;  %v10185_v12 = vcombine.low %v13305_v55, %v13307_v36 }
 0x797   :  { %6640 = vmatprep.subr.bf16.mxu0 %v10230_v25  ;;  %6713 = vmatprep.subr.bf16.mxu1 %v10232_v30  ;;  %v10187_v61 = vcombine.low %v13309_v54, %v13313_v20  ;;  %v10188_v48 = vcombine.high %v13309_v54, %v13313_v20  ;;  %v14965_v25 = vld [vmem:[#allocation23_spill] sm:$0xff]  ;;  %v14972_v54 = vld [vmem:[#allocation13_spill] sm:$0xff]  ;;  %v14973_v20 = vld [vmem:[#allocation42_spill] sm:$0xff] }
 0x798   :  { %v5168_v26 = vunpack.c.l.bf16 %v14965_v25  ;;  %v5169_v56 = vunpack.c.h.bf16 %v14965_v25 }
 0x79a   :  { %6641 = vmatpush2.bf16.msra.mxu0 %v10229_v27  ;;  %6714 = vmatpush2.bf16.msra.mxu1 %v10231_v28 }
 0x79b   :  { %6642 = vmatprep.subr.bf16.mxu0 %v10222_v22  ;;  %6715 = vmatprep.subr.bf16.mxu1 %v10224_v19 }
 0x79e   :  { %6643 = vmatpush2.bf16.msra.mxu0 %v10221_v29  ;;  %6716 = vmatpush2.bf16.msra.mxu1 %v10223_v33 }
 0x79f   :  { %6644 = vmatprep.subr.bf16.mxu0 %v10214_v53  ;;  %6717 = vmatprep.subr.bf16.mxu1 %v10216_v49 }
 0x7a2   :  { %6645 = vmatpush2.bf16.msra.mxu0 %v10213_v43  ;;  %6718 = vmatpush2.bf16.msra.mxu1 %v10215_v14 }
 0x7a3   :  { %6646 = vmatprep.subr.bf16.mxu0 %v10206_v42  ;;  %6719 = vmatprep.subr.bf16.mxu1 %v10208_v9  ;;  %v14966_v42 = vld [vmem:[#allocation24_spill] sm:$0xff] }
 0x7a4   :  { %v5476_v1 = vunpack.c.l.bf16 %v14966_v42  ;;  %v5477_v5 = vunpack.c.h.bf16 %v14966_v42  ;;  %v5861_v42 = vld [vmem:[#allocation7 + $0x198] sm:$0xff] }
 0x7a6   :  { %6647 = vmatpush2.bf16.msra.mxu0 %v10205_v52  ;;  %6720 = vmatpush2.bf16.msra.mxu1 %v10207_v37 }
 0x7a7   :  { %6648 = vmatprep.subr.bf16.mxu0 %v10198_v45  ;;  %6721 = vmatprep.subr.bf16.mxu1 %v10200_v21 }
 0x7aa   :  { %6649 = vmatpush2.bf16.msra.mxu0 %v10197_v31  ;;  %6722 = vmatpush2.bf16.msra.mxu1 %v10199_v15 }
 0x7ab   :  { %6650 = vmatprep.subr.bf16.mxu0 %v10190_v17  ;;  %6723 = vmatprep.subr.bf16.mxu1 %v10192_v35 }
 0x7ae   :  { %6651 = vmatpush2.bf16.msra.mxu0 %v10189_v40  ;;  %6724 = vmatpush2.bf16.msra.mxu1 %v10191_v2 }
 0x7af   :  { %6766 = vmatprep.subr.bf16.mxu0 %v10186_v10  ;;  %6839 = vmatprep.subr.bf16.mxu1 %v10188_v48  ;;  %v14967_v48 = vld [vmem:[#allocation25_spill] sm:$0xff] }
 0x7b0   :  { %v5479_v23 = vunpack.c.h.bf16 %v14967_v48  ;;  %v5478_v25 = vunpack.c.l.bf16 %v14967_v48  ;;  %v14974_v48 = vld [vmem:[#allocation54_spill] sm:$0xff] }
 0x811   :  { %v5397_v27 = vpop.f32.mrf.mxu0  ;;  %v5438_v28 = vpop.f32.mrf.mxu1 }
 0x812   :  { %v5445_v30 = vadd.f32 %v5397_v27, %v5166_v24  ;;  %v5447_v63 = vadd.f32 %v5438_v28, %v5168_v26 }
 0x813   :  { %v5399_v22 = vpop.f32.mrf.mxu0  ;;  %v5440_v34 = vpop.f32.mrf.mxu1 }
 0x814   :  { %v10087_v29 = vmul.f32 -1.442695, %v5445_v30  ;;  %v5446_v33 = vadd.f32 %v5399_v22, %v5167_v47  ;;  %v5448_v19 = vadd.f32 %v5440_v34, %v5169_v56 }
 0x815   :  { %v5401_v3 = vpop.f32.mrf.mxu0  ;;  %v5442_v8 = vpop.f32.mrf.mxu1 }
 0x816   :  { %11218 = vpow2.f32 %v10087_v29  ;;  %v10088_v6 = vmul.f32 -1.442695, %v5446_v33  ;;  %v10089_v44 = vmul.f32 -1.442695, %v5448_v19 }
 0x817   :  { %v5402_v43 = vpop.f32.mrf.mxu0  ;;  %v5443_v53 = vpop.f32.mrf.mxu1 }
 0x818   :  { %11220 = vpow2.f32 %v10088_v6 }
 0x819   :  { %11222 = vtanh.f32 %v5447_v63 }
 0x81a   :  { %11224 = vpow2.f32 %v10089_v44 }
 0x823   :  { %v11219_v7 = vpop.eup %11218 }
 0x824   :  { %v5452_v59 = vadd.f32 1.0, %v11219_v7 }
 0x825   :  { %v11221_v14 = vpop.eup %11220 }
 0x826   :  { %11226 = vrcp.f32 %v5452_v59  ;;  %v5458_v49 = vadd.f32 1.0, %v11221_v14  ;;  %v11223_v11 = vpop.eup %11222  ;;  %v5860_v59 = vld [vmem:[#allocation7 + $0x190] sm:$0xff] }
 0x827   :  { %v11225_v46 = vpop.eup %11224 }
 0x828   :  { %11228 = vrcp.f32 %v5458_v49  ;;  %v5465_v16 = vadd.f32 1.0, %v11225_v46  ;;  %v5864_v49 = vld [vmem:[#allocation7 + $0x1b0] sm:$0xff] }
 0x831   :  { %v5707_v9 = vpop.f32.mrf.mxu0  ;;  %v5748_v38 = vpop.f32.mrf.mxu1 }
 0x832   :  { %v5755_v32 = vadd.f32 %v5707_v9, %v5476_v1  ;;  %v5757_v26 = vadd.f32 %v5748_v38, %v5478_v25  ;;  %v5865_v1 = vld [vmem:[#allocation7 + $0x1b8] sm:$0xff]  ;;  %v14970_v9 = vld [vmem:[#allocation37_spill] sm:$0xff] }
 0x833   :  { %v11227_v52 = vpop.eup %11226  ;;  %v5709_v37 = vpop.f32.mrf.mxu0  ;;  %v14971_v38 = vld [vmem:[#allocation41_spill] sm:$0xff] }
 0x834   :  { %v5750_v45 = vpop.f32.mrf.mxu1  ;;  %v5469_v21 = vmul.f32 %v11227_v52, %v11223_v11  ;;  %v10122_v39 = vmul.f32 -1.442695, %v5755_v32  ;;  %v5756_v50 = vadd.f32 %v5709_v37, %v5477_v5  ;;  %v13348_v46 = vpack.c.bf16 %v14971_v38, %v14970_v9  ;;  %v5852_v32 = vld [vmem:[#allocation7 + $0x150] sm:$0xff]  ;;  %v5853_v37 = vld [vmem:[#allocation7 + $0x158] sm:$0xff] }
 0x835   :  { %v11229_v13 = vpop.eup %11228  ;;  %v5711_v31 = vpop.f32.mrf.mxu0  ;;  %v5758_v24 = vadd.f32 %v5750_v45, %v5479_v23  ;;  %v10178_v5 = vcombine.high %v5860_v59, %v5864_v49  ;;  %v5856_v52 = vld [vmem:[#allocation7 + $0x170] sm:$0xff]  ;;  %v5857_v45 = vld [vmem:[#allocation7 + $0x178] sm:$0xff] }
 0x836   :  { %v5752_v15 = vpop.f32.mrf.mxu1  ;;  %v5468_v17 = vmul.f32 %v11229_v13, %v13249_v4  ;;  %11230 = vpow2.f32 %v10122_v39  ;;  %v10123_v35 = vmul.f32 -1.442695, %v5756_v50  ;;  %v10177_v39 = vcombine.low %v5860_v59, %v5864_v49  ;;  %v5845_v31 = vld [vmem:[#allocation7 + $0x118] sm:$0xff]  ;;  %v14975_v23 = vld [vmem:[#allocation34_spill] sm:$0xff] }
 0x837   :  { %v5712_v40 = vpop.f32.mrf.mxu0  ;;  %v10124_v27 = vmul.f32 -1.442695, %v5758_v24  ;;  %v10179_v50 = vcombine.low %v5861_v42, %v5865_v1  ;;  %v10170_v13 = vcombine.high %v5852_v32, %v5856_v52  ;;  %v5849_v15 = vld [vmem:[#allocation7 + $0x138] sm:$0xff]  ;;  %v10169_v55 = vcombine.low %v5852_v32, %v5856_v52  ;;  %v5812_v38 = vld [vmem:[#allocation7 + $0x10] sm:$0xff] }
 0x838   :  { %v5753_v2 = vpop.f32.mrf.mxu1  ;;  %v5470_v10 = vadd.f32 %v5469_v21, %v5468_v17  ;;  %11232 = vpow2.f32 %v10123_v35  ;;  %v13360_v21 = vpack.c.bf16 %v12969_v60, %v13199_v51  ;;  %v5844_v51 = vld [vmem:[#allocation7 + $0x110] sm:$0xff]  ;;  %v10171_v36 = vcombine.low %v5853_v37, %v5857_v45 }
 0x839   :  { %11234 = vrcp.f32 %v5465_v16  ;;  %v10172_v16 = vcombine.high %v5853_v37, %v5857_v45  ;;  %v5848_v60 = vld [vmem:[#allocation7 + $0x130] sm:$0xff]  ;;  %v10164_v35 = vcombine.high %v5845_v31, %v5849_v15  ;;  %v5837_v2 = vld [vmem:[#allocation7 + $0xd8] sm:$0xff]  ;;  %v13378_v24 = vpack.c.bf16 %v14975_v23, %v14974_v48 }
 0x83a   :  { %11236 = vtanh.f32 %v5470_v10  ;;  %v10162_v17 = vcombine.high %v5844_v51, %v5848_v60  ;;  %v5840_v40 = vld [vmem:[#allocation7 + $0xf0] sm:$0xff]  ;;  %v5841_v10 = vld [vmem:[#allocation7 + $0xf8] sm:$0xff]  ;;  %v10161_v25 = vcombine.low %v5844_v51, %v5848_v60 }
 0x83b   :  { %11238 = vtanh.f32 %v5757_v26  ;;  %v10163_v26 = vcombine.low %v5845_v31, %v5849_v15  ;;  %v5816_v32 = vld [vmem:[#allocation7 + $0x30] sm:$0xff]  ;;  %v5933_v51 = vld [vmem:[#allocation7 + $0x3d8] sm:$0xff] }
 0x83c   :  { %11240 = vpow2.f32 %v10124_v27  ;;  %v5937_v60 = vld [vmem:[#allocation7 + $0x3f8] sm:$0xff] }
 0x83d   :  { %v10252_v15 = vcombine.high %v5933_v51, %v5937_v60  ;;  %v5917_v48 = vld [vmem:[#allocation7 + $0x358] sm:$0xff] }
 0x843   :  { %v11231_v28 = vpop.eup %11230 }
 0x844   :  { %v5762_v30 = vadd.f32 1.0, %v11231_v28  ;;  %v10156_v28 = vcombine.high %v5837_v2, %v5841_v10 }
 0x845   :  { %v11233_v63 = vpop.eup %11232 }
 0x846   :  { %v11235_v4 = vpop.eup %11234  ;;  %11242 = vrcp.f32 %v5762_v30  ;;  %v5768_v47 = vadd.f32 1.0, %v11233_v63  ;;  %v5828_v30 = vld [vmem:[#allocation7 + $0x90] sm:$0xff] }
 0x847   :  { %v11237_v56 = vpop.eup %11236  ;;  %v5832_v63 = vld [vmem:[#allocation7 + $0xb0] sm:$0xff] }
 0x848   :  { %11244 = vrcp.f32 %v5768_v47  ;;  %v13330_v22 = vmul.f32 %v11237_v56, %v11235_v4  ;;  %v11239_v34 = vpop.eup %11238  ;;  %v5829_v4 = vld [vmem:[#allocation7 + $0x98] sm:$0xff] }
 0x849   :  { %v11241_v29 = vpop.eup %11240  ;;  %v5833_v47 = vld [vmem:[#allocation7 + $0xb8] sm:$0xff] }
 0x84a   :  { %v5775_v8 = vadd.f32 1.0, %v11241_v29  ;;  %v14976_v29 = vld [vmem:[#allocation14_spill] sm:$0xff]  ;;  %v10147_v49 = vcombine.low %v5829_v4, %v5833_v47  ;;  %v5473_v9 = vsel %vm1082_vm4, %v13330_v22, %v13256_v58  ;;  %v10129_v22 = vcombine.low %v5812_v38, %v5816_v32 }
 0x84b   :  { %v13410_v45 = vpack.c.bf16 %v5473_v9, %v13256_v58 }
 0x84c   :  { %11246 = vrcp.f32 %v5775_v8  ;;  %v10146_v8 = vcombine.high %v5828_v30, %v5832_v63 }
 0x853   :  { %v11243_v33 = vpop.eup %11242 }
 0x854   :  { %v5779_v19 = vmul.f32 %v11243_v33, %v11239_v34  ;;  %v10155_v34 = vcombine.low %v5837_v2, %v5841_v10  ;;  %v13384_v33 = vpack.c.bf16 %v13098_v0, %v14976_v29  ;;  %v14980_v0 = vld [vmem:[#allocation39_spill] sm:$0xff]  ;;  %v5916_v2 = vld [vmem:[#allocation7 + $0x350] sm:$0xff] }
 0x855   :  { %v11245_v3 = vpop.eup %11244  ;;  %v5920_v10 = vld [vmem:[#allocation7 + $0x370] sm:$0xff] }
 0x856   :  { %v5778_v6 = vmul.f32 %v11245_v3, %v13280_v18  ;;  %v5820_v3 = vld [vmem:[#allocation7 + $0x50] sm:$0xff]  ;;  %v13448_v18 = vld [vmem:[#allocation9 + $0xac] ss:$16 sps:$4 sm:$0xff]  }
 0x857   :  { %14985 = vst [vmem:[#allocation51_spill] sm:$0xff] %v13448_v18 }
 0x858   :  { %v5780_v43 = vadd.f32 %v5779_v19, %v5778_v6  ;;  %v10148_v6 = vcombine.high %v5829_v4, %v5833_v47  ;;  %v5913_v4 = vld [vmem:[#allocation7 + $0x338] sm:$0xff]  ;;  %v10233_v47 = vcombine.low %v5916_v2, %v5920_v10  ;;  %v13512_v19 = vld [vmem:[#allocation9 + $0x20] ss:$16 sps:$4 sm:$0xff]  }
 0x859   :  { %v11247_v53 = vpop.eup %11246  ;;  %15002 = vst [vmem:[#allocation31_spill] sm:$0xff] %v13512_v19 }
 0x85a   :  { %11248 = vtanh.f32 %v5780_v43  ;;  %v5824_v43 = vld [vmem:[#allocation7 + $0x70] sm:$0xff] }
 0x85b   :  { %v10137_v52 = vcombine.low %v5820_v3, %v5824_v43 }
 0x867   :  { %v11249_v44 = vpop.eup %11248 }
 0x868   :  { %v5782_v7 = vmul.f32 %v11249_v44, %v11247_v53  ;;  %v5821_v53 = vld [vmem:[#allocation7 + $0x58] sm:$0xff] }
 0x869   :  { %v5825_v44 = vld [vmem:[#allocation7 + $0x78] sm:$0xff] }
 0x86a   :  { %v5783_v14 = vsel %vm770_vm2, %v5782_v7, %v13301_v41  ;;  %v14979_v7 = vld [vmem:[#allocation55_spill] sm:$0xff]  ;;  %v10139_v37 = vcombine.low %v5821_v53, %v5825_v44 }
 0x86b   :  { %v13337_v11 = vpack.c.bf16 %v13301_v41, %v5783_v14  ;;  %v10180_v41 = vcombine.high %v5861_v42, %v5865_v1  ;;  %v13397_v59 = vpack.c.bf16 %v14980_v0, %v14979_v7  ;;  %v10145_v14 = vcombine.low %v5828_v30, %v5832_v63  ;;  %v5912_v30 = vld [vmem:[#allocation7 + $0x330] sm:$0xff]  ;;  %v5909_v63 = vld [vmem:[#allocation7 + $0x318] sm:$0xff] }
 0x86c   :  { %v10138_v42 = vcombine.high %v5820_v3, %v5824_v43  ;;  %v10140_v1 = vcombine.high %v5821_v53, %v5825_v44  ;;  %v10228_v29 = vcombine.high %v5909_v63, %v5913_v4  ;;  %v5900_v3 = vld [vmem:[#allocation7 + $0x2d0] sm:$0xff]  ;;  %v5905_v43 = vld [vmem:[#allocation7 + $0x2f8] sm:$0xff]  ;;  %v10227_v44 = vcombine.low %v5909_v63, %v5913_v4 }
 0x86d   :  { %6652 = vmatprep.mubr.bf16.mxu0 %v13337_v11  ;;  %6725 = vmatprep.mubr.bf16.mxu1 %v13337_v11  ;;  %v13474_v63 = vld [vmem:[#allocation9 + $0x64] ss:$16 sps:$4 sm:$0xff]   ;;  %v13476_v4 = vld [vmem:[#allocation9 + $0x6c] ss:$16 sps:$4 sm:$0xff]  }
 0x86e   :  { %10475 = vmatmul.mubr.msk.bf16.vlgmr.msra.gmra.mxu0 %vm13342_vm13, %v13348_v46  ;;  %10481 = vmatmul.mubr.msk.bf16.vlgmr.msra.gmra.mxu1 %vm13342_vm13, %v13348_v46  ;;  %14992 = vst [vmem:[#allocation20_spill] sm:$0xff] %v13474_v63  ;;  %14993 = vst [vmem:[#allocation21_spill] sm:$0xff] %v13476_v4 }
 0x86f   :  { %6767 = vmatpush1.bf16.msra.mxu0 %v10185_v12  ;;  %6840 = vmatpush1.bf16.msra.mxu1 %v10187_v61  ;;  %v13372_v12 = vpack.c.bf16 %v14973_v20, %v14972_v54  ;;  %v5836_v61 = vld [vmem:[#allocation7 + $0xd0] sm:$0xff]  ;;  %v5925_v54 = vld [vmem:[#allocation7 + $0x398] sm:$0xff] }
 0x870   :  { %6662 = vmatprep.mubr.bf16.mxu0 %v13360_v21  ;;  %6735 = vmatprep.mubr.bf16.mxu1 %v13360_v21  ;;  %v10154_v27 = vcombine.high %v5836_v61, %v5840_v40  ;;  %v10153_v56 = vcombine.low %v5836_v61, %v5840_v40  ;;  %v5929_v20 = vld [vmem:[#allocation7 + $0x3b8] sm:$0xff] }
 0x871   :  { %6768 = vmatprep.subr.bf16.mxu0 %v10178_v5  ;;  %6841 = vmatprep.subr.bf16.mxu1 %v10180_v41  ;;  %v5813_v5 = vld [vmem:[#allocation7 + $0x18] sm:$0xff]  ;;  %v10244_v40 = vcombine.high %v5925_v54, %v5929_v20 }
 0x872   :  { %v5817_v41 = vld [vmem:[#allocation7 + $0x38] sm:$0xff] }
 0x873   :  { %6769 = vmatpush1.bf16.msra.mxu0 %v10177_v39  ;;  %6842 = vmatpush1.bf16.msra.mxu1 %v10179_v50  ;;  %v5932_v39 = vld [vmem:[#allocation7 + $0x3d0] sm:$0xff]  ;;  %v10130_v50 = vcombine.high %v5812_v38, %v5816_v32  ;;  %v10131_v31 = vcombine.low %v5813_v5, %v5817_v41 }
 0x874   :  { %6770 = vmatprep.subr.bf16.mxu0 %v10170_v13  ;;  %6843 = vmatprep.subr.bf16.mxu1 %v10172_v16  ;;  %v10132_v13 = vcombine.high %v5813_v5, %v5817_v41  ;;  %v5936_v16 = vld [vmem:[#allocation7 + $0x3f0] sm:$0xff] }
 0x875   :  { %v10250_v58 = vcombine.high %v5932_v39, %v5936_v16  ;;  %v10249_v61 = vcombine.low %v5932_v39, %v5936_v16  ;;  %v5884_v41 = vld [vmem:[#allocation7 + $0x250] sm:$0xff]  ;;  %v5889_v39 = vld [vmem:[#allocation7 + $0x278] sm:$0xff] }
 0x876   :  { %6663 = vmatmul.mubr.bf16.gmra.mxu0 %v13372_v12  ;;  %6736 = vmatmul.mubr.bf16.gmra.mxu1 %v13372_v12 }
 0x877   :  { %6771 = vmatpush1.bf16.msra.mxu0 %v10169_v55  ;;  %6844 = vmatpush1.bf16.msra.mxu1 %v10171_v36  ;;  %v5924_v55 = vld [vmem:[#allocation7 + $0x390] sm:$0xff] }
 0x878   :  { %6672 = vmatprep.mubr.bf16.mxu0 %v13378_v24  ;;  %6745 = vmatprep.mubr.bf16.mxu1 %v13378_v24  ;;  %v5928_v36 = vld [vmem:[#allocation7 + $0x3b0] sm:$0xff] }
 0x879   :  { %6772 = vmatprep.subr.bf16.mxu0 %v10162_v17  ;;  %6845 = vmatprep.subr.bf16.mxu1 %v10164_v35  ;;  %v10251_v17 = vcombine.low %v5933_v51, %v5937_v60  ;;  %v10242_v35 = vcombine.high %v5924_v55, %v5928_v36  ;;  %v10241_v23 = vcombine.low %v5924_v55, %v5928_v36  ;;  %v5876_v60 = vld [vmem:[#allocation7 + $0x210] sm:$0xff] }
 0x87b   :  { %6773 = vmatpush1.bf16.msra.mxu0 %v10161_v25  ;;  %6846 = vmatpush1.bf16.msra.mxu1 %v10163_v26  ;;  %v10243_v25 = vcombine.low %v5925_v54, %v5929_v20  ;;  %v10234_v26 = vcombine.high %v5916_v2, %v5920_v10  ;;  %v13424_v2 = vld [vmem:[#allocation9 + $0xe8] ss:$16 sps:$4 sm:$0xff]   ;;  %v13426_v10 = vld [vmem:[#allocation9 + $0xc4] ss:$16 sps:$4 sm:$0xff]  }
 0x87c   :  { %6774 = vmatprep.subr.bf16.mxu0 %v10154_v27  ;;  %6847 = vmatprep.subr.bf16.mxu1 %v10156_v28  ;;  %v5908_v28 = vld [vmem:[#allocation7 + $0x310] sm:$0xff] }
 0x87d   :  { %v10225_v53 = vcombine.low %v5908_v28, %v5912_v30 }
 0x87e   :  { %6673 = vmatmul.mubr.bf16.gmra.mxu0 %v13384_v33  ;;  %6746 = vmatmul.mubr.bf16.gmra.mxu1 %v13384_v33 }
 0x87f   :  { %6775 = vmatpush1.bf16.msra.mxu0 %v10153_v56  ;;  %6848 = vmatpush1.bf16.msra.mxu1 %v10155_v34  ;;  %v10226_v34 = vcombine.high %v5908_v28, %v5912_v30  ;;  %v13468_v28 = vld [vmem:[#allocation9 + $0x80] ss:$16 sps:$4 sm:$0xff]   ;;  %v13470_v30 = vld [vmem:[#allocation9 + $0x88] ss:$16 sps:$4 sm:$0xff]  }
 0x880   :  { %10478 = vmatprep.mubr.msk.bf16.mxu0 %vm13389_vm14, %v13397_v59  ;;  %10484 = vmatprep.mubr.msk.bf16.mxu1 %vm13389_vm14, %v13397_v59  ;;  %14990 = vst [vmem:[#allocation28_spill] sm:$0xff] %v13468_v28  ;;  %14991 = vst [vmem:[#allocation29_spill] sm:$0xff] %v13470_v30 }
 0x881   :  { %6776 = vmatprep.subr.bf16.mxu0 %v10146_v8  ;;  %6849 = vmatprep.subr.bf16.mxu1 %v10148_v6  ;;  %v5904_v8 = vld [vmem:[#allocation7 + $0x2f0] sm:$0xff]  ;;  %v5901_v6 = vld [vmem:[#allocation7 + $0x2d8] sm:$0xff] }
 0x882   :  { %v10218_v7 = vcombine.high %v5900_v3, %v5904_v8  ;;  %v10220_v0 = vcombine.high %v5901_v6, %v5905_v43  ;;  %v10217_v9 = vcombine.low %v5900_v3, %v5904_v8  ;;  %v10219_v38 = vcombine.low %v5901_v6, %v5905_v43  ;;  %v13508_v3 = vld [vmem:[#allocation9 + $0x2c] ss:$16 sps:$4 sm:$0xff]   ;;  %v13518_v8 = vld [vmem:[#allocation9 + $0x4] ss:$16 sps:$4 sm:$0xff]   ;;  %v13528_v43 = vld [vmem:[#allocation9] ss:$16 sps:$4 sm:$0xff]  }
 0x883   :  { %6777 = vmatpush1.bf16.msra.mxu0 %v10145_v14  ;;  %6850 = vmatpush1.bf16.msra.mxu1 %v10147_v49  ;;  %v5892_v14 = vld [vmem:[#allocation7 + $0x290] sm:$0xff]  ;;  %15001 = vst [vmem:[#allocation30_spill] sm:$0xff] %v13508_v3  ;;  %15004 = vst [vmem:[#allocation44_spill] sm:$0xff] %v13518_v8  ;;  %v13520_v6 = vld [vmem:[#allocation9 + $0xc] ss:$16 sps:$4 sm:$0xff]  }
 0x884   :  { %6778 = vmatprep.subr.bf16.mxu0 %v10138_v42  ;;  %6851 = vmatprep.subr.bf16.mxu1 %v10140_v1  ;;  %v5896_v49 = vld [vmem:[#allocation7 + $0x2b0] sm:$0xff]  ;;  %v5893_v42 = vld [vmem:[#allocation7 + $0x298] sm:$0xff]  ;;  %15005 = vst [vmem:[#allocation45_spill] sm:$0xff] %v13520_v6  ;;  %15006 = vst [vmem:[#allocation46_spill] sm:$0xff] %v13528_v43 }
 0x885   :  { %v5897_v1 = vld [vmem:[#allocation7 + $0x2b8] sm:$0xff]  ;;  %v10210_v32 = vcombine.high %v5892_v14, %v5896_v49 }
 0x886   :  { %6683 = vmatmul.mubr.bf16.gmra.mxu0 %v13410_v45  ;;  %6756 = vmatmul.mubr.bf16.gmra.mxu1 %v13410_v45  ;;  %v10212_v5 = vcombine.high %v5893_v42, %v5897_v1 }
 0x887   :  { %6779 = vmatpush1.bf16.msra.mxu0 %v10137_v52  ;;  %6852 = vmatpush1.bf16.msra.mxu1 %v10139_v37  ;;  %v5888_v52 = vld [vmem:[#allocation7 + $0x270] sm:$0xff]  ;;  %v5885_v37 = vld [vmem:[#allocation7 + $0x258] sm:$0xff] }
 0x888   :  { %6798 = vmatprep.mubr.bf16.mxu0 %v13337_v11  ;;  %6871 = vmatprep.mubr.bf16.mxu1 %v13337_v11  ;;  %v5921_v11 = vld [vmem:[#allocation7 + $0x378] sm:$0xff]  ;;  %v10202_v16 = vcombine.high %v5884_v41, %v5888_v52  ;;  %v10204_v51 = vcombine.high %v5885_v37, %v5889_v39  ;;  %v10203_v55 = vcombine.low %v5885_v37, %v5889_v39  ;;  %v13580_v37 = vld [vmem:[#allocation9 + $0x180] ss:$16 sps:$4 sm:$0xff]  }
 0x889   :  { %6780 = vmatprep.subr.bf16.mxu0 %v10130_v50  ;;  %6853 = vmatprep.subr.bf16.mxu1 %v10132_v13  ;;  %v10236_v27 = vcombine.high %v5917_v48, %v5921_v11  ;;  %v10235_v56 = vcombine.low %v5917_v48, %v5921_v11  ;;  %v10209_v50 = vcombine.low %v5892_v14, %v5896_v49  ;;  %v13428_v48 = vld [vmem:[#allocation9 + $0xcc] ss:$16 sps:$4 sm:$0xff]   ;;  %v13440_v11 = vld [vmem:[#allocation9 + $0xc0] ss:$16 sps:$4 sm:$0xff]   ;;  %v13546_v14 = vld [vmem:[#allocation9 + $0x1c4] ss:$16 sps:$4 sm:$0xff]  }
 0x88a   :  { %v10211_v13 = vcombine.low %v5893_v42, %v5897_v1  ;;  %14981 = vst [vmem:[#allocation47_spill] sm:$0xff] %v13428_v48  ;;  %14982 = vst [vmem:[#allocation48_spill] sm:$0xff] %v13440_v11  ;;  %v13548_v49 = vld [vmem:[#allocation9 + $0x1cc] ss:$16 sps:$4 sm:$0xff]   ;;  %v13554_v42 = vld [vmem:[#allocation9 + $0x1c0] ss:$16 sps:$4 sm:$0xff]  }
 0x88b   :  { %6781 = vmatpush1.bf16.msra.mxu0 %v10129_v22  ;;  %6854 = vmatpush1.bf16.msra.mxu1 %v10131_v31  ;;  %v5880_v22 = vld [vmem:[#allocation7 + $0x230] sm:$0xff]  ;;  %v5877_v31 = vld [vmem:[#allocation7 + $0x218] sm:$0xff] }
 0x88c   :  { %6782 = vmatprep.subr.bf16.mxu0 %v10250_v58  ;;  %6855 = vmatprep.subr.bf16.mxu1 %v10252_v15  ;;  %v5881_v58 = vld [vmem:[#allocation7 + $0x238] sm:$0xff]  ;;  %v10201_v15 = vcombine.low %v5884_v41, %v5888_v52  ;;  %v10194_v36 = vcombine.high %v5876_v60, %v5880_v22  ;;  %v10193_v20 = vcombine.low %v5876_v60, %v5880_v22  ;;  %v13574_v41 = vld [vmem:[#allocation9 + $0x184] ss:$16 sps:$4 sm:$0xff]  }
 0x88d   :  { %v10196_v54 = vcombine.high %v5877_v31, %v5881_v58  ;;  %v13556_v1 = vld [vmem:[#allocation9 + $0x1c8] ss:$16 sps:$4 sm:$0xff]   ;;  %v13576_v52 = vld [vmem:[#allocation9 + $0x18c] ss:$16 sps:$4 sm:$0xff]   ;;  %v13598_v60 = vld [vmem:[#allocation9 + $0x144] ss:$16 sps:$4 sm:$0xff]  }
 0x88e   :  { %v13582_v39 = vld [vmem:[#allocation9 + $0x188] ss:$16 sps:$4 sm:$0xff]   ;;  %v13600_v22 = vld [vmem:[#allocation9 + $0x14c] ss:$16 sps:$4 sm:$0xff]  }
 0x88f   :  { %6783 = vmatpush2.bf16.msra.mxu0 %v10249_v61  ;;  %6856 = vmatpush2.bf16.msra.mxu1 %v10251_v17  ;;  %v10195_v61 = vcombine.low %v5877_v31, %v5881_v58  ;;  %v13416_v17 = vld [vmem:[#allocation9 + $0xe4] ss:$16 sps:$4 sm:$0xff]   ;;  %v13604_v31 = vld [vmem:[#allocation9 + $0x140] ss:$16 sps:$4 sm:$0xff]   ;;  %v13606_v58 = vld [vmem:[#allocation9 + $0x148] ss:$16 sps:$4 sm:$0xff]  }
 0x890   :  { %6784 = vmatprep.subr.bf16.mxu0 %v10242_v35  ;;  %6857 = vmatprep.subr.bf16.mxu1 %v10244_v40  ;;  %v13418_v35 = vld [vmem:[#allocation9 + $0xec] ss:$16 sps:$4 sm:$0xff]   ;;  %v13422_v40 = vld [vmem:[#allocation9 + $0xe0] ss:$16 sps:$4 sm:$0xff]   ;;  %15010 = vst [vmem:[#allocation25_spill] sm:$0xff] %v13604_v31 }
 0x893   :  { %6785 = vmatpush2.bf16.msra.mxu0 %v10241_v23  ;;  %6858 = vmatpush2.bf16.msra.mxu1 %v10243_v25  ;;  %v13442_v23 = vld [vmem:[#allocation9 + $0xc8] ss:$16 sps:$4 sm:$0xff]   ;;  %v13446_v25 = vld [vmem:[#allocation9 + $0xa4] ss:$16 sps:$4 sm:$0xff]  }
 0x894   :  { %6786 = vmatprep.subr.bf16.mxu0 %v10234_v26  ;;  %6859 = vmatprep.subr.bf16.mxu1 %v10236_v27  ;;  %14983 = vst [vmem:[#allocation49_spill] sm:$0xff] %v13442_v23  ;;  %14984 = vst [vmem:[#allocation50_spill] sm:$0xff] %v13446_v25  ;;  %v13458_v26 = vld [vmem:[#allocation9 + $0x84] ss:$16 sps:$4 sm:$0xff]   ;;  %v13460_v27 = vld [vmem:[#allocation9 + $0x8c] ss:$16 sps:$4 sm:$0xff]  }
 0x895   :  { %14988 = vst [vmem:[#allocation18_spill] sm:$0xff] %v13458_v26  ;;  %14989 = vst [vmem:[#allocation19_spill] sm:$0xff] %v13460_v27 }
 0x897   :  { %6787 = vmatpush2.bf16.msra.mxu0 %v10233_v47  ;;  %6860 = vmatpush2.bf16.msra.mxu1 %v10235_v56  ;;  %v13486_v47 = vld [vmem:[#allocation9 + $0x44] ss:$16 sps:$4 sm:$0xff]   ;;  %v13488_v56 = vld [vmem:[#allocation9 + $0x4c] ss:$16 sps:$4 sm:$0xff]  }
 0x898   :  { %6788 = vmatprep.subr.bf16.mxu0 %v10226_v34  ;;  %6861 = vmatprep.subr.bf16.mxu1 %v10228_v29  ;;  %14996 = vst [vmem:[#allocation15_spill] sm:$0xff] %v13486_v47  ;;  %14997 = vst [vmem:[#allocation32_spill] sm:$0xff] %v13488_v56  ;;  %v13500_v34 = vld [vmem:[#allocation9 + $0x40] ss:$16 sps:$4 sm:$0xff]   ;;  %v13502_v29 = vld [vmem:[#allocation9 + $0x48] ss:$16 sps:$4 sm:$0xff]  }
 0x899   :  { %14998 = vst [vmem:[#allocation33_spill] sm:$0xff] %v13500_v34  ;;  %14999 = vst [vmem:[#allocation16_spill] sm:$0xff] %v13502_v29 }
 0x89b   :  { %6789 = vmatpush2.bf16.msra.mxu0 %v10225_v53  ;;  %6862 = vmatpush2.bf16.msra.mxu1 %v10227_v44  ;;  %v13530_v53 = vld [vmem:[#allocation9 + $0x8] ss:$16 sps:$4 sm:$0xff]   ;;  %v13534_v44 = vld [vmem:[#allocation9 + $0x1e4] ss:$16 sps:$4 sm:$0xff]  }
 0x89c   :  { %6790 = vmatprep.subr.bf16.mxu0 %v10218_v7  ;;  %6863 = vmatprep.subr.bf16.mxu1 %v10220_v0  ;;  %15007 = vst [vmem:[#allocation22_spill] sm:$0xff] %v13530_v53  ;;  %15008 = vst [vmem:[#allocation23_spill] sm:$0xff] %v13534_v44  ;;  %v13536_v7 = vld [vmem:[#allocation9 + $0x1ec] ss:$16 sps:$4 sm:$0xff]   ;;  %v13542_v0 = vld [vmem:[#allocation9 + $0x1e8] ss:$16 sps:$4 sm:$0xff]  }
 0x89d   :  { %15009 = vst [vmem:[#allocation24_spill] sm:$0xff] %v13536_v7 }
 0x89f   :  { %6791 = vmatpush2.bf16.msra.mxu0 %v10217_v9  ;;  %6864 = vmatpush2.bf16.msra.mxu1 %v10219_v38  ;;  %v13560_v9 = vld [vmem:[#allocation9 + $0x1a4] ss:$16 sps:$4 sm:$0xff]   ;;  %v13562_v38 = vld [vmem:[#allocation9 + $0x1ac] ss:$16 sps:$4 sm:$0xff]  }
 0x8a0   :  { %6792 = vmatprep.subr.bf16.mxu0 %v10210_v32  ;;  %6865 = vmatprep.subr.bf16.mxu1 %v10212_v5  ;;  %v13568_v32 = vld [vmem:[#allocation9 + $0x1a0] ss:$16 sps:$4 sm:$0xff]   ;;  %v13570_v5 = vld [vmem:[#allocation9 + $0x1a8] ss:$16 sps:$4 sm:$0xff]  }
 0x8a3   :  { %6793 = vmatpush2.bf16.msra.mxu0 %v10209_v50  ;;  %6866 = vmatpush2.bf16.msra.mxu1 %v10211_v13  ;;  %v13586_v50 = vld [vmem:[#allocation9 + $0x164] ss:$16 sps:$4 sm:$0xff]   ;;  %v13588_v13 = vld [vmem:[#allocation9 + $0x16c] ss:$16 sps:$4 sm:$0xff]  }
 0x8a4   :  { %6794 = vmatprep.subr.bf16.mxu0 %v10202_v16  ;;  %6867 = vmatprep.subr.bf16.mxu1 %v10204_v51  ;;  %v13592_v16 = vld [vmem:[#allocation9 + $0x160] ss:$16 sps:$4 sm:$0xff]   ;;  %v13594_v51 = vld [vmem:[#allocation9 + $0x168] ss:$16 sps:$4 sm:$0xff]  }
 0x8a7   :  { %6795 = vmatpush2.bf16.msra.mxu0 %v10201_v15  ;;  %6868 = vmatpush2.bf16.msra.mxu1 %v10203_v55  ;;  %v13610_v15 = vld [vmem:[#allocation9 + $0x124] ss:$16 sps:$4 sm:$0xff]   ;;  %v13612_v55 = vld [vmem:[#allocation9 + $0x12c] ss:$16 sps:$4 sm:$0xff]  }
 0x8a8   :  { %6796 = vmatprep.subr.bf16.mxu0 %v10194_v36  ;;  %6869 = vmatprep.subr.bf16.mxu1 %v10196_v54  ;;  %v13616_v36 = vld [vmem:[#allocation9 + $0x120] ss:$16 sps:$4 sm:$0xff]   ;;  %v13618_v54 = vld [vmem:[#allocation9 + $0x128] ss:$16 sps:$4 sm:$0xff]  }
 0x8ab   :  { %6797 = vmatpush2.bf16.msra.mxu0 %v10193_v20  ;;  %6870 = vmatpush2.bf16.msra.mxu1 %v10195_v61  ;;  %v13622_v20 = vld [vmem:[#allocation9 + $0x104] ss:$16 sps:$4 sm:$0xff]   ;;  %v13624_v61 = vld [vmem:[#allocation9 + $0x10c] ss:$16 sps:$4 sm:$0xff]  }
 0x8ac   :  { %7398 = vmatprep.subr.bf16.mxu0 %v13416_v17  ;;  %7439 = vmatprep.subr.bf16.mxu1 %v13418_v35 }
 0x8ae   :  { %10487 = vmatmul.mubr.msk.bf16.vlgmr.msra.gmra.mxu0 %vm13342_vm13, %v13348_v46  ;;  %10493 = vmatmul.mubr.msk.bf16.vlgmr.msra.gmra.mxu1 %vm13342_vm13, %v13348_v46  ;;  %v13452_v46 = vld [vmem:[#allocation9 + $0xa0] ss:$16 sps:$4 sm:$0xff]  }
 0x8af   :  { %6808 = vmatprep.mubr.bf16.mxu0 %v13360_v21  ;;  %6881 = vmatprep.mubr.bf16.mxu1 %v13360_v21  ;;  %14986 = vst [vmem:[#allocation52_spill] sm:$0xff] %v13452_v46  ;;  %v13454_v21 = vld [vmem:[#allocation9 + $0xa8] ss:$16 sps:$4 sm:$0xff]  }
 0x8b0   :  { %7399 = vmatpush1.bf16.msra.mxu0 %v13422_v40  ;;  %7440 = vmatpush1.bf16.msra.mxu1 %v13424_v2  ;;  %14987 = vst [vmem:[#allocation53_spill] sm:$0xff] %v13454_v21 }
 0x8b1   :  { %7400 = vmatprep.subr.bf16.mxu0 %v13426_v10  ;;  %7441 = vmatprep.subr.bf16.mxu1 %v13428_v48 }
 0x8b4   :  { %7401 = vmatpush1.bf16.msra.mxu0 %v13440_v11  ;;  %7442 = vmatpush1.bf16.msra.mxu1 %v13442_v23 }
 0x8b5   :  { %7402 = vmatprep.subr.bf16.mxu0 %v13446_v25  ;;  %7443 = vmatprep.subr.bf16.mxu1 %v13448_v18 }
 0x8b6   :  { %6809 = vmatmul.mubr.bf16.gmra.mxu0 %v13372_v12  ;;  %6882 = vmatmul.mubr.bf16.gmra.mxu1 %v13372_v12  ;;  %v13480_v12 = vld [vmem:[#allocation9 + $0x60] ss:$16 sps:$4 sm:$0xff]  }
 0x8b7   :  { %6818 = vmatprep.mubr.bf16.mxu0 %v13378_v24  ;;  %6891 = vmatprep.mubr.bf16.mxu1 %v13378_v24  ;;  %14994 = vst [vmem:[#allocation26_spill] sm:$0xff] %v13480_v12  ;;  %v13482_v24 = vld [vmem:[#allocation9 + $0x68] ss:$16 sps:$4 sm:$0xff]  }
 0x8b8   :  { %7403 = vmatpush1.bf16.msra.mxu0 %v13452_v46  ;;  %7444 = vmatpush1.bf16.msra.mxu1 %v13454_v21  ;;  %14995 = vst [vmem:[#allocation27_spill] sm:$0xff] %v13482_v24 }
 0x8b9   :  { %7404 = vmatprep.subr.bf16.mxu0 %v13458_v26  ;;  %7445 = vmatprep.subr.bf16.mxu1 %v13460_v27 }
 0x8bc   :  { %7405 = vmatpush1.bf16.msra.mxu0 %v13468_v28  ;;  %7446 = vmatpush1.bf16.msra.mxu1 %v13470_v30 }
 0x8bd   :  { %7406 = vmatprep.subr.bf16.mxu0 %v13474_v63  ;;  %7447 = vmatprep.subr.bf16.mxu1 %v13476_v4 }
 0x8be   :  { %6819 = vmatmul.mubr.bf16.gmra.mxu0 %v13384_v33  ;;  %6892 = vmatmul.mubr.bf16.gmra.mxu1 %v13384_v33  ;;  %v13506_v33 = vld [vmem:[#allocation9 + $0x24] ss:$16 sps:$4 sm:$0xff]  }
 0x8bf   :  { %10490 = vmatprep.mubr.msk.bf16.mxu0 %vm13389_vm14, %v13397_v59  ;;  %10496 = vmatprep.mubr.msk.bf16.mxu1 %vm13389_vm14, %v13397_v59  ;;  %15000 = vst [vmem:[#allocation17_spill] sm:$0xff] %v13506_v33  ;;  %v13514_v59 = vld [vmem:[#allocation9 + $0x28] ss:$16 sps:$4 sm:$0xff]  }
 0x8c0   :  { %7407 = vmatpush1.bf16.msra.mxu0 %v13480_v12  ;;  %7448 = vmatpush1.bf16.msra.mxu1 %v13482_v24  ;;  %15003 = vst [vmem:[#allocation43_spill] sm:$0xff] %v13514_v59 }
 0x8c1   :  { %7408 = vmatprep.subr.bf16.mxu0 %v13486_v47  ;;  %7449 = vmatprep.subr.bf16.mxu1 %v13488_v56 }
 0x8c4   :  { %7409 = vmatpush1.bf16.msra.mxu0 %v13500_v34  ;;  %7450 = vmatpush1.bf16.msra.mxu1 %v13502_v29 }
 0x8c5   :  { %7410 = vmatprep.subr.bf16.mxu0 %v13506_v33  ;;  %7451 = vmatprep.subr.bf16.mxu1 %v13508_v3 }
 0x8c6   :  { %6829 = vmatmul.mubr.bf16.gmra.mxu0 %v13410_v45  ;;  %6902 = vmatmul.mubr.bf16.gmra.mxu1 %v13410_v45  ;;  %v13540_v45 = vld [vmem:[#allocation9 + $0x1e0] ss:$16 sps:$4 sm:$0xff]  }
 0x8c7   :  { %7430 = vmatprep.mubr.bf16.mxu0 %v14861_v62  ;;  %7471 = vmatprep.mubr.bf16.mxu1 %v14861_v62 }
 0x8c8   :  { %7411 = vmatpush1.bf16.msra.mxu0 %v13512_v19  ;;  %7452 = vmatpush1.bf16.msra.mxu1 %v13514_v59 }
 0x8c9   :  { %7412 = vmatprep.subr.bf16.mxu0 %v13518_v8  ;;  %7453 = vmatprep.subr.bf16.mxu1 %v13520_v6 }
 0x8cc   :  { %7413 = vmatpush1.bf16.msra.mxu0 %v13528_v43  ;;  %7454 = vmatpush1.bf16.msra.mxu1 %v13530_v53 }
 0x8cd   :  { %7709 = vmatprep.subr.bf16.mxu0 %v13534_v44  ;;  %7750 = vmatprep.subr.bf16.mxu1 %v13536_v7 }
 0x8cf   :  { %7431 = vmatmul.mubr.bf16.vlgmr.msra.gmra.mxu0 %v14861_v62  ;;  %7472 = vmatmul.mubr.bf16.vlgmr.msra.gmra.mxu1 %v14861_v62 }
 0x8d0   :  { %7710 = vmatpush1.bf16.msra.mxu0 %v13540_v45  ;;  %7751 = vmatpush1.bf16.msra.mxu1 %v13542_v0 }
 0x8d1   :  { %7711 = vmatprep.subr.bf16.mxu0 %v13546_v14  ;;  %7752 = vmatprep.subr.bf16.mxu1 %v13548_v49 }
 0x8d2   :  { %7741 = vmatprep.mubr.bf16.mxu0 %v14861_v62  ;;  %7782 = vmatprep.mubr.bf16.mxu1 %v14861_v62 }
 0x8d4   :  { %7712 = vmatpush1.bf16.msra.mxu0 %v13554_v42  ;;  %7753 = vmatpush1.bf16.msra.mxu1 %v13556_v1 }
 0x8d5   :  { %7713 = vmatprep.subr.bf16.mxu0 %v13560_v9  ;;  %7754 = vmatprep.subr.bf16.mxu1 %v13562_v38 }
 0x8d8   :  { %7714 = vmatpush1.bf16.msra.mxu0 %v13568_v32  ;;  %7755 = vmatpush1.bf16.msra.mxu1 %v13570_v5 }
 0x8d9   :  { %7715 = vmatprep.subr.bf16.mxu0 %v13574_v41  ;;  %7756 = vmatprep.subr.bf16.mxu1 %v13576_v52 }
 0x8dc   :  { %7716 = vmatpush1.bf16.msra.mxu0 %v13580_v37  ;;  %7757 = vmatpush1.bf16.msra.mxu1 %v13582_v39 }
 0x8dd   :  { %7717 = vmatprep.subr.bf16.mxu0 %v13586_v50  ;;  %7758 = vmatprep.subr.bf16.mxu1 %v13588_v13 }
 0x8e0   :  { %7718 = vmatpush1.bf16.msra.mxu0 %v13592_v16  ;;  %7759 = vmatpush1.bf16.msra.mxu1 %v13594_v51 }
 0x8e1   :  { %7719 = vmatprep.subr.bf16.mxu0 %v13598_v60  ;;  %7760 = vmatprep.subr.bf16.mxu1 %v13600_v22 }
 0x8e4   :  { %7720 = vmatpush1.bf16.msra.mxu0 %v13604_v31  ;;  %7761 = vmatpush1.bf16.msra.mxu1 %v13606_v58  ;;  %v13630_v31 = vld [vmem:[#allocation9 + $0x108] ss:$16 sps:$4 sm:$0xff]  }
 0x8e5   :  { %7721 = vmatprep.subr.bf16.mxu0 %v13610_v15  ;;  %7762 = vmatprep.subr.bf16.mxu1 %v13612_v55 }
 0x8e8   :  { %7722 = vmatpush1.bf16.msra.mxu0 %v13616_v36  ;;  %7763 = vmatpush1.bf16.msra.mxu1 %v13618_v54 }
 0x8e9   :  { %7723 = vmatprep.subr.bf16.mxu0 %v13622_v20  ;;  %7764 = vmatprep.subr.bf16.mxu1 %v13624_v61 }
 0x8ec   :  { %7724 = vmatpush1.bf16.msra.mxu0 %v13628_v57  ;;  %7765 = vmatpush1.bf16.msra.mxu1 %v13630_v31 }
 0x8ed   :  { %7828 = vmatprep.subr.bf16.mxu0 %v13416_v17  ;;  %7869 = vmatprep.subr.bf16.mxu1 %v13418_v35 }
 0x8ef   :  { %7742 = vmatmul.mubr.bf16.vlgmr.msra.gmra.mxu0 %v14861_v62  ;;  %7783 = vmatmul.mubr.bf16.vlgmr.msra.gmra.mxu1 %v14861_v62 }
 0x8f0   :  { %7829 = vmatpush1.bf16.msra.mxu0 %v13422_v40  ;;  %7870 = vmatpush1.bf16.msra.mxu1 %v13424_v2 }
 0x8f1   :  { %7830 = vmatprep.subr.bf16.mxu0 %v13426_v10  ;;  %7871 = vmatprep.subr.bf16.mxu1 %v13428_v48 }
 0x8f2   :  { %7860 = vmatprep.mubr.bf16.mxu0 %v14861_v62  ;;  %7901 = vmatprep.mubr.bf16.mxu1 %v14861_v62 }
 0x8f4   :  { %7831 = vmatpush1.bf16.msra.mxu0 %v13440_v11  ;;  %7872 = vmatpush1.bf16.msra.mxu1 %v13442_v23 }
 0x8f5   :  { %7832 = vmatprep.subr.bf16.mxu0 %v13446_v25  ;;  %7873 = vmatprep.subr.bf16.mxu1 %v13448_v18 }
 0x8f8   :  { %7833 = vmatpush1.bf16.msra.mxu0 %v13452_v46  ;;  %7874 = vmatpush1.bf16.msra.mxu1 %v13454_v21 }
 0x8f9   :  { %7834 = vmatprep.subr.bf16.mxu0 %v13458_v26  ;;  %7875 = vmatprep.subr.bf16.mxu1 %v13460_v27 }
 0x8fc   :  { %7835 = vmatpush1.bf16.msra.mxu0 %v13468_v28  ;;  %7876 = vmatpush1.bf16.msra.mxu1 %v13470_v30 }
 0x8fd   :  { %7836 = vmatprep.subr.bf16.mxu0 %v13474_v63  ;;  %7877 = vmatprep.subr.bf16.mxu1 %v13476_v4 }
 0x900   :  { %7837 = vmatpush1.bf16.msra.mxu0 %v13480_v12  ;;  %7878 = vmatpush1.bf16.msra.mxu1 %v13482_v24 }
 0x901   :  { %7838 = vmatprep.subr.bf16.mxu0 %v13486_v47  ;;  %7879 = vmatprep.subr.bf16.mxu1 %v13488_v56 }
 0x904   :  { %7839 = vmatpush1.bf16.msra.mxu0 %v13500_v34  ;;  %7880 = vmatpush1.bf16.msra.mxu1 %v13502_v29 }
 0x905   :  { %7840 = vmatprep.subr.bf16.mxu0 %v13506_v33  ;;  %7881 = vmatprep.subr.bf16.mxu1 %v13508_v3  ;;  %v13677_v3 = vld [vmem:[%s14613_s6] sm:$0xff] }
 0x908   :  { %7841 = vmatpush1.bf16.msra.mxu0 %v13512_v19  ;;  %7882 = vmatpush1.bf16.msra.mxu1 %v13514_v59  ;;  %v15011_v19 = vld [vmem:[#allocation12_spill] sm:$0xff] }
 0x909   :  { %7842 = vmatprep.subr.bf16.mxu0 %v13518_v8  ;;  %7883 = vmatprep.subr.bf16.mxu1 %v13520_v6  ;;  %v15012_v33 = vsub.s32 2, %v15011_v19  ;;  %v15013_v6 = vsub.s32 3, %v15011_v19  ;;  %v15014_v29 = vsub.s32 0, %v15011_v19 }
 0x90b   :  { %v13682_v59 = vrot.slane %v13677_v3, %v15012_v33  ;;  %v13696_v34 = vrot.slane %v13677_v3, %v15014_v29 }
 0x90c   :  { %7843 = vmatpush1.bf16.msra.mxu0 %v13528_v43  ;;  %7884 = vmatpush1.bf16.msra.mxu1 %v13530_v53  ;;  %v13687_v43 = vrot.slane %v13677_v3, %v15013_v6  ;;  %v15015_v6 = vsub.s32 1, %v15011_v19 }
 0x90d   :  { %7947 = vmatprep.subr.bf16.mxu0 %v13534_v44  ;;  %7988 = vmatprep.subr.bf16.mxu1 %v13536_v7 }
 0x90e   :  { %v13703_v12 = vrot.slane %v13677_v3, %v15015_v6 }
 0x92e   :  { %v13689_v53 = vpop.f32.mrf.mxu0  ;;  %v6727_v44 = vpop.f32.mrf.mxu1 }
 0x92f   :  { %v6728_v56 = vadd.f32 %v6727_v44, %v13682_v59 }
 0x930   :  { %v13691_v8 = vpop.f32.mrf.mxu0  ;;  %v6729_v7 = vpop.f32.mrf.mxu1 }
 0x931   :  { %v6730_v33 = vadd.f32 %v6729_v7, %v13687_v43 }
 0x932   :  { %v6658_v47 = vpop.f32.mrf.mxu0  ;;  %v6731_v24 = vpop.f32.mrf.mxu1 }
 0x933   :  { %v13705_v4 = vpack.c.bf16 %v6730_v33, %v6728_v56  ;;  %v6659_v63 = vadd.f32 %v6658_v47, %v13696_v34  ;;  %v6732_v30 = vadd.f32 %v6731_v24, %v13682_v59 }
 0x934   :  { %v6660_v28 = vpop.f32.mrf.mxu0  ;;  %v6733_v29 = vpop.f32.mrf.mxu1 }
 0x935   :  { %v6661_v27 = vadd.f32 %v6660_v28, %v13703_v12  ;;  %v6734_v44 = vadd.f32 %v6733_v29, %v13687_v43 }
 0x936   :  { %v6664_v7 = vpop.f32.mrf.mxu0  ;;  %v6737_v26 = vpop.f32.mrf.mxu1 }
 0x937   :  { %v13711_v21 = vpack.c.bf16 %v6661_v27, %v6659_v63  ;;  %v13713_v46 = vpack.c.bf16 %v6734_v44, %v6732_v30  ;;  %v6665_v6 = vadd.f32 %v6664_v7, %v13696_v34  ;;  %v6738_v56 = vadd.f32 %v6737_v26, %v13682_v59 }
 0x938   :  { %v6666_v33 = vpop.f32.mrf.mxu0  ;;  %v6739_v47 = vpop.f32.mrf.mxu1 }
 0x939   :  { %15016 = vst [vmem:[#allocation37_spill] sm:$0xff] %v13711_v21  ;;  %15017 = vst [vmem:[#allocation41_spill] sm:$0xff] %v13713_v46  ;;  %v6667_v24 = vadd.f32 %v6666_v33, %v13703_v12  ;;  %v6740_v18 = vadd.f32 %v6739_v47, %v13687_v43 }
 0x93a   :  { %v6668_v25 = vpop.f32.mrf.mxu0  ;;  %v6741_v28 = vpop.f32.mrf.mxu1 }
 0x93b   :  { %v13719_v23 = vpack.c.bf16 %v6667_v24, %v6665_v6  ;;  %v13721_v29 = vpack.c.bf16 %v6740_v18, %v6738_v56  ;;  %v6669_v27 = vadd.f32 %v6668_v25, %v13696_v34  ;;  %v6742_v30 = vadd.f32 %v6741_v28, %v13682_v59 }
 0x93c   :  { %v6670_v63 = vpop.f32.mrf.mxu0  ;;  %v6743_v44 = vpop.f32.mrf.mxu1 }
 0x93d   :  { %15018 = vst [vmem:[#allocation13_spill] sm:$0xff] %v13719_v23  ;;  %15019 = vst [vmem:[#allocation42_spill] sm:$0xff] %v13721_v29  ;;  %v6671_v26 = vadd.f32 %v6670_v63, %v13703_v12  ;;  %v6744_v7 = vadd.f32 %v6743_v44, %v13687_v43 }
 0x93e   :  { %v6674_v46 = vpop.f32.mrf.mxu0  ;;  %v6747_v33 = vpop.f32.mrf.mxu1 }
 0x93f   :  { %v13727_v21 = vpack.c.bf16 %v6671_v26, %v6669_v27  ;;  %v13729_v47 = vpack.c.bf16 %v6744_v7, %v6742_v30  ;;  %v6675_v6 = vadd.f32 %v6674_v46, %v13696_v34  ;;  %v6748_v18 = vadd.f32 %v6747_v33, %v13682_v59 }
 0x940   :  { %v6676_v56 = vpop.f32.mrf.mxu0  ;;  %v6749_v25 = vpop.f32.mrf.mxu1 }
 0x941   :  { %15020 = vst [vmem:[#allocation54_spill] sm:$0xff] %v13727_v21  ;;  %15021 = vst [vmem:[#allocation34_spill] sm:$0xff] %v13729_v47  ;;  %v6677_v24 = vadd.f32 %v6676_v56, %v13703_v12  ;;  %v6750_v28 = vadd.f32 %v6749_v25, %v13687_v43 }
 0x942   :  { %v6678_v29 = vpop.f32.mrf.mxu0  ;;  %v6751_v63 = vpop.f32.mrf.mxu1 }
 0x943   :  { %v13735_v23 = vpack.c.bf16 %v6677_v24, %v6675_v6  ;;  %v13737_v44 = vpack.c.bf16 %v6750_v28, %v6748_v18  ;;  %v6679_v27 = vadd.f32 %v6678_v29, %v13696_v34  ;;  %v6752_v30 = vadd.f32 %v6751_v63, %v13682_v59 }
 0x944   :  { %v6680_v26 = vpop.f32.mrf.mxu0  ;;  %v6753_v46 = vpop.f32.mrf.mxu1 }
 0x945   :  { %15022 = vst [vmem:[#allocation14_spill] sm:$0xff] %v13735_v23  ;;  %15023 = vst [vmem:[#allocation55_spill] sm:$0xff] %v13737_v44  ;;  %v6681_v7 = vadd.f32 %v6680_v26, %v13703_v12  ;;  %v6754_v33 = vadd.f32 %v6753_v46, %v13687_v43 }
 0x946   :  { %v6684_v47 = vpop.f32.mrf.mxu0  ;;  %v6757_v56 = vpop.f32.mrf.mxu1 }
 0x947   :  { %v13743_v21 = vpack.c.bf16 %v6681_v7, %v6679_v27  ;;  %v13745_v25 = vpack.c.bf16 %v6754_v33, %v6752_v30  ;;  %v6685_v6 = vadd.f32 %v6684_v47, %v13696_v34  ;;  %v6758_v18 = vadd.f32 %v6757_v56, %v13682_v59 }
 0x948   :  { %v6686_v24 = vpop.f32.mrf.mxu0  ;;  %v6759_v29 = vpop.f32.mrf.mxu1 }
 0x949   :  { %15024 = vst [vmem:[#allocation39_spill] sm:$0xff] %v13743_v21  ;;  %15025 = vst [vmem:[#allocation12_spill] sm:$0xff] %v13745_v25  ;;  %v6687_v28 = vadd.f32 %v6686_v24, %v13703_v12  ;;  %v6760_v63 = vadd.f32 %v6759_v29, %v13687_v43  ;;  %v15030_v29 = vsub.s32 4, %v15011_v19 }
 0x94a   :  { %v6688_v44 = vpop.f32.mrf.mxu0  ;;  %v6761_v26 = vpop.f32.mrf.mxu1 }
 0x94b   :  { %v13751_v23 = vpack.c.bf16 %v6687_v28, %v6685_v6  ;;  %v13753_v46 = vpack.c.bf16 %v6760_v63, %v6758_v18  ;;  %v6689_v27 = vadd.f32 %v6688_v44, %v13696_v34  ;;  %v6762_v30 = vadd.f32 %v6761_v26, %v13682_v59 }
 0x94c   :  { %v6690_v7 = vpop.f32.mrf.mxu0  ;;  %v6763_v47 = vpop.f32.mrf.mxu1  ;;  %v13766_v6 = vrot.slane %v13677_v3, %v15030_v29  ;;  %v15031_v18 = vsub.s32 6, %v15011_v19  ;;  %v15032_v59 = vsub.s32 5, %v15011_v19 }
 0x94d   :  { %15026 = vst [vmem:[#allocation56_spill] sm:$0xff] %v13751_v23  ;;  %15027 = vst [vmem:[#allocation57_spill] sm:$0xff] %v13753_v46  ;;  %v6691_v33 = vadd.f32 %v6690_v7, %v13703_v12  ;;  %v6764_v56 = vadd.f32 %v6763_v47, %v13687_v43  ;;  %v15033_v43 = vsub.s32 7, %v15011_v19 }
 0x94e   :  { %v13771_v44 = vrot.slane %v13677_v3, %v15031_v18  ;;  %v13776_v28 = vrot.slane %v13677_v3, %v15032_v59 }
 0x94f   :  { %v13759_v25 = vpack.c.bf16 %v6691_v33, %v6689_v27  ;;  %v13761_v24 = vpack.c.bf16 %v6764_v56, %v6762_v30  ;;  %v13781_v63 = vrot.slane %v13677_v3, %v15033_v43 }
 0x951   :  { %15028 = vst [vmem:[#allocation58_spill] sm:$0xff] %v13759_v25  ;;  %15029 = vst [vmem:[#allocation59_spill] sm:$0xff] %v13761_v24 }
 0x96e   :  { %v6800_v26 = vpop.f32.mrf.mxu0  ;;  %v6873_v27 = vpop.f32.mrf.mxu1 }
 0x96f   :  { %v6801_v30 = vadd.f32 %v6800_v26, %v13766_v6  ;;  %v6874_v7 = vadd.f32 %v6873_v27, %v13771_v44 }
 0x970   :  { %v6802_v47 = vpop.f32.mrf.mxu0  ;;  %v6875_v33 = vpop.f32.mrf.mxu1 }
 0x971   :  { %v6803_v56 = vadd.f32 %v6802_v47, %v13776_v28  ;;  %v6876_v29 = vadd.f32 %v6875_v33, %v13781_v63 }
 0x972   :  { %v6804_v18 = vpop.f32.mrf.mxu0  ;;  %v6877_v59 = vpop.f32.mrf.mxu1 }
 0x973   :  { %v13787_v24 = vpack.c.bf16 %v6803_v56, %v6801_v30  ;;  %v13789_v19 = vpack.c.bf16 %v6876_v29, %v6874_v7  ;;  %v6805_v3 = vadd.f32 %v6804_v18, %v13766_v6  ;;  %v6878_v43 = vadd.f32 %v6877_v59, %v13771_v44 }
 0x974   :  { %v6806_v25 = vpop.f32.mrf.mxu0  ;;  %v6879_v26 = vpop.f32.mrf.mxu1 }
 0x975   :  { %15034 = vst [vmem:[#allocation60_spill] sm:$0xff] %v13787_v24  ;;  %15035 = vst [vmem:[#allocation61_spill] sm:$0xff] %v13789_v19  ;;  %v6807_v27 = vadd.f32 %v6806_v25, %v13776_v28  ;;  %v6880_v46 = vadd.f32 %v6879_v26, %v13781_v63 }
 0x976   :  { %v6810_v23 = vpop.f32.mrf.mxu0  ;;  %v6883_v47 = vpop.f32.mrf.mxu1 }
 0x977   :  { %v13795_v21 = vpack.c.bf16 %v6807_v27, %v6805_v3  ;;  %v13797_v33 = vpack.c.bf16 %v6880_v46, %v6878_v43  ;;  %v6811_v30 = vadd.f32 %v6810_v23, %v13766_v6  ;;  %v6884_v7 = vadd.f32 %v6883_v47, %v13771_v44 }
 0x978   :  { %v6812_v56 = vpop.f32.mrf.mxu0  ;;  %v6885_v29 = vpop.f32.mrf.mxu1 }
 0x979   :  { %15036 = vst [vmem:[#allocation62_spill] sm:$0xff] %v13795_v21  ;;  %15037 = vst [vmem:[#allocation63_spill] sm:$0xff] %v13797_v33  ;;  %v6813_v18 = vadd.f32 %v6812_v56, %v13776_v28  ;;  %v6886_v59 = vadd.f32 %v6885_v29, %v13781_v63 }
 0x97a   :  { %v6814_v19 = vpop.f32.mrf.mxu0  ;;  %v6887_v25 = vpop.f32.mrf.mxu1 }
 0x97b   :  { %v13803_v24 = vpack.c.bf16 %v6813_v18, %v6811_v30  ;;  %v13805_v26 = vpack.c.bf16 %v6886_v59, %v6884_v7  ;;  %v6815_v3 = vadd.f32 %v6814_v19, %v13766_v6  ;;  %v6888_v46 = vadd.f32 %v6887_v25, %v13771_v44 }
 0x97c   :  { %v6816_v43 = vpop.f32.mrf.mxu0  ;;  %v6889_v23 = vpop.f32.mrf.mxu1 }
 0x97d   :  { %15038 = vst [vmem:[#allocation64_spill] sm:$0xff] %v13803_v24  ;;  %15039 = vst [vmem:[#allocation65_spill] sm:$0xff] %v13805_v26  ;;  %v6817_v27 = vadd.f32 %v6816_v43, %v13776_v28  ;;  %v6890_v47 = vadd.f32 %v6889_v23, %v13781_v63 }
 0x97e   :  { %v6820_v33 = vpop.f32.mrf.mxu0  ;;  %v6893_v56 = vpop.f32.mrf.mxu1 }
 0x97f   :  { %v13811_v21 = vpack.c.bf16 %v6817_v27, %v6815_v3  ;;  %v13813_v29 = vpack.c.bf16 %v6890_v47, %v6888_v46  ;;  %v6821_v30 = vadd.f32 %v6820_v33, %v13766_v6  ;;  %v6894_v7 = vadd.f32 %v6893_v56, %v13771_v44 }
 0x980   :  { %v6822_v18 = vpop.f32.mrf.mxu0  ;;  %v6895_v19 = vpop.f32.mrf.mxu1 }
 0x981   :  { %15040 = vst [vmem:[#allocation66_spill] sm:$0xff] %v13811_v21  ;;  %15041 = vst [vmem:[#allocation67_spill] sm:$0xff] %v13813_v29  ;;  %v6823_v59 = vadd.f32 %v6822_v18, %v13776_v28  ;;  %v6896_v25 = vadd.f32 %v6895_v19, %v13781_v63  ;;  %v6657_v18 = vadd.f32 %v13691_v8, %v13703_v12 }
 0x982   :  { %v6824_v26 = vpop.f32.mrf.mxu0  ;;  %v6897_v43 = vpop.f32.mrf.mxu1 }
 0x983   :  { %v13819_v24 = vpack.c.bf16 %v6823_v59, %v6821_v30  ;;  %v13821_v23 = vpack.c.bf16 %v6896_v25, %v6894_v7  ;;  %v6825_v3 = vadd.f32 %v6824_v26, %v13766_v6  ;;  %v6898_v46 = vadd.f32 %v6897_v43, %v13771_v44 }
 0x984   :  { %v6826_v27 = vpop.f32.mrf.mxu0  ;;  %v6899_v33 = vpop.f32.mrf.mxu1  ;;  %v6655_v59 = vadd.f32 %v13689_v53, %v13696_v34 }
 0x985   :  { %15042 = vst [vmem:[#allocation68_spill] sm:$0xff] %v13819_v24  ;;  %15043 = vst [vmem:[#allocation69_spill] sm:$0xff] %v13821_v23  ;;  %v6827_v47 = vadd.f32 %v6826_v27, %v13776_v28  ;;  %v6900_v56 = vadd.f32 %v6899_v33, %v13781_v63 }
 0x986   :  { %v6830_v19 = vpop.f32.mrf.mxu0  ;;  %v6903_v29 = vpop.f32.mrf.mxu1  ;;  %v10441_v12 = vpack.c.bf16 %v6657_v18, %v6655_v59 }
 0x987   :  { %v13829_v21 = vpack.c.bf16 %v6827_v47, %v6825_v3  ;;  %v13831_v30 = vpack.c.bf16 %v6900_v56, %v6898_v46  ;;  %v6831_v7 = vadd.f32 %v6830_v19, %v13766_v6  ;;  %v6904_v26 = vadd.f32 %v6903_v29, %v13771_v44 }
 0x988   :  { %v6832_v25 = vpop.f32.mrf.mxu0  ;;  %v6905_v43 = vpop.f32.mrf.mxu1  ;;  %v7202_v19 = vunpack.c.l.bf16 %v10441_v12  ;;  %v7203_v34 = vunpack.c.h.bf16 %v10441_v12 }
 0x989   :  { %15044 = vst [vmem:[#allocation70_spill] sm:$0xff] %v13829_v21  ;;  %15045 = vst [vmem:[#allocation71_spill] sm:$0xff] %v13831_v30  ;;  %v6833_v27 = vadd.f32 %v6832_v25, %v13776_v28  ;;  %v6906_v33 = vadd.f32 %v6905_v43, %v13781_v63 }
 0x98a   :  { %v6834_v8 = vpop.f32.mrf.mxu0  ;;  %v6907_v23 = vpop.f32.mrf.mxu1 }
 0x98b   :  { %v13839_v3 = vpack.c.bf16 %v6833_v27, %v6831_v7  ;;  %v13841_v46 = vpack.c.bf16 %v6906_v33, %v6904_v26  ;;  %v7205_v26 = vunpack.c.h.bf16 %v13705_v4  ;;  %v7204_v33 = vunpack.c.l.bf16 %v13705_v4 }
 0x98c   :  { %v6836_v47 = vpop.f32.mrf.mxu0  ;;  %v6909_v56 = vpop.f32.mrf.mxu1 }
 0x98d   :  { %15046 = vst [vmem:[#allocation72_spill] sm:$0xff] %v13839_v3  ;;  %15047 = vst [vmem:[#allocation73_spill] sm:$0xff] %v13841_v46 }
 0x98f   :  { %v7432_v29 = vpop.f32.mrf.mxu0  ;;  %v7473_v24 = vpop.f32.mrf.mxu1 }
 0x990   :  { %v7480_v30 = vadd.f32 %v7432_v29, %v7202_v19  ;;  %v7482_v19 = vadd.f32 %v7473_v24, %v7204_v33  ;;  %v6910_v24 = vadd.f32 %v6909_v56, %v13781_v63 }
 0x991   :  { %v7434_v53 = vpop.f32.mrf.mxu0  ;;  %v7475_v21 = vpop.f32.mrf.mxu1 }
 0x992   :  { %v10317_v11 = vmul.f32 -1.442695, %v7480_v30  ;;  %v7481_v25 = vadd.f32 %v7434_v53, %v7203_v34  ;;  %v7483_v27 = vadd.f32 %v7475_v21, %v7205_v26 }
 0x993   :  { %v7436_v48 = vpop.f32.mrf.mxu0  ;;  %v7477_v43 = vpop.f32.mrf.mxu1 }
 0x994   :  { %11250 = vpow2.f32 %v10317_v11  ;;  %v10318_v18 = vmul.f32 -1.442695, %v7481_v25  ;;  %v10319_v46 = vmul.f32 -1.442695, %v7483_v27  ;;  %v6837_v48 = vadd.f32 %v6836_v47, %v13776_v28 }
 0x995   :  { %v7437_v59 = vpop.f32.mrf.mxu0  ;;  %v7478_v7 = vpop.f32.mrf.mxu1  ;;  %v6835_v11 = vadd.f32 %v6834_v8, %v13766_v6  ;;  %v6908_v28 = vadd.f32 %v6907_v23, %v13771_v44 }
 0x996   :  { %11252 = vpow2.f32 %v10318_v18 }
 0x997   :  { %11254 = vpow2.f32 %v10319_v46  ;;  %v10471_v34 = vpack.c.bf16 %v6837_v48, %v6835_v11 }
 0x999   :  { %v7512_v53 = vunpack.c.l.bf16 %v10471_v34  ;;  %v7513_v18 = vunpack.c.h.bf16 %v10471_v34 }
 0x9a1   :  { %v11251_v3 = vpop.eup %11250 }
 0x9a2   :  { %v7487_v12 = vadd.f32 1.0, %v11251_v3 }
 0x9a3   :  { %v11253_v29 = vpop.eup %11252 }
 0x9a4   :  { %11256 = vrcp.f32 %v7487_v12  ;;  %v7493_v30 = vadd.f32 1.0, %v11253_v29  ;;  %v11255_v43 = vpop.eup %11254 }
 0x9a5   :  { %11258 = vtanh.f32 %v7482_v19  ;;  %v7500_v47 = vadd.f32 1.0, %v11255_v43 }
 0x9a6   :  { %11260 = vrcp.f32 %v7493_v30  ;;  %v10472_v30 = vpack.c.bf16 %v6910_v24, %v6908_v28 }
 0x9a8   :  { %v7515_v63 = vunpack.c.h.bf16 %v10472_v30 }
 0x9af   :  { %v7743_v25 = vpop.f32.mrf.mxu0  ;;  %v7784_v21 = vpop.f32.mrf.mxu1 }
 0x9b0   :  { %v7791_v4 = vadd.f32 %v7743_v25, %v7512_v53  ;;  %v7514_v53 = vunpack.c.l.bf16 %v10472_v30 }
 0x9b1   :  { %v11257_v59 = vpop.eup %11256  ;;  %v7745_v3 = vpop.f32.mrf.mxu0 }
 0x9b2   :  { %v7786_v46 = vpop.f32.mrf.mxu1  ;;  %v11259_v7 = vpop.eup %11258  ;;  %v10352_v26 = vmul.f32 -1.442695, %v7791_v4  ;;  %v7792_v27 = vadd.f32 %v7745_v3, %v7513_v18  ;;  %v7793_v25 = vadd.f32 %v7784_v21, %v7514_v53  ;;  %v15055_v53 = vld [vmem:[#allocation51_spill] sm:$0xff] }
 0x9b3   :  { %v11261_v33 = vpop.eup %11260  ;;  %v7747_v6 = vpop.f32.mrf.mxu0  ;;  %v7504_v12 = vmul.f32 %v11259_v7, %v11257_v59  ;;  %v7794_v56 = vadd.f32 %v7786_v46, %v7515_v63  ;;  %v15051_v63 = vld [vmem:[#allocation47_spill] sm:$0xff] }
 0x9b4   :  { %v7788_v8 = vpop.f32.mrf.mxu1  ;;  %v7503_v19 = vmul.f32 0.0, %v11261_v33  ;;  %11262 = vpow2.f32 %v10352_v26  ;;  %v10353_v29 = vmul.f32 -1.442695, %v7792_v27  ;;  %v15068_v26 = vld [vmem:[#allocation33_spill] sm:$0xff] }
 0x9b5   :  { %v7748_v48 = vpop.f32.mrf.mxu0  ;;  %v10354_v44 = vmul.f32 -1.442695, %v7794_v56  ;;  %v15054_v56 = vld [vmem:[#allocation50_spill] sm:$0xff] }
 0x9b6   :  { %v7789_v11 = vpop.f32.mrf.mxu1  ;;  %v13849_v34 = vadd.f32 %v7504_v12, %v7503_v19  ;;  %11264 = vpow2.f32 %v10353_v29  ;;  %v15049_v19 = vld [vmem:[#allocation25_spill] sm:$0xff] }
 0x9b7   :  { %11266 = vrcp.f32 %v7500_v47  ;;  %v15079_v11 = vld [vmem:[#allocation24_spill] sm:$0xff] }
 0x9b8   :  { %11268 = vtanh.f32 %v13849_v34 }
 0x9b9   :  { %11270 = vpow2.f32 %v10354_v44  ;;  %v15056_v44 = vld [vmem:[#allocation52_spill] sm:$0xff] }
 0x9c1   :  { %v11263_v23 = vpop.eup %11262 }
 0x9c2   :  { %v7798_v43 = vadd.f32 1.0, %v11263_v23  ;;  %v15060_v23 = vld [vmem:[#allocation28_spill] sm:$0xff] }
 0x9c3   :  { %v11265_v4 = vpop.eup %11264 }
 0x9c4   :  { %v11267_v18 = vpop.eup %11266  ;;  %11272 = vrcp.f32 %v7798_v43  ;;  %v7804_v59 = vadd.f32 1.0, %v11265_v4  ;;  %v15062_v43 = vld [vmem:[#allocation20_spill] sm:$0xff]  ;;  %v15063_v4 = vld [vmem:[#allocation21_spill] sm:$0xff] }
 0x9c5   :  { %v11269_v24 = vpop.eup %11268  ;;  %11274 = vtanh.f32 %v7793_v25  ;;  %v15061_v25 = vld [vmem:[#allocation29_spill] sm:$0xff] }
 0x9c6   :  { %11276 = vrcp.f32 %v7804_v59  ;;  %v13852_v3 = vmul.f32 %v11269_v24, %v11267_v18  ;;  %v11271_v21 = vpop.eup %11270  ;;  %v15064_v18 = vld [vmem:[#allocation26_spill] sm:$0xff]  ;;  %v15065_v59 = vld [vmem:[#allocation27_spill] sm:$0xff] }
 0x9c7   :  { %v7811_v28 = vadd.f32 1.0, %v11271_v21  ;;  %v15066_v24 = vld [vmem:[#allocation15_spill] sm:$0xff]  ;;  %v15069_v21 = vld [vmem:[#allocation16_spill] sm:$0xff] }
 0x9c8   :  { %v10356_v7 = vpack.c.bf16 %v13852_v3, %v13852_v3 }
 0x9c9   :  { %11278 = vrcp.f32 %v7811_v28  ;;  %v15073_v28 = vld [vmem:[#allocation43_spill] sm:$0xff] }
 0x9ca   :  { %10357 = vmatmul.mubr.msk.bf16.vlgmr.msra.gmra.mxu0 %vm12247_vm3, %v10356_v7  ;;  %10360 = vmatmul.mubr.msk.bf16.vlgmr.msra.gmra.mxu1 %vm12247_vm3, %v10356_v7  ;;  %v15067_v7 = vld [vmem:[#allocation32_spill] sm:$0xff] }
 0x9cb   :  { %7948 = vmatpush1.bf16.msra.mxu0 %v13540_v45  ;;  %7989 = vmatpush1.bf16.msra.mxu1 %v13542_v0 }
 0x9cc   :  { %7949 = vmatprep.subr.bf16.mxu0 %v13546_v14  ;;  %7990 = vmatprep.subr.bf16.mxu1 %v13548_v49 }
 0x9cd   :  { %7979 = vmatprep.mubr.bf16.mxu0 %v14861_v62  ;;  %8020 = vmatprep.mubr.bf16.mxu1 %v14861_v62 }
 0x9cf   :  { %7950 = vmatpush1.bf16.msra.mxu0 %v13554_v42  ;;  %7991 = vmatpush1.bf16.msra.mxu1 %v13556_v1 }
 0x9d0   :  { %7951 = vmatprep.subr.bf16.mxu0 %v13560_v9  ;;  %7992 = vmatprep.subr.bf16.mxu1 %v13562_v38 }
 0x9d1   :  { %v11273_v46 = vpop.eup %11272 }
 0x9d2   :  { %v11275_v27 = vpop.eup %11274 }
 0x9d3   :  { %v11277_v33 = vpop.eup %11276  ;;  %7952 = vmatpush1.bf16.msra.mxu0 %v13568_v32  ;;  %7993 = vmatpush1.bf16.msra.mxu1 %v13570_v5  ;;  %v7815_v6 = vmul.f32 %v11275_v27, %v11273_v46  ;;  %v15070_v46 = vld [vmem:[#allocation17_spill] sm:$0xff]  ;;  %v15071_v27 = vld [vmem:[#allocation30_spill] sm:$0xff] }
 0x9d4   :  { %v7814_v47 = vmul.f32 0.0, %v11277_v33  ;;  %7953 = vmatprep.subr.bf16.mxu0 %v13574_v41  ;;  %7994 = vmatprep.subr.bf16.mxu1 %v13576_v52  ;;  %v15072_v33 = vld [vmem:[#allocation31_spill] sm:$0xff] }
 0x9d6   :  { %v13874_v8 = vadd.f32 %v7815_v6, %v7814_v47  ;;  %v11279_v12 = vpop.eup %11278  ;;  %v15074_v47 = vld [vmem:[#allocation44_spill] sm:$0xff]  ;;  %v15075_v6 = vld [vmem:[#allocation45_spill] sm:$0xff] }
 0x9d7   :  { %7954 = vmatpush1.bf16.msra.mxu0 %v13580_v37  ;;  %7995 = vmatpush1.bf16.msra.mxu1 %v13582_v39 }
 0x9d8   :  { %11280 = vtanh.f32 %v13874_v8  ;;  %7955 = vmatprep.subr.bf16.mxu0 %v13586_v50  ;;  %7996 = vmatprep.subr.bf16.mxu1 %v13588_v13 }
 0x9db   :  { %7956 = vmatpush1.bf16.msra.mxu0 %v13592_v16  ;;  %7997 = vmatpush1.bf16.msra.mxu1 %v13594_v51 }
 0x9dc   :  { %7957 = vmatprep.subr.bf16.mxu0 %v13598_v60  ;;  %7998 = vmatprep.subr.bf16.mxu1 %v13600_v22 }
 0x9df   :  { %7958 = vmatpush1.bf16.msra.mxu0 %v15049_v19  ;;  %7999 = vmatpush1.bf16.msra.mxu1 %v13606_v58 }
 0x9e0   :  { %7959 = vmatprep.subr.bf16.mxu0 %v13610_v15  ;;  %8000 = vmatprep.subr.bf16.mxu1 %v13612_v55 }
 0x9e3   :  { %7960 = vmatpush1.bf16.msra.mxu0 %v13616_v36  ;;  %8001 = vmatpush1.bf16.msra.mxu1 %v13618_v54 }
 0x9e4   :  { %7961 = vmatprep.subr.bf16.mxu0 %v13622_v20  ;;  %8002 = vmatprep.subr.bf16.mxu1 %v13624_v61 }
 0x9e5   :  { %v11281_v29 = vpop.eup %11280 }
 0x9e6   :  { %v13893_v30 = vmul.f32 %v11281_v29, %v11279_v12  ;;  %v15076_v12 = vld [vmem:[#allocation46_spill] sm:$0xff] }
 0x9e7   :  { %7962 = vmatpush1.bf16.msra.mxu0 %v13628_v57  ;;  %8003 = vmatpush1.bf16.msra.mxu1 %v13630_v31  ;;  %v15077_v29 = vld [vmem:[#allocation22_spill] sm:$0xff] }
 0x9e8   :  { %v10365_v48 = vpack.c.bf16 %v13893_v30, %v13893_v30  ;;  %8066 = vmatprep.subr.bf16.mxu0 %v13416_v17  ;;  %8107 = vmatprep.subr.bf16.mxu1 %v13418_v35  ;;  %v15052_v17 = vld [vmem:[#allocation48_spill] sm:$0xff]  ;;  %v15053_v35 = vld [vmem:[#allocation49_spill] sm:$0xff] }
 0x9ea   :  { %10366 = vmatmul.mubr.msk.bf16.vlgmr.msra.gmra.mxu0 %vm12282_vm5, %v10365_v48  ;;  %10369 = vmatmul.mubr.msk.bf16.vlgmr.msra.gmra.mxu1 %vm12282_vm5, %v10365_v48  ;;  %v15078_v48 = vld [vmem:[#allocation23_spill] sm:$0xff] }
 0x9eb   :  { %8067 = vmatpush1.bf16.msra.mxu0 %v13422_v40  ;;  %8108 = vmatpush1.bf16.msra.mxu1 %v13424_v2  ;;  %v15057_v40 = vld [vmem:[#allocation53_spill] sm:$0xff]  ;;  %v15058_v2 = vld [vmem:[#allocation18_spill] sm:$0xff] }
 0x9ec   :  { %8068 = vmatprep.subr.bf16.mxu0 %v13426_v10  ;;  %8109 = vmatprep.subr.bf16.mxu1 %v15051_v63  ;;  %v15059_v10 = vld [vmem:[#allocation19_spill] sm:$0xff]  ;;  %v15080_v63 = vld [vmem:[#allocation37_spill] sm:$0xff] }
 0x9ed   :  { %8098 = vmatprep.mubr.bf16.mxu0 %v14861_v62  ;;  %8139 = vmatprep.mubr.bf16.mxu1 %v14861_v62 }
 0x9ef   :  { %8069 = vmatpush1.bf16.msra.mxu0 %v15052_v17  ;;  %8110 = vmatpush1.bf16.msra.mxu1 %v15053_v35  ;;  %v7823_v17 = vunpack.c.l.bf16 %v15080_v63 }
 0x9f0   :  { %8070 = vmatprep.subr.bf16.mxu0 %v15054_v56  ;;  %8111 = vmatprep.subr.bf16.mxu1 %v15055_v53 }
 0x9f3   :  { %8071 = vmatpush1.bf16.msra.mxu0 %v15056_v44  ;;  %8112 = vmatpush1.bf16.msra.mxu1 %v15057_v40  ;;  %v7824_v44 = vunpack.c.h.bf16 %v15080_v63 }
 0x9f4   :  { %8072 = vmatprep.subr.bf16.mxu0 %v15058_v2  ;;  %8113 = vmatprep.subr.bf16.mxu1 %v15059_v10 }
 0x9f7   :  { %8073 = vmatpush1.bf16.msra.mxu0 %v15060_v23  ;;  %8114 = vmatpush1.bf16.msra.mxu1 %v15061_v25 }
 0x9f8   :  { %8074 = vmatprep.subr.bf16.mxu0 %v15062_v43  ;;  %8115 = vmatprep.subr.bf16.mxu1 %v15063_v4 }
 0x9fb   :  { %8075 = vmatpush1.bf16.msra.mxu0 %v15064_v18  ;;  %8116 = vmatpush1.bf16.msra.mxu1 %v15065_v59 }
 0x9fc   :  { %8076 = vmatprep.subr.bf16.mxu0 %v15066_v24  ;;  %8117 = vmatprep.subr.bf16.mxu1 %v15067_v7  ;;  %v15081_v24 = vld [vmem:[#allocation41_spill] sm:$0xff] }
 0x9fd   :  { %v7826_v7 = vunpack.c.h.bf16 %v15081_v24 }
 0x9ff   :  { %8077 = vmatpush1.bf16.msra.mxu0 %v15068_v26  ;;  %8118 = vmatpush1.bf16.msra.mxu1 %v15069_v21  ;;  %v7825_v21 = vunpack.c.l.bf16 %v15081_v24 }
 0xa00   :  { %8078 = vmatprep.subr.bf16.mxu0 %v15070_v46  ;;  %8119 = vmatprep.subr.bf16.mxu1 %v15071_v27 }
 0xa03   :  { %8079 = vmatpush1.bf16.msra.mxu0 %v15072_v33  ;;  %8120 = vmatpush1.bf16.msra.mxu1 %v15073_v28 }
 0xa04   :  { %8080 = vmatprep.subr.bf16.mxu0 %v15074_v47  ;;  %8121 = vmatprep.subr.bf16.mxu1 %v15075_v6 }
 0xa07   :  { %8081 = vmatpush1.bf16.msra.mxu0 %v15076_v12  ;;  %8122 = vmatpush1.bf16.msra.mxu1 %v15077_v29  ;;  %v15082_v12 = vld [vmem:[#allocation72_spill] sm:$0xff] }
 0xa08   :  { %8185 = vmatprep.subr.bf16.mxu0 %v15078_v48  ;;  %8226 = vmatprep.subr.bf16.mxu1 %v15079_v11  ;;  %v7942_v29 = vunpack.c.l.bf16 %v15082_v12 }
 0xa8a   :  { %v7862_v35 = vpop.f32.mrf.mxu0  ;;  %v7903_v56 = vpop.f32.mrf.mxu1 }
 0xa8b   :  { %v7910_v53 = vadd.f32 %v7862_v35, %v7823_v17  ;;  %v7912_v46 = vadd.f32 %v7903_v56, %v7825_v21 }
 0xa8c   :  { %v7864_v40 = vpop.f32.mrf.mxu0  ;;  %v7905_v2 = vpop.f32.mrf.mxu1 }
 0xa8d   :  { %v10361_v10 = vmul.f32 -1.442695, %v7910_v53  ;;  %v7911_v23 = vadd.f32 %v7864_v40, %v7824_v44  ;;  %v7913_v26 = vadd.f32 %v7905_v2, %v7826_v7  ;;  %v7943_v53 = vunpack.c.h.bf16 %v15082_v12 }
 0xa8e   :  { %v7866_v25 = vpop.f32.mrf.mxu0  ;;  %v7907_v43 = vpop.f32.mrf.mxu1 }
 0xa8f   :  { %11282 = vpow2.f32 %v10361_v10  ;;  %v10362_v4 = vmul.f32 -1.442695, %v7911_v23  ;;  %v10363_v27 = vmul.f32 -1.442695, %v7913_v26 }
 0xa90   :  { %v7867_v18 = vpop.f32.mrf.mxu0  ;;  %v7908_v59 = vpop.f32.mrf.mxu1 }
 0xa91   :  { %11284 = vpow2.f32 %v10362_v4  ;;  %v7509_v4 = vsel %vm770_vm2, %v13849_v34, 0.0 }
 0xa92   :  { %11286 = vtanh.f32 %v7912_v46 }
 0xa93   :  { %11288 = vpow2.f32 %v10363_v27 }
 0xa9c   :  { %v11283_v33 = vpop.eup %11282 }
 0xa9d   :  { %v7917_v28 = vadd.f32 1.0, %v11283_v33 }
 0xa9e   :  { %v11285_v47 = vpop.eup %11284 }
 0xa9f   :  { %11290 = vrcp.f32 %v7917_v28  ;;  %v7923_v6 = vadd.f32 1.0, %v11285_v47  ;;  %v11287_v48 = vpop.eup %11286  ;;  %v15084_v28 = vld [vmem:[#allocation73_spill] sm:$0xff] }
 0xaa0   :  { %v11289_v17 = vpop.eup %11288  ;;  %v7945_v47 = vunpack.c.h.bf16 %v15084_v28  ;;  %v7944_v34 = vunpack.c.l.bf16 %v15084_v28  ;;  %v14100_v28 = vld [vmem:[#allocation9 + $0xc] ss:$16 sps:$4 sm:$0xff]  }
 0xaa1   :  { %11292 = vrcp.f32 %v7923_v6  ;;  %v7930_v18 = vadd.f32 1.0, %v11289_v17  ;;  %15109 = vst [vmem:[#allocation31_spill] sm:$0xff] %v14100_v28 }
 0xaaa   :  { %v7981_v11 = vpop.f32.mrf.mxu0  ;;  %v8022_v63 = vpop.f32.mrf.mxu1 }
 0xaab   :  { %v8029_v35 = vadd.f32 %v7981_v11, %v7942_v29  ;;  %v8031_v12 = vadd.f32 %v8022_v63, %v7944_v34  ;;  %v14109_v34 = vld [vmem:[#allocation9 + $0x1e4] ss:$16 sps:$4 sm:$0xff]  }
 0xaac   :  { %v11291_v44 = vpop.eup %11290  ;;  %v7983_v56 = vpop.f32.mrf.mxu0  ;;  %15112 = vst [vmem:[#allocation45_spill] sm:$0xff] %v14109_v34 }
 0xaad   :  { %v8024_v40 = vpop.f32.mrf.mxu1  ;;  %v7934_v2 = vmul.f32 %v11291_v44, %v11287_v48  ;;  %v10370_v10 = vmul.f32 -1.442695, %v8029_v35  ;;  %v8030_v23 = vadd.f32 %v7983_v56, %v7943_v53 }
 0xaae   :  { %v11293_v25 = vpop.eup %11292  ;;  %v7985_v59 = vpop.f32.mrf.mxu0  ;;  %v8032_v6 = vadd.f32 %v8024_v40, %v7945_v47  ;;  %v14103_v47 = vld [vmem:[#allocation9] ss:$16 sps:$4 sm:$0xff]  }
 0xaaf   :  { %v8026_v24 = vpop.f32.mrf.mxu1  ;;  %v7933_v7 = vmul.f32 %v11293_v25, %v7509_v4  ;;  %11294 = vpow2.f32 %v10370_v10  ;;  %v10371_v26 = vmul.f32 -1.442695, %v8030_v23  ;;  %v14079_v59 = vld [vmem:[#allocation9 + $0x40] ss:$16 sps:$4 sm:$0xff]   ;;  %15110 = vst [vmem:[#allocation43_spill] sm:$0xff] %v14103_v47 }
 0xab0   :  { %v7986_v21 = vpop.f32.mrf.mxu0  ;;  %v10372_v29 = vmul.f32 -1.442695, %v8032_v6  ;;  %15102 = vst [vmem:[#allocation27_spill] sm:$0xff] %v14079_v59  ;;  %v14082_v24 = vld [vmem:[#allocation9 + $0x48] ss:$16 sps:$4 sm:$0xff]  }
 0xab1   :  { %v8027_v46 = vpop.f32.mrf.mxu1  ;;  %v7935_v27 = vadd.f32 %v7934_v2, %v7933_v7  ;;  %11296 = vpow2.f32 %v10371_v26  ;;  %v7508_v2 = vsel %vm770_vm2, %v13852_v3, 0.0  ;;  %15103 = vst [vmem:[#allocation15_spill] sm:$0xff] %v14082_v24  ;;  %v14085_v7 = vld [vmem:[#allocation9 + $0x24] ss:$16 sps:$4 sm:$0xff]   ;;  %v14088_v26 = vld [vmem:[#allocation9 + $0x2c] ss:$16 sps:$4 sm:$0xff]  }
 0xab2   :  { %11298 = vrcp.f32 %v7930_v18  ;;  %v14076_v18 = vld [vmem:[#allocation9 + $0x4c] ss:$16 sps:$4 sm:$0xff]   ;;  %15104 = vst [vmem:[#allocation32_spill] sm:$0xff] %v14085_v7  ;;  %15105 = vst [vmem:[#allocation33_spill] sm:$0xff] %v14088_v26  ;;  %v14091_v21 = vld [vmem:[#allocation9 + $0x20] ss:$16 sps:$4 sm:$0xff]  }
 0xab3   :  { %11300 = vtanh.f32 %v7935_v27  ;;  %v13950_v33 = vsel %vm1398_vm6, %v7935_v27, %v7509_v4  ;;  %v14073_v4 = vld [vmem:[#allocation9 + $0x44] ss:$16 sps:$4 sm:$0xff]   ;;  %15101 = vst [vmem:[#allocation26_spill] sm:$0xff] %v14076_v18  ;;  %15106 = vst [vmem:[#allocation16_spill] sm:$0xff] %v14091_v21  ;;  %v14094_v46 = vld [vmem:[#allocation9 + $0x28] ss:$16 sps:$4 sm:$0xff]  }
 0xab4   :  { %11302 = vtanh.f32 %v8031_v12  ;;  %15100 = vst [vmem:[#allocation21_spill] sm:$0xff] %v14073_v4  ;;  %15107 = vst [vmem:[#allocation17_spill] sm:$0xff] %v14094_v46  ;;  %v14097_v27 = vld [vmem:[#allocation9 + $0x4] ss:$16 sps:$4 sm:$0xff]   ;;  %v14106_v6 = vld [vmem:[#allocation9 + $0x8] ss:$16 sps:$4 sm:$0xff]  }
 0xab5   :  { %11304 = vpow2.f32 %v10372_v29  ;;  %15108 = vst [vmem:[#allocation30_spill] sm:$0xff] %v14097_v27  ;;  %15111 = vst [vmem:[#allocation44_spill] sm:$0xff] %v14106_v6  ;;  %v14112_v12 = vld [vmem:[#allocation9 + $0x1ec] ss:$16 sps:$4 sm:$0xff]  }
 0xab6   :  { %15113 = vst [vmem:[#allocation46_spill] sm:$0xff] %v14112_v12  ;;  %v15114_v29 = vld [vmem:[#allocation13_spill] sm:$0xff] }
 0xabc   :  { %v11295_v48 = vpop.eup %11294 }
 0xabd   :  { %v8036_v11 = vadd.f32 1.0, %v11295_v48  ;;  %v8061_v48 = vunpack.c.l.bf16 %v15114_v29 }
 0xabe   :  { %v11297_v17 = vpop.eup %11296 }
 0xabf   :  { %v11299_v35 = vpop.eup %11298  ;;  %11306 = vrcp.f32 %v8036_v11  ;;  %v8042_v53 = vadd.f32 1.0, %v11297_v17 }
 0xac0   :  { %v11301_v44 = vpop.eup %11300 }
 0xac1   :  { %11308 = vrcp.f32 %v8042_v53  ;;  %v7937_v56 = vmul.f32 %v11301_v44, %v11299_v35  ;;  %v11303_v3 = vpop.eup %11302  ;;  %v8062_v53 = vunpack.c.h.bf16 %v15114_v29 }
 0xac2   :  { %v11305_v10 = vpop.eup %11304 }
 0xac3   :  { %v13959_v40 = vsel %vm1398_vm6, %v7937_v56, %v7508_v2 }
 0xac4   :  { %v8065_v63 = vpack.c.bf16 %v13959_v40, %v13959_v40 }
 0xac6   :  { %8099 = vmatmul.mubr.bf16.vlgmr.msra.gmra.mxu0 %v8065_v63  ;;  %8140 = vmatmul.mubr.bf16.vlgmr.msra.gmra.mxu1 %v8065_v63 }
 0xac7   :  { %8186 = vmatpush1.bf16.msra.mxu0 %v13540_v45  ;;  %8227 = vmatpush1.bf16.msra.mxu1 %v13542_v0 }
 0xac8   :  { %8187 = vmatprep.subr.bf16.mxu0 %v13546_v14  ;;  %8228 = vmatprep.subr.bf16.mxu1 %v13548_v49  ;;  %v7820_v14 = vsel %vm1082_vm4, %v13874_v8, 0.0  ;;  %v8049_v49 = vadd.f32 1.0, %v11305_v10  ;;  %v14064_v8 = vld [vmem:[#allocation9 + $0x6c] ss:$16 sps:$4 sm:$0xff]  }
 0xac9   :  { %8217 = vmatprep.mubr.bf16.mxu0 %v14861_v62  ;;  %8258 = vmatprep.mubr.bf16.mxu1 %v14861_v62  ;;  %15097 = vst [vmem:[#allocation28_spill] sm:$0xff] %v14064_v8 }
 0xaca   :  { %11310 = vrcp.f32 %v8049_v49 }
 0xacb   :  { %8188 = vmatpush1.bf16.msra.mxu0 %v13554_v42  ;;  %8229 = vmatpush1.bf16.msra.mxu1 %v13556_v1 }
 0xacc   :  { %v11307_v23 = vpop.eup %11306  ;;  %8189 = vmatprep.subr.bf16.mxu0 %v13560_v9  ;;  %8230 = vmatprep.subr.bf16.mxu1 %v13562_v38 }
 0xacd   :  { %v8053_v45 = vmul.f32 %v11307_v23, %v11303_v3 }
 0xace   :  { %v11309_v0 = vpop.eup %11308 }
 0xacf   :  { %v8052_v25 = vmul.f32 %v11309_v0, %v7820_v14  ;;  %8190 = vmatpush1.bf16.msra.mxu0 %v13568_v32  ;;  %8231 = vmatpush1.bf16.msra.mxu1 %v13570_v5  ;;  %v7819_v5 = vsel %vm1082_vm4, %v13893_v30, 0.0  ;;  %v14070_v30 = vld [vmem:[#allocation9 + $0x68] ss:$16 sps:$4 sm:$0xff]  }
 0xad0   :  { %8191 = vmatprep.subr.bf16.mxu0 %v13574_v41  ;;  %8232 = vmatprep.subr.bf16.mxu1 %v13576_v52  ;;  %15099 = vst [vmem:[#allocation20_spill] sm:$0xff] %v14070_v30 }
 0xad1   :  { %v8054_v42 = vadd.f32 %v8053_v45, %v8052_v25 }
 0xad3   :  { %11312 = vtanh.f32 %v8054_v42  ;;  %8192 = vmatpush1.bf16.msra.mxu0 %v13580_v37  ;;  %8233 = vmatpush1.bf16.msra.mxu1 %v13582_v39  ;;  %v13984_v1 = vsel %vm1711_vm7, %v8054_v42, %v7820_v14  ;;  %v14011_v37 = vld [vmem:[#allocation9 + $0xe4] ss:$16 sps:$4 sm:$0xff]   ;;  %v14014_v39 = vld [vmem:[#allocation9 + $0xec] ss:$16 sps:$4 sm:$0xff]  }
 0xad4   :  { %8193 = vmatprep.subr.bf16.mxu0 %v13586_v50  ;;  %8234 = vmatprep.subr.bf16.mxu1 %v13588_v13  ;;  %v14020_v50 = vld [vmem:[#allocation9 + $0xe8] ss:$16 sps:$4 sm:$0xff]   ;;  %v14023_v13 = vld [vmem:[#allocation9 + $0xc4] ss:$16 sps:$4 sm:$0xff]  }
 0xad5   :  { %v15115_v14 = vld [vmem:[#allocation42_spill] sm:$0xff] }
 0xad6   :  { %v8064_v49 = vunpack.c.h.bf16 %v15115_v14  ;;  %v8063_v42 = vunpack.c.l.bf16 %v15115_v14 }
 0xad7   :  { %8194 = vmatpush1.bf16.msra.mxu0 %v13592_v16  ;;  %8235 = vmatpush1.bf16.msra.mxu1 %v13594_v51  ;;  %v11311_v9 = vpop.eup %11310  ;;  %v14026_v16 = vld [vmem:[#allocation9 + $0xcc] ss:$16 sps:$4 sm:$0xff]   ;;  %v14031_v51 = vld [vmem:[#allocation9 + $0xc0] ss:$16 sps:$4 sm:$0xff]  }
 0xad8   :  { %8195 = vmatprep.subr.bf16.mxu0 %v13598_v60  ;;  %8236 = vmatprep.subr.bf16.mxu1 %v13600_v22  ;;  %15085 = vst [vmem:[#allocation38_spill] sm:$0xff] %v14026_v16  ;;  %15086 = vst [vmem:[#allocation25_spill] sm:$0xff] %v14031_v51  ;;  %v14034_v60 = vld [vmem:[#allocation9 + $0xc8] ss:$16 sps:$4 sm:$0xff]   ;;  %v14037_v22 = vld [vmem:[#allocation9 + $0xa4] ss:$16 sps:$4 sm:$0xff]  }
 0xad9   :  { %15087 = vst [vmem:[#allocation40_spill] sm:$0xff] %v14034_v60  ;;  %15088 = vst [vmem:[#allocation47_spill] sm:$0xff] %v14037_v22 }
 0xadb   :  { %8196 = vmatpush1.bf16.msra.mxu0 %v15049_v19  ;;  %8237 = vmatpush1.bf16.msra.mxu1 %v13606_v58  ;;  %v14043_v58 = vld [vmem:[#allocation9 + $0xa0] ss:$16 sps:$4 sm:$0xff]  }
 0xadc   :  { %8197 = vmatprep.subr.bf16.mxu0 %v13610_v15  ;;  %8238 = vmatprep.subr.bf16.mxu1 %v13612_v55  ;;  %15090 = vst [vmem:[#allocation49_spill] sm:$0xff] %v14043_v58  ;;  %v14046_v15 = vld [vmem:[#allocation9 + $0xa8] ss:$16 sps:$4 sm:$0xff]   ;;  %v14049_v55 = vld [vmem:[#allocation9 + $0x84] ss:$16 sps:$4 sm:$0xff]  }
 0xadd   :  { %15091 = vst [vmem:[#allocation50_spill] sm:$0xff] %v14046_v15  ;;  %15092 = vst [vmem:[#allocation51_spill] sm:$0xff] %v14049_v55  ;;  %v14067_v19 = vld [vmem:[#allocation9 + $0x60] ss:$16 sps:$4 sm:$0xff]  }
 0xade   :  { %15098 = vst [vmem:[#allocation29_spill] sm:$0xff] %v14067_v19 }
 0xadf   :  { %8198 = vmatpush1.bf16.msra.mxu0 %v13616_v36  ;;  %8239 = vmatpush1.bf16.msra.mxu1 %v13618_v54  ;;  %v14052_v36 = vld [vmem:[#allocation9 + $0x8c] ss:$16 sps:$4 sm:$0xff]   ;;  %v14055_v54 = vld [vmem:[#allocation9 + $0x80] ss:$16 sps:$4 sm:$0xff]  }
 0xae0   :  { %v11313_v38 = vpop.eup %11312  ;;  %8199 = vmatprep.subr.bf16.mxu0 %v13622_v20  ;;  %8240 = vmatprep.subr.bf16.mxu1 %v13624_v61  ;;  %15093 = vst [vmem:[#allocation52_spill] sm:$0xff] %v14052_v36  ;;  %15094 = vst [vmem:[#allocation53_spill] sm:$0xff] %v14055_v54  ;;  %v14058_v20 = vld [vmem:[#allocation9 + $0x88] ss:$16 sps:$4 sm:$0xff]   ;;  %v14061_v61 = vld [vmem:[#allocation9 + $0x64] ss:$16 sps:$4 sm:$0xff]  }
 0xae1   :  { %v8056_v32 = vmul.f32 %v11313_v38, %v11311_v9  ;;  %15095 = vst [vmem:[#allocation18_spill] sm:$0xff] %v14058_v20  ;;  %15096 = vst [vmem:[#allocation19_spill] sm:$0xff] %v14061_v61 }
 0xae3   :  { %8200 = vmatpush1.bf16.msra.mxu0 %v13628_v57  ;;  %8241 = vmatpush1.bf16.msra.mxu1 %v13630_v31  ;;  %v14007_v41 = vsel %vm1711_vm7, %v8056_v32, %v7819_v5  ;;  %v14017_v57 = vld [vmem:[#allocation9 + $0xe0] ss:$16 sps:$4 sm:$0xff]   ;;  %v14040_v31 = vld [vmem:[#allocation9 + $0xac] ss:$16 sps:$4 sm:$0xff]  }
 0xae4   :  { %v8184_v52 = vpack.c.bf16 %v14007_v41, %v14007_v41  ;;  %8304 = vmatprep.subr.bf16.mxu0 %v14011_v37  ;;  %8345 = vmatprep.subr.bf16.mxu1 %v14014_v39  ;;  %15089 = vst [vmem:[#allocation48_spill] sm:$0xff] %v14040_v31 }
 0xae6   :  { %8218 = vmatmul.mubr.bf16.vlgmr.msra.gmra.mxu0 %v8184_v52  ;;  %8259 = vmatmul.mubr.bf16.vlgmr.msra.gmra.mxu1 %v8184_v52 }
 0xae7   :  { %8305 = vmatpush1.bf16.msra.mxu0 %v14017_v57  ;;  %8346 = vmatpush1.bf16.msra.mxu1 %v14020_v50 }
 0xae8   :  { %8306 = vmatprep.subr.bf16.mxu0 %v14023_v13  ;;  %8347 = vmatprep.subr.bf16.mxu1 %v14026_v16 }
 0xae9   :  { %8336 = vmatprep.mubr.bf16.mxu0 %v14861_v62  ;;  %8377 = vmatprep.mubr.bf16.mxu1 %v14861_v62 }
 0xaeb   :  { %8307 = vmatpush1.bf16.msra.mxu0 %v14031_v51  ;;  %8348 = vmatpush1.bf16.msra.mxu1 %v14034_v60 }
 0xaec   :  { %8308 = vmatprep.subr.bf16.mxu0 %v14037_v22  ;;  %8349 = vmatprep.subr.bf16.mxu1 %v14040_v31 }
 0xaef   :  { %8309 = vmatpush1.bf16.msra.mxu0 %v14043_v58  ;;  %8350 = vmatpush1.bf16.msra.mxu1 %v14046_v15 }
 0xaf0   :  { %8310 = vmatprep.subr.bf16.mxu0 %v14049_v55  ;;  %8351 = vmatprep.subr.bf16.mxu1 %v14052_v36 }
 0xaf3   :  { %8311 = vmatpush1.bf16.msra.mxu0 %v14055_v54  ;;  %8352 = vmatpush1.bf16.msra.mxu1 %v14058_v20 }
 0xaf4   :  { %8312 = vmatprep.subr.bf16.mxu0 %v14061_v61  ;;  %8353 = vmatprep.subr.bf16.mxu1 %v14064_v8 }
 0xaf7   :  { %8313 = vmatpush1.bf16.msra.mxu0 %v14067_v19  ;;  %8354 = vmatpush1.bf16.msra.mxu1 %v14070_v30 }
 0xaf8   :  { %8314 = vmatprep.subr.bf16.mxu0 %v14073_v4  ;;  %8355 = vmatprep.subr.bf16.mxu1 %v14076_v18 }
 0xafb   :  { %8315 = vmatpush1.bf16.msra.mxu0 %v14079_v59  ;;  %8356 = vmatpush1.bf16.msra.mxu1 %v14082_v24 }
 0xafc   :  { %8316 = vmatprep.subr.bf16.mxu0 %v14085_v7  ;;  %8357 = vmatprep.subr.bf16.mxu1 %v14088_v26 }
 0xaff   :  { %8317 = vmatpush1.bf16.msra.mxu0 %v14091_v21  ;;  %8358 = vmatpush1.bf16.msra.mxu1 %v14094_v46 }
 0xb00   :  { %8318 = vmatprep.subr.bf16.mxu0 %v14097_v27  ;;  %8359 = vmatprep.subr.bf16.mxu1 %v14100_v28 }
 0xb03   :  { %8319 = vmatpush1.bf16.msra.mxu0 %v14103_v47  ;;  %8360 = vmatpush1.bf16.msra.mxu1 %v14106_v6 }
 0xb04   :  { %8423 = vmatprep.subr.bf16.mxu0 %v14109_v34  ;;  %8464 = vmatprep.subr.bf16.mxu1 %v14112_v12 }
 0xb86   :  { %v8100_v11 = vpop.f32.mrf.mxu0  ;;  %v8141_v17 = vpop.f32.mrf.mxu1 }
 0xb87   :  { %v8148_v35 = vadd.f32 %v8100_v11, %v8061_v48  ;;  %v8150_v9 = vadd.f32 %v8141_v17, %v8063_v42  ;;  %v15116_v48 = vld [vmem:[#allocation70_spill] sm:$0xff] }
 0xb88   :  { %v8102_v44 = vpop.f32.mrf.mxu0  ;;  %v8143_v56 = vpop.f32.mrf.mxu1  ;;  %v8180_v11 = vunpack.c.l.bf16 %v15116_v48 }
 0xb89   :  { %v10373_v2 = vmul.f32 -1.442695, %v8148_v35  ;;  %v8149_v63 = vadd.f32 %v8102_v44, %v8062_v53  ;;  %v8151_v25 = vadd.f32 %v8143_v56, %v8064_v49  ;;  %v8181_v56 = vunpack.c.h.bf16 %v15116_v48  ;;  %v15117_v48 = vld [vmem:[#allocation71_spill] sm:$0xff] }
 0xb8a   :  { %v8104_v3 = vpop.f32.mrf.mxu0  ;;  %v8145_v10 = vpop.f32.mrf.mxu1 }
 0xb8b   :  { %11314 = vpow2.f32 %v10373_v2  ;;  %v10374_v23 = vmul.f32 -1.442695, %v8149_v63  ;;  %v10375_v38 = vmul.f32 -1.442695, %v8151_v25 }
 0xb8c   :  { %v8105_v45 = vpop.f32.mrf.mxu0  ;;  %v8146_v0 = vpop.f32.mrf.mxu1 }
 0xb8d   :  { %11316 = vpow2.f32 %v10374_v23 }
 0xb8e   :  { %11318 = vtanh.f32 %v8150_v9 }
 0xb8f   :  { %11320 = vpow2.f32 %v10375_v38 }
 0xb98   :  { %v11315_v32 = vpop.eup %11314 }
 0xb99   :  { %v8155_v5 = vadd.f32 1.0, %v11315_v32 }
 0xb9a   :  { %v11317_v52 = vpop.eup %11316 }
 0xb9b   :  { %11322 = vrcp.f32 %v8155_v5  ;;  %v8161_v29 = vadd.f32 1.0, %v11317_v52  ;;  %v11319_v35 = vpop.eup %11318 }
 0xb9c   :  { %v11321_v2 = vpop.eup %11320 }
 0xb9d   :  { %11324 = vrcp.f32 %v8161_v29  ;;  %v8168_v49 = vadd.f32 1.0, %v11321_v2 }
 0xba6   :  { %v8219_v53 = vpop.f32.mrf.mxu0  ;;  %v8260_v44 = vpop.f32.mrf.mxu1 }
 0xba7   :  { %v8267_v63 = vadd.f32 %v8219_v53, %v8180_v11  ;;  %v8183_v11 = vunpack.c.h.bf16 %v15117_v48  ;;  %v8182_v53 = vunpack.c.l.bf16 %v15117_v48  ;;  %v14159_v48 = vld [vmem:[#allocation9 + $0x1ac] ss:$16 sps:$4 sm:$0xff]  }
 0xba8   :  { %v11323_v3 = vpop.eup %11322  ;;  %v8221_v17 = vpop.f32.mrf.mxu0 }
 0xba9   :  { %v8262_v10 = vpop.f32.mrf.mxu1  ;;  %v8172_v23 = vmul.f32 %v11323_v3, %v11319_v35  ;;  %v10376_v45 = vmul.f32 -1.442695, %v8267_v63  ;;  %v8268_v0 = vadd.f32 %v8221_v17, %v8181_v56  ;;  %v8269_v2 = vadd.f32 %v8260_v44, %v8182_v53 }
 0xbaa   :  { %v11325_v14 = vpop.eup %11324  ;;  %v8223_v25 = vpop.f32.mrf.mxu0  ;;  %v8270_v35 = vadd.f32 %v8262_v10, %v8183_v11  ;;  %v14136_v10 = vld [vmem:[#allocation9 + $0x1e0] ss:$16 sps:$4 sm:$0xff]  }
 0xbab   :  { %v8264_v42 = vpop.f32.mrf.mxu1  ;;  %v8171_v9 = vmul.f32 %v11325_v14, %v13950_v33  ;;  %11326 = vpow2.f32 %v10376_v45  ;;  %v10377_v38 = vmul.f32 -1.442695, %v8268_v0  ;;  %v14142_v25 = vld [vmem:[#allocation9 + $0x1c4] ss:$16 sps:$4 sm:$0xff]  }
 0xbac   :  { %v8224_v32 = vpop.f32.mrf.mxu0  ;;  %v10378_v63 = vmul.f32 -1.442695, %v8270_v35  ;;  %v14145_v42 = vld [vmem:[#allocation9 + $0x1cc] ss:$16 sps:$4 sm:$0xff]  }
 0xbad   :  { %v8265_v5 = vpop.f32.mrf.mxu1  ;;  %v8173_v52 = vadd.f32 %v8172_v23, %v8171_v9  ;;  %11328 = vpow2.f32 %v10377_v38  ;;  %v14150_v38 = vld [vmem:[#allocation9 + $0x1c0] ss:$16 sps:$4 sm:$0xff]   ;;  %v14153_v32 = vld [vmem:[#allocation9 + $0x1c8] ss:$16 sps:$4 sm:$0xff]  }
 0xbae   :  { %11330 = vrcp.f32 %v8168_v49  ;;  %v14139_v49 = vld [vmem:[#allocation9 + $0x1e8] ss:$16 sps:$4 sm:$0xff]  }
 0xbaf   :  { %11332 = vtanh.f32 %v8173_v52  ;;  %v14125_v29 = vsel %vm2028_vm8, %v8173_v52, %v13950_v33  ;;  %v14156_v52 = vld [vmem:[#allocation9 + $0x1a4] ss:$16 sps:$4 sm:$0xff]  }
 0xbb0   :  { %11334 = vtanh.f32 %v8269_v2 }
 0xbb1   :  { %11336 = vpow2.f32 %v10378_v63  ;;  %v14163_v63 = vld [vmem:[#allocation9 + $0x1a0] ss:$16 sps:$4 sm:$0xff]  }
 0xbb8   :  { %v11327_v56 = vpop.eup %11326 }
 0xbb9   :  { %v8274_v3 = vadd.f32 1.0, %v11327_v56  ;;  %v14166_v56 = vld [vmem:[#allocation9 + $0x1a8] ss:$16 sps:$4 sm:$0xff]  }
 0xbba   :  { %v11329_v17 = vpop.eup %11328 }
 0xbbb   :  { %v11331_v23 = vpop.eup %11330  ;;  %11338 = vrcp.f32 %v8274_v3  ;;  %v8280_v45 = vadd.f32 1.0, %v11329_v17  ;;  %v14169_v3 = vld [vmem:[#allocation9 + $0x184] ss:$16 sps:$4 sm:$0xff]   ;;  %v14172_v17 = vld [vmem:[#allocation9 + $0x18c] ss:$16 sps:$4 sm:$0xff]  }
 0xbbc   :  { %v11333_v0 = vpop.eup %11332 }
 0xbbd   :  { %11340 = vrcp.f32 %v8280_v45  ;;  %v8175_v14 = vmul.f32 %v11333_v0, %v11331_v23  ;;  %v14175_v45 = vld [vmem:[#allocation9 + $0x180] ss:$16 sps:$4 sm:$0xff]   ;;  %v14178_v0 = vld [vmem:[#allocation9 + $0x188] ss:$16 sps:$4 sm:$0xff]  }
 0xbbf   :  { %v14132_v33 = vsel %vm2028_vm8, %v8175_v14, %v13959_v40  ;;  %v11335_v40 = vpop.eup %11334 }
 0xbc0   :  { %v8303_v44 = vpack.c.bf16 %v14132_v33, %v14132_v33  ;;  %v11337_v9 = vpop.eup %11336 }
 0xbc1   :  { %v8287_v53 = vadd.f32 1.0, %v11337_v9  ;;  %v14192_v9 = vld [vmem:[#allocation9 + $0x160] ss:$16 sps:$4 sm:$0xff]  }
 0xbc2   :  { %8337 = vmatmul.mubr.bf16.vlgmr.msra.gmra.mxu0 %v8303_v44  ;;  %8378 = vmatmul.mubr.bf16.vlgmr.msra.gmra.mxu1 %v8303_v44  ;;  %v14186_v44 = vld [vmem:[#allocation9 + $0x164] ss:$16 sps:$4 sm:$0xff]   ;;  %15119 = vst [vmem:[#allocation23_spill] sm:$0xff] %v14192_v9 }
 0xbc3   :  { %8424 = vmatpush1.bf16.msra.mxu0 %v14136_v10  ;;  %8465 = vmatpush1.bf16.msra.mxu1 %v14139_v49  ;;  %11342 = vrcp.f32 %v8287_v53  ;;  %v14207_v53 = vld [vmem:[#allocation9 + $0x148] ss:$16 sps:$4 sm:$0xff]  }
 0xbc4   :  { %8425 = vmatprep.subr.bf16.mxu0 %v14142_v25  ;;  %8466 = vmatprep.subr.bf16.mxu1 %v14145_v42  ;;  %15124 = vst [vmem:[#allocation73_spill] sm:$0xff] %v14207_v53 }
 0xbc5   :  { %8455 = vmatprep.mubr.bf16.mxu0 %v14861_v62  ;;  %8496 = vmatprep.mubr.bf16.mxu1 %v14861_v62 }
 0xbc7   :  { %8426 = vmatpush1.bf16.msra.mxu0 %v14150_v38  ;;  %8467 = vmatpush1.bf16.msra.mxu1 %v14153_v32 }
 0xbc8   :  { %v11339_v5 = vpop.eup %11338  ;;  %8427 = vmatprep.subr.bf16.mxu0 %v14156_v52  ;;  %8468 = vmatprep.subr.bf16.mxu1 %v14159_v48 }
 0xbc9   :  { %v8291_v11 = vmul.f32 %v11339_v5, %v11335_v40  ;;  %v14189_v40 = vld [vmem:[#allocation9 + $0x16c] ss:$16 sps:$4 sm:$0xff]   ;;  %v14195_v5 = vld [vmem:[#allocation9 + $0x168] ss:$16 sps:$4 sm:$0xff]  }
 0xbca   :  { %v11341_v35 = vpop.eup %11340  ;;  %15118 = vst [vmem:[#allocation22_spill] sm:$0xff] %v14189_v40  ;;  %15120 = vst [vmem:[#allocation24_spill] sm:$0xff] %v14195_v5 }
 0xbcb   :  { %v8290_v2 = vmul.f32 %v11341_v35, %v13984_v1  ;;  %8428 = vmatpush1.bf16.msra.mxu0 %v14163_v63  ;;  %8469 = vmatpush1.bf16.msra.mxu1 %v14166_v56  ;;  %v14204_v35 = vld [vmem:[#allocation9 + $0x140] ss:$16 sps:$4 sm:$0xff]  }
 0xbcc   :  { %8429 = vmatprep.subr.bf16.mxu0 %v14169_v3  ;;  %8470 = vmatprep.subr.bf16.mxu1 %v14172_v17  ;;  %15123 = vst [vmem:[#allocation72_spill] sm:$0xff] %v14204_v35 }
 0xbcd   :  { %v8292_v23 = vadd.f32 %v8291_v11, %v8290_v2  ;;  %v14198_v11 = vld [vmem:[#allocation9 + $0x144] ss:$16 sps:$4 sm:$0xff]  }
 0xbce   :  { %15121 = vst [vmem:[#allocation37_spill] sm:$0xff] %v14198_v11  ;;  %v14210_v2 = vld [vmem:[#allocation9 + $0x124] ss:$16 sps:$4 sm:$0xff]  }
 0xbcf   :  { %11344 = vtanh.f32 %v8292_v23  ;;  %8430 = vmatpush1.bf16.msra.mxu0 %v14175_v45  ;;  %8471 = vmatpush1.bf16.msra.mxu1 %v14178_v0  ;;  %v14184_v14 = vsel %vm2341_vm9, %v8292_v23, %v13984_v1  ;;  %v14201_v1 = vld [vmem:[#allocation9 + $0x14c] ss:$16 sps:$4 sm:$0xff]   ;;  %15125 = vst [vmem:[#allocation13_spill] sm:$0xff] %v14210_v2 }
 0xbd0   :  { %8431 = vmatprep.subr.bf16.mxu0 %v14186_v44  ;;  %8472 = vmatprep.subr.bf16.mxu1 %v14189_v40  ;;  %15122 = vst [vmem:[#allocation41_spill] sm:$0xff] %v14201_v1  ;;  %v14213_v23 = vld [vmem:[#allocation9 + $0x12c] ss:$16 sps:$4 sm:$0xff]   ;;  %v14231_v40 = vld [vmem:[#allocation9 + $0x108] ss:$16 sps:$4 sm:$0xff]  }
 0xbd1   :  { %15126 = vst [vmem:[#allocation42_spill] sm:$0xff] %v14213_v23 }
 0xbd3   :  { %8432 = vmatpush1.bf16.msra.mxu0 %v14192_v9  ;;  %8473 = vmatpush1.bf16.msra.mxu1 %v14195_v5  ;;  %v14216_v5 = vld [vmem:[#allocation9 + $0x120] ss:$16 sps:$4 sm:$0xff]   ;;  %v14222_v9 = vld [vmem:[#allocation9 + $0x104] ss:$16 sps:$4 sm:$0xff]  }
 0xbd4   :  { %8433 = vmatprep.subr.bf16.mxu0 %v14198_v11  ;;  %8474 = vmatprep.subr.bf16.mxu1 %v14201_v1  ;;  %v11343_v11 = vpop.eup %11342  ;;  %v14219_v1 = vld [vmem:[#allocation9 + $0x128] ss:$16 sps:$4 sm:$0xff]   ;;  %15128 = vst [vmem:[#allocation71_spill] sm:$0xff] %v14222_v9 }
 0xbd5   :  { %15127 = vst [vmem:[#allocation70_spill] sm:$0xff] %v14219_v1 }
 0xbd7   :  { %8434 = vmatpush1.bf16.msra.mxu0 %v14204_v35  ;;  %8475 = vmatpush1.bf16.msra.mxu1 %v14207_v53  ;;  %v14225_v53 = vld [vmem:[#allocation9 + $0x10c] ss:$16 sps:$4 sm:$0xff]  }
 0xbd8   :  { %8435 = vmatprep.subr.bf16.mxu0 %v14210_v2  ;;  %8476 = vmatprep.subr.bf16.mxu1 %v14213_v23  ;;  %v14228_v23 = vld [vmem:[#allocation9 + $0x100] ss:$16 sps:$4 sm:$0xff]  }
 0xbdb   :  { %8436 = vmatpush1.bf16.msra.mxu0 %v14216_v5  ;;  %8477 = vmatpush1.bf16.msra.mxu1 %v14219_v1 }
 0xbdc   :  { %v11345_v35 = vpop.eup %11344  ;;  %8437 = vmatprep.subr.bf16.mxu0 %v14222_v9  ;;  %8478 = vmatprep.subr.bf16.mxu1 %v14225_v53 }
 0xbdd   :  { %v8294_v2 = vmul.f32 %v11345_v35, %v11343_v11 }
 0xbdf   :  { %8438 = vmatpush1.bf16.msra.mxu0 %v14228_v23  ;;  %8479 = vmatpush1.bf16.msra.mxu1 %v14231_v40  ;;  %v14237_v1 = vsel %vm2341_vm9, %v8294_v2, %v14007_v41  ;;  %v15129_v41 = vld [vmem:[#allocation54_spill] sm:$0xff] }
 0xbe0   :  { %v8422_v9 = vpack.c.bf16 %v14237_v1, %v14237_v1  ;;  %8542 = vmatprep.subr.bf16.mxu0 %v14011_v37  ;;  %8583 = vmatprep.subr.bf16.mxu1 %v14014_v39  ;;  %v8300_v43 = vunpack.c.h.bf16 %v15129_v41 }
 0xbe2   :  { %8456 = vmatmul.mubr.bf16.vlgmr.msra.gmra.mxu0 %v8422_v9  ;;  %8497 = vmatmul.mubr.bf16.vlgmr.msra.gmra.mxu1 %v8422_v9  ;;  %v8299_v9 = vunpack.c.l.bf16 %v15129_v41 }
 0xbe3   :  { %8543 = vmatpush1.bf16.msra.mxu0 %v14017_v57  ;;  %8584 = vmatpush1.bf16.msra.mxu1 %v14020_v50 }
 0xbe4   :  { %8544 = vmatprep.subr.bf16.mxu0 %v14023_v13  ;;  %8585 = vmatprep.subr.bf16.mxu1 %v14026_v16 }
 0xbe5   :  { %8574 = vmatprep.mubr.bf16.mxu0 %v14861_v62  ;;  %8615 = vmatprep.mubr.bf16.mxu1 %v14861_v62 }
 0xbe7   :  { %8545 = vmatpush1.bf16.msra.mxu0 %v14031_v51  ;;  %8586 = vmatpush1.bf16.msra.mxu1 %v14034_v60 }
 0xbe8   :  { %8546 = vmatprep.subr.bf16.mxu0 %v14037_v22  ;;  %8587 = vmatprep.subr.bf16.mxu1 %v14040_v31 }
 0xbeb   :  { %8547 = vmatpush1.bf16.msra.mxu0 %v14043_v58  ;;  %8588 = vmatpush1.bf16.msra.mxu1 %v14046_v15 }
 0xbec   :  { %8548 = vmatprep.subr.bf16.mxu0 %v14049_v55  ;;  %8589 = vmatprep.subr.bf16.mxu1 %v14052_v36 }
 0xbef   :  { %8549 = vmatpush1.bf16.msra.mxu0 %v14055_v54  ;;  %8590 = vmatpush1.bf16.msra.mxu1 %v14058_v20 }
 0xbf0   :  { %8550 = vmatprep.subr.bf16.mxu0 %v14061_v61  ;;  %8591 = vmatprep.subr.bf16.mxu1 %v14064_v8 }
 0xbf3   :  { %8551 = vmatpush1.bf16.msra.mxu0 %v14067_v19  ;;  %8592 = vmatpush1.bf16.msra.mxu1 %v14070_v30 }
 0xbf4   :  { %8552 = vmatprep.subr.bf16.mxu0 %v14073_v4  ;;  %8593 = vmatprep.subr.bf16.mxu1 %v14076_v18 }
 0xbf7   :  { %8553 = vmatpush1.bf16.msra.mxu0 %v14079_v59  ;;  %8594 = vmatpush1.bf16.msra.mxu1 %v14082_v24 }
 0xbf8   :  { %8554 = vmatprep.subr.bf16.mxu0 %v14085_v7  ;;  %8595 = vmatprep.subr.bf16.mxu1 %v14088_v26 }
 0xbfb   :  { %8555 = vmatpush1.bf16.msra.mxu0 %v14091_v21  ;;  %8596 = vmatpush1.bf16.msra.mxu1 %v14094_v46 }
 0xbfc   :  { %8556 = vmatprep.subr.bf16.mxu0 %v14097_v27  ;;  %8597 = vmatprep.subr.bf16.mxu1 %v14100_v28 }
 0xbff   :  { %8557 = vmatpush1.bf16.msra.mxu0 %v14103_v47  ;;  %8598 = vmatpush1.bf16.msra.mxu1 %v14106_v6 }
 0xc00   :  { %8661 = vmatprep.subr.bf16.mxu0 %v14109_v34  ;;  %8702 = vmatprep.subr.bf16.mxu1 %v14112_v12  ;;  %v15130_v34 = vld [vmem:[#allocation34_spill] sm:$0xff] }
 0xc01   :  { %v8302_v12 = vunpack.c.h.bf16 %v15130_v34  ;;  %v8301_v18 = vunpack.c.l.bf16 %v15130_v34 }
 0xc82   :  { %v8338_v11 = vpop.f32.mrf.mxu0  ;;  %v8379_v35 = vpop.f32.mrf.mxu1 }
 0xc83   :  { %v8386_v2 = vadd.f32 %v8338_v11, %v8299_v9  ;;  %v8388_v4 = vadd.f32 %v8379_v35, %v8301_v18 }
 0xc84   :  { %v8340_v46 = vpop.f32.mrf.mxu0  ;;  %v8381_v21 = vpop.f32.mrf.mxu1 }
 0xc85   :  { %v10379_v27 = vmul.f32 -1.442695, %v8386_v2  ;;  %v8387_v26 = vadd.f32 %v8340_v46, %v8300_v43  ;;  %v8389_v59 = vadd.f32 %v8381_v21, %v8302_v12 }
 0xc86   :  { %v8342_v28 = vpop.f32.mrf.mxu0  ;;  %v8383_v7 = vpop.f32.mrf.mxu1 }
 0xc87   :  { %11346 = vpow2.f32 %v10379_v27  ;;  %v10380_v47 = vmul.f32 -1.442695, %v8387_v26  ;;  %v10381_v9 = vmul.f32 -1.442695, %v8389_v59  ;;  %v15131_v7 = vld [vmem:[#allocation68_spill] sm:$0xff] }
 0xc88   :  { %v8343_v6 = vpop.f32.mrf.mxu0  ;;  %v8384_v24 = vpop.f32.mrf.mxu1  ;;  %v8418_v26 = vunpack.c.l.bf16 %v15131_v7  ;;  %v8419_v21 = vunpack.c.h.bf16 %v15131_v7  ;;  %v15167_v7 = vld [vmem:[#allocation25_spill] sm:$0xff] }
 0xc89   :  { %11348 = vpow2.f32 %v10380_v47 }
 0xc8a   :  { %11350 = vtanh.f32 %v8388_v4 }
 0xc8b   :  { %11352 = vpow2.f32 %v10381_v9 }
 0xc94   :  { %v11347_v11 = vpop.eup %11346 }
 0xc95   :  { %v8393_v41 = vadd.f32 1.0, %v11347_v11 }
 0xc96   :  { %v11349_v30 = vpop.eup %11348 }
 0xc97   :  { %11354 = vrcp.f32 %v8393_v41  ;;  %v8399_v43 = vadd.f32 1.0, %v11349_v30  ;;  %v11351_v46 = vpop.eup %11350 }
 0xc98   :  { %v11353_v28 = vpop.eup %11352 }
 0xc99   :  { %11356 = vrcp.f32 %v8399_v43  ;;  %v8406_v2 = vadd.f32 1.0, %v11353_v28 }
 0xca2   :  { %v8457_v24 = vpop.f32.mrf.mxu0  ;;  %v8498_v27 = vpop.f32.mrf.mxu1 }
 0xca3   :  { %v8505_v47 = vadd.f32 %v8457_v24, %v8418_v26 }
 0xca4   :  { %v11355_v6 = vpop.eup %11354  ;;  %v8459_v18 = vpop.f32.mrf.mxu0 }
 0xca5   :  { %v8500_v59 = vpop.f32.mrf.mxu1  ;;  %v8410_v34 = vmul.f32 %v11355_v6, %v11351_v46  ;;  %v10382_v12 = vmul.f32 -1.442695, %v8505_v47  ;;  %v8506_v4 = vadd.f32 %v8459_v18, %v8419_v21  ;;  %v15133_v46 = vld [vmem:[#allocation69_spill] sm:$0xff] }
 0xca6   :  { %v11357_v35 = vpop.eup %11356  ;;  %v8461_v9 = vpop.f32.mrf.mxu0  ;;  %v8421_v24 = vunpack.c.h.bf16 %v15133_v46  ;;  %v8420_v47 = vunpack.c.l.bf16 %v15133_v46 }
 0xca7   :  { %v8502_v30 = vpop.f32.mrf.mxu1  ;;  %v8409_v11 = vmul.f32 %v11357_v35, %v14125_v29  ;;  %11358 = vpow2.f32 %v10382_v12  ;;  %v10383_v41 = vmul.f32 -1.442695, %v8506_v4 }
 0xca8   :  { %v8462_v43 = vpop.f32.mrf.mxu0  ;;  %v8508_v28 = vadd.f32 %v8500_v59, %v8421_v24  ;;  %v8507_v21 = vadd.f32 %v8498_v27, %v8420_v47  ;;  %v15134_v24 = vld [vmem:[#allocation22_spill] sm:$0xff]  ;;  %v15136_v47 = vld [vmem:[#allocation24_spill] sm:$0xff] }
 0xca9   :  { %v8503_v19 = vpop.f32.mrf.mxu1  ;;  %v8411_v8 = vadd.f32 %v8410_v34, %v8409_v11  ;;  %11360 = vpow2.f32 %v10383_v41 }
 0xcaa   :  { %11362 = vrcp.f32 %v8406_v2  ;;  %v10384_v6 = vmul.f32 -1.442695, %v8508_v28  ;;  %v15135_v28 = vld [vmem:[#allocation23_spill] sm:$0xff] }
 0xcab   :  { %11364 = vtanh.f32 %v8411_v8  ;;  %v14287_v26 = vsel %vm2658_vm10, %v8411_v8, %v14125_v29 }
 0xcac   :  { %11366 = vtanh.f32 %v8507_v21  ;;  %v15137_v21 = vld [vmem:[#allocation37_spill] sm:$0xff] }
 0xcad   :  { %11368 = vpow2.f32 %v10384_v6  ;;  %v15138_v6 = vld [vmem:[#allocation41_spill] sm:$0xff] }
 0xcb4   :  { %v11359_v18 = vpop.eup %11358 }
 0xcb5   :  { %v8512_v12 = vadd.f32 1.0, %v11359_v18  ;;  %v15139_v18 = vld [vmem:[#allocation72_spill] sm:$0xff] }
 0xcb6   :  { %v11361_v19 = vpop.eup %11360 }
 0xcb7   :  { %v11363_v34 = vpop.eup %11362  ;;  %11370 = vrcp.f32 %v8512_v12  ;;  %v8518_v4 = vadd.f32 1.0, %v11361_v19  ;;  %v15140_v12 = vld [vmem:[#allocation73_spill] sm:$0xff] }
 0xcb8   :  { %v11365_v35 = vpop.eup %11364  ;;  %v15141_v19 = vld [vmem:[#allocation13_spill] sm:$0xff] }
 0xcb9   :  { %11372 = vrcp.f32 %v8518_v4  ;;  %v8413_v2 = vmul.f32 %v11365_v35, %v11363_v34  ;;  %v11367_v27 = vpop.eup %11366  ;;  %v15143_v4 = vld [vmem:[#allocation70_spill] sm:$0xff] }
 0xcbb   :  { %v14294_v8 = vsel %vm2658_vm10, %v8413_v2, %v14132_v33  ;;  %v11369_v33 = vpop.eup %11368  ;;  %v15144_v2 = vld [vmem:[#allocation71_spill] sm:$0xff] }
 0xcbc   :  { %v8541_v29 = vpack.c.bf16 %v14294_v8, %v14294_v8  ;;  %v8525_v11 = vadd.f32 1.0, %v11369_v33 }
 0xcbe   :  { %8575 = vmatmul.mubr.bf16.vlgmr.msra.gmra.mxu0 %v8541_v29  ;;  %8616 = vmatmul.mubr.bf16.vlgmr.msra.gmra.mxu1 %v8541_v29  ;;  %11374 = vrcp.f32 %v8525_v11  ;;  %v15149_v11 = vld [vmem:[#allocation26_spill] sm:$0xff] }
 0xcbf   :  { %8662 = vmatpush1.bf16.msra.mxu0 %v14136_v10  ;;  %8703 = vmatpush1.bf16.msra.mxu1 %v14139_v49 }
 0xcc0   :  { %8663 = vmatprep.subr.bf16.mxu0 %v14142_v25  ;;  %8704 = vmatprep.subr.bf16.mxu1 %v14145_v42 }
 0xcc1   :  { %8693 = vmatprep.mubr.bf16.mxu0 %v14861_v62  ;;  %8734 = vmatprep.mubr.bf16.mxu1 %v14861_v62 }
 0xcc3   :  { %8664 = vmatpush1.bf16.msra.mxu0 %v14150_v38  ;;  %8705 = vmatpush1.bf16.msra.mxu1 %v14153_v32 }
 0xcc4   :  { %v11371_v59 = vpop.eup %11370  ;;  %8665 = vmatprep.subr.bf16.mxu0 %v14156_v52  ;;  %8706 = vmatprep.subr.bf16.mxu1 %v14159_v48 }
 0xcc5   :  { %v8529_v9 = vmul.f32 %v11371_v59, %v11367_v27  ;;  %v15146_v59 = vld [vmem:[#allocation29_spill] sm:$0xff] }
 0xcc6   :  { %v11373_v30 = vpop.eup %11372 }
 0xcc7   :  { %v8528_v41 = vmul.f32 %v11373_v30, %v14184_v14  ;;  %8666 = vmatpush1.bf16.msra.mxu0 %v14163_v63  ;;  %8707 = vmatpush1.bf16.msra.mxu1 %v14166_v56  ;;  %v15148_v30 = vld [vmem:[#allocation21_spill] sm:$0xff] }
 0xcc8   :  { %8667 = vmatprep.subr.bf16.mxu0 %v14169_v3  ;;  %8708 = vmatprep.subr.bf16.mxu1 %v14172_v17 }
 0xcc9   :  { %v8530_v43 = vadd.f32 %v8529_v9, %v8528_v41  ;;  %v15147_v9 = vld [vmem:[#allocation20_spill] sm:$0xff]  ;;  %v15150_v41 = vld [vmem:[#allocation27_spill] sm:$0xff] }
 0xccb   :  { %11376 = vtanh.f32 %v8530_v43  ;;  %8668 = vmatpush1.bf16.msra.mxu0 %v14175_v45  ;;  %8709 = vmatpush1.bf16.msra.mxu1 %v14178_v0  ;;  %v14318_v46 = vsel %vm2971_vm11, %v8530_v43, %v14184_v14  ;;  %v15142_v14 = vld [vmem:[#allocation42_spill] sm:$0xff]  ;;  %v11375_v34 = vpop.eup %11374  ;;  %v15151_v43 = vld [vmem:[#allocation15_spill] sm:$0xff] }
 0xccc   :  { %8669 = vmatprep.subr.bf16.mxu0 %v14186_v44  ;;  %8710 = vmatprep.subr.bf16.mxu1 %v15134_v24 }
 0xccf   :  { %8670 = vmatpush1.bf16.msra.mxu0 %v15135_v28  ;;  %8711 = vmatpush1.bf16.msra.mxu1 %v15136_v47 }
 0xcd0   :  { %8671 = vmatprep.subr.bf16.mxu0 %v15137_v21  ;;  %8712 = vmatprep.subr.bf16.mxu1 %v15138_v6 }
 0xcd3   :  { %8672 = vmatpush1.bf16.msra.mxu0 %v15139_v18  ;;  %8713 = vmatpush1.bf16.msra.mxu1 %v15140_v12 }
 0xcd4   :  { %8673 = vmatprep.subr.bf16.mxu0 %v15141_v19  ;;  %8714 = vmatprep.subr.bf16.mxu1 %v15142_v14 }
 0xcd7   :  { %8674 = vmatpush1.bf16.msra.mxu0 %v14216_v5  ;;  %8715 = vmatpush1.bf16.msra.mxu1 %v15143_v4 }
 0xcd8   :  { %v11377_v35 = vpop.eup %11376  ;;  %8675 = vmatprep.subr.bf16.mxu0 %v15144_v2  ;;  %8716 = vmatprep.subr.bf16.mxu1 %v14225_v53 }
 0xcd9   :  { %v8532_v29 = vmul.f32 %v11377_v35, %v11375_v34  ;;  %v15152_v34 = vld [vmem:[#allocation32_spill] sm:$0xff]  ;;  %v15153_v35 = vld [vmem:[#allocation33_spill] sm:$0xff] }
 0xcdb   :  { %8676 = vmatpush1.bf16.msra.mxu0 %v14228_v23  ;;  %8717 = vmatpush1.bf16.msra.mxu1 %v14231_v40  ;;  %v14339_v27 = vsel %vm2971_vm11, %v8532_v29, %v14237_v1  ;;  %v15145_v1 = vld [vmem:[#allocation28_spill] sm:$0xff] }
 0xcdc   :  { %v8660_v33 = vpack.c.bf16 %v14339_v27, %v14339_v27  ;;  %8780 = vmatprep.subr.bf16.mxu0 %v14011_v37  ;;  %8821 = vmatprep.subr.bf16.mxu1 %v14014_v39  ;;  %v15154_v29 = vld [vmem:[#allocation16_spill] sm:$0xff] }
 0xcde   :  { %8694 = vmatmul.mubr.bf16.vlgmr.msra.gmra.mxu0 %v8660_v33  ;;  %8735 = vmatmul.mubr.bf16.vlgmr.msra.gmra.mxu1 %v8660_v33  ;;  %v15155_v33 = vld [vmem:[#allocation17_spill] sm:$0xff] }
 0xcdf   :  { %8781 = vmatpush1.bf16.msra.mxu0 %v14017_v57  ;;  %8822 = vmatpush1.bf16.msra.mxu1 %v14020_v50 }
 0xce0   :  { %8782 = vmatprep.subr.bf16.mxu0 %v14023_v13  ;;  %8823 = vmatprep.subr.bf16.mxu1 %v14026_v16 }
 0xce1   :  { %8812 = vmatprep.mubr.bf16.mxu0 %v14861_v62  ;;  %8853 = vmatprep.mubr.bf16.mxu1 %v14861_v62 }
 0xce3   :  { %8783 = vmatpush1.bf16.msra.mxu0 %v14031_v51  ;;  %8824 = vmatpush1.bf16.msra.mxu1 %v14034_v60 }
 0xce4   :  { %8784 = vmatprep.subr.bf16.mxu0 %v14037_v22  ;;  %8825 = vmatprep.subr.bf16.mxu1 %v14040_v31 }
 0xce7   :  { %8785 = vmatpush1.bf16.msra.mxu0 %v14043_v58  ;;  %8826 = vmatpush1.bf16.msra.mxu1 %v14046_v15 }
 0xce8   :  { %8786 = vmatprep.subr.bf16.mxu0 %v14049_v55  ;;  %8827 = vmatprep.subr.bf16.mxu1 %v14052_v36 }
 0xceb   :  { %8787 = vmatpush1.bf16.msra.mxu0 %v14055_v54  ;;  %8828 = vmatpush1.bf16.msra.mxu1 %v14058_v20 }
 0xcec   :  { %8788 = vmatprep.subr.bf16.mxu0 %v14061_v61  ;;  %8829 = vmatprep.subr.bf16.mxu1 %v15145_v1  ;;  %v15156_v1 = vld [vmem:[#allocation30_spill] sm:$0xff] }
 0xcef   :  { %8789 = vmatpush1.bf16.msra.mxu0 %v15146_v59  ;;  %8830 = vmatpush1.bf16.msra.mxu1 %v15147_v9  ;;  %v15157_v59 = vld [vmem:[#allocation31_spill] sm:$0xff] }
 0xcf0   :  { %8790 = vmatprep.subr.bf16.mxu0 %v15148_v30  ;;  %8831 = vmatprep.subr.bf16.mxu1 %v15149_v11  ;;  %v15158_v9 = vld [vmem:[#allocation43_spill] sm:$0xff]  ;;  %v15159_v30 = vld [vmem:[#allocation44_spill] sm:$0xff]  ;;  %v15160_v11 = vld [vmem:[#allocation45_spill] sm:$0xff] }
 0xcf3   :  { %8791 = vmatpush1.bf16.msra.mxu0 %v15150_v41  ;;  %8832 = vmatpush1.bf16.msra.mxu1 %v15151_v43  ;;  %v15161_v41 = vld [vmem:[#allocation46_spill] sm:$0xff] }
 0xcf4   :  { %8792 = vmatprep.subr.bf16.mxu0 %v15152_v34  ;;  %8833 = vmatprep.subr.bf16.mxu1 %v15153_v35  ;;  %v15162_v43 = vld [vmem:[#allocation14_spill] sm:$0xff] }
 0xcf5   :  { %v8537_v34 = vunpack.c.l.bf16 %v15162_v43 }
 0xcf7   :  { %8793 = vmatpush1.bf16.msra.mxu0 %v15154_v29  ;;  %8834 = vmatpush1.bf16.msra.mxu1 %v15155_v33  ;;  %v8538_v29 = vunpack.c.h.bf16 %v15162_v43 }
 0xcf8   :  { %8794 = vmatprep.subr.bf16.mxu0 %v15156_v1  ;;  %8835 = vmatprep.subr.bf16.mxu1 %v15157_v59 }
 0xcfb   :  { %8795 = vmatpush1.bf16.msra.mxu0 %v15158_v9  ;;  %8836 = vmatpush1.bf16.msra.mxu1 %v15159_v30 }
 0xcfc   :  { %8899 = vmatprep.subr.bf16.mxu0 %v15160_v11  ;;  %8940 = vmatprep.subr.bf16.mxu1 %v15161_v41  ;;  %v15163_v11 = vld [vmem:[#allocation55_spill] sm:$0xff] }
 0xcfd   :  { %v8540_v41 = vunpack.c.h.bf16 %v15163_v11  ;;  %v8539_v31 = vunpack.c.l.bf16 %v15163_v11 }
 0xd7e   :  { %v8576_v61 = vpop.f32.mrf.mxu0  ;;  %v8617_v35 = vpop.f32.mrf.mxu1 }
 0xd7f   :  { %v8624_v20 = vadd.f32 %v8576_v61, %v8537_v34  ;;  %v8626_v22 = vadd.f32 %v8617_v35, %v8539_v31 }
 0xd80   :  { %v8578_v33 = vpop.f32.mrf.mxu0  ;;  %v8619_v54 = vpop.f32.mrf.mxu1 }
 0xd81   :  { %v10385_v1 = vmul.f32 -1.442695, %v8624_v20  ;;  %v8625_v36 = vadd.f32 %v8578_v33, %v8538_v29  ;;  %v8627_v58 = vadd.f32 %v8619_v54, %v8540_v41 }
 0xd82   :  { %v8580_v59 = vpop.f32.mrf.mxu0  ;;  %v8621_v55 = vpop.f32.mrf.mxu1 }
 0xd83   :  { %11378 = vpow2.f32 %v10385_v1  ;;  %v10386_v9 = vmul.f32 -1.442695, %v8625_v36  ;;  %v10387_v61 = vmul.f32 -1.442695, %v8627_v58  ;;  %v15164_v55 = vld [vmem:[#allocation66_spill] sm:$0xff] }
 0xd84   :  { %v8581_v30 = vpop.f32.mrf.mxu0  ;;  %v8622_v15 = vpop.f32.mrf.mxu1  ;;  %v8656_v36 = vunpack.c.l.bf16 %v15164_v55  ;;  %v8657_v54 = vunpack.c.h.bf16 %v15164_v55 }
 0xd85   :  { %11380 = vpow2.f32 %v10386_v9 }
 0xd86   :  { %11382 = vtanh.f32 %v8626_v22 }
 0xd87   :  { %11384 = vpow2.f32 %v10387_v61 }
 0xd90   :  { %v11379_v34 = vpop.eup %11378 }
 0xd91   :  { %v8631_v43 = vadd.f32 1.0, %v11379_v34 }
 0xd92   :  { %v11381_v60 = vpop.eup %11380 }
 0xd93   :  { %11386 = vrcp.f32 %v8631_v43  ;;  %v8637_v20 = vadd.f32 1.0, %v11381_v60  ;;  %v11383_v1 = vpop.eup %11382 }
 0xd94   :  { %v11385_v9 = vpop.eup %11384 }
 0xd95   :  { %11388 = vrcp.f32 %v8637_v20  ;;  %v8644_v33 = vadd.f32 1.0, %v11385_v9 }
 0xd9e   :  { %v8695_v15 = vpop.f32.mrf.mxu0  ;;  %v8736_v59 = vpop.f32.mrf.mxu1 }
 0xd9f   :  { %v8743_v30 = vadd.f32 %v8695_v15, %v8656_v36  ;;  %v15165_v36 = vld [vmem:[#allocation67_spill] sm:$0xff] }
 0xda0   :  { %v11387_v11 = vpop.eup %11386  ;;  %v8697_v31 = vpop.f32.mrf.mxu0  ;;  %v8658_v9 = vunpack.c.l.bf16 %v15165_v36 }
 0xda1   :  { %v8738_v58 = vpop.f32.mrf.mxu1  ;;  %v8648_v41 = vmul.f32 %v11387_v11, %v11383_v1  ;;  %v10388_v35 = vmul.f32 -1.442695, %v8743_v30  ;;  %v8744_v22 = vadd.f32 %v8697_v31, %v8657_v54  ;;  %v8659_v1 = vunpack.c.h.bf16 %v15165_v36 }
 0xda2   :  { %v11389_v29 = vpop.eup %11388  ;;  %v8699_v61 = vpop.f32.mrf.mxu0  ;;  %v8745_v30 = vadd.f32 %v8736_v59, %v8658_v9 }
 0xda3   :  { %v8740_v60 = vpop.f32.mrf.mxu1  ;;  %v8647_v34 = vmul.f32 %v11389_v29, %v14287_v26  ;;  %11390 = vpow2.f32 %v10388_v35  ;;  %v10389_v43 = vmul.f32 -1.442695, %v8744_v22  ;;  %v8746_v15 = vadd.f32 %v8738_v58, %v8659_v1 }
 0xda4   :  { %v8700_v20 = vpop.f32.mrf.mxu0 }
 0xda5   :  { %v8741_v51 = vpop.f32.mrf.mxu1  ;;  %v8649_v16 = vadd.f32 %v8648_v41, %v8647_v34  ;;  %11392 = vpow2.f32 %v10389_v43  ;;  %v10390_v54 = vmul.f32 -1.442695, %v8746_v15 }
 0xda6   :  { %11394 = vrcp.f32 %v8644_v33 }
 0xda7   :  { %11396 = vtanh.f32 %v8649_v16  ;;  %v14389_v55 = vsel %vm2971_vm11, %v8649_v16, %v14287_v26 }
 0xda8   :  { %11398 = vtanh.f32 %v8745_v30  ;;  %v15166_v30 = vld [vmem:[#allocation38_spill] sm:$0xff] }
 0xda9   :  { %11400 = vpow2.f32 %v10390_v54  ;;  %v15171_v54 = vld [vmem:[#allocation49_spill] sm:$0xff] }
 0xdb0   :  { %v11391_v11 = vpop.eup %11390 }
 0xdb1   :  { %v8750_v31 = vadd.f32 1.0, %v11391_v11  ;;  %v15175_v11 = vld [vmem:[#allocation53_spill] sm:$0xff] }
 0xdb2   :  { %v11393_v51 = vpop.eup %11392 }
 0xdb3   :  { %v11395_v41 = vpop.eup %11394  ;;  %11402 = vrcp.f32 %v8750_v31  ;;  %v8756_v35 = vadd.f32 1.0, %v11393_v51  ;;  %v15176_v31 = vld [vmem:[#allocation18_spill] sm:$0xff]  ;;  %v15177_v51 = vld [vmem:[#allocation19_spill] sm:$0xff] }
 0xdb4   :  { %v11397_v22 = vpop.eup %11396 }
 0xdb5   :  { %11404 = vrcp.f32 %v8756_v35  ;;  %v8651_v29 = vmul.f32 %v11397_v22, %v11395_v41  ;;  %v11399_v59 = vpop.eup %11398  ;;  %v15178_v41 = vld [vmem:[#allocation28_spill] sm:$0xff]  ;;  %v15179_v35 = vld [vmem:[#allocation29_spill] sm:$0xff] }
 0xdb6   :  { %v15180_v22 = vld [vmem:[#allocation20_spill] sm:$0xff] }
 0xdb7   :  { %v14396_v16 = vsel %vm2971_vm11, %v8651_v29, %v14294_v8  ;;  %v11401_v8 = vpop.eup %11400  ;;  %v15181_v29 = vld [vmem:[#allocation21_spill] sm:$0xff] }
 0xdb8   :  { %v8779_v26 = vpack.c.bf16 %v14396_v16, %v14396_v16  ;;  %v8763_v60 = vadd.f32 1.0, %v11401_v8  ;;  %v15184_v8 = vld [vmem:[#allocation15_spill] sm:$0xff] }
 0xdba   :  { %8813 = vmatmul.mubr.bf16.vlgmr.msra.gmra.mxu0 %v8779_v26  ;;  %8854 = vmatmul.mubr.bf16.vlgmr.msra.gmra.mxu1 %v8779_v26  ;;  %11406 = vrcp.f32 %v8763_v60  ;;  %v15182_v26 = vld [vmem:[#allocation26_spill] sm:$0xff]  ;;  %v15188_v60 = vld [vmem:[#allocation17_spill] sm:$0xff] }
 0xdbb   :  { %8900 = vmatpush1.bf16.msra.mxu0 %v14136_v10  ;;  %8941 = vmatpush1.bf16.msra.mxu1 %v14139_v49 }
 0xdbc   :  { %8901 = vmatprep.subr.bf16.mxu0 %v14142_v25  ;;  %8942 = vmatprep.subr.bf16.mxu1 %v14145_v42 }
 0xdbd   :  { %8931 = vmatprep.mubr.bf16.mxu0 %v14861_v62  ;;  %8972 = vmatprep.mubr.bf16.mxu1 %v14861_v62 }
 0xdbf   :  { %8902 = vmatpush1.bf16.msra.mxu0 %v14150_v38  ;;  %8943 = vmatpush1.bf16.msra.mxu1 %v14153_v32 }
 0xdc0   :  { %v11403_v58 = vpop.eup %11402  ;;  %8903 = vmatprep.subr.bf16.mxu0 %v14156_v52  ;;  %8944 = vmatprep.subr.bf16.mxu1 %v14159_v48 }
 0xdc1   :  { %v8767_v33 = vmul.f32 %v11403_v58, %v11399_v59  ;;  %v15183_v59 = vld [vmem:[#allocation27_spill] sm:$0xff]  ;;  %v15185_v58 = vld [vmem:[#allocation32_spill] sm:$0xff] }
 0xdc2   :  { %v11405_v61 = vpop.eup %11404 }
 0xdc3   :  { %v8766_v34 = vmul.f32 %v11405_v61, %v14318_v46  ;;  %8904 = vmatpush1.bf16.msra.mxu0 %v14163_v63  ;;  %8945 = vmatpush1.bf16.msra.mxu1 %v14166_v56  ;;  %v15187_v61 = vld [vmem:[#allocation16_spill] sm:$0xff] }
 0xdc4   :  { %8905 = vmatprep.subr.bf16.mxu0 %v14169_v3  ;;  %8946 = vmatprep.subr.bf16.mxu1 %v14172_v17 }
 0xdc5   :  { %v8768_v43 = vadd.f32 %v8767_v33, %v8766_v34  ;;  %v15186_v33 = vld [vmem:[#allocation33_spill] sm:$0xff]  ;;  %v15189_v34 = vld [vmem:[#allocation30_spill] sm:$0xff] }
 0xdc7   :  { %11408 = vtanh.f32 %v8768_v43  ;;  %8906 = vmatpush1.bf16.msra.mxu0 %v14175_v45  ;;  %8947 = vmatpush1.bf16.msra.mxu1 %v14178_v0  ;;  %v14420_v20 = vsel %vm2658_vm10, %v8768_v43, %v14318_v46  ;;  %v11407_v46 = vpop.eup %11406  ;;  %v15190_v43 = vld [vmem:[#allocation31_spill] sm:$0xff] }
 0xdc8   :  { %8907 = vmatprep.subr.bf16.mxu0 %v14186_v44  ;;  %8948 = vmatprep.subr.bf16.mxu1 %v15134_v24 }
 0xdcb   :  { %8908 = vmatpush1.bf16.msra.mxu0 %v15135_v28  ;;  %8949 = vmatpush1.bf16.msra.mxu1 %v15136_v47 }
 0xdcc   :  { %8909 = vmatprep.subr.bf16.mxu0 %v15137_v21  ;;  %8950 = vmatprep.subr.bf16.mxu1 %v15138_v6 }
 0xdcf   :  { %8910 = vmatpush1.bf16.msra.mxu0 %v15139_v18  ;;  %8951 = vmatpush1.bf16.msra.mxu1 %v15140_v12 }
 0xdd0   :  { %8911 = vmatprep.subr.bf16.mxu0 %v15141_v19  ;;  %8952 = vmatprep.subr.bf16.mxu1 %v15142_v14 }
 0xdd3   :  { %8912 = vmatpush1.bf16.msra.mxu0 %v14216_v5  ;;  %8953 = vmatpush1.bf16.msra.mxu1 %v15143_v4 }
 0xdd4   :  { %v11409_v36 = vpop.eup %11408  ;;  %8913 = vmatprep.subr.bf16.mxu0 %v15144_v2  ;;  %8954 = vmatprep.subr.bf16.mxu1 %v14225_v53 }
 0xdd5   :  { %v8770_v1 = vmul.f32 %v11409_v36, %v11407_v46  ;;  %v15191_v46 = vld [vmem:[#allocation43_spill] sm:$0xff]  ;;  %v15192_v36 = vld [vmem:[#allocation44_spill] sm:$0xff] }
 0xdd7   :  { %8914 = vmatpush1.bf16.msra.mxu0 %v14228_v23  ;;  %8955 = vmatpush1.bf16.msra.mxu1 %v14231_v40  ;;  %v14441_v15 = vsel %vm2658_vm10, %v8770_v1, %v14339_v27  ;;  %v15168_v27 = vld [vmem:[#allocation40_spill] sm:$0xff]  ;;  %v15193_v1 = vld [vmem:[#allocation45_spill] sm:$0xff] }
 0xdd8   :  { %v8898_v9 = vpack.c.bf16 %v14441_v15, %v14441_v15  ;;  %9018 = vmatprep.subr.bf16.mxu0 %v14011_v37  ;;  %9059 = vmatprep.subr.bf16.mxu1 %v14014_v39  ;;  %v15169_v37 = vld [vmem:[#allocation47_spill] sm:$0xff]  ;;  %v15170_v39 = vld [vmem:[#allocation48_spill] sm:$0xff] }
 0xdda   :  { %8932 = vmatmul.mubr.bf16.vlgmr.msra.gmra.mxu0 %v8898_v9  ;;  %8973 = vmatmul.mubr.bf16.vlgmr.msra.gmra.mxu1 %v8898_v9  ;;  %v15194_v9 = vld [vmem:[#allocation46_spill] sm:$0xff] }
 0xddb   :  { %9019 = vmatpush1.bf16.msra.mxu0 %v14017_v57  ;;  %9060 = vmatpush1.bf16.msra.mxu1 %v14020_v50  ;;  %v15172_v57 = vld [vmem:[#allocation50_spill] sm:$0xff]  ;;  %v15173_v50 = vld [vmem:[#allocation51_spill] sm:$0xff] }
 0xddc   :  { %9020 = vmatprep.subr.bf16.mxu0 %v14023_v13  ;;  %9061 = vmatprep.subr.bf16.mxu1 %v15166_v30  ;;  %v15174_v13 = vld [vmem:[#allocation52_spill] sm:$0xff]  ;;  %v15195_v30 = vld [vmem:[#allocation39_spill] sm:$0xff] }
 0xddd   :  { %9050 = vmatprep.mubr.bf16.mxu0 %v14861_v62  ;;  %9091 = vmatprep.mubr.bf16.mxu1 %v14861_v62 }
 0xddf   :  { %9021 = vmatpush1.bf16.msra.mxu0 %v15167_v7  ;;  %9062 = vmatpush1.bf16.msra.mxu1 %v15168_v27  ;;  %v8775_v7 = vunpack.c.l.bf16 %v15195_v30 }
 0xde0   :  { %9022 = vmatprep.subr.bf16.mxu0 %v15169_v37  ;;  %9063 = vmatprep.subr.bf16.mxu1 %v15170_v39 }
 0xde3   :  { %9023 = vmatpush1.bf16.msra.mxu0 %v15171_v54  ;;  %9064 = vmatpush1.bf16.msra.mxu1 %v15172_v57  ;;  %v8776_v54 = vunpack.c.h.bf16 %v15195_v30 }
 0xde4   :  { %9024 = vmatprep.subr.bf16.mxu0 %v15173_v50  ;;  %9065 = vmatprep.subr.bf16.mxu1 %v15174_v13 }
 0xde7   :  { %9025 = vmatpush1.bf16.msra.mxu0 %v15175_v11  ;;  %9066 = vmatpush1.bf16.msra.mxu1 %v15176_v31 }
 0xde8   :  { %9026 = vmatprep.subr.bf16.mxu0 %v15177_v51  ;;  %9067 = vmatprep.subr.bf16.mxu1 %v15178_v41 }
 0xdeb   :  { %9027 = vmatpush1.bf16.msra.mxu0 %v15179_v35  ;;  %9068 = vmatpush1.bf16.msra.mxu1 %v15180_v22 }
 0xdec   :  { %9028 = vmatprep.subr.bf16.mxu0 %v15181_v29  ;;  %9069 = vmatprep.subr.bf16.mxu1 %v15182_v26  ;;  %v15196_v29 = vld [vmem:[#allocation12_spill] sm:$0xff] }
 0xded   :  { %v8778_v26 = vunpack.c.h.bf16 %v15196_v29 }
 0xdef   :  { %9029 = vmatpush1.bf16.msra.mxu0 %v15183_v59  ;;  %9070 = vmatpush1.bf16.msra.mxu1 %v15184_v8  ;;  %v8777_v8 = vunpack.c.l.bf16 %v15196_v29 }
 0xdf0   :  { %9030 = vmatprep.subr.bf16.mxu0 %v15185_v58  ;;  %9071 = vmatprep.subr.bf16.mxu1 %v15186_v33 }
 0xdf3   :  { %9031 = vmatpush1.bf16.msra.mxu0 %v15187_v61  ;;  %9072 = vmatpush1.bf16.msra.mxu1 %v15188_v60 }
 0xdf4   :  { %9032 = vmatprep.subr.bf16.mxu0 %v15189_v34  ;;  %9073 = vmatprep.subr.bf16.mxu1 %v15190_v43 }
 0xdf7   :  { %9033 = vmatpush1.bf16.msra.mxu0 %v15191_v46  ;;  %9074 = vmatpush1.bf16.msra.mxu1 %v15192_v36  ;;  %v15197_v46 = vld [vmem:[#allocation64_spill] sm:$0xff] }
 0xdf8   :  { %9137 = vmatprep.subr.bf16.mxu0 %v15193_v1  ;;  %9178 = vmatprep.subr.bf16.mxu1 %v15194_v9  ;;  %v8894_v36 = vunpack.c.l.bf16 %v15197_v46 }
 0xe7a   :  { %v8814_v27 = vpop.f32.mrf.mxu0  ;;  %v8855_v37 = vpop.f32.mrf.mxu1 }
 0xe7b   :  { %v8862_v39 = vadd.f32 %v8814_v27, %v8775_v7  ;;  %v8864_v58 = vadd.f32 %v8855_v37, %v8777_v8 }
 0xe7c   :  { %v8816_v57 = vpop.f32.mrf.mxu0  ;;  %v8857_v50 = vpop.f32.mrf.mxu1 }
 0xe7d   :  { %v10391_v13 = vmul.f32 -1.442695, %v8862_v39  ;;  %v8863_v11 = vadd.f32 %v8816_v57, %v8776_v54  ;;  %v8865_v59 = vadd.f32 %v8857_v50, %v8778_v26  ;;  %v8895_v39 = vunpack.c.h.bf16 %v15197_v46 }
 0xe7e   :  { %v8818_v31 = vpop.f32.mrf.mxu0  ;;  %v8859_v51 = vpop.f32.mrf.mxu1 }
 0xe7f   :  { %11410 = vpow2.f32 %v10391_v13  ;;  %v10392_v41 = vmul.f32 -1.442695, %v8863_v11  ;;  %v10393_v33 = vmul.f32 -1.442695, %v8865_v59 }
 0xe80   :  { %v8819_v35 = vpop.f32.mrf.mxu0  ;;  %v8860_v22 = vpop.f32.mrf.mxu1 }
 0xe81   :  { %11412 = vpow2.f32 %v10392_v41 }
 0xe82   :  { %11414 = vtanh.f32 %v8864_v58 }
 0xe83   :  { %11416 = vpow2.f32 %v10393_v33 }
 0xe8c   :  { %v11411_v61 = vpop.eup %11410 }
 0xe8d   :  { %v8869_v60 = vadd.f32 1.0, %v11411_v61  ;;  %v15199_v61 = vld [vmem:[#allocation65_spill] sm:$0xff] }
 0xe8e   :  { %v11413_v34 = vpop.eup %11412 }
 0xe8f   :  { %11418 = vrcp.f32 %v8869_v60  ;;  %v8875_v43 = vadd.f32 1.0, %v11413_v34  ;;  %v11415_v1 = vpop.eup %11414  ;;  %v8897_v60 = vunpack.c.h.bf16 %v15199_v61 }
 0xe90   :  { %v11417_v7 = vpop.eup %11416 }
 0xe91   :  { %11420 = vrcp.f32 %v8875_v43  ;;  %v8882_v51 = vadd.f32 1.0, %v11417_v7  ;;  %v8896_v43 = vunpack.c.l.bf16 %v15199_v61  ;;  %v11619_v61 = vld [vmem:[#allocation9 + $0x1e4] ss:$16 sps:$4 sm:$0xff]  }
 0xe9a   :  { %v8933_v9 = vpop.f32.mrf.mxu0  ;;  %v8974_v30 = vpop.f32.mrf.mxu1 }
 0xe9b   :  { %v8981_v27 = vadd.f32 %v8933_v9, %v8894_v36  ;;  %v8983_v46 = vadd.f32 %v8974_v30, %v8896_v43 }
 0xe9c   :  { %v11419_v54 = vpop.eup %11418  ;;  %v8935_v37 = vpop.f32.mrf.mxu0 }
 0xe9d   :  { %v8976_v57 = vpop.f32.mrf.mxu1  ;;  %v8886_v50 = vmul.f32 %v11419_v54, %v11415_v1  ;;  %v10394_v13 = vmul.f32 -1.442695, %v8981_v27  ;;  %v8982_v11 = vadd.f32 %v8935_v37, %v8895_v39 }
 0xe9e   :  { %v11421_v31 = vpop.eup %11420  ;;  %v8937_v41 = vpop.f32.mrf.mxu0  ;;  %v8984_v34 = vadd.f32 %v8976_v57, %v8897_v60  ;;  %v11620_v60 = vld [vmem:[#allocation9 + $0x1ec] ss:$16 sps:$4 sm:$0xff]  }
 0xe9f   :  { %v8978_v35 = vpop.f32.mrf.mxu1  ;;  %v8885_v22 = vmul.f32 %v11421_v31, %v14389_v55  ;;  %11422 = vpow2.f32 %v10394_v13  ;;  %v10395_v29 = vmul.f32 -1.442695, %v8982_v11  ;;  %v11608_v13 = vld [vmem:[#allocation9 + $0x4c] ss:$16 sps:$4 sm:$0xff]   ;;  %v11609_v11 = vld [vmem:[#allocation9 + $0x40] ss:$16 sps:$4 sm:$0xff]  }
 0xea0   :  { %v8938_v26 = vpop.f32.mrf.mxu0  ;;  %v10396_v36 = vmul.f32 -1.442695, %v8984_v34  ;;  %v11610_v31 = vld [vmem:[#allocation9 + $0x48] ss:$16 sps:$4 sm:$0xff]   ;;  %v11612_v41 = vld [vmem:[#allocation9 + $0x2c] ss:$16 sps:$4 sm:$0xff]  }
 0xea1   :  { %v8979_v59 = vpop.f32.mrf.mxu1  ;;  %v8887_v8 = vadd.f32 %v8886_v50, %v8885_v22  ;;  %11424 = vpow2.f32 %v10395_v29  ;;  %v11613_v35 = vld [vmem:[#allocation9 + $0x20] ss:$16 sps:$4 sm:$0xff]   ;;  %v11614_v22 = vld [vmem:[#allocation9 + $0x28] ss:$16 sps:$4 sm:$0xff]   ;;  %v11615_v29 = vld [vmem:[#allocation9 + $0x4] ss:$16 sps:$4 sm:$0xff]  }
 0xea2   :  { %11426 = vrcp.f32 %v8882_v51  ;;  %v11611_v51 = vld [vmem:[#allocation9 + $0x24] ss:$16 sps:$4 sm:$0xff]   ;;  %v11616_v26 = vld [vmem:[#allocation9 + $0xc] ss:$16 sps:$4 sm:$0xff]   ;;  %v11617_v59 = vld [vmem:[#allocation9] ss:$16 sps:$4 sm:$0xff]  }
 0xea3   :  { %11428 = vtanh.f32 %v8887_v8  ;;  %v14491_v33 = vsel %vm2341_vm9, %v8887_v8, %v14389_v55  ;;  %v11618_v8 = vld [vmem:[#allocation9 + $0x8] ss:$16 sps:$4 sm:$0xff]   ;;  %v15200_v34 = vld [vmem:[#allocation56_spill] sm:$0xff] }
 0xea4   :  { %11430 = vtanh.f32 %v8983_v46  ;;  %v9013_v43 = vunpack.c.l.bf16 %v15200_v34 }
 0xea5   :  { %11432 = vpow2.f32 %v10396_v36 }
 0xeac   :  { %v11423_v1 = vpop.eup %11422 }
 0xead   :  { %v8988_v9 = vadd.f32 1.0, %v11423_v1 }
 0xeae   :  { %v11425_v7 = vpop.eup %11424 }
 0xeaf   :  { %v11427_v27 = vpop.eup %11426  ;;  %11434 = vrcp.f32 %v8988_v9  ;;  %v8994_v39 = vadd.f32 1.0, %v11425_v7  ;;  %v9014_v9 = vunpack.c.h.bf16 %v15200_v34 }
 0xeb0   :  { %v11429_v54 = vpop.eup %11428 }
 0xeb1   :  { %11436 = vrcp.f32 %v8994_v39  ;;  %v8889_v37 = vmul.f32 %v11429_v54, %v11427_v27  ;;  %v11431_v57 = vpop.eup %11430 }
 0xeb3   :  { %v14498_v55 = vsel %vm2341_vm9, %v8889_v37, %v14396_v16  ;;  %v11433_v16 = vpop.eup %11432 }
 0xeb4   :  { %v9017_v30 = vpack.c.bf16 %v14498_v55, %v14498_v55 }
 0xeb6   :  { %9051 = vmatmul.mubr.bf16.vlgmr.msra.gmra.mxu0 %v9017_v30  ;;  %9092 = vmatmul.mubr.bf16.vlgmr.msra.gmra.mxu1 %v9017_v30 }
 0xeb7   :  { %9138 = vmatpush1.bf16.msra.mxu0 %v14136_v10  ;;  %9179 = vmatpush1.bf16.msra.mxu1 %v14139_v49 }
 0xeb8   :  { %9139 = vmatprep.subr.bf16.mxu0 %v14142_v25  ;;  %9180 = vmatprep.subr.bf16.mxu1 %v14145_v42  ;;  %v9001_v25 = vadd.f32 1.0, %v11433_v16 }
 0xeb9   :  { %9169 = vmatprep.mubr.bf16.mxu0 %v14861_v62  ;;  %9210 = vmatprep.mubr.bf16.mxu1 %v14861_v62 }
 0xeba   :  { %11438 = vrcp.f32 %v9001_v25 }
 0xebb   :  { %9140 = vmatpush1.bf16.msra.mxu0 %v14150_v38  ;;  %9181 = vmatpush1.bf16.msra.mxu1 %v14153_v32 }
 0xebc   :  { %v11435_v50 = vpop.eup %11434  ;;  %9141 = vmatprep.subr.bf16.mxu0 %v14156_v52  ;;  %9182 = vmatprep.subr.bf16.mxu1 %v14159_v48 }
 0xebd   :  { %v9005_v10 = vmul.f32 %v11435_v50, %v11431_v57 }
 0xebe   :  { %v11437_v49 = vpop.eup %11436 }
 0xebf   :  { %v9004_v42 = vmul.f32 %v11437_v49, %v14420_v20  ;;  %9142 = vmatpush1.bf16.msra.mxu0 %v14163_v63  ;;  %9183 = vmatpush1.bf16.msra.mxu1 %v14166_v56 }
 0xec0   :  { %9143 = vmatprep.subr.bf16.mxu0 %v14169_v3  ;;  %9184 = vmatprep.subr.bf16.mxu1 %v14172_v17  ;;  %v11587_v17 = vld [vmem:[#allocation9 + $0xe4] ss:$16 sps:$4 sm:$0xff]  }
 0xec1   :  { %v9006_v38 = vadd.f32 %v9005_v10, %v9004_v42  ;;  %v15201_v10 = vld [vmem:[#allocation57_spill] sm:$0xff] }
 0xec2   :  { %v9016_v49 = vunpack.c.h.bf16 %v15201_v10  ;;  %v9015_v42 = vunpack.c.l.bf16 %v15201_v10 }
 0xec3   :  { %11440 = vtanh.f32 %v9006_v38  ;;  %9144 = vmatpush1.bf16.msra.mxu0 %v14175_v45  ;;  %9185 = vmatpush1.bf16.msra.mxu1 %v14178_v0  ;;  %v14522_v32 = vsel %vm2028_vm8, %v9006_v38, %v14420_v20  ;;  %v11588_v45 = vld [vmem:[#allocation9 + $0xec] ss:$16 sps:$4 sm:$0xff]   ;;  %v11589_v0 = vld [vmem:[#allocation9 + $0xe0] ss:$16 sps:$4 sm:$0xff]   ;;  %v11606_v20 = vld [vmem:[#allocation9 + $0x68] ss:$16 sps:$4 sm:$0xff]  }
 0xec4   :  { %9145 = vmatprep.subr.bf16.mxu0 %v14186_v44  ;;  %9186 = vmatprep.subr.bf16.mxu1 %v15134_v24  ;;  %v11590_v44 = vld [vmem:[#allocation9 + $0xe8] ss:$16 sps:$4 sm:$0xff]   ;;  %v11595_v24 = vld [vmem:[#allocation9 + $0xa4] ss:$16 sps:$4 sm:$0xff]  }
 0xec7   :  { %9146 = vmatpush1.bf16.msra.mxu0 %v15135_v28  ;;  %9187 = vmatpush1.bf16.msra.mxu1 %v15136_v47  ;;  %v11439_v52 = vpop.eup %11438  ;;  %v11596_v28 = vld [vmem:[#allocation9 + $0xac] ss:$16 sps:$4 sm:$0xff]   ;;  %v11597_v47 = vld [vmem:[#allocation9 + $0xa0] ss:$16 sps:$4 sm:$0xff]  }
 0xec8   :  { %9147 = vmatprep.subr.bf16.mxu0 %v15137_v21  ;;  %9188 = vmatprep.subr.bf16.mxu1 %v15138_v6  ;;  %v11598_v21 = vld [vmem:[#allocation9 + $0xa8] ss:$16 sps:$4 sm:$0xff]   ;;  %v11599_v6 = vld [vmem:[#allocation9 + $0x84] ss:$16 sps:$4 sm:$0xff]  }
 0xecb   :  { %9148 = vmatpush1.bf16.msra.mxu0 %v15139_v18  ;;  %9189 = vmatpush1.bf16.msra.mxu1 %v15140_v12  ;;  %v11600_v18 = vld [vmem:[#allocation9 + $0x8c] ss:$16 sps:$4 sm:$0xff]   ;;  %v11601_v12 = vld [vmem:[#allocation9 + $0x80] ss:$16 sps:$4 sm:$0xff]  }
 0xecc   :  { %9149 = vmatprep.subr.bf16.mxu0 %v15141_v19  ;;  %9190 = vmatprep.subr.bf16.mxu1 %v15142_v14  ;;  %v11602_v19 = vld [vmem:[#allocation9 + $0x88] ss:$16 sps:$4 sm:$0xff]   ;;  %v11603_v14 = vld [vmem:[#allocation9 + $0x64] ss:$16 sps:$4 sm:$0xff]  }
 0xecf   :  { %9150 = vmatpush1.bf16.msra.mxu0 %v14216_v5  ;;  %9191 = vmatpush1.bf16.msra.mxu1 %v15143_v4  ;;  %v11591_v5 = vld [vmem:[#allocation9 + $0xc4] ss:$16 sps:$4 sm:$0xff]   ;;  %v11604_v4 = vld [vmem:[#allocation9 + $0x6c] ss:$16 sps:$4 sm:$0xff]  }
 0xed0   :  { %v11441_v48 = vpop.eup %11440  ;;  %9151 = vmatprep.subr.bf16.mxu0 %v15144_v2  ;;  %9192 = vmatprep.subr.bf16.mxu1 %v14225_v53  ;;  %v11593_v53 = vld [vmem:[#allocation9 + $0xc0] ss:$16 sps:$4 sm:$0xff]  }
 0xed1   :  { %v9008_v63 = vmul.f32 %v11441_v48, %v11439_v52  ;;  %v11605_v2 = vld [vmem:[#allocation9 + $0x60] ss:$16 sps:$4 sm:$0xff]  }
 0xed3   :  { %9152 = vmatpush1.bf16.msra.mxu0 %v14228_v23  ;;  %9193 = vmatpush1.bf16.msra.mxu1 %v14231_v40  ;;  %v14543_v56 = vsel %vm2028_vm8, %v9008_v63, %v14441_v15  ;;  %v11592_v40 = vld [vmem:[#allocation9 + $0xcc] ss:$16 sps:$4 sm:$0xff]   ;;  %v11594_v23 = vld [vmem:[#allocation9 + $0xc8] ss:$16 sps:$4 sm:$0xff]   ;;  %v11607_v15 = vld [vmem:[#allocation9 + $0x44] ss:$16 sps:$4 sm:$0xff]  }
 0xed4   :  { %v9136_v3 = vpack.c.bf16 %v14543_v56, %v14543_v56  ;;  %9256 = vmatprep.subr.bf16.mxu0 %v11587_v17  ;;  %9297 = vmatprep.subr.bf16.mxu1 %v11588_v45  ;;  %v15202_v45 = vld [vmem:[#allocation62_spill] sm:$0xff] }
 0xed6   :  { %9170 = vmatmul.mubr.bf16.vlgmr.msra.gmra.mxu0 %v9136_v3  ;;  %9211 = vmatmul.mubr.bf16.vlgmr.msra.gmra.mxu1 %v9136_v3 }
 0xed7   :  { %9257 = vmatpush1.bf16.msra.mxu0 %v11589_v0  ;;  %9298 = vmatpush1.bf16.msra.mxu1 %v11590_v44  ;;  %v9132_v0 = vunpack.c.l.bf16 %v15202_v45 }
 0xed8   :  { %9258 = vmatprep.subr.bf16.mxu0 %v11591_v5  ;;  %9299 = vmatprep.subr.bf16.mxu1 %v11592_v40 }
 0xed9   :  { %9288 = vmatprep.mubr.bf16.mxu0 %v14861_v62  ;;  %9329 = vmatprep.mubr.bf16.mxu1 %v14861_v62 }
 0xedb   :  { %9259 = vmatpush1.bf16.msra.mxu0 %v11593_v53  ;;  %9300 = vmatpush1.bf16.msra.mxu1 %v11594_v23 }
 0xedc   :  { %9260 = vmatprep.subr.bf16.mxu0 %v11595_v24  ;;  %9301 = vmatprep.subr.bf16.mxu1 %v11596_v28  ;;  %v9133_v24 = vunpack.c.h.bf16 %v15202_v45 }
 0xedf   :  { %9261 = vmatpush1.bf16.msra.mxu0 %v11597_v47  ;;  %9302 = vmatpush1.bf16.msra.mxu1 %v11598_v21 }
 0xee0   :  { %9262 = vmatprep.subr.bf16.mxu0 %v11599_v6  ;;  %9303 = vmatprep.subr.bf16.mxu1 %v11600_v18 }
 0xee3   :  { %9263 = vmatpush1.bf16.msra.mxu0 %v11601_v12  ;;  %9304 = vmatpush1.bf16.msra.mxu1 %v11602_v19 }
 0xee4   :  { %9264 = vmatprep.subr.bf16.mxu0 %v11603_v14  ;;  %9305 = vmatprep.subr.bf16.mxu1 %v11604_v4 }
 0xee7   :  { %9265 = vmatpush1.bf16.msra.mxu0 %v11605_v2  ;;  %9306 = vmatpush1.bf16.msra.mxu1 %v11606_v20 }
 0xee8   :  { %9266 = vmatprep.subr.bf16.mxu0 %v11607_v15  ;;  %9307 = vmatprep.subr.bf16.mxu1 %v11608_v13 }
 0xeeb   :  { %9267 = vmatpush1.bf16.msra.mxu0 %v11609_v11  ;;  %9308 = vmatpush1.bf16.msra.mxu1 %v11610_v31 }
 0xeec   :  { %9268 = vmatprep.subr.bf16.mxu0 %v11611_v51  ;;  %9309 = vmatprep.subr.bf16.mxu1 %v11612_v41  ;;  %v15203_v41 = vld [vmem:[#allocation63_spill] sm:$0xff] }
 0xeef   :  { %9269 = vmatpush1.bf16.msra.mxu0 %v11613_v35  ;;  %9310 = vmatpush1.bf16.msra.mxu1 %v11614_v22  ;;  %v9135_v35 = vunpack.c.h.bf16 %v15203_v41 }
 0xef0   :  { %9270 = vmatprep.subr.bf16.mxu0 %v11615_v29  ;;  %9311 = vmatprep.subr.bf16.mxu1 %v11616_v26  ;;  %v9134_v29 = vunpack.c.l.bf16 %v15203_v41 }
 0xef3   :  { %9271 = vmatpush1.bf16.msra.mxu0 %v11617_v59  ;;  %9312 = vmatpush1.bf16.msra.mxu1 %v11618_v8 }
 0xef4   :  { %9374 = vmatprep.subr.bf16.mxu0 %v11619_v61  ;;  %9415 = vmatprep.subr.bf16.mxu1 %v11620_v60 }
 0xf76   :  { %v9052_v46 = vpop.f32.mrf.mxu0  ;;  %v9093_v36 = vpop.f32.mrf.mxu1 }
 0xf77   :  { %v9100_v1 = vadd.f32 %v9052_v46, %v9013_v43  ;;  %v9102_v38 = vadd.f32 %v9093_v36, %v9015_v42 }
 0xf78   :  { %v9054_v7 = vpop.f32.mrf.mxu0  ;;  %v9095_v27 = vpop.f32.mrf.mxu1 }
 0xf79   :  { %v10397_v39 = vmul.f32 -1.442695, %v9100_v1  ;;  %v9101_v54 = vadd.f32 %v9054_v7, %v9014_v9  ;;  %v9103_v25 = vadd.f32 %v9095_v27, %v9016_v49  ;;  %v11621_v9 = vld [vmem:[#allocation9 + $0x1e0] ss:$16 sps:$4 sm:$0xff]   ;;  %v11622_v7 = vld [vmem:[#allocation9 + $0x1e8] ss:$16 sps:$4 sm:$0xff]  }
 0xf7a   :  { %v9056_v37 = vpop.f32.mrf.mxu0  ;;  %v9097_v30 = vpop.f32.mrf.mxu1  ;;  %v11623_v27 = vld [vmem:[#allocation9 + $0x1c4] ss:$16 sps:$4 sm:$0xff]  }
 0xf7b   :  { %11442 = vpow2.f32 %v10397_v39  ;;  %v10398_v57 = vmul.f32 -1.442695, %v9101_v54  ;;  %v10399_v52 = vmul.f32 -1.442695, %v9103_v25  ;;  %v11624_v39 = vld [vmem:[#allocation9 + $0x1cc] ss:$16 sps:$4 sm:$0xff]  }
 0xf7c   :  { %v9057_v16 = vpop.f32.mrf.mxu0  ;;  %v9098_v50 = vpop.f32.mrf.mxu1  ;;  %v11625_v37 = vld [vmem:[#allocation9 + $0x1c0] ss:$16 sps:$4 sm:$0xff]   ;;  %v11626_v30 = vld [vmem:[#allocation9 + $0x1c8] ss:$16 sps:$4 sm:$0xff]  }
 0xf7d   :  { %11444 = vpow2.f32 %v10398_v57  ;;  %v11627_v16 = vld [vmem:[#allocation9 + $0x1a4] ss:$16 sps:$4 sm:$0xff]   ;;  %v11628_v50 = vld [vmem:[#allocation9 + $0x1ac] ss:$16 sps:$4 sm:$0xff]  }
 0xf7e   :  { %11446 = vtanh.f32 %v9102_v38  ;;  %v11629_v38 = vld [vmem:[#allocation9 + $0x1a0] ss:$16 sps:$4 sm:$0xff]  }
 0xf7f   :  { %11448 = vpow2.f32 %v10399_v52  ;;  %v11630_v52 = vld [vmem:[#allocation9 + $0x1a8] ss:$16 sps:$4 sm:$0xff]  }
 0xf88   :  { %v11443_v48 = vpop.eup %11442 }
 0xf89   :  { %v9107_v63 = vadd.f32 1.0, %v11443_v48  ;;  %v11632_v48 = vld [vmem:[#allocation9 + $0x18c] ss:$16 sps:$4 sm:$0xff]  }
 0xf8a   :  { %v11445_v3 = vpop.eup %11444 }
 0xf8b   :  { %11450 = vrcp.f32 %v9107_v63  ;;  %v9113_v17 = vadd.f32 1.0, %v11445_v3  ;;  %v11447_v44 = vpop.eup %11446  ;;  %v11633_v3 = vld [vmem:[#allocation9 + $0x180] ss:$16 sps:$4 sm:$0xff]  }
 0xf8c   :  { %v11449_v53 = vpop.eup %11448 }
 0xf8d   :  { %11452 = vrcp.f32 %v9113_v17  ;;  %v9120_v14 = vadd.f32 1.0, %v11449_v53  ;;  %v11634_v17 = vld [vmem:[#allocation9 + $0x188] ss:$16 sps:$4 sm:$0xff]   ;;  %v11639_v53 = vld [vmem:[#allocation9 + $0x144] ss:$16 sps:$4 sm:$0xff]  }
 0xf96   :  { %v9171_v5 = vpop.f32.mrf.mxu0  ;;  %v9212_v40 = vpop.f32.mrf.mxu1 }
 0xf97   :  { %v9219_v23 = vadd.f32 %v9171_v5, %v9132_v0  ;;  %v9221_v26 = vadd.f32 %v9212_v40, %v9134_v29  ;;  %v11635_v0 = vld [vmem:[#allocation9 + $0x164] ss:$16 sps:$4 sm:$0xff]   ;;  %v11637_v5 = vld [vmem:[#allocation9 + $0x160] ss:$16 sps:$4 sm:$0xff]   ;;  %v11638_v40 = vld [vmem:[#allocation9 + $0x168] ss:$16 sps:$4 sm:$0xff]  }
 0xf98   :  { %v11451_v28 = vpop.eup %11450  ;;  %v9173_v47 = vpop.f32.mrf.mxu0 }
 0xf99   :  { %v9214_v21 = vpop.f32.mrf.mxu1  ;;  %v9124_v6 = vmul.f32 %v11451_v28, %v11447_v44  ;;  %v10400_v18 = vmul.f32 -1.442695, %v9219_v23  ;;  %v9220_v12 = vadd.f32 %v9173_v47, %v9133_v24  ;;  %v11636_v44 = vld [vmem:[#allocation9 + $0x16c] ss:$16 sps:$4 sm:$0xff]   ;;  %v11641_v24 = vld [vmem:[#allocation9 + $0x140] ss:$16 sps:$4 sm:$0xff]  }
 0xf9a   :  { %v11453_v19 = vpop.eup %11452  ;;  %v9175_v4 = vpop.f32.mrf.mxu0  ;;  %v9222_v22 = vadd.f32 %v9214_v21, %v9135_v35  ;;  %v11640_v23 = vld [vmem:[#allocation9 + $0x14c] ss:$16 sps:$4 sm:$0xff]   ;;  %v11642_v28 = vld [vmem:[#allocation9 + $0x148] ss:$16 sps:$4 sm:$0xff]   ;;  %v11643_v47 = vld [vmem:[#allocation9 + $0x124] ss:$16 sps:$4 sm:$0xff]  }
 0xf9b   :  { %v9216_v2 = vpop.f32.mrf.mxu1  ;;  %v9123_v20 = vmul.f32 %v11453_v19, %v14491_v33  ;;  %11454 = vpow2.f32 %v10400_v18  ;;  %v10401_v15 = vmul.f32 -1.442695, %v9220_v12  ;;  %v11646_v18 = vld [vmem:[#allocation9 + $0x128] ss:$16 sps:$4 sm:$0xff]   ;;  %v11647_v19 = vld [vmem:[#allocation9 + $0x104] ss:$16 sps:$4 sm:$0xff]  }
 0xf9c   :  { %v9176_v13 = vpop.f32.mrf.mxu0  ;;  %v10402_v59 = vmul.f32 -1.442695, %v9222_v22  ;;  %v11649_v2 = vld [vmem:[#allocation9 + $0x100] ss:$16 sps:$4 sm:$0xff]  }
 0xf9d   :  { %v9217_v11 = vpop.f32.mrf.mxu1  ;;  %v9125_v31 = vadd.f32 %v9124_v6, %v9123_v20  ;;  %11456 = vpow2.f32 %v10401_v15  ;;  %v11645_v6 = vld [vmem:[#allocation9 + $0x120] ss:$16 sps:$4 sm:$0xff]   ;;  %v11650_v20 = vld [vmem:[#allocation9 + $0x108] ss:$16 sps:$4 sm:$0xff]  }
 0xf9e   :  { %11458 = vrcp.f32 %v9120_v14  ;;  %v11648_v14 = vld [vmem:[#allocation9 + $0x10c] ss:$16 sps:$4 sm:$0xff]   ;;  %v15204_v11 = vld [vmem:[#allocation58_spill] sm:$0xff] }
 0xf9f   :  { %11460 = vtanh.f32 %v9125_v31  ;;  %v14559_v51 = vsel %vm1711_vm7, %v9125_v31, %v14491_v33  ;;  %v9251_v31 = vunpack.c.l.bf16 %v15204_v11  ;;  %v9252_v29 = vunpack.c.h.bf16 %v15204_v11 }
 0xfa0   :  { %11462 = vtanh.f32 %v9221_v26 }
 0xfa1   :  { %11464 = vpow2.f32 %v10402_v59 }
 0xfa8   :  { %v11455_v8 = vpop.eup %11454 }
 0xfa9   :  { %v9226_v61 = vadd.f32 1.0, %v11455_v8 }
 0xfaa   :  { %v11457_v60 = vpop.eup %11456 }
 0xfab   :  { %v11459_v34 = vpop.eup %11458  ;;  %11466 = vrcp.f32 %v9226_v61  ;;  %v9232_v43 = vadd.f32 1.0, %v11457_v60 }
 0xfac   :  { %v11461_v46 = vpop.eup %11460 }
 0xfad   :  { %11468 = vrcp.f32 %v9232_v43  ;;  %v9127_v36 = vmul.f32 %v11461_v46, %v11459_v34  ;;  %v11463_v54 = vpop.eup %11462 }
 0xfaf   :  { %v14566_v33 = vsel %vm1711_vm7, %v9127_v36, %v14498_v55  ;;  %v11465_v55 = vpop.eup %11464  ;;  %v15205_v36 = vld [vmem:[#allocation59_spill] sm:$0xff] }
 0xfb0   :  { %v9255_v1 = vpack.c.bf16 %v14566_v33, %v14566_v33  ;;  %v9239_v25 = vadd.f32 1.0, %v11465_v55 }
 0xfb2   :  { %9289 = vmatmul.mubr.bf16.vlgmr.msra.gmra.mxu0 %v9255_v1  ;;  %9330 = vmatmul.mubr.bf16.vlgmr.msra.gmra.mxu1 %v9255_v1  ;;  %11470 = vrcp.f32 %v9239_v25  ;;  %v9254_v1 = vunpack.c.h.bf16 %v15205_v36 }
 0xfb3   :  { %9375 = vmatpush1.bf16.msra.mxu0 %v11621_v9  ;;  %9416 = vmatpush1.bf16.msra.mxu1 %v11622_v7  ;;  %v9253_v7 = vunpack.c.l.bf16 %v15205_v36 }
 0xfb4   :  { %9376 = vmatprep.subr.bf16.mxu0 %v11623_v27  ;;  %9417 = vmatprep.subr.bf16.mxu1 %v11624_v39 }
 0xfb5   :  { %9406 = vmatprep.mubr.bf16.mxu0 %v14861_v62  ;;  %9447 = vmatprep.mubr.bf16.mxu1 %v14861_v62  ;;  %v11631_v62 = vld [vmem:[#allocation9 + $0x184] ss:$16 sps:$4 sm:$0xff]  }
 0xfb7   :  { %9377 = vmatpush1.bf16.msra.mxu0 %v11625_v37  ;;  %9418 = vmatpush1.bf16.msra.mxu1 %v11626_v30 }
 0xfb8   :  { %v11467_v57 = vpop.eup %11466  ;;  %9378 = vmatprep.subr.bf16.mxu0 %v11627_v16  ;;  %9419 = vmatprep.subr.bf16.mxu1 %v11628_v50 }
 0xfb9   :  { %v9243_v10 = vmul.f32 %v11467_v57, %v11463_v54  ;;  %v15206_v57 = vld [vmem:[#allocation60_spill] sm:$0xff] }
 0xfba   :  { %v11469_v49 = vpop.eup %11468  ;;  %v9369_v16 = vunpack.c.l.bf16 %v15206_v57 }
 0xfbb   :  { %v9242_v42 = vmul.f32 %v11469_v49, %v14522_v32  ;;  %9379 = vmatpush1.bf16.msra.mxu0 %v11629_v38  ;;  %9420 = vmatpush1.bf16.msra.mxu1 %v11630_v52  ;;  %v9370_v38 = vunpack.c.h.bf16 %v15206_v57 }
 0xfbc   :  { %9380 = vmatprep.subr.bf16.mxu0 %v11631_v62  ;;  %9421 = vmatprep.subr.bf16.mxu1 %v11632_v48 }
 0xfbd   :  { %v9244_v63 = vadd.f32 %v9243_v10, %v9242_v42 }
 0xfbf   :  { %11472 = vtanh.f32 %v9244_v63  ;;  %9381 = vmatpush1.bf16.msra.mxu0 %v11633_v3  ;;  %9422 = vmatpush1.bf16.msra.mxu1 %v11634_v17  ;;  %v14576_v45 = vsel %vm1398_vm6, %v9244_v63, %v14522_v32  ;;  %v11644_v32 = vld [vmem:[#allocation9 + $0x12c] ss:$16 sps:$4 sm:$0xff]   ;;  %v11471_v21 = vpop.eup %11470 }
 0xfc0   :  { %9382 = vmatprep.subr.bf16.mxu0 %v11635_v0  ;;  %9423 = vmatprep.subr.bf16.mxu1 %v11636_v44 }
 0xfc3   :  { %9383 = vmatpush1.bf16.msra.mxu0 %v11637_v5  ;;  %9424 = vmatpush1.bf16.msra.mxu1 %v11638_v40 }
 0xfc4   :  { %9384 = vmatprep.subr.bf16.mxu0 %v11639_v53  ;;  %9425 = vmatprep.subr.bf16.mxu1 %v11640_v23 }
 0xfc7   :  { %9385 = vmatpush1.bf16.msra.mxu0 %v11641_v24  ;;  %9426 = vmatpush1.bf16.msra.mxu1 %v11642_v28 }
 0xfc8   :  { %9386 = vmatprep.subr.bf16.mxu0 %v11643_v47  ;;  %9427 = vmatprep.subr.bf16.mxu1 %v11644_v32  ;;  %v15207_v32 = vld [vmem:[#allocation61_spill] sm:$0xff] }
 0xfcb   :  { %9387 = vmatpush1.bf16.msra.mxu0 %v11645_v6  ;;  %9428 = vmatpush1.bf16.msra.mxu1 %v11646_v18  ;;  %v9371_v18 = vunpack.c.l.bf16 %v15207_v32 }
 0xfcc   :  { %v11473_v12 = vpop.eup %11472  ;;  %9388 = vmatprep.subr.bf16.mxu0 %v11647_v19  ;;  %9429 = vmatprep.subr.bf16.mxu1 %v11648_v14 }
 0xfcd   :  { %v9246_v4 = vmul.f32 %v11473_v12, %v11471_v21  ;;  %v9372_v21 = vunpack.c.h.bf16 %v15207_v32 }
 0xfcf   :  { %9389 = vmatpush1.bf16.msra.mxu0 %v11649_v2  ;;  %9430 = vmatpush1.bf16.msra.mxu1 %v11650_v20  ;;  %v14581_v15 = vsel %vm1398_vm6, %v9246_v4, %v14543_v56 }
 0xfd0   :  { %v9373_v13 = vpack.c.bf16 %v14581_v15, %v14581_v15 }
 0xfd2   :  { %9407 = vmatmul.mubr.bf16.vlgmr.msra.gmra.mxu0 %v9373_v13  ;;  %9448 = vmatmul.mubr.bf16.vlgmr.msra.gmra.mxu1 %v9373_v13 }
0x1072   :  { %v9290_v41 = vpop.f32.mrf.mxu0  ;;  %v9331_v35 = vpop.f32.mrf.mxu1 }
0x1073   :  { %v9338_v22 = vadd.f32 %v9290_v41, %v9251_v31  ;;  %v9340_v27 = vadd.f32 %v9331_v35, %v9253_v7 }
0x1074   :  { %v9292_v26 = vpop.f32.mrf.mxu0  ;;  %v9333_v59 = vpop.f32.mrf.mxu1 }
0x1075   :  { %v10403_v8 = vmul.f32 -1.442695, %v9338_v22  ;;  %v9339_v61 = vadd.f32 %v9292_v26, %v9252_v29  ;;  %v9341_v9 = vadd.f32 %v9333_v59, %v9254_v1 }
0x1076   :  { %v9294_v60 = vpop.f32.mrf.mxu0  ;;  %v9335_v34 = vpop.f32.mrf.mxu1 }
0x1077   :  { %11474 = vpow2.f32 %v10403_v8  ;;  %v10404_v56 = vmul.f32 -1.442695, %v9339_v61  ;;  %v10405_v39 = vmul.f32 -1.442695, %v9341_v9 }
0x1078   :  { %v9295_v43 = vpop.f32.mrf.mxu0  ;;  %v9336_v46 = vpop.f32.mrf.mxu1 }
0x1079   :  { %11476 = vpow2.f32 %v10404_v56 }
0x107a   :  { %11478 = vtanh.f32 %v9340_v27 }
0x107b   :  { %11480 = vpow2.f32 %v10405_v39 }
0x1084   :  { %v11475_v54 = vpop.eup %11474 }
0x1085   :  { %v9345_v55 = vadd.f32 1.0, %v11475_v54 }
0x1086   :  { %v11477_v37 = vpop.eup %11476 }
0x1087   :  { %11482 = vrcp.f32 %v9345_v55  ;;  %v9351_v30 = vadd.f32 1.0, %v11477_v37  ;;  %v11479_v50 = vpop.eup %11478 }
0x1088   :  { %v11481_v25 = vpop.eup %11480 }
0x1089   :  { %11484 = vrcp.f32 %v9351_v30  ;;  %v9358_v44 = vadd.f32 1.0, %v11481_v25 }
0x1092   :  { %v9408_v10 = vpop.f32.mrf.mxu0  ;;  %v9449_v49 = vpop.f32.mrf.mxu1 }
0x1093   :  { %v9456_v42 = vadd.f32 %v9408_v10, %v9369_v16  ;;  %v9458_v12 = vadd.f32 %v9449_v49, %v9371_v18 }
0x1094   :  { %v11483_v52 = vpop.eup %11482  ;;  %v9410_v62 = vpop.f32.mrf.mxu0 }
0x1095   :  { %v9451_v48 = vpop.f32.mrf.mxu1  ;;  %v9362_v63 = vmul.f32 %v11483_v52, %v11479_v50  ;;  %v10406_v3 = vmul.f32 -1.442695, %v9456_v42  ;;  %v9457_v17 = vadd.f32 %v9410_v62, %v9370_v38 }
0x1096   :  { %v11485_v0 = vpop.eup %11484  ;;  %v9412_v5 = vpop.f32.mrf.mxu0  ;;  %v9459_v6 = vadd.f32 %v9451_v48, %v9372_v21 }
0x1097   :  { %v9453_v40 = vpop.f32.mrf.mxu1  ;;  %v9361_v53 = vmul.f32 %v11485_v0, %v14559_v51  ;;  %11486 = vpow2.f32 %v10406_v3  ;;  %v10407_v23 = vmul.f32 -1.442695, %v9457_v17 }
0x1098   :  { %v9413_v24 = vpop.f32.mrf.mxu0  ;;  %v10408_v19 = vmul.f32 -1.442695, %v9459_v6 }
0x1099   :  { %v9454_v28 = vpop.f32.mrf.mxu1  ;;  %v9363_v47 = vadd.f32 %v9362_v63, %v9361_v53  ;;  %11488 = vpow2.f32 %v10407_v23 }
0x109a   :  { %11490 = vrcp.f32 %v9358_v44 }
0x109b   :  { %11492 = vtanh.f32 %v9363_v47 }
0x109c   :  { %11494 = vtanh.f32 %v9458_v12 }
0x109d   :  { %11496 = vpow2.f32 %v10408_v19 }
0x10a4   :  { %v11487_v14 = vpop.eup %11486 }
0x10a5   :  { %v9463_v4 = vadd.f32 1.0, %v11487_v14 }
0x10a6   :  { %v11489_v2 = vpop.eup %11488 }
0x10a7   :  { %v11491_v51 = vpop.eup %11490  ;;  %11498 = vrcp.f32 %v9463_v4  ;;  %v9469_v20 = vadd.f32 1.0, %v11489_v2 }
0x10a8   :  { %v11493_v13 = vpop.eup %11492 }
0x10a9   :  { %v9365_v11 = vmul.f32 %v11493_v13, %v11491_v51  ;;  %11500 = vrcp.f32 %v9469_v20  ;;  %v11495_v41 = vpop.eup %11494 }
0x10aa   :  { %v11497_v35 = vpop.eup %11496 }
0x10ab   :  { %v9366_v31 = vsel %vm1082_vm4, %v9365_v11, %v14566_v33  ;;  %v9476_v59 = vadd.f32 1.0, %v11497_v35 }
0x10ac   :  { %9485 = vst [vmem:[%s14615_s8] sm:$0xff] %v9366_v31 }
0x10ad   :  { %11502 = vrcp.f32 %v9476_v59 }
0x10b4   :  { %v11499_v22 = vpop.eup %11498 }
0x10b5   :  { %v9480_v29 = vmul.f32 %v11499_v22, %v11495_v41 }
0x10b6   :  { %v11501_v26 = vpop.eup %11500 }
0x10b7   :  { %v9479_v8 = vmul.f32 %v11501_v26, %v14576_v45 }
0x10b9   :  { %v9481_v61 = vadd.f32 %v9480_v29, %v9479_v8 }
0x10ba   :  { %v11503_v60 = vpop.eup %11502 }
0x10bb   :  { %11504 = vtanh.f32 %v9481_v61 }
0x10c8   :  { %v11505_v34 = vpop.eup %11504 }
0x10c9   :  { %v9483_v56 = vmul.f32 %v11505_v34, %v11503_v60 }
0x10cb   :  { %v9484_v33 = vsel %vm770_vm2, %v9483_v56, %v14581_v15 }
0x10cc   :  { %9486 = vst [vmem:[%s14615_s8 + $0x8] sm:$0xff] %v9484_v33 }
0x10cd   :  { %9491 = vsyncpa [#allocation6], 1 }
0x10ce   :  { %9492 = vsyncpa [#allocation8], 1 }

</bundles_post_ra>
